<compile_context>
chip_gen: v5e
topology: v5e:2x2
jax: 0.10.0
libtpu: 0.0.40
codegen_flags: <defaults>
</compile_context>

<pallas_src>
import numpy as np

import jax
import jax.numpy as jnp
from jax.experimental import pallas as pl
from jax.experimental.pallas import tpu as pltpu

_ALPHA = 0.2          # LeakyReLU slope
_BN2D_EPS = 0.8       # nn.BatchNorm2d(out, 0.8)
_BN1D_EPS = 1e-5      # nn.BatchNorm1d default
_HID = 128            # head hidden width (fixed by the module)
_HEAD_PAD = 384       # padded fused-head width: [cls 128 | code 128 | adv 1 | pad]
_SLAB = 128           # lane-dense combined output width


def _lrelu(x):
    return jnp.maximum(x, _ALPHA * x)


# ---------------------------------------------------------------------------
# Host-side (trace-time) helpers.  All tiny; none of this runs in the kernel.
# ---------------------------------------------------------------------------
def _conv_scatter_map(h, w, ksize=3, stride=2, pad=1):
    """Constant 0/1 map T[t, p, q] = 1 iff input pixel p feeds output pixel q
    through kernel tap t (zero padding handled by absence)."""
    ho = (h + 2 * pad - ksize) // stride + 1
    wo = (w + 2 * pad - ksize) // stride + 1
    t = np.zeros((ksize * ksize, h * w, ho * wo), np.float32)
    for dh in range(ksize):
        for dw in range(ksize):
            for oh in range(ho):
                ih = oh * stride - pad + dh
                if not 0 <= ih < h:
                    continue
                for ow in range(wo):
                    iw = ow * stride - pad + dw
                    if 0 <= iw < w:
                        t[dh * ksize + dw, ih * w + iw, oh * wo + ow] = 1.0
    return t, ho, wo


def _bn_fold(gamma, beta, mean, var, eps):
    scale = gamma / jnp.sqrt(var + eps)
    return scale, beta - mean * scale


def _pick_batch_tile(b):
    for t in (128, 64, 32, 16, 8):
        if b % t == 0:
            return t
    return b            # small / odd batch: single full-batch block


# ---------------------------------------------------------------------------
# The single fused kernel: 4 dense conv matmuls + fused heads on a batch tile.
# ---------------------------------------------------------------------------
def _make_kernel(n_conv, classes):
    def kernel(*refs):
        it = iter(refs)
        x_ref = next(it)
        conv = [tuple(next(it) for _ in range(4)) for _ in range(n_conv)]
        wh1, sc_h, sh_h, wh2, b2 = (next(it) for _ in range(5))
        o_ref = next(it)

        act = x_ref[...]                                      # (Bt, F0) bf16
        # Conv tower: each layer is one dense matmul + bias + LeakyReLU + BN affine.
        for w_ref, b_ref, s_ref, t_ref in conv:
            z = jnp.dot(act, w_ref[...], preferred_element_type=jnp.float32)
            z = _lrelu(z + b_ref[...])                        # bias + LeakyReLU (f32)
            z = z * s_ref[...] + t_ref[...]                   # folded BN2d (identity L1)
            act = z.astype(jnp.bfloat16)                      # (Bt, Ho*Wo*Cout)

        # Fused head stage 1: [cls hidden | code hidden | adv passthrough | pad].
        h = jnp.dot(act, wh1[...], preferred_element_type=jnp.float32)
        h = h * sc_h[...] + sh_h[...]                         # folded BN1d (+L1 bias)
        lane = jax.lax.broadcasted_iota(jnp.int32, h.shape, 1)
        h = jnp.where(lane < 2 * _HID, _lrelu(h), h)          # no LReLU on adv column

        # Fused head stage 2 -> lane-dense slab: col 0 = validity,
        # cols 1..1+classes = label logits, next code_dim = latent code.
        slab = jnp.dot(h.astype(jnp.bfloat16), wh2[...],
                       preferred_element_type=jnp.float32) + b2[...]

        # In-slab masked softmax over the label columns only.
        lane_o = jax.lax.broadcasted_iota(jnp.int32, slab.shape, 1)
        lmask = (lane_o >= 1) & (lane_o < 1 + classes)
        m = jnp.max(jnp.where(lmask, slab, -jnp.inf), axis=-1, keepdims=True)
        e = jnp.where(lmask, jnp.exp(slab - m), 0.0)
        inv = pl.reciprocal(jnp.sum(e, axis=-1, keepdims=True), approx=True)
        o_ref[...] = jnp.where(lmask, e * inv, slab)          # one dense store

    return kernel


# ---------------------------------------------------------------------------
# Full forward pass: host-side weight folding + one pallas_call.
# ---------------------------------------------------------------------------
def discriminator_forward(image_nchw, p):
    batch, cin, h0, w0 = (int(d) for d in image_nchw.shape)
    f32, bf16 = jnp.float32, jnp.bfloat16

    classes = int(p["cls_w2"].shape[0])
    code_dim = int(p["code_w2"].shape[0])
    assert 1 + classes + code_dim <= _SLAB

    # Input: NCHW -> NHWC-flat (B, H*W*C); channel-fastest matches folded weights.
    x = jnp.transpose(image_nchw, (0, 2, 3, 1)).reshape(batch, h0 * w0 * cin)
    inputs = [x.astype(bf16)]
    flops = 0

    # ---- conv tower: fold im2col + weights into one dense matrix per layer ----
    layer_defs = (("w1", "b1", None), ("w2", "b2", "bn2"),
                  ("w3", "b3", "bn3"), ("w4", "b4", "bn4"))
    h, w = h0, w0
    feat0 = h0 * w0 * cin
    for wk, bk, bnk in layer_defs:
        wt = p[wk]
        cout, cin_l = int(wt.shape[0]), int(wt.shape[1])
        tmap, ho, wo = _conv_scatter_map(h, w)
        fin, fout = h * w * cin_l, ho * wo * cout
        w9 = jnp.transpose(wt, (2, 3, 1, 0)).reshape(9, cin_l, cout)
        bigw = jnp.einsum("tpq,tio->piqo", jnp.asarray(tmap), w9).reshape(fin, fout)
        bias = jnp.tile(p[bk].astype(f32), (ho * wo,))
        if bnk is not None:
            sc, sh = _bn_fold(*p[bnk], _BN2D_EPS)
            sc = jnp.tile(sc.astype(f32), (ho * wo,))
            sh = jnp.tile(sh.astype(f32), (ho * wo,))
        else:                                   # layer 1: no BatchNorm
            sc = jnp.ones((fout,), f32)
            sh = jnp.zeros((fout,), f32)
        inputs += [bigw.astype(bf16), bias.reshape(1, fout),
                   sc.reshape(1, fout), sh.reshape(1, fout)]
        flops += 2 * batch * fin * fout
        h, w = ho, wo

    # ---- fused heads ----
    hw_f = h * w
    out_dim = int(p["adv_w"].shape[1])
    assert out_dim == _HID * hw_f

    def head_cols(w_mat):
        """(n, out_dim) -> (out_dim, n) with rows reordered from PyTorch's
        CHW-flatten order to this kernel's spatial-major feature order."""
        wt = jnp.transpose(w_mat)
        if hw_f > 1:
            # TODO(synk): hw_f > 1 path (img_size >= 32) is untested vs PyTorch.
            i = np.arange(out_dim)
            src = (i % _HID) * hw_f + (i // _HID)
            wt = jnp.take(wt, jnp.asarray(src), axis=0)
        return wt.astype(f32)

    cls_s, cls_t = _bn_fold(*p["cls_bn"], _BN1D_EPS)
    cod_s, cod_t = _bn_fold(*p["code_bn"], _BN1D_EPS)

    wh1 = jnp.concatenate(
        [head_cols(p["cls_w1"]), head_cols(p["code_w1"]), head_cols(p["adv_w"]),
         jnp.zeros((out_dim, _HEAD_PAD - (2 * _HID + 1)), f32)], axis=1)
    sc_h = jnp.concatenate([cls_s, cod_s, jnp.ones((_HEAD_PAD - 2 * _HID,), f32)])
    sh_h = jnp.concatenate([cls_t + cls_s * p["cls_b1"],
                            cod_t + cod_s * p["code_b1"],
                            jnp.zeros((_HEAD_PAD - 2 * _HID,), f32)])

    wh2 = jnp.zeros((_HEAD_PAD, _SLAB), f32)
    wh2 = wh2.at[0:_HID, 1:1 + classes].set(jnp.transpose(p["cls_w2"]))
    wh2 = wh2.at[_HID:2 * _HID,
                 1 + classes:1 + classes + code_dim].set(jnp.transpose(p["code_w2"]))
    wh2 = wh2.at[2 * _HID, 0].set(1.0)                       # validity passthrough
    b2 = jnp.zeros((_SLAB,), f32)
    b2 = b2.at[0].set(p["adv_b"][0])
    b2 = b2.at[1:1 + classes].set(p["cls_b2"])
    b2 = b2.at[1 + classes:1 + classes + code_dim].set(p["code_b2"])

    inputs += [wh1.astype(bf16), sc_h.reshape(1, _HEAD_PAD),
               sh_h.reshape(1, _HEAD_PAD), wh2.astype(bf16), b2.reshape(1, _SLAB)]
    flops += 2 * batch * (out_dim * _HEAD_PAD + _HEAD_PAD * _SLAB)

    # ---- grid over batch tiles; weights VMEM-resident via constant index maps ----
    bt = _pick_batch_tile(batch)
    grid = (batch // bt,)

    in_specs = [pl.BlockSpec((bt, feat0), lambda i: (i, 0))]
    in_specs += [pl.BlockSpec(tuple(int(d) for d in a.shape), lambda i: (0, 0))
                 for a in inputs[1:]]
    out_specs = pl.BlockSpec((bt, _SLAB), lambda i: (i, 0))
    out_shape = jax.ShapeDtypeStruct((batch, _SLAB), f32)

    bytes_accessed = sum(int(np.prod(a.shape)) * a.dtype.itemsize for a in inputs)
    bytes_accessed += batch * _SLAB * 4

    slab = pl.pallas_call(
        _make_kernel(len(layer_defs), classes),
        out_shape=out_shape,
        grid_spec=pltpu.PrefetchScalarGridSpec(
            num_scalar_prefetch=0, grid=grid,
            in_specs=in_specs, out_specs=out_specs),
        compiler_params=pltpu.CompilerParams(
            dimension_semantics=("parallel",)),
        cost_estimate=pl.CostEstimate(flops=flops,
                                      transcendentals=batch * classes,
                                      bytes_accessed=bytes_accessed),
    )(*inputs)

    validity = slab[:, 0:1]
    label = slab[:, 1:1 + classes]
    latent_code = slab[:, 1 + classes:1 + classes + code_dim]
    return validity, label, latent_code


# ---------------------------------------------------------------------------
# Deterministic parameter construction + smoke test.
# ---------------------------------------------------------------------------
def _bn_params(key, n):
    k1, k2, k3, k4 = jax.random.split(key, 4)
    gamma = 1.0 + 0.1 * jax.random.normal(k1, (n,), jnp.float32)
    beta = 0.1 * jax.random.normal(k2, (n,), jnp.float32)
    mean = 0.1 * jax.random.normal(k3, (n,), jnp.float32)
    var = jax.random.uniform(k4, (n,), jnp.float32, 0.5, 1.5)
    return gamma, beta, mean, var


def make_params(key, classes, channels, img_size, code_dim):
    out_dim = 128 * (img_size // 16) * (img_size // 16)
    ks = jax.random.split(key, 21)
    s = 0.05
    return {
        "w1": s * jax.random.normal(ks[0], (16, channels, 3, 3), jnp.float32),
        "b1": s * jax.random.normal(ks[1], (16,), jnp.float32),
        "w2": s * jax.random.normal(ks[2], (32, 16, 3, 3), jnp.float32),
        "b2": s * jax.random.normal(ks[3], (32,), jnp.float32),
        "w3": s * jax.random.normal(ks[4], (64, 32, 3, 3), jnp.float32),
        "b3": s * jax.random.normal(ks[5], (64,), jnp.float32),
        "w4": s * jax.random.normal(ks[6], (128, 64, 3, 3), jnp.float32),
        "b4": s * jax.random.normal(ks[7], (128,), jnp.float32),
        "bn2": _bn_params(ks[8], 32),
        "bn3": _bn_params(ks[9], 64),
        "bn4": _bn_params(ks[10], 128),
        "adv_w": s * jax.random.normal(ks[11], (1, out_dim), jnp.float32),
        "adv_b": s * jax.random.normal(ks[12], (1,), jnp.float32),
        "cls_w1": s * jax.random.normal(ks[13], (128, out_dim), jnp.float32),
        "cls_b1": s * jax.random.normal(ks[14], (128,), jnp.float32),
        "cls_bn": _bn_params(ks[15], 128),
        "cls_w2": s * jax.random.normal(ks[16], (classes, 128), jnp.float32),
        "cls_b2": jnp.zeros((classes,), jnp.float32),
        "code_w1": s * jax.random.normal(ks[17], (128, out_dim), jnp.float32),
        "code_b1": s * jax.random.normal(ks[18], (128,), jnp.float32),
        "code_bn": _bn_params(ks[19], 128),
        "code_w2": s * jax.random.normal(ks[20], (code_dim, 128), jnp.float32),
        "code_b2": jnp.zeros((code_dim,), jnp.float32),
    }


if __name__ == "__main__":
    classes, channels, img_size, latent_dim, code_dim = 10, 4, 16, 62, 2
    B = 2

    key = jax.random.PRNGKey(0)
    k_params, k_x = jax.random.split(key)
    params = make_params(k_params, classes, channels, img_size, code_dim)
    x = jax.random.normal(k_x, (B, channels, img_size, img_size), jnp.float32)

    fwd = jax.jit(discriminator_forward)
    validity, label, latent_code = fwd(x, params)
    jax.block_until_ready((validity, label, latent_code))

    assert validity.shape == (B, 1)
    assert label.shape == (B, classes)
    assert latent_code.shape == (B, code_dim)
    assert bool(jnp.all(jnp.isfinite(validity)))
    assert bool(jnp.all(jnp.isfinite(label)))
    assert bool(jnp.all(jnp.isfinite(latent_code)))
    # Softmax rows sum to ~1 (EUP approximate reciprocal + bf16 MXU -> loose tol).
    assert bool(jnp.allclose(jnp.sum(label, axis=1), 1.0, atol=1e-2))
    print("KERNEL_OK")
</pallas_src>

<mosaic_0001>
module attributes {stable_mosaic.version = 11 : i64} {
  func.func @kernel(%arg0: i32, %arg1: memref<2x1024xbf16, #tpu.memory_space<vmem>>, %arg2: memref<1024x1024xbf16, #tpu.memory_space<vmem>>, %arg3: memref<1x1024xf32, #tpu.memory_space<vmem>>, %arg4: memref<1x1024xf32, #tpu.memory_space<vmem>>, %arg5: memref<1x1024xf32, #tpu.memory_space<vmem>>, %arg6: memref<1024x512xbf16, #tpu.memory_space<vmem>>, %arg7: memref<1x512xf32, #tpu.memory_space<vmem>>, %arg8: memref<1x512xf32, #tpu.memory_space<vmem>>, %arg9: memref<1x512xf32, #tpu.memory_space<vmem>>, %arg10: memref<512x256xbf16, #tpu.memory_space<vmem>>, %arg11: memref<1x256xf32, #tpu.memory_space<vmem>>, %arg12: memref<1x256xf32, #tpu.memory_space<vmem>>, %arg13: memref<1x256xf32, #tpu.memory_space<vmem>>, %arg14: memref<256x128xbf16, #tpu.memory_space<vmem>>, %arg15: memref<1x128xf32, #tpu.memory_space<vmem>>, %arg16: memref<1x128xf32, #tpu.memory_space<vmem>>, %arg17: memref<1x128xf32, #tpu.memory_space<vmem>>, %arg18: memref<128x384xbf16, #tpu.memory_space<vmem>>, %arg19: memref<1x384xf32, #tpu.memory_space<vmem>>, %arg20: memref<1x384xf32, #tpu.memory_space<vmem>>, %arg21: memref<384x128xbf16, #tpu.memory_space<vmem>>, %arg22: memref<1x128xf32, #tpu.memory_space<vmem>>, %arg23: memref<2x128xf32, #tpu.memory_space<vmem>>) attributes {dimension_semantics = [#tpu.dimension_semantics<parallel>], iteration_bounds = array<i64: 1>, scalar_prefetch = 0 : i64, scratch_operands = 0 : i64, tpu.core_type = #tpu.core_type<tc>, window_params = [{transform_indices = @transform_0, window_bounds = array<i64: 2, 1024>}, {pipeline_mode = #tpu.pipeline_mode<synchronous>, transform_indices = @transform_1, window_bounds = array<i64: 1024, 1024>}, {pipeline_mode = #tpu.pipeline_mode<synchronous>, transform_indices = @transform_2, window_bounds = array<i64: 1, 1024>}, {pipeline_mode = #tpu.pipeline_mode<synchronous>, transform_indices = @transform_3, window_bounds = array<i64: 1, 1024>}, {pipeline_mode = #tpu.pipeline_mode<synchronous>, transform_indices = @transform_4, window_bounds = array<i64: 1, 1024>}, {pipeline_mode = #tpu.pipeline_mode<synchronous>, transform_indices = @transform_5, window_bounds = array<i64: 1024, 512>}, {pipeline_mode = #tpu.pipeline_mode<synchronous>, transform_indices = @transform_6, window_bounds = array<i64: 1, 512>}, {pipeline_mode = #tpu.pipeline_mode<synchronous>, transform_indices = @transform_7, window_bounds = array<i64: 1, 512>}, {pipeline_mode = #tpu.pipeline_mode<synchronous>, transform_indices = @transform_8, window_bounds = array<i64: 1, 512>}, {pipeline_mode = #tpu.pipeline_mode<synchronous>, transform_indices = @transform_9, window_bounds = array<i64: 512, 256>}, {pipeline_mode = #tpu.pipeline_mode<synchronous>, transform_indices = @transform_10, window_bounds = array<i64: 1, 256>}, {pipeline_mode = #tpu.pipeline_mode<synchronous>, transform_indices = @transform_11, window_bounds = array<i64: 1, 256>}, {pipeline_mode = #tpu.pipeline_mode<synchronous>, transform_indices = @transform_12, window_bounds = array<i64: 1, 256>}, {pipeline_mode = #tpu.pipeline_mode<synchronous>, transform_indices = @transform_13, window_bounds = array<i64: 256, 128>}, {pipeline_mode = #tpu.pipeline_mode<synchronous>, transform_indices = @transform_14, window_bounds = array<i64: 1, 128>}, {pipeline_mode = #tpu.pipeline_mode<synchronous>, transform_indices = @transform_15, window_bounds = array<i64: 1, 128>}, {pipeline_mode = #tpu.pipeline_mode<synchronous>, transform_indices = @transform_16, window_bounds = array<i64: 1, 128>}, {pipeline_mode = #tpu.pipeline_mode<synchronous>, transform_indices = @transform_17, window_bounds = array<i64: 128, 384>}, {pipeline_mode = #tpu.pipeline_mode<synchronous>, transform_indices = @transform_18, window_bounds = array<i64: 1, 384>}, {pipeline_mode = #tpu.pipeline_mode<synchronous>, transform_indices = @transform_19, window_bounds = array<i64: 1, 384>}, {pipeline_mode = #tpu.pipeline_mode<synchronous>, transform_indices = @transform_20, window_bounds = array<i64: 384, 128>}, {pipeline_mode = #tpu.pipeline_mode<synchronous>, transform_indices = @transform_21, window_bounds = array<i64: 1, 128>}, {transform_indices = @transform_22, window_bounds = array<i64: 2, 128>}]} {
    %c0 = arith.constant 0 : index
    %c0_0 = arith.constant 0 : index
    %0 = vector.load %arg1[%c0, %c0_0] : memref<2x1024xbf16, #tpu.memory_space<vmem>>, vector<2x1024xbf16>
    %c0_1 = arith.constant 0 : index
    %c0_2 = arith.constant 0 : index
    %1 = vector.load %arg2[%c0_1, %c0_2] : memref<1024x1024xbf16, #tpu.memory_space<vmem>>, vector<1024x1024xbf16>
    %cst = arith.constant dense<0.000000e+00> : vector<2x1024xf32>
    %2 = tpu.matmul %0, %1, %cst {dimension_numbers = #tpu.dot_dimension_numbers<[1], [0], [0], [1], [0, 0, 1, 1], [], []>} : vector<2x1024xbf16>, vector<1024x1024xbf16>, vector<2x1024xf32> -> vector<2x1024xf32>
    %c0_3 = arith.constant 0 : index
    %c0_4 = arith.constant 0 : index
    %3 = vector.load %arg3[%c0_3, %c0_4] : memref<1x1024xf32, #tpu.memory_space<vmem>>, vector<1x1024xf32>
    %4 = vector.broadcast %3 : vector<1x1024xf32> to vector<2x1024xf32>
    %5 = arith.addf %2, %4 : vector<2x1024xf32>
    %cst_5 = arith.constant 2.000000e-01 : f32
    %6 = vector.broadcast %cst_5 : f32 to vector<2x1024xf32>
    %7 = arith.mulf %6, %5 : vector<2x1024xf32>
    %8 = arith.maximumf %5, %7 : vector<2x1024xf32>
    %c0_6 = arith.constant 0 : index
    %c0_7 = arith.constant 0 : index
    %9 = vector.load %arg4[%c0_6, %c0_7] : memref<1x1024xf32, #tpu.memory_space<vmem>>, vector<1x1024xf32>
    %10 = vector.broadcast %9 : vector<1x1024xf32> to vector<2x1024xf32>
    %11 = arith.mulf %8, %10 : vector<2x1024xf32>
    %c0_8 = arith.constant 0 : index
    %c0_9 = arith.constant 0 : index
    %12 = vector.load %arg5[%c0_8, %c0_9] : memref<1x1024xf32, #tpu.memory_space<vmem>>, vector<1x1024xf32>
    %13 = vector.broadcast %12 : vector<1x1024xf32> to vector<2x1024xf32>
    %14 = arith.addf %11, %13 : vector<2x1024xf32>
    %15 = arith.truncf %14 : vector<2x1024xf32> to vector<2x1024xbf16>
    %c0_10 = arith.constant 0 : index
    %c0_11 = arith.constant 0 : index
    %16 = vector.load %arg6[%c0_10, %c0_11] : memref<1024x512xbf16, #tpu.memory_space<vmem>>, vector<1024x512xbf16>
    %cst_12 = arith.constant dense<0.000000e+00> : vector<2x512xf32>
    %17 = tpu.matmul %15, %16, %cst_12 {dimension_numbers = #tpu.dot_dimension_numbers<[1], [0], [0], [1], [0, 0, 1, 1], [], []>} : vector<2x1024xbf16>, vector<1024x512xbf16>, vector<2x512xf32> -> vector<2x512xf32>
    %c0_13 = arith.constant 0 : index
    %c0_14 = arith.constant 0 : index
    %18 = vector.load %arg7[%c0_13, %c0_14] : memref<1x512xf32, #tpu.memory_space<vmem>>, vector<1x512xf32>
    %19 = vector.broadcast %18 : vector<1x512xf32> to vector<2x512xf32>
    %20 = arith.addf %17, %19 : vector<2x512xf32>
    %cst_15 = arith.constant 2.000000e-01 : f32
    %21 = vector.broadcast %cst_15 : f32 to vector<2x512xf32>
    %22 = arith.mulf %21, %20 : vector<2x512xf32>
    %23 = arith.maximumf %20, %22 : vector<2x512xf32>
    %c0_16 = arith.constant 0 : index
    %c0_17 = arith.constant 0 : index
    %24 = vector.load %arg8[%c0_16, %c0_17] : memref<1x512xf32, #tpu.memory_space<vmem>>, vector<1x512xf32>
    %25 = vector.broadcast %24 : vector<1x512xf32> to vector<2x512xf32>
    %26 = arith.mulf %23, %25 : vector<2x512xf32>
    %c0_18 = arith.constant 0 : index
    %c0_19 = arith.constant 0 : index
    %27 = vector.load %arg9[%c0_18, %c0_19] : memref<1x512xf32, #tpu.memory_space<vmem>>, vector<1x512xf32>
    %28 = vector.broadcast %27 : vector<1x512xf32> to vector<2x512xf32>
    %29 = arith.addf %26, %28 : vector<2x512xf32>
    %30 = arith.truncf %29 : vector<2x512xf32> to vector<2x512xbf16>
    %c0_20 = arith.constant 0 : index
    %c0_21 = arith.constant 0 : index
    %31 = vector.load %arg10[%c0_20, %c0_21] : memref<512x256xbf16, #tpu.memory_space<vmem>>, vector<512x256xbf16>
    %cst_22 = arith.constant dense<0.000000e+00> : vector<2x256xf32>
    %32 = tpu.matmul %30, %31, %cst_22 {dimension_numbers = #tpu.dot_dimension_numbers<[1], [0], [0], [1], [0, 0, 1, 1], [], []>} : vector<2x512xbf16>, vector<512x256xbf16>, vector<2x256xf32> -> vector<2x256xf32>
    %c0_23 = arith.constant 0 : index
    %c0_24 = arith.constant 0 : index
    %33 = vector.load %arg11[%c0_23, %c0_24] : memref<1x256xf32, #tpu.memory_space<vmem>>, vector<1x256xf32>
    %34 = vector.broadcast %33 : vector<1x256xf32> to vector<2x256xf32>
    %35 = arith.addf %32, %34 : vector<2x256xf32>
    %cst_25 = arith.constant 2.000000e-01 : f32
    %36 = vector.broadcast %cst_25 : f32 to vector<2x256xf32>
    %37 = arith.mulf %36, %35 : vector<2x256xf32>
    %38 = arith.maximumf %35, %37 : vector<2x256xf32>
    %c0_26 = arith.constant 0 : index
    %c0_27 = arith.constant 0 : index
    %39 = vector.load %arg12[%c0_26, %c0_27] : memref<1x256xf32, #tpu.memory_space<vmem>>, vector<1x256xf32>
    %40 = vector.broadcast %39 : vector<1x256xf32> to vector<2x256xf32>
    %41 = arith.mulf %38, %40 : vector<2x256xf32>
    %c0_28 = arith.constant 0 : index
    %c0_29 = arith.constant 0 : index
    %42 = vector.load %arg13[%c0_28, %c0_29] : memref<1x256xf32, #tpu.memory_space<vmem>>, vector<1x256xf32>
    %43 = vector.broadcast %42 : vector<1x256xf32> to vector<2x256xf32>
    %44 = arith.addf %41, %43 : vector<2x256xf32>
    %45 = arith.truncf %44 : vector<2x256xf32> to vector<2x256xbf16>
    %c0_30 = arith.constant 0 : index
    %c0_31 = arith.constant 0 : index
    %46 = vector.load %arg14[%c0_30, %c0_31] : memref<256x128xbf16, #tpu.memory_space<vmem>>, vector<256x128xbf16>
    %cst_32 = arith.constant dense<0.000000e+00> : vector<2x128xf32>
    %47 = tpu.matmul %45, %46, %cst_32 {dimension_numbers = #tpu.dot_dimension_numbers<[1], [0], [0], [1], [0, 0, 1, 1], [], []>} : vector<2x256xbf16>, vector<256x128xbf16>, vector<2x128xf32> -> vector<2x128xf32>
    %c0_33 = arith.constant 0 : index
    %c0_34 = arith.constant 0 : index
    %48 = vector.load %arg15[%c0_33, %c0_34] : memref<1x128xf32, #tpu.memory_space<vmem>>, vector<1x128xf32>
    %49 = vector.broadcast %48 : vector<1x128xf32> to vector<2x128xf32>
    %50 = arith.addf %47, %49 : vector<2x128xf32>
    %cst_35 = arith.constant 2.000000e-01 : f32
    %51 = vector.broadcast %cst_35 : f32 to vector<2x128xf32>
    %52 = arith.mulf %51, %50 : vector<2x128xf32>
    %53 = arith.maximumf %50, %52 : vector<2x128xf32>
    %c0_36 = arith.constant 0 : index
    %c0_37 = arith.constant 0 : index
    %54 = vector.load %arg16[%c0_36, %c0_37] : memref<1x128xf32, #tpu.memory_space<vmem>>, vector<1x128xf32>
    %55 = vector.broadcast %54 : vector<1x128xf32> to vector<2x128xf32>
    %56 = arith.mulf %53, %55 : vector<2x128xf32>
    %c0_38 = arith.constant 0 : index
    %c0_39 = arith.constant 0 : index
    %57 = vector.load %arg17[%c0_38, %c0_39] : memref<1x128xf32, #tpu.memory_space<vmem>>, vector<1x128xf32>
    %58 = vector.broadcast %57 : vector<1x128xf32> to vector<2x128xf32>
    %59 = arith.addf %56, %58 : vector<2x128xf32>
    %60 = arith.truncf %59 : vector<2x128xf32> to vector<2x128xbf16>
    %c0_40 = arith.constant 0 : index
    %c0_41 = arith.constant 0 : index
    %61 = vector.load %arg18[%c0_40, %c0_41] : memref<128x384xbf16, #tpu.memory_space<vmem>>, vector<128x384xbf16>
    %cst_42 = arith.constant dense<0.000000e+00> : vector<2x384xf32>
    %62 = tpu.matmul %60, %61, %cst_42 {dimension_numbers = #tpu.dot_dimension_numbers<[1], [0], [0], [1], [0, 0, 1, 1], [], []>} : vector<2x128xbf16>, vector<128x384xbf16>, vector<2x384xf32> -> vector<2x384xf32>
    %c0_43 = arith.constant 0 : index
    %c0_44 = arith.constant 0 : index
    %63 = vector.load %arg19[%c0_43, %c0_44] : memref<1x384xf32, #tpu.memory_space<vmem>>, vector<1x384xf32>
    %64 = vector.broadcast %63 : vector<1x384xf32> to vector<2x384xf32>
    %65 = arith.mulf %62, %64 : vector<2x384xf32>
    %c0_45 = arith.constant 0 : index
    %c0_46 = arith.constant 0 : index
    %66 = vector.load %arg20[%c0_45, %c0_46] : memref<1x384xf32, #tpu.memory_space<vmem>>, vector<1x384xf32>
    %67 = vector.broadcast %66 : vector<1x384xf32> to vector<2x384xf32>
    %68 = arith.addf %65, %67 : vector<2x384xf32>
    %69 = tpu.iota {dimensions = array<i32: 1>} : vector<2x384xi32>
    %c256_i32 = arith.constant 256 : i32
    %70 = vector.broadcast %c256_i32 : i32 to vector<2x384xi32>
    %71 = arith.cmpi slt, %69, %70 : vector<2x384xi32>
    %cst_47 = arith.constant 2.000000e-01 : f32
    %72 = vector.broadcast %cst_47 : f32 to vector<2x384xf32>
    %73 = arith.mulf %72, %68 : vector<2x384xf32>
    %74 = arith.maximumf %68, %73 : vector<2x384xf32>
    %75 = arith.select %71, %74, %68 : vector<2x384xi1>, vector<2x384xf32>
    %76 = arith.truncf %75 : vector<2x384xf32> to vector<2x384xbf16>
    %c0_48 = arith.constant 0 : index
    %c0_49 = arith.constant 0 : index
    %77 = vector.load %arg21[%c0_48, %c0_49] : memref<384x128xbf16, #tpu.memory_space<vmem>>, vector<384x128xbf16>
    %cst_50 = arith.constant dense<0.000000e+00> : vector<2x128xf32>
    %78 = tpu.matmul %76, %77, %cst_50 {dimension_numbers = #tpu.dot_dimension_numbers<[1], [0], [0], [1], [0, 0, 1, 1], [], []>} : vector<2x384xbf16>, vector<384x128xbf16>, vector<2x128xf32> -> vector<2x128xf32>
    %c0_51 = arith.constant 0 : index
    %c0_52 = arith.constant 0 : index
    %79 = vector.load %arg22[%c0_51, %c0_52] : memref<1x128xf32, #tpu.memory_space<vmem>>, vector<1x128xf32>
    %80 = vector.broadcast %79 : vector<1x128xf32> to vector<2x128xf32>
    %81 = arith.addf %78, %80 : vector<2x128xf32>
    %82 = tpu.iota {dimensions = array<i32: 1>} : vector<2x128xi32>
    %c1_i32 = arith.constant 1 : i32
    %83 = vector.broadcast %c1_i32 : i32 to vector<2x128xi32>
    %84 = arith.cmpi sge, %82, %83 : vector<2x128xi32>
    %c11_i32 = arith.constant 11 : i32
    %85 = vector.broadcast %c11_i32 : i32 to vector<2x128xi32>
    %86 = arith.cmpi slt, %82, %85 : vector<2x128xi32>
    %87 = arith.andi %84, %86 : vector<2x128xi1>
    %cst_53 = arith.constant 0xFF800000 : f32
    %88 = vector.broadcast %cst_53 : f32 to vector<2x128xf32>
    %89 = arith.select %87, %81, %88 : vector<2x128xi1>, vector<2x128xf32>
    %cst_54 = arith.constant dense<0xFF800000> : vector<2xf32>
    %90 = vector.multi_reduction <maximumf>, %89, %cst_54 [1] : vector<2x128xf32> to vector<2xf32>
    %91 = vector.shape_cast %90 : vector<2xf32> to vector<2x1xf32>
    %92 = vector.broadcast %91 : vector<2x1xf32> to vector<2x128xf32>
    %93 = arith.subf %81, %92 : vector<2x128xf32>
    %94 = math.exp %93 : vector<2x128xf32>
    %cst_55 = arith.constant 0.000000e+00 : f32
    %95 = vector.broadcast %cst_55 : f32 to vector<2x128xf32>
    %96 = arith.select %87, %94, %95 : vector<2x128xi1>, vector<2x128xf32>
    %cst_56 = arith.constant dense<0.000000e+00> : vector<2xf32>
    %97 = vector.multi_reduction <add>, %96, %cst_56 [1] : vector<2x128xf32> to vector<2xf32>
    %98 = vector.shape_cast %97 : vector<2xf32> to vector<2x1xf32>
    %99 = tpu.reciprocal %98 {approx = true} : vector<2x1xf32> -> vector<2x1xf32>
    %100 = vector.broadcast %99 : vector<2x1xf32> to vector<2x128xf32>
    %101 = arith.mulf %96, %100 : vector<2x128xf32>
    %102 = arith.select %87, %101, %81 : vector<2x128xi1>, vector<2x128xf32>
    %c0_57 = arith.constant 0 : index
    %c0_58 = arith.constant 0 : index
    %103 = vector.load %arg23[%c0_57, %c0_58] : memref<2x128xf32, #tpu.memory_space<vmem>>, vector<2x128xf32>
    tpu.vector_store %arg23[%c0_57, %c0_58], %102 {strides = array<i32>} : memref<2x128xf32, #tpu.memory_space<vmem>>, vector<2x128xf32>,
    return
  }
  func.func @transform_0(%arg0: i32) -> (i32, i32) {
    %c0_i32 = arith.constant 0 : i32
    %c0_i32_0 = arith.constant 0 : i32
    return %arg0, %c0_i32 : i32, i32
  }
  func.func @transform_1(%arg0: i32) -> (i32, i32) {
    %c0_i32 = arith.constant 0 : i32
    %c0_i32_0 = arith.constant 0 : i32
    %c0_i32_1 = arith.constant 0 : i32
    return %c0_i32, %c0_i32_0 : i32, i32
  }
  func.func @transform_2(%arg0: i32) -> (i32, i32) {
    %c0_i32 = arith.constant 0 : i32
    %c0_i32_0 = arith.constant 0 : i32
    %c0_i32_1 = arith.constant 0 : i32
    return %c0_i32, %c0_i32_0 : i32, i32
  }
  func.func @transform_3(%arg0: i32) -> (i32, i32) {
    %c0_i32 = arith.constant 0 : i32
    %c0_i32_0 = arith.constant 0 : i32
    %c0_i32_1 = arith.constant 0 : i32
    return %c0_i32, %c0_i32_0 : i32, i32
  }
  func.func @transform_4(%arg0: i32) -> (i32, i32) {
    %c0_i32 = arith.constant 0 : i32
    %c0_i32_0 = arith.constant 0 : i32
    %c0_i32_1 = arith.constant 0 : i32
    return %c0_i32, %c0_i32_0 : i32, i32
  }
  func.func @transform_5(%arg0: i32) -> (i32, i32) {
    %c0_i32 = arith.constant 0 : i32
    %c0_i32_0 = arith.constant 0 : i32
    %c0_i32_1 = arith.constant 0 : i32
    return %c0_i32, %c0_i32_0 : i32, i32
  }
  func.func @transform_6(%arg0: i32) -> (i32, i32) {
    %c0_i32 = arith.constant 0 : i32
    %c0_i32_0 = arith.constant 0 : i32
    %c0_i32_1 = arith.constant 0 : i32
    return %c0_i32, %c0_i32_0 : i32, i32
  }
  func.func @transform_7(%arg0: i32) -> (i32, i32) {
    %c0_i32 = arith.constant 0 : i32
    %c0_i32_0 = arith.constant 0 : i32
    %c0_i32_1 = arith.constant 0 : i32
    return %c0_i32, %c0_i32_0 : i32, i32
  }
  func.func @transform_8(%arg0: i32) -> (i32, i32) {
    %c0_i32 = arith.constant 0 : i32
    %c0_i32_0 = arith.constant 0 : i32
    %c0_i32_1 = arith.constant 0 : i32
    return %c0_i32, %c0_i32_0 : i32, i32
  }
  func.func @transform_9(%arg0: i32) -> (i32, i32) {
    %c0_i32 = arith.constant 0 : i32
    %c0_i32_0 = arith.constant 0 : i32
    %c0_i32_1 = arith.constant 0 : i32
    return %c0_i32, %c0_i32_0 : i32, i32
  }
  func.func @transform_10(%arg0: i32) -> (i32, i32) {
    %c0_i32 = arith.constant 0 : i32
    %c0_i32_0 = arith.constant 0 : i32
    %c0_i32_1 = arith.constant 0 : i32
    return %c0_i32, %c0_i32_0 : i32, i32
  }
  func.func @transform_11(%arg0: i32) -> (i32, i32) {
    %c0_i32 = arith.constant 0 : i32
    %c0_i32_0 = arith.constant 0 : i32
    %c0_i32_1 = arith.constant 0 : i32
    return %c0_i32, %c0_i32_0 : i32, i32
  }
  func.func @transform_12(%arg0: i32) -> (i32, i32) {
    %c0_i32 = arith.constant 0 : i32
    %c0_i32_0 = arith.constant 0 : i32
    %c0_i32_1 = arith.constant 0 : i32
    return %c0_i32, %c0_i32_0 : i32, i32
  }
  func.func @transform_13(%arg0: i32) -> (i32, i32) {
    %c0_i32 = arith.constant 0 : i32
    %c0_i32_0 = arith.constant 0 : i32
    %c0_i32_1 = arith.constant 0 : i32
    return %c0_i32, %c0_i32_0 : i32, i32
  }
  func.func @transform_14(%arg0: i32) -> (i32, i32) {
    %c0_i32 = arith.constant 0 : i32
    %c0_i32_0 = arith.constant 0 : i32
    %c0_i32_1 = arith.constant 0 : i32
    return %c0_i32, %c0_i32_0 : i32, i32
  }
  func.func @transform_15(%arg0: i32) -> (i32, i32) {
    %c0_i32 = arith.constant 0 : i32
    %c0_i32_0 = arith.constant 0 : i32
    %c0_i32_1 = arith.constant 0 : i32
    return %c0_i32, %c0_i32_0 : i32, i32
  }
  func.func @transform_16(%arg0: i32) -> (i32, i32) {
    %c0_i32 = arith.constant 0 : i32
    %c0_i32_0 = arith.constant 0 : i32
    %c0_i32_1 = arith.constant 0 : i32
    return %c0_i32, %c0_i32_0 : i32, i32
  }
  func.func @transform_17(%arg0: i32) -> (i32, i32) {
    %c0_i32 = arith.constant 0 : i32
    %c0_i32_0 = arith.constant 0 : i32
    %c0_i32_1 = arith.constant 0 : i32
    return %c0_i32, %c0_i32_0 : i32, i32
  }
  func.func @transform_18(%arg0: i32) -> (i32, i32) {
    %c0_i32 = arith.constant 0 : i32
    %c0_i32_0 = arith.constant 0 : i32
    %c0_i32_1 = arith.constant 0 : i32
    return %c0_i32, %c0_i32_0 : i32, i32
  }
  func.func @transform_19(%arg0: i32) -> (i32, i32) {
    %c0_i32 = arith.constant 0 : i32
    %c0_i32_0 = arith.constant 0 : i32
    %c0_i32_1 = arith.constant 0 : i32
    return %c0_i32, %c0_i32_0 : i32, i32
  }
  func.func @transform_20(%arg0: i32) -> (i32, i32) {
    %c0_i32 = arith.constant 0 : i32
    %c0_i32_0 = arith.constant 0 : i32
    %c0_i32_1 = arith.constant 0 : i32
    return %c0_i32, %c0_i32_0 : i32, i32
  }
  func.func @transform_21(%arg0: i32) -> (i32, i32) {
    %c0_i32 = arith.constant 0 : i32
    %c0_i32_0 = arith.constant 0 : i32
    %c0_i32_1 = arith.constant 0 : i32
    return %c0_i32, %c0_i32_0 : i32, i32
  }
  func.func @transform_22(%arg0: i32) -> (i32, i32) {
    %c0_i32 = arith.constant 0 : i32
    %c0_i32_0 = arith.constant 0 : i32
    return %arg0, %c0_i32 : i32, i32
  }
}

</mosaic_0001>

<bundles_post_ra>
// kernel: tile.41
= control target key start
LH: loop header
LB: loop body
LE: loop exit
PB: predicated region body
PF: predicated region fallthrough
CT: control target
= control target key end

     0   :  { %s64_s0 = inlined_call_operand.vmem [shape: f32[16], index: 0, kind: input, shape index: {}]   ;;  %s65_s1 = inlined_call_operand.vmem [shape: f32[64,16], index: 1, kind: output, shape index: {}]  }
   0x1   :  { %v4_v0 = vld [vmem:[%s64_s0] ss:$0 sm:$0xff] }
   0x2   :  { %5 = vst [vmem:[%s65_s1] sm:$0xff] %v4_v0 }
   0x3   :  { %20 = vst [vmem:[%s65_s1 + $0x8] sm:$0xff] %v4_v0 }
   0x4   :  { %21 = vst [vmem:[%s65_s1 + $0x10] sm:$0xff] %v4_v0 }
   0x5   :  { %22 = vst [vmem:[%s65_s1 + $0x18] sm:$0xff] %v4_v0 }
   0x6   :  { %23 = vst [vmem:[%s65_s1 + $0x20] sm:$0xff] %v4_v0 }
   0x7   :  { %24 = vst [vmem:[%s65_s1 + $0x28] sm:$0xff] %v4_v0 }
   0x8   :  { %25 = vst [vmem:[%s65_s1 + $0x30] sm:$0xff] %v4_v0 }
   0x9   :  { %26 = vst [vmem:[%s65_s1 + $0x38] sm:$0xff] %v4_v0 }

// kernel: tile.42
= control target key start
LH: loop header
LB: loop body
LE: loop exit
PB: predicated region body
PF: predicated region fallthrough
CT: control target
= control target key end

     0   :  { %vm4_vm0 = vcmask 1047556   ;;  %s162_s14 = smov 112   ;;  %s163_s15 = smov 80   ;;  %vm6_vm1 = vcmask 130048   ;;  %vm17_vm2 = vcmask 1048448   ;;  %vm28_vm3 = vcmask 917248   ;;  %s259_s0 = inlined_call_operand.vmem [shape: f32[64,16], index: 0, kind: input, shape index: {}]   ;;  %s260_s1 = inlined_call_operand.vmem [shape: f32[1,1024], index: 1, kind: output, shape index: {}]  }
   0x1   :  { %v134_v0 = vld [vmem:[%s259_s0 + $0x7] ss:$8 sm:$0xf]   ;;  %v138_v2 = vld [vmem:[%s259_s0 + $0x5] ss:$8 sm:$0xf]  }
   0x2   :  { %v135_v1 = vld [vmem:[%s259_s0 + $0x7] ss:$8 sm:$0xf0]   ;;  %v139_v4 = vld [vmem:[%s259_s0 + $0x5] ss:$8 sm:$0xf0]  }
   0x3   :  { %v14_v3 = vsel %vm4_vm0, %v135_v1, %v134_v0  ;;  %v36_v5 = vsel %vm4_vm0, %v139_v4, %v138_v2  ;;  %v136_v6 = vld [vmem:[%s259_s0 + $0x6] ss:$8 sm:$0xf]   ;;  %v140_v8 = vld [vmem:[%s259_s0 + $0x4] ss:$8 sm:$0xf]  }
   0x4   :  { %15 = vrot.lane.b32.xlu0 %v14_v3, %s162_s14  ;;  %37 = vrot.lane.b32.xlu1 %v36_v5, %s163_s15  ;;  %v137_v7 = vld [vmem:[%s259_s0 + $0x6] ss:$8 sm:$0xf0]   ;;  %v141_v9 = vld [vmem:[%s259_s0 + $0x4] ss:$8 sm:$0xf0]  }
   0x5   :  { %v142_v10 = vld [vmem:[%s259_s0 + $0x3] ss:$8 sm:$0xf]   ;;  %v25_v12 = vsel %vm4_vm0, %v137_v7, %v136_v6  ;;  %v47_v14 = vsel %vm4_vm0, %v141_v9, %v140_v8  ;;  %s164_s28 = smov 48   ;;  %s165_s29 = smov 96   ;;  %vm39_vm4 = vcmask 786048  }
   0x6   :  { %v143_v11 = vld [vmem:[%s259_s0 + $0x3] ss:$8 sm:$0xf0]   ;;  %v144_v15 = vld [vmem:[%s259_s0 + $0x2] ss:$8 sm:$0xf]  }
   0x7   :  { %v58_v13 = vsel %vm4_vm0, %v143_v11, %v142_v10  ;;  %v145_v16 = vld [vmem:[%s259_s0 + $0x2] ss:$8 sm:$0xf0]   ;;  %s166_s5 = smov 64   ;;  %s167_s10 = smov 32   ;;  %vm50_vm5 = vcmask 654848  }
   0x8   :  { %59 = vrot.lane.b32.xlu2 %v58_v13, %s164_s28  ;;  %v146_v17 = vld [vmem:[%s259_s0 + $0x1] ss:$8 sm:$0xf]   ;;  %v69_v19 = vsel %vm4_vm0, %v145_v16, %v144_v15  ;;  %s168_s11 = smov 16   ;;  %vm61_vm6 = vcmask 523648   ;;  %vm72_vm7 = vcmask 392448  }
   0x9   :  { %v147_v18 = vld [vmem:[%s259_s0 + $0x1] ss:$8 sm:$0xf0]   ;;  %v2_v21 = vld [vmem:[%s259_s0] ss:$8 sm:$0xf]  }
   0xa   :  { %v80_v20 = vsel %vm4_vm0, %v147_v18, %v146_v17  ;;  %v3_v22 = vld [vmem:[%s259_s0] ss:$8 sm:$0xf0]   ;;  %vm83_vm8 = vcmask 261248  }
   0xb   :  { %v5_v23 = vsel %vm4_vm0, %v3_v22, %v2_v21 }
   0xc   :  { %26 = vrot.lane.b32.xlu0 %v25_v12, %s165_s29  ;;  %48 = vrot.lane.b32.xlu1 %v47_v14, %s166_s5  ;;  %7 = vst.msk [vmem:[#allocation0] ss:$8 sm:$0xf] %vm6_vm1, %v5_v23  }
   0xd   :  { %8 = vst.msk [vmem:[#allocation0] ss:$8 sm:$0xf0] %vm6_vm1, %v5_v23  }
  0x10   :  { %70 = vrot.lane.b32.xlu2 %v69_v19, %s167_s10 }
  0x14   :  { %81 = vrot.lane.b32.xlu0 %v80_v20, %s168_s11 }
  0x62   :  { %v60_v24 = vpop.permute.xlu2 %59  }
  0x6a   :  { %v71_v25 = vpop.permute.xlu2 %70  }
  0x76   :  { %v16_v26 = vpop.permute.xlu0 %15   ;;  %v38_v27 = vpop.permute.xlu1 %37  }
  0x77   :  { %18 = vst.msk [vmem:[#allocation0] ss:$8 sm:$0xf] %vm17_vm2, %v16_v26  }
  0x78   :  { %19 = vst.msk [vmem:[#allocation0] ss:$8 sm:$0xf0] %vm17_vm2, %v16_v26  }
  0x7e   :  { %v27_v28 = vpop.permute.xlu0 %26   ;;  %v49_v29 = vpop.permute.xlu1 %48  }
  0x7f   :  { %29 = vst.msk [vmem:[#allocation0] ss:$8 sm:$0xf] %vm28_vm3, %v27_v28  }
  0x80   :  { %30 = vst.msk [vmem:[#allocation0] ss:$8 sm:$0xf0] %vm28_vm3, %v27_v28  }
  0x81   :  { %40 = vst.msk [vmem:[#allocation0] ss:$8 sm:$0xf] %vm39_vm4, %v38_v27  }
  0x82   :  { %41 = vst.msk [vmem:[#allocation0] ss:$8 sm:$0xf0] %vm39_vm4, %v38_v27  }
  0x83   :  { %51 = vst.msk [vmem:[#allocation0] ss:$8 sm:$0xf] %vm50_vm5, %v49_v29  }
  0x84   :  { %52 = vst.msk [vmem:[#allocation0] ss:$8 sm:$0xf0] %vm50_vm5, %v49_v29  }
  0x85   :  { %62 = vst.msk [vmem:[#allocation0] ss:$8 sm:$0xf] %vm61_vm6, %v60_v24  }
  0x86   :  { %63 = vst.msk [vmem:[#allocation0] ss:$8 sm:$0xf0] %vm61_vm6, %v60_v24   ;;  %v82_v30 = vpop.permute.xlu0 %81  }
  0x87   :  { %73 = vst.msk [vmem:[#allocation0] ss:$8 sm:$0xf] %vm72_vm7, %v71_v25  }
  0x88   :  { %74 = vst.msk [vmem:[#allocation0] ss:$8 sm:$0xf0] %vm72_vm7, %v71_v25  }
  0x89   :  { %84 = vst.msk [vmem:[#allocation0] ss:$8 sm:$0xf] %vm83_vm8, %v82_v30  }
  0x8a   :  { %85 = vst.msk [vmem:[#allocation0] ss:$8 sm:$0xf0] %vm83_vm8, %v82_v30  }
  0x90   :  { %v88_v31 = vld [vmem:[#allocation0] sm:$0x1]  ;;  %v93_v32 = vld [vmem:[#allocation0 + $0x8] sm:$0x1]  ;;  %v99_v33 = vld [vmem:[#allocation0 + $0x10] sm:$0x1] }
  0x91   :  { %91 = vst [vmem:[%s260_s1] sm:$0x1] %v88_v31  ;;  %v105_v34 = vld [vmem:[#allocation0 + $0x18] sm:$0x1]  ;;  %v111_v35 = vld [vmem:[#allocation0 + $0x20] sm:$0x1] }
  0x92   :  { %148 = vst [vmem:[%s260_s1 + $0x1] sm:$0x1] %v93_v32  ;;  %v117_v36 = vld [vmem:[#allocation0 + $0x28] sm:$0x1]  ;;  %v123_v37 = vld [vmem:[#allocation0 + $0x30] sm:$0x1] }
  0x93   :  { %149 = vst [vmem:[%s260_s1 + $0x2] sm:$0x1] %v99_v33  ;;  %v129_v38 = vld [vmem:[#allocation0 + $0x38] sm:$0x1] }
  0x94   :  { %150 = vst [vmem:[%s260_s1 + $0x3] sm:$0x1] %v105_v34 }
  0x95   :  { %151 = vst [vmem:[%s260_s1 + $0x4] sm:$0x1] %v111_v35 }
  0x96   :  { %152 = vst [vmem:[%s260_s1 + $0x5] sm:$0x1] %v117_v36 }
  0x97   :  { %153 = vst [vmem:[%s260_s1 + $0x6] sm:$0x1] %v123_v37 }
  0x98   :  { %154 = vst [vmem:[%s260_s1 + $0x7] sm:$0x1] %v129_v38 }

// kernel: tile.46
= control target key start
LH: loop header
LB: loop body
LE: loop exit
PB: predicated region body
PF: predicated region fallthrough
CT: control target
= control target key end

     0   :  { %s28_s0 = inlined_call_operand.vmem [shape: f32[32], index: 0, kind: input, shape index: {}]   ;;  %s29_s1 = inlined_call_operand.vmem [shape: f32[16,32], index: 1, kind: output, shape index: {}]  }
   0x1   :  { %v4_v0 = vld [vmem:[%s28_s0] ss:$0 sm:$0xff] }
   0x2   :  { %5 = vst [vmem:[%s29_s1] sm:$0xff] %v4_v0 }
   0x3   :  { %8 = vst [vmem:[%s29_s1 + $0x8] sm:$0xff] %v4_v0 }

// kernel: tile.55
= control target key start
LH: loop header
LB: loop body
LE: loop exit
PB: predicated region body
PF: predicated region fallthrough
CT: control target
= control target key end

     0   :  { %s56_s8 = smov 96   ;;  %s57_s11 = smov 32   ;;  %vm3_vm0 = vcmask 261120   ;;  %vm9_vm1 = vcmask 1048320   ;;  %vm15_vm2 = vcmask 785920   ;;  %vm21_vm3 = vcmask 523520   ;;  %s93_s0 = inlined_call_operand.vmem [shape: f32[16,32], index: 0, kind: input, shape index: {}]   ;;  %s94_s1 = inlined_call_operand.vmem [shape: f32[1,512], index: 1, kind: output, shape index: {}]  }
   0x1   :  { %v47_v0 = vld [vmem:[%s93_s0 + $0x3] ss:$4 sm:$0xf]   ;;  %v49_v1 = vld [vmem:[%s93_s0 + $0x1] ss:$4 sm:$0xf]  }
   0x2   :  { %7 = vrot.lane.b32.xlu0 %v47_v0, %s56_s8  ;;  %19 = vrot.lane.b32.xlu1 %v49_v1, %s57_s11  ;;  %v48_v2 = vld [vmem:[%s93_s0 + $0x2] ss:$4 sm:$0xf]   ;;  %s58_s14 = smov 64  }
   0x3   :  { %v2_v3 = vld [vmem:[%s93_s0] ss:$4 sm:$0xf]  }
   0x4   :  { %4 = vst.msk [vmem:[#allocation0] ss:$8 sm:$0xf] %vm3_vm0, %v2_v3  }
   0xa   :  { %13 = vrot.lane.b32.xlu0 %v48_v2, %s58_s14 }
  0x74   :  { %v8_v4 = vpop.permute.xlu0 %7   ;;  %v20_v5 = vpop.permute.xlu1 %19  }
  0x75   :  { %10 = vst.msk [vmem:[#allocation0] ss:$8 sm:$0xf] %vm9_vm1, %v8_v4  }
  0x7c   :  { %v14_v6 = vpop.permute.xlu0 %13  }
  0x7d   :  { %16 = vst.msk [vmem:[#allocation0] ss:$8 sm:$0xf] %vm15_vm2, %v14_v6  }
  0x7e   :  { %22 = vst.msk [vmem:[#allocation0] ss:$8 sm:$0xf] %vm21_vm3, %v20_v5  }
  0x85   :  { %v25_v7 = vld [vmem:[#allocation0] sm:$0x1]  ;;  %v30_v8 = vld [vmem:[#allocation0 + $0x8] sm:$0x1]  ;;  %v36_v9 = vld [vmem:[#allocation0 + $0x10] sm:$0x1] }
  0x86   :  { %28 = vst [vmem:[%s94_s1] sm:$0x1] %v25_v7  ;;  %v42_v10 = vld [vmem:[#allocation0 + $0x18] sm:$0x1] }
  0x87   :  { %50 = vst [vmem:[%s94_s1 + $0x1] sm:$0x1] %v30_v8 }
  0x88   :  { %51 = vst [vmem:[%s94_s1 + $0x2] sm:$0x1] %v36_v9 }
  0x89   :  { %52 = vst [vmem:[%s94_s1 + $0x3] sm:$0x1] %v42_v10 }

// kernel: tile.61
= control target key start
LH: loop header
LB: loop body
LE: loop exit
PB: predicated region body
PF: predicated region fallthrough
CT: control target
= control target key end

     0   :  { %s22_s0 = inlined_call_operand.vmem [shape: f32[64], index: 0, kind: input, shape index: {}]   ;;  %s23_s1 = inlined_call_operand.vmem [shape: f32[4,64], index: 1, kind: output, shape index: {}]  }
   0x1   :  { %v4_v0 = vld [vmem:[%s22_s0] ss:$0 sm:$0xff] }
   0x2   :  { %5 = vst [vmem:[%s23_s1] sm:$0xf] %v4_v0 }

// kernel: tile.70
= control target key start
LH: loop header
LB: loop body
LE: loop exit
PB: predicated region body
PF: predicated region fallthrough
CT: control target
= control target key end

     0   :  { %s6_s8 = smov 3  ;;  %vm8_vm0 = vcmask 523264   ;;  %s31_s9 = smov 64   ;;  %vm15_vm1 = vcmask 1048064   ;;  %s51_s0 = inlined_call_operand.vmem [shape: f32[4,64], index: 0, kind: input, shape index: {}]   ;;  %s52_s1 = inlined_call_operand.vmem [shape: f32[1,256], index: 1, kind: output, shape index: {}]  }
   0x1   :  { %v4_v0 = vld [vmem:[%s51_s0] sm:$0xf]  ;;  %s11_s0 = smov 3 }
   0x2   :  { %5 = vst [vmem:[#allocation1] sm:$0xf] %v4_v0 }
   0x9   :  { %v12_v1 = vld [vmem:[#allocation1 + $0x1] ss:$2 sm:%s11_s0]   ;;  %v7_v2 = vld [vmem:[#allocation1] ss:$2 sm:%s6_s8]  }
   0xa   :  { %13 = vrot.lane.b32.xlu0 %v12_v1, %s31_s9  ;;  %9 = vst.msk [vmem:[#allocation0] ss:$8 sm:$0x3] %vm8_vm0, %v7_v2  }
  0x7c   :  { %v14_v3 = vpop.permute.xlu0 %13  }
  0x7d   :  { %16 = vst.msk [vmem:[#allocation0] ss:$8 sm:$0x3] %vm15_vm1, %v14_v3  }
  0x84   :  { %v19_v4 = vld [vmem:[#allocation0] sm:$0x1]  ;;  %v24_v5 = vld [vmem:[#allocation0 + $0x8] sm:$0x1] }
  0x85   :  { %22 = vst [vmem:[%s52_s1] sm:$0x1] %v19_v4 }
  0x86   :  { %29 = vst [vmem:[%s52_s1 + $0x1] sm:$0x1] %v24_v5 }

// kernel: discriminator_forward.1
= control target key start
LH: loop header
LB: loop body
LE: loop exit
PB: predicated region body
PF: predicated region fallthrough
CT: control target
= control target key end

     0   :  { %vm7256_vm3 = vcmask 1041408   ;;  %s17602_s1 = inlined_call_operand.vmem [shape: bf16[1024,1024], index: 1, kind: input, shape index: {}]   ;;  %s17603_s0 = inlined_call_operand.vmem [shape: bf16[2,1024], index: 0, kind: input, shape index: {}]   ;;  %s17604_s2 = inlined_call_operand.vmem [shape: f32[1,1024], index: 2, kind: input, shape index: {}]   ;;  %s17605_s5 = inlined_call_operand.vmem [shape: bf16[1024,512], index: 5, kind: input, shape index: {}]   ;;  %s17606_s3 = inlined_call_operand.vmem [shape: f32[1,1024], index: 3, kind: input, shape index: {}]   ;;  %s17607_s4 = inlined_call_operand.vmem [shape: f32[1,1024], index: 4, kind: input, shape index: {}]   ;;  %s17608_s6 = inlined_call_operand.vmem [shape: f32[1,512], index: 6, kind: input, shape index: {}]   ;;  %s17609_s9 = inlined_call_operand.vmem [shape: bf16[512,256], index: 9, kind: input, shape index: {}]   ;;  %s17610_s7 = inlined_call_operand.vmem [shape: f32[1,512], index: 7, kind: input, shape index: {}]   ;;  %s17611_s8 = inlined_call_operand.vmem [shape: f32[1,512], index: 8, kind: input, shape index: {}]   ;;  %s17612_s10 = inlined_call_operand.vmem [shape: f32[1,256], index: 10, kind: input, shape index: {}]   ;;  %s17613_s14 = inlined_call_operand.vmem [shape: f32[1,128], index: 14, kind: input, shape index: {}]   ;;  %s17614_s13 = inlined_call_operand.vmem [shape: bf16[256,128], index: 13, kind: input, shape index: {}]   ;;  %s17615_s17 = inlined_call_operand.vmem [shape: bf16[128,384], index: 17, kind: input, shape index: {}]   ;;  %s17616_s11 = inlined_call_operand.vmem [shape: f32[1,256], index: 11, kind: input, shape index: {}]   ;;  %s17617_s12 = inlined_call_operand.vmem [shape: f32[1,256], index: 12, kind: input, shape index: {}]   ;;  %s17618_s15 = inlined_call_operand.vmem [shape: f32[1,128], index: 15, kind: input, shape index: {}]   ;;  %s17619_s16 = inlined_call_operand.vmem [shape: f32[1,128], index: 16, kind: input, shape index: {}]   ;;  %s17620_s20 = inlined_call_operand.vmem [shape: bf16[384,128], index: 20, kind: input, shape index: {}]   ;;  %s17621_s18 = inlined_call_operand.vmem [shape: f32[1,384], index: 18, kind: input, shape index: {}]   ;;  %s17622_s19 = inlined_call_operand.vmem [shape: f32[1,384], index: 19, kind: input, shape index: {}]   ;;  %s17623_s21 = inlined_call_operand.vmem [shape: f32[1,128], index: 21, kind: input, shape index: {}]   ;;  %s17624_s22 = inlined_call_operand.vmem [shape: f32[2,128], index: 22, kind: output, shape index: {}]  }
   0x1   :  { %17631 = sst [smem:[#allocation2_spill]] %s17602_s1 }
   0x2   :  { %17632 = sst [smem:[#allocation3_spill]] %s17603_s0 }
   0x3   :  { %17633 = sst [smem:[#allocation4_spill]] %s17604_s2 }
   0x4   :  { %17634 = sst [smem:[#allocation5_spill]] %s17605_s5 }
   0x5   :  { %17635 = sst [smem:[#allocation6_spill]] %s17606_s3 }
   0x6   :  { %17636 = sst [smem:[#allocation7_spill]] %s17607_s4 }
   0x7   :  { %17637 = sst [smem:[#allocation8_spill]] %s17608_s6 }
   0x8   :  { %s17638_s29 = sld [smem:[#allocation2_spill]] }
   0x9   :  { %s17639_s30 = sld [smem:[#allocation3_spill]] }
   0xa   :  { %s17640_s4 = sld [smem:[#allocation4_spill]] }
   0xb   :  { %s17641_s0 = sld [smem:[#allocation5_spill]] }
   0xc   :  { %s17643_s23 = sld [smem:[#allocation7_spill]] }
   0xd   :  { %s17644_s5 = sld [smem:[#allocation8_spill]] }
   0xe   :  { %v7501_v0 = vld [vmem:[%s17638_s29 + $0x1c0] sm:$0xf] }
   0xf   :  { %v10919_v1 = vld [vmem:[%s17638_s29 + $0x1dc] sm:$0xf0] }
  0x10   :  { %v7757_v2 = vld [vmem:[%s17638_s29 + $0x3c0] sm:$0xf]  ;;  %v7502_v3 = vor.u32 %v10919_v1, %v7501_v0 }
  0x11   :  { %v10983_v4 = vld [vmem:[%s17638_s29 + $0x3dc] sm:$0xf0] }
  0x12   :  { %v8013_v5 = vld [vmem:[%s17638_s29 + $0x5c0] sm:$0xf]  ;;  %v7758_v7 = vor.u32 %v10983_v4, %v7757_v2  ;;  %3180 = vmatpush.bf16.msra.mxu0 %v7502_v3 }
  0x13   :  { %v11047_v6 = vld [vmem:[%s17638_s29 + $0x5dc] sm:$0xf0] }
  0x14   :  { %v8014_v8 = vor.u32 %v11047_v6, %v8013_v5  ;;  %v8269_v9 = vld [vmem:[%s17638_s29 + $0x7c0] sm:$0xf]  ;;  %3193 = vmatpush.bf16.msra.mxu1 %v7758_v7 }
  0x15   :  { %v11111_v10 = vld [vmem:[%s17638_s29 + $0x7dc] sm:$0xf0] }
  0x16   :  { %v7469_v11 = vld [vmem:[%s17638_s29 + $0x180] sm:$0xf]  ;;  %v8270_v12 = vor.u32 %v11111_v10, %v8269_v9  ;;  %3206 = vmatpush.bf16.msra.mxu2 %v8014_v8 }
  0x17   :  { %v10911_v13 = vld [vmem:[%s17638_s29 + $0x19c] sm:$0xf0] }
  0x18   :  { %v7725_v14 = vld [vmem:[%s17638_s29 + $0x380] sm:$0xf]  ;;  %v7470_v16 = vor.u32 %v10911_v13, %v7469_v11  ;;  %3219 = vmatpush.bf16.msra.mxu3 %v8270_v12 }
  0x19   :  { %v10975_v15 = vld [vmem:[%s17638_s29 + $0x39c] sm:$0xf0] }
  0x1a   :  { %v7726_v17 = vor.u32 %v10975_v15, %v7725_v14  ;;  %v7981_v18 = vld [vmem:[%s17638_s29 + $0x580] sm:$0xf]  ;;  %3181 = vmatpush.bf16.msra.mxu0 %v7470_v16 }
  0x1b   :  { %v11039_v19 = vld [vmem:[%s17638_s29 + $0x59c] sm:$0xf0] }
  0x1c   :  { %v8237_v20 = vld [vmem:[%s17638_s29 + $0x780] sm:$0xf]  ;;  %v7982_v21 = vor.u32 %v11039_v19, %v7981_v18  ;;  %3194 = vmatpush.bf16.msra.mxu1 %v7726_v17 }
  0x1d   :  { %v11103_v22 = vld [vmem:[%s17638_s29 + $0x79c] sm:$0xf0] }
  0x1e   :  { %v7437_v23 = vld [vmem:[%s17638_s29 + $0x140] sm:$0xf]  ;;  %v8238_v25 = vor.u32 %v11103_v22, %v8237_v20  ;;  %3207 = vmatpush.bf16.msra.mxu2 %v7982_v21 }
  0x1f   :  { %v10903_v24 = vld [vmem:[%s17638_s29 + $0x15c] sm:$0xf0] }
  0x20   :  { %v7693_v26 = vld [vmem:[%s17638_s29 + $0x340] sm:$0xf]  ;;  %v7438_v29 = vor.u32 %v10903_v24, %v7437_v23  ;;  %3220 = vmatpush.bf16.msra.mxu3 %v8238_v25 }
  0x21   :  { %v10967_v27 = vld [vmem:[%s17638_s29 + $0x35c] sm:$0xf0] }
  0x22   :  { %v7949_v28 = vld [vmem:[%s17638_s29 + $0x540] sm:$0xf]  ;;  %v7694_v33 = vor.u32 %v10967_v27, %v7693_v26  ;;  %3182 = vmatpush.bf16.msra.mxu0 %v7438_v29 }
  0x23   :  { %v11031_v30 = vld [vmem:[%s17638_s29 + $0x55c] sm:$0xf0] }
  0x24   :  { %v8205_v31 = vld [vmem:[%s17638_s29 + $0x740] sm:$0xf]  ;;  %v7950_v34 = vor.u32 %v11031_v30, %v7949_v28  ;;  %3195 = vmatpush.bf16.msra.mxu1 %v7694_v33 }
  0x25   :  { %v11095_v32 = vld [vmem:[%s17638_s29 + $0x75c] sm:$0xf0] }
  0x26   :  { %v7405_v35 = vld [vmem:[%s17638_s29 + $0x100] sm:$0xf]  ;;  %v8206_v38 = vor.u32 %v11095_v32, %v8205_v31  ;;  %3208 = vmatpush.bf16.msra.mxu2 %v7950_v34 }
  0x27   :  { %v10895_v36 = vld [vmem:[%s17638_s29 + $0x11c] sm:$0xf0] }
  0x28   :  { %v7661_v37 = vld [vmem:[%s17638_s29 + $0x300] sm:$0xf]  ;;  %v7406_v44 = vor.u32 %v10895_v36, %v7405_v35  ;;  %3221 = vmatpush.bf16.msra.mxu3 %v8206_v38 }
  0x29   :  { %v10959_v39 = vld [vmem:[%s17638_s29 + $0x31c] sm:$0xf0] }
  0x2a   :  { %v7917_v40 = vld [vmem:[%s17638_s29 + $0x500] sm:$0xf]  ;;  %v7662_v45 = vor.u32 %v10959_v39, %v7661_v37  ;;  %3183 = vmatpush.bf16.msra.mxu0 %v7406_v44 }
  0x2b   :  { %v11023_v41 = vld [vmem:[%s17638_s29 + $0x51c] sm:$0xf0] }
  0x2c   :  { %v8173_v42 = vld [vmem:[%s17638_s29 + $0x700] sm:$0xf]  ;;  %v7918_v46 = vor.u32 %v11023_v41, %v7917_v40  ;;  %3196 = vmatpush.bf16.msra.mxu1 %v7662_v45 }
  0x2d   :  { %v11087_v43 = vld [vmem:[%s17638_s29 + $0x71c] sm:$0xf0] }
  0x2e   :  { %v7373_v47 = vld [vmem:[%s17638_s29 + $0xc0] sm:$0xf]  ;;  %v8174_v50 = vor.u32 %v11087_v43, %v8173_v42  ;;  %3209 = vmatpush.bf16.msra.mxu2 %v7918_v46 }
  0x2f   :  { %v10887_v48 = vld [vmem:[%s17638_s29 + $0xdc] sm:$0xf0] }
  0x30   :  { %v7629_v49 = vld [vmem:[%s17638_s29 + $0x2c0] sm:$0xf]  ;;  %v7374_v56 = vor.u32 %v10887_v48, %v7373_v47  ;;  %3222 = vmatpush.bf16.msra.mxu3 %v8174_v50 }
  0x31   :  { %v10951_v51 = vld [vmem:[%s17638_s29 + $0x2dc] sm:$0xf0] }
  0x32   :  { %v7885_v52 = vld [vmem:[%s17638_s29 + $0x4c0] sm:$0xf]  ;;  %v7630_v57 = vor.u32 %v10951_v51, %v7629_v49  ;;  %3184 = vmatpush.bf16.msra.mxu0 %v7374_v56 }
  0x33   :  { %v11015_v53 = vld [vmem:[%s17638_s29 + $0x4dc] sm:$0xf0] }
  0x34   :  { %v8141_v54 = vld [vmem:[%s17638_s29 + $0x6c0] sm:$0xf]  ;;  %v7886_v58 = vor.u32 %v11015_v53, %v7885_v52  ;;  %3197 = vmatpush.bf16.msra.mxu1 %v7630_v57 }
  0x35   :  { %v11079_v55 = vld [vmem:[%s17638_s29 + $0x6dc] sm:$0xf0] }
  0x36   :  { %v7341_v59 = vld [vmem:[%s17638_s29 + $0x80] sm:$0xf]  ;;  %v8142_v62 = vor.u32 %v11079_v55, %v8141_v54  ;;  %3210 = vmatpush.bf16.msra.mxu2 %v7886_v58 }
  0x37   :  { %v10879_v60 = vld [vmem:[%s17638_s29 + $0x9c] sm:$0xf0] }
  0x38   :  { %v7597_v61 = vld [vmem:[%s17638_s29 + $0x280] sm:$0xf]  ;;  %v7342_v4 = vor.u32 %v10879_v60, %v7341_v59  ;;  %3223 = vmatpush.bf16.msra.mxu3 %v8142_v62 }
  0x39   :  { %v10943_v63 = vld [vmem:[%s17638_s29 + $0x29c] sm:$0xf0] }
  0x3a   :  { %v7853_v0 = vld [vmem:[%s17638_s29 + $0x480] sm:$0xf]  ;;  %v7598_v5 = vor.u32 %v10943_v63, %v7597_v61  ;;  %3185 = vmatpush.bf16.msra.mxu0 %v7342_v4 }
  0x3b   :  { %v11007_v1 = vld [vmem:[%s17638_s29 + $0x49c] sm:$0xf0] }
  0x3c   :  { %v8109_v2 = vld [vmem:[%s17638_s29 + $0x680] sm:$0xf]  ;;  %v7854_v6 = vor.u32 %v11007_v1, %v7853_v0  ;;  %3198 = vmatpush.bf16.msra.mxu1 %v7598_v5 }
  0x3d   :  { %v11071_v3 = vld [vmem:[%s17638_s29 + $0x69c] sm:$0xf0] }
  0x3e   :  { %v7309_v7 = vld [vmem:[%s17638_s29 + $0x40] sm:$0xf]  ;;  %v8110_v10 = vor.u32 %v11071_v3, %v8109_v2  ;;  %3211 = vmatpush.bf16.msra.mxu2 %v7854_v6 }
  0x3f   :  { %v10871_v8 = vld [vmem:[%s17638_s29 + $0x5c] sm:$0xf0] }
  0x40   :  { %v7565_v9 = vld [vmem:[%s17638_s29 + $0x240] sm:$0xf]  ;;  %v7310_v16 = vor.u32 %v10871_v8, %v7309_v7  ;;  %3224 = vmatpush.bf16.msra.mxu3 %v8110_v10 }
  0x41   :  { %v10935_v11 = vld [vmem:[%s17638_s29 + $0x25c] sm:$0xf0] }
  0x42   :  { %v7821_v12 = vld [vmem:[%s17638_s29 + $0x440] sm:$0xf]  ;;  %v7566_v19 = vor.u32 %v10935_v11, %v7565_v9  ;;  %3186 = vmatpush.bf16.msra.mxu0 %v7310_v16 }
  0x43   :  { %v10999_v13 = vld [vmem:[%s17638_s29 + $0x45c] sm:$0xf0] }
  0x44   :  { %v8077_v14 = vld [vmem:[%s17638_s29 + $0x640] sm:$0xf]  ;;  %v7822_v20 = vor.u32 %v10999_v13, %v7821_v12  ;;  %3199 = vmatpush.bf16.msra.mxu1 %v7566_v19 }
  0x45   :  { %v11063_v15 = vld [vmem:[%s17638_s29 + $0x65c] sm:$0xf0] }
  0x46   :  { %v7277_v17 = vld [vmem:[%s17638_s29] sm:$0xf]  ;;  %v8078_v24 = vor.u32 %v11063_v15, %v8077_v14  ;;  %3212 = vmatpush.bf16.msra.mxu2 %v7822_v20 }
  0x47   :  { %v10863_v18 = vld [vmem:[%s17638_s29 + $0x1c] sm:$0xf0] }
  0x48   :  { %v7533_v21 = vld [vmem:[%s17638_s29 + $0x200] sm:$0xf]  ;;  %v7278_v31 = vor.u32 %v10863_v18, %v7277_v17  ;;  %3225 = vmatpush.bf16.msra.mxu3 %v8078_v24 }
  0x49   :  { %v10927_v22 = vld [vmem:[%s17638_s29 + $0x21c] sm:$0xf0] }
  0x4a   :  { %v7789_v23 = vld [vmem:[%s17638_s29 + $0x400] sm:$0xf]  ;;  %v7534_v35 = vor.u32 %v10927_v22, %v7533_v21  ;;  %3187 = vmatpush.bf16.msra.mxu0 %v7278_v31 }
  0x4b   :  { %v10991_v25 = vld [vmem:[%s17638_s29 + $0x41c] sm:$0xf0] }
  0x4c   :  { %v8045_v26 = vld [vmem:[%s17638_s29 + $0x600] sm:$0xf]  ;;  %v7790_v36 = vor.u32 %v10991_v25, %v7789_v23  ;;  %3200 = vmatpush.bf16.msra.mxu1 %v7534_v35 }
  0x4d   :  { %v11055_v27 = vld [vmem:[%s17638_s29 + $0x61c] sm:$0xf0] }
  0x4e   :  { %v8525_v28 = vld [vmem:[%s17638_s29 + $0x9c0] sm:$0xf]  ;;  %v8046_v39 = vor.u32 %v11055_v27, %v8045_v26  ;;  %3213 = vmatpush.bf16.msra.mxu2 %v7790_v36 }
  0x4f   :  { %v11175_v29 = vld [vmem:[%s17638_s29 + $0x9dc] sm:$0xf0] }
  0x50   :  { %v8781_v30 = vld [vmem:[%s17638_s29 + $0xbc0] sm:$0xf]  ;;  %v8526_v40 = vor.u32 %v11175_v29, %v8525_v28  ;;  %3226 = vmatpush.bf16.msra.mxu3 %v8046_v39 }
  0x51   :  { %v11239_v32 = vld [vmem:[%s17638_s29 + $0xbdc] sm:$0xf0] }
  0x52   :  { %v9037_v33 = vld [vmem:[%s17638_s29 + $0xdc0] sm:$0xf]  ;;  %v8782_v41 = vor.u32 %v11239_v32, %v8781_v30  ;;  %3232 = vmatpush.bf16.msrb.mxu0 %v8526_v40 }
  0x53   :  { %v11303_v34 = vld [vmem:[%s17638_s29 + $0xddc] sm:$0xf0] }
  0x54   :  { %v9293_v37 = vld [vmem:[%s17638_s29 + $0xfc0] sm:$0xf]  ;;  %v9038_v42 = vor.u32 %v11303_v34, %v9037_v33  ;;  %3245 = vmatpush.bf16.msrb.mxu1 %v8782_v41 }
  0x55   :  { %v11367_v38 = vld [vmem:[%s17638_s29 + $0xfdc] sm:$0xf0] }
  0x56   :  { %v8493_v43 = vld [vmem:[%s17638_s29 + $0x980] sm:$0xf]  ;;  %v9294_v46 = vor.u32 %v11367_v38, %v9293_v37  ;;  %3258 = vmatpush.bf16.msrb.mxu2 %v9038_v42 }
  0x57   :  { %v11167_v44 = vld [vmem:[%s17638_s29 + $0x99c] sm:$0xf0] }
  0x58   :  { %v8749_v45 = vld [vmem:[%s17638_s29 + $0xb80] sm:$0xf]  ;;  %v8494_v52 = vor.u32 %v11167_v44, %v8493_v43  ;;  %3271 = vmatpush.bf16.msrb.mxu3 %v9294_v46 }
  0x59   :  { %v11231_v47 = vld [vmem:[%s17638_s29 + $0xb9c] sm:$0xf0] }
  0x5a   :  { %v9005_v48 = vld [vmem:[%s17638_s29 + $0xd80] sm:$0xf]  ;;  %v8750_v55 = vor.u32 %v11231_v47, %v8749_v45  ;;  %3233 = vmatpush.bf16.msrb.mxu0 %v8494_v52 }
  0x5b   :  { %v11295_v49 = vld [vmem:[%s17638_s29 + $0xd9c] sm:$0xf0] }
  0x5c   :  { %v9261_v50 = vld [vmem:[%s17638_s29 + $0xf80] sm:$0xf]  ;;  %v9006_v56 = vor.u32 %v11295_v49, %v9005_v48  ;;  %3246 = vmatpush.bf16.msrb.mxu1 %v8750_v55 }
  0x5d   :  { %v11359_v51 = vld [vmem:[%s17638_s29 + $0xf9c] sm:$0xf0] }
  0x5e   :  { %v8461_v53 = vld [vmem:[%s17638_s29 + $0x940] sm:$0xf]  ;;  %v9262_v60 = vor.u32 %v11359_v51, %v9261_v50  ;;  %3259 = vmatpush.bf16.msrb.mxu2 %v9006_v56 }
  0x5f   :  { %v11159_v54 = vld [vmem:[%s17638_s29 + $0x95c] sm:$0xf0] }
  0x60   :  { %v8717_v57 = vld [vmem:[%s17638_s29 + $0xb40] sm:$0xf]  ;;  %v8462_v1 = vor.u32 %v11159_v54, %v8461_v53  ;;  %3272 = vmatpush.bf16.msrb.mxu3 %v9262_v60 }
  0x61   :  { %v11223_v58 = vld [vmem:[%s17638_s29 + $0xb5c] sm:$0xf0] }
  0x62   :  { %v71_v59 = vld [vmem:[%s17639_s30] sm:$0xff]  ;;  %v8718_v2 = vor.u32 %v11223_v58, %v8717_v57  ;;  %3234 = vmatpush.bf16.msrb.mxu0 %v8462_v1  ;;  %s17642_s30 = sld [smem:[#allocation6_spill]] }
  0x63   :  { %v8973_v61 = vld [vmem:[%s17638_s29 + $0xd40] sm:$0xf]  ;;  %603 = vst [vmem:[#allocation1] ss:$9 sm:$0xff] %v71_v59  ;;  %v10915_v1 = vld [vmem:[%s17638_s29 + $0x1c4] sm:$0xf] }
  0x64   :  { %v11287_v62 = vld [vmem:[%s17638_s29 + $0xd5c] sm:$0xf0]  ;;  %3247 = vmatpush.bf16.msrb.mxu1 %v8718_v2  ;;  %v7503_v2 = vld [vmem:[%s17638_s29 + $0x1e0] sm:$0xf0] }
  0x65   :  { %v9229_v63 = vld [vmem:[%s17638_s29 + $0xf40] sm:$0xf]  ;;  %v8974_v3 = vor.u32 %v11287_v62, %v8973_v61 }
  0x66   :  { %v11351_v0 = vld [vmem:[%s17638_s29 + $0xf5c] sm:$0xf0] }
  0x67   :  { %v8429_v4 = vld [vmem:[%s17638_s29 + $0x900] sm:$0xf]  ;;  %v9230_v7 = vor.u32 %v11351_v0, %v9229_v63  ;;  %3260 = vmatpush.bf16.msrb.mxu2 %v8974_v3  ;;  %v10979_v3 = vld [vmem:[%s17638_s29 + $0x3c4] sm:$0xf] }
  0x68   :  { %v11151_v5 = vld [vmem:[%s17638_s29 + $0x91c] sm:$0xf0] }
  0x69   :  { %v8685_v6 = vld [vmem:[%s17638_s29 + $0xb00] sm:$0xf]  ;;  %v8430_v14 = vor.u32 %v11151_v5, %v8429_v4  ;;  %3273 = vmatpush.bf16.msrb.mxu3 %v9230_v7  ;;  %v7759_v5 = vld [vmem:[%s17638_s29 + $0x3e0] sm:$0xf0] }
  0x6a   :  { %v11215_v8 = vld [vmem:[%s17638_s29 + $0xb1c] sm:$0xf0]  ;;  %v12211_v20 = vld [vmem:[#allocation1 + $0x12] sm:$0xff]  ;;  %v12224_v26 = vld [vmem:[#allocation1 + $0x9] sm:$0xff] }
  0x6b   :  { %v8941_v9 = vld [vmem:[%s17638_s29 + $0xd00] sm:$0xf]  ;;  %v8686_v18 = vor.u32 %v11215_v8, %v8685_v6  ;;  %3214 = vmatmul.bf16.vlgmr.msra.gmra.mxu2 %v12211_v20  ;;  %3235 = vmatpush.bf16.msrb.mxu0 %v8430_v14  ;;  %v11043_v6 = vld [vmem:[%s17638_s29 + $0x5c4] sm:$0xf]  ;;  %v7762_v14 = vor.u32 %v10979_v3, %v7759_v5 }
  0x6c   :  { %v11279_v10 = vld [vmem:[%s17638_s29 + $0xd1c] sm:$0xf0]  ;;  %3201 = vmatmul.bf16.vlgmr.msra.gmra.mxu1 %v12224_v26  ;;  %v8015_v7 = vld [vmem:[%s17638_s29 + $0x5e0] sm:$0xf0] }
  0x6d   :  { %v9197_v11 = vld [vmem:[%s17638_s29 + $0xf00] sm:$0xf]  ;;  %v8942_v19 = vor.u32 %v11279_v10, %v8941_v9  ;;  %3248 = vmatpush.bf16.msrb.mxu1 %v8686_v18  ;;  %v11107_v10 = vld [vmem:[%s17638_s29 + $0x7c4] sm:$0xf] }
  0x6e   :  { %v11343_v12 = vld [vmem:[%s17638_s29 + $0xf1c] sm:$0xf0]  ;;  %v10971_v18 = vld [vmem:[%s17638_s29 + $0x384] sm:$0xf] }
  0x6f   :  { %v8397_v13 = vld [vmem:[%s17638_s29 + $0x8c0] sm:$0xf]  ;;  %v9198_v23 = vor.u32 %v11343_v12, %v9197_v11  ;;  %3261 = vmatpush.bf16.msrb.mxu2 %v8942_v19  ;;  %v8271_v11 = vld [vmem:[%s17638_s29 + $0x7e0] sm:$0xf0] }
  0x70   :  { %v11143_v15 = vld [vmem:[%s17638_s29 + $0x8dc] sm:$0xf0]  ;;  %v8274_v19 = vor.u32 %v11107_v10, %v8271_v11  ;;  %v11075_v3 = vld [vmem:[%s17638_s29 + $0x6c4] sm:$0xf] }
  0x71   :  { %v8653_v16 = vld [vmem:[%s17638_s29 + $0xac0] sm:$0xf]  ;;  %v8398_v29 = vor.u32 %v11143_v15, %v8397_v13  ;;  %3274 = vmatpush.bf16.msrb.mxu3 %v9198_v23  ;;  %v7506_v13 = vor.u32 %v10915_v1, %v7503_v2  ;;  %v8018_v15 = vor.u32 %v11043_v6, %v8015_v7  ;;  %v7727_v23 = vld [vmem:[%s17638_s29 + $0x3a0] sm:$0xf0] }
  0x72   :  { %v11207_v17 = vld [vmem:[%s17638_s29 + $0xadc] sm:$0xf0]  ;;  %v11011_v1 = vld [vmem:[%s17638_s29 + $0x4c4] sm:$0xf] }
  0x73   :  { %v12213_v21 = vld [vmem:[#allocation1] sm:$0xff]  ;;  %v8654_v30 = vor.u32 %v11207_v17, %v8653_v16  ;;  %3236 = vmatpush.bf16.msrb.mxu0 %v8398_v29  ;;  %v12355_v29 = vld [vmem:[#allocation1 + $0x36] sm:$0xff] }
  0x74   :  { %v12215_v22 = vld [vmem:[#allocation1 + $0x1b] sm:$0xff]  ;;  %3188 = vmatmul.bf16.vlgmr.msra.gmra.mxu0 %v12213_v21  ;;  %v10907_v16 = vld [vmem:[%s17638_s29 + $0x184] sm:$0xf] }
  0x75   :  { %v8909_v24 = vld [vmem:[%s17638_s29 + $0xcc0] sm:$0xf]  ;;  %3227 = vmatmul.bf16.vlgmr.msra.gmra.mxu3 %v12215_v22  ;;  %3249 = vmatpush.bf16.msrb.mxu1 %v8654_v30  ;;  %v7471_v17 = vld [vmem:[%s17638_s29 + $0x1a0] sm:$0xf0] }
  0x76   :  { %v11271_v25 = vld [vmem:[%s17638_s29 + $0xcdc] sm:$0xf0]  ;;  %v7474_v30 = vor.u32 %v10907_v16, %v7471_v17  ;;  %v7887_v2 = vld [vmem:[%s17638_s29 + $0x4e0] sm:$0xf0] }
  0x77   :  { %v9165_v27 = vld [vmem:[%s17638_s29 + $0xec0] sm:$0xf]  ;;  %v8910_v31 = vor.u32 %v11271_v25, %v8909_v24  ;;  %v11035_v24 = vld [vmem:[%s17638_s29 + $0x584] sm:$0xf]  ;;  %v7890_v7 = vor.u32 %v11011_v1, %v7887_v2 }
  0x78   :  { %v11335_v28 = vld [vmem:[%s17638_s29 + $0xedc] sm:$0xf0]  ;;  %v7983_v25 = vld [vmem:[%s17638_s29 + $0x5a0] sm:$0xf0] }
  0x79   :  { %v8365_v32 = vld [vmem:[%s17638_s29 + $0x880] sm:$0xf]  ;;  %v9166_v35 = vor.u32 %v11335_v28, %v9165_v27  ;;  %3262 = vmatpush.bf16.msrb.mxu2 %v8910_v31  ;;  %v11099_v27 = vld [vmem:[%s17638_s29 + $0x784] sm:$0xf] }
  0x7a   :  { %v11135_v33 = vld [vmem:[%s17638_s29 + $0x89c] sm:$0xf0]  ;;  %v8239_v28 = vld [vmem:[%s17638_s29 + $0x7a0] sm:$0xf0] }
  0x7b   :  { %v8621_v34 = vld [vmem:[%s17638_s29 + $0xa80] sm:$0xf]  ;;  %v8366_v41 = vor.u32 %v11135_v33, %v8365_v32  ;;  %3275 = vmatpush.bf16.msrb.mxu3 %v9166_v35  ;;  %v12357_v31 = vld [vmem:[#allocation1 + $0x24] sm:$0xff]  ;;  %v7986_v35 = vor.u32 %v11035_v24, %v7983_v25 }
  0x7c   :  { %v11199_v36 = vld [vmem:[%s17638_s29 + $0xa9c] sm:$0xf0]  ;;  %v10899_v33 = vld [vmem:[%s17638_s29 + $0x144] sm:$0xf] }
  0x7d   :  { %v8877_v37 = vld [vmem:[%s17638_s29 + $0xc80] sm:$0xf]  ;;  %v8622_v42 = vor.u32 %v11199_v36, %v8621_v34  ;;  %3237 = vmatpush.bf16.msrb.mxu0 %v8366_v41  ;;  %v7730_v34 = vor.u32 %v10971_v18, %v7727_v23  ;;  %v7439_v36 = vld [vmem:[%s17638_s29 + $0x160] sm:$0xf0] }
  0x7e   :  { %v11263_v38 = vld [vmem:[%s17638_s29 + $0xc9c] sm:$0xf0]  ;;  %v11027_v41 = vld [vmem:[%s17638_s29 + $0x544] sm:$0xf] }
  0x7f   :  { %v9133_v39 = vld [vmem:[%s17638_s29 + $0xe80] sm:$0xf]  ;;  %v8878_v43 = vor.u32 %v11263_v38, %v8877_v37  ;;  %3250 = vmatpush.bf16.msrb.mxu1 %v8622_v42  ;;  %v10963_v37 = vld [vmem:[%s17638_s29 + $0x344] sm:$0xf]  ;;  %v12370_v38 = vld [vmem:[#allocation1 + $0x2d] sm:$0xff] }
  0x80   :  { %v11327_v40 = vld [vmem:[%s17638_s29 + $0xe9c] sm:$0xf0]  ;;  %v7951_v42 = vld [vmem:[%s17638_s29 + $0x560] sm:$0xf0] }
  0x81   :  { %v8333_v44 = vld [vmem:[%s17638_s29 + $0x840] sm:$0xf]  ;;  %v9134_v47 = vor.u32 %v11327_v40, %v9133_v39  ;;  %3263 = vmatpush.bf16.msrb.mxu2 %v8878_v43  ;;  %v8242_v39 = vor.u32 %v11099_v27, %v8239_v28  ;;  %v7695_v40 = vld [vmem:[%s17638_s29 + $0x360] sm:$0xf0] }
  0x82   :  { %v11127_v45 = vld [vmem:[%s17638_s29 + $0x85c] sm:$0xf0]  ;;  %v11091_v43 = vld [vmem:[%s17638_s29 + $0x744] sm:$0xf] }
  0x83   :  { %v8589_v46 = vld [vmem:[%s17638_s29 + $0xa40] sm:$0xf]  ;;  %v8334_v53 = vor.u32 %v11127_v45, %v8333_v44  ;;  %3276 = vmatpush.bf16.msrb.mxu3 %v9134_v47  ;;  %v8207_v44 = vld [vmem:[%s17638_s29 + $0x760] sm:$0xf0]  ;;  %v7442_v45 = vor.u32 %v10899_v33, %v7439_v36  ;;  %v7954_v47 = vor.u32 %v11027_v41, %v7951_v42 }
  0x84   :  { %v11191_v48 = vld [vmem:[%s17638_s29 + $0xa5c] sm:$0xf0]  ;;  %v10939_v10 = vld [vmem:[%s17638_s29 + $0x284] sm:$0xf] }
  0x85   :  { %v8845_v49 = vld [vmem:[%s17638_s29 + $0xc40] sm:$0xf]  ;;  %v8590_v56 = vor.u32 %v11191_v48, %v8589_v46  ;;  %3238 = vmatpush.bf16.msrb.mxu0 %v8334_v53  ;;  %v7698_v46 = vor.u32 %v10963_v37, %v7695_v40  ;;  %v10891_v48 = vld [vmem:[%s17638_s29 + $0x104] sm:$0xf] }
  0x86   :  { %v11255_v50 = vld [vmem:[%s17638_s29 + $0xc5c] sm:$0xf0]  ;;  %v11019_v53 = vld [vmem:[%s17638_s29 + $0x504] sm:$0xf] }
  0x87   :  { %v9101_v51 = vld [vmem:[%s17638_s29 + $0xe40] sm:$0xf]  ;;  %v8846_v57 = vor.u32 %v11255_v50, %v8845_v49  ;;  %3251 = vmatpush.bf16.msrb.mxu1 %v8590_v56  ;;  %v7407_v49 = vld [vmem:[%s17638_s29 + $0x120] sm:$0xf0] }
  0x88   :  { %v11319_v52 = vld [vmem:[%s17638_s29 + $0xe5c] sm:$0xf0]  ;;  %v10955_v50 = vld [vmem:[%s17638_s29 + $0x304] sm:$0xf] }
  0x89   :  { %v8301_v54 = vld [vmem:[%s17638_s29 + $0x800] sm:$0xf]  ;;  %v9102_v61 = vor.u32 %v11319_v52, %v9101_v51  ;;  %3264 = vmatpush.bf16.msrb.mxu2 %v8846_v57  ;;  %v8210_v51 = vor.u32 %v11091_v43, %v8207_v44  ;;  %v7663_v52 = vld [vmem:[%s17638_s29 + $0x320] sm:$0xf0]  ;;  %v7410_v57 = vor.u32 %v10891_v48, %v7407_v49 }
  0x8a   :  { %v11119_v55 = vld [vmem:[%s17638_s29 + $0x81c] sm:$0xf0]  ;;  %v8175_v56 = vld [vmem:[%s17638_s29 + $0x720] sm:$0xf0] }
  0x8b   :  { %v8557_v58 = vld [vmem:[%s17638_s29 + $0xa00] sm:$0xf]  ;;  %v8302_v4 = vor.u32 %v11119_v55, %v8301_v54  ;;  %3277 = vmatpush.bf16.msrb.mxu3 %v9102_v61  ;;  %v7919_v54 = vld [vmem:[%s17638_s29 + $0x520] sm:$0xf0] }
  0x8c   :  { %v11183_v59 = vld [vmem:[%s17638_s29 + $0xa1c] sm:$0xf0]  ;;  %v11083_v55 = vld [vmem:[%s17638_s29 + $0x704] sm:$0xf] }
  0x8d   :  { %v8813_v60 = vld [vmem:[%s17638_s29 + $0xc00] sm:$0xf]  ;;  %v8558_v8 = vor.u32 %v11183_v59, %v8557_v58  ;;  %3239 = vmatpush.bf16.msrb.mxu0 %v8302_v4  ;;  %v7666_v58 = vor.u32 %v10955_v50, %v7663_v52  ;;  %v7922_v59 = vor.u32 %v11019_v53, %v7919_v54  ;;  %v7375_v61 = vld [vmem:[%s17638_s29 + $0xe0] sm:$0xf0] }
  0x8e   :  { %v11247_v62 = vld [vmem:[%s17638_s29 + $0xc1c] sm:$0xf0]  ;;  %v8143_v4 = vld [vmem:[%s17638_s29 + $0x6e0] sm:$0xf0] }
  0x8f   :  { %v9069_v63 = vld [vmem:[%s17638_s29 + $0xe00] sm:$0xf]  ;;  %v8814_v9 = vor.u32 %v11247_v62, %v8813_v60  ;;  %3252 = vmatpush.bf16.msrb.mxu1 %v8558_v8  ;;  %v10883_v60 = vld [vmem:[%s17638_s29 + $0xc4] sm:$0xf]  ;;  %v8146_v11 = vor.u32 %v11075_v3, %v8143_v4 }
  0x90   :  { %v11311_v0 = vld [vmem:[%s17638_s29 + $0xe1c] sm:$0xf0]  ;;  %3240 = vmatmul.bf16.vlgmr.msrb.gmra.mxu0 %v12357_v31  ;;  %v10947_v62 = vld [vmem:[%s17638_s29 + $0x2c4] sm:$0xf]  ;;  %v7378_v5 = vor.u32 %v10883_v60, %v7375_v61 }
  0x91   :  { %v9070_v12 = vor.u32 %v11311_v0, %v9069_v63  ;;  %3265 = vmatpush.bf16.msrb.mxu2 %v8814_v9  ;;  %3284 = vmatpush.bf16.msra.mxu0 %v7506_v13  ;;  %v12359_v32 = vld [vmem:[#allocation1 + $0x3f] sm:$0xff]  ;;  %v8178_v63 = vor.u32 %v11083_v55, %v8175_v56 }
  0x92   :  { %3253 = vmatmul.bf16.vlgmr.msrb.gmra.mxu1 %v12370_v38  ;;  %v7631_v0 = vld [vmem:[%s17638_s29 + $0x2e0] sm:$0xf0] }
  0x93   :  { %3278 = vmatpush.bf16.msrb.mxu3 %v9070_v12  ;;  %3297 = vmatpush.bf16.msra.mxu1 %v7762_v14  ;;  %v7634_v6 = vor.u32 %v10947_v62, %v7631_v0  ;;  %v10875_v8 = vld [vmem:[%s17638_s29 + $0x84] sm:$0xf] }
  0x94   :  { %3266 = vmatmul.bf16.vlgmr.msrb.gmra.mxu2 %v12355_v29  ;;  %v7343_v9 = vld [vmem:[%s17638_s29 + $0xa0] sm:$0xf0] }
  0x95   :  { %3310 = vmatpush.bf16.msra.mxu2 %v8018_v15  ;;  %3285 = vmatpush.bf16.msra.mxu0 %v7474_v30  ;;  %v7599_v12 = vld [vmem:[%s17638_s29 + $0x2a0] sm:$0xf0]  ;;  %v7346_v17 = vor.u32 %v10875_v8, %v7343_v9 }
  0x96   :  { %3279 = vmatmul.bf16.vlgmr.msrb.gmra.mxu3 %v12359_v32  ;;  %v11003_v13 = vld [vmem:[%s17638_s29 + $0x484] sm:$0xf]  ;;  %v7602_v18 = vor.u32 %v10939_v10, %v7599_v12 }
  0x97   :  { %3323 = vmatpush.bf16.msra.mxu3 %v8274_v19  ;;  %3298 = vmatpush.bf16.msra.mxu1 %v7730_v34  ;;  %v7855_v14 = vld [vmem:[%s17638_s29 + $0x4a0] sm:$0xf0] }
  0x98   :  { %v11067_v15 = vld [vmem:[%s17638_s29 + $0x684] sm:$0xf]  ;;  %v7858_v19 = vor.u32 %v11003_v13, %v7855_v14 }
  0x99   :  { %3311 = vmatpush.bf16.msra.mxu2 %v7986_v35  ;;  %3286 = vmatpush.bf16.msra.mxu0 %v7442_v45  ;;  %v8111_v16 = vld [vmem:[%s17638_s29 + $0x6a0] sm:$0xf0] }
  0x9a   :  { %v10867_v23 = vld [vmem:[%s17638_s29 + $0x44] sm:$0xf]  ;;  %v8114_v27 = vor.u32 %v11067_v15, %v8111_v16 }
  0x9b   :  { %3324 = vmatpush.bf16.msra.mxu3 %v8242_v39  ;;  %3299 = vmatpush.bf16.msra.mxu1 %v7698_v46  ;;  %v7311_v24 = vld [vmem:[%s17638_s29 + $0x60] sm:$0xf0] }
  0x9c   :  { %v10931_v25 = vld [vmem:[%s17638_s29 + $0x244] sm:$0xf]  ;;  %v7314_v36 = vor.u32 %v10867_v23, %v7311_v24 }
  0x9d   :  { %3312 = vmatpush.bf16.msra.mxu2 %v7954_v47  ;;  %3287 = vmatpush.bf16.msra.mxu0 %v7410_v57  ;;  %v7567_v28 = vld [vmem:[%s17638_s29 + $0x260] sm:$0xf0] }
  0x9e   :  { %v10995_v30 = vld [vmem:[%s17638_s29 + $0x444] sm:$0xf]  ;;  %v7570_v40 = vor.u32 %v10931_v25, %v7567_v28 }
  0x9f   :  { %3325 = vmatpush.bf16.msra.mxu3 %v8210_v51  ;;  %3300 = vmatpush.bf16.msra.mxu1 %v7666_v58  ;;  %v7823_v33 = vld [vmem:[%s17638_s29 + $0x460] sm:$0xf0] }
  0xa0   :  { %v11059_v34 = vld [vmem:[%s17638_s29 + $0x644] sm:$0xf]  ;;  %v7826_v41 = vor.u32 %v10995_v30, %v7823_v33 }
  0xa1   :  { %3313 = vmatpush.bf16.msra.mxu2 %v7922_v59  ;;  %3288 = vmatpush.bf16.msra.mxu0 %v7378_v5  ;;  %v8079_v35 = vld [vmem:[%s17638_s29 + $0x660] sm:$0xf0] }
  0xa2   :  { %v10859_v37 = vld [vmem:[%s17638_s29 + $0x4] sm:$0xf]  ;;  %v8082_v45 = vor.u32 %v11059_v34, %v8079_v35 }
  0xa3   :  { %3326 = vmatpush.bf16.msra.mxu3 %v8178_v63  ;;  %3301 = vmatpush.bf16.msra.mxu1 %v7634_v6  ;;  %v7279_v39 = vld [vmem:[%s17638_s29 + $0x20] sm:$0xf0] }
  0xa4   :  { %v10923_v42 = vld [vmem:[%s17638_s29 + $0x204] sm:$0xf]  ;;  %v7282_v52 = vor.u32 %v10859_v37, %v7279_v39 }
  0xa5   :  { %3314 = vmatpush.bf16.msra.mxu2 %v7890_v7  ;;  %3289 = vmatpush.bf16.msra.mxu0 %v7346_v17  ;;  %v7535_v43 = vld [vmem:[%s17638_s29 + $0x220] sm:$0xf0] }
  0xa6   :  { %v10987_v44 = vld [vmem:[%s17638_s29 + $0x404] sm:$0xf]  ;;  %v7538_v56 = vor.u32 %v10923_v42, %v7535_v43 }
  0xa7   :  { %3327 = vmatpush.bf16.msra.mxu3 %v8146_v11  ;;  %3302 = vmatpush.bf16.msra.mxu1 %v7602_v18  ;;  %v7791_v46 = vld [vmem:[%s17638_s29 + $0x420] sm:$0xf0] }
  0xa8   :  { %v11051_v47 = vld [vmem:[%s17638_s29 + $0x604] sm:$0xf]  ;;  %v7794_v57 = vor.u32 %v10987_v44, %v7791_v46 }
  0xa9   :  { %3315 = vmatpush.bf16.msra.mxu2 %v7858_v19  ;;  %v8047_v48 = vld [vmem:[%s17638_s29 + $0x620] sm:$0xf0]  ;;  %3290 = vmatpush.bf16.msra.mxu0 %v7314_v36 }
  0xaa   :  { %v11171_v49 = vld [vmem:[%s17638_s29 + $0x9c4] sm:$0xf]  ;;  %v8050_v60 = vor.u32 %v11051_v47, %v8047_v48 }
  0xab   :  { %3328 = vmatpush.bf16.msra.mxu3 %v8114_v27  ;;  %v8527_v50 = vld [vmem:[%s17638_s29 + $0x9e0] sm:$0xf0]  ;;  %3303 = vmatpush.bf16.msra.mxu1 %v7570_v40 }
  0xac   :  { %v11235_v51 = vld [vmem:[%s17638_s29 + $0xbc4] sm:$0xf]  ;;  %v8530_v61 = vor.u32 %v11171_v49, %v8527_v50 }
  0xad   :  { %v8783_v53 = vld [vmem:[%s17638_s29 + $0xbe0] sm:$0xf0]  ;;  %3316 = vmatpush.bf16.msra.mxu2 %v7826_v41  ;;  %3291 = vmatpush.bf16.msra.mxu0 %v7282_v52 }
  0xae   :  { %v11299_v54 = vld [vmem:[%s17638_s29 + $0xdc4] sm:$0xf]  ;;  %v8786_v62 = vor.u32 %v11235_v51, %v8783_v53 }
  0xaf   :  { %v9039_v55 = vld [vmem:[%s17638_s29 + $0xde0] sm:$0xf0]  ;;  %3329 = vmatpush.bf16.msra.mxu3 %v8082_v45  ;;  %3304 = vmatpush.bf16.msra.mxu1 %v7538_v56 }
  0xb0   :  { %v11363_v58 = vld [vmem:[%s17638_s29 + $0xfc4] sm:$0xf]  ;;  %v9042_v63 = vor.u32 %v11299_v54, %v9039_v55  ;;  %3292 = vmatmul.bf16.vlgmr.msra.gmra.mxu0 %v12213_v21 }
  0xb1   :  { %v9295_v59 = vld [vmem:[%s17638_s29 + $0xfe0] sm:$0xf0]  ;;  %3317 = vmatpush.bf16.msra.mxu2 %v7794_v57  ;;  %3336 = vmatpush.bf16.msrb.mxu0 %v8530_v61 }
  0xb2   :  { %v11163_v0 = vld [vmem:[%s17638_s29 + $0x984] sm:$0xf]  ;;  %v9298_v3 = vor.u32 %v11363_v58, %v9295_v59  ;;  %3305 = vmatmul.bf16.vlgmr.msra.gmra.mxu1 %v12224_v26 }
  0xb3   :  { %v8495_v1 = vld [vmem:[%s17638_s29 + $0x9a0] sm:$0xf0]  ;;  %3330 = vmatpush.bf16.msra.mxu3 %v8050_v60  ;;  %3349 = vmatpush.bf16.msrb.mxu1 %v8786_v62 }
  0xb4   :  { %v11227_v2 = vld [vmem:[%s17638_s29 + $0xb84] sm:$0xf]  ;;  %v8498_v9 = vor.u32 %v11163_v0, %v8495_v1  ;;  %3318 = vmatmul.bf16.vlgmr.msra.gmra.mxu2 %v12211_v20 }
  0xb5   :  { %v8751_v4 = vld [vmem:[%s17638_s29 + $0xba0] sm:$0xf0]  ;;  %3362 = vmatpush.bf16.msrb.mxu2 %v9042_v63 }
  0xb6   :  { %v11291_v5 = vld [vmem:[%s17638_s29 + $0xd84] sm:$0xf]  ;;  %v8754_v10 = vor.u32 %v11227_v2, %v8751_v4  ;;  %3331 = vmatmul.bf16.vlgmr.msra.gmra.mxu3 %v12215_v22  ;;  %3337 = vmatpush.bf16.msrb.mxu0 %v8498_v9 }
  0xb7   :  { %v9007_v6 = vld [vmem:[%s17638_s29 + $0xda0] sm:$0xf0]  ;;  %3375 = vmatpush.bf16.msrb.mxu3 %v9298_v3 }
  0xb8   :  { %v11355_v7 = vld [vmem:[%s17638_s29 + $0xf84] sm:$0xf]  ;;  %v9010_v11 = vor.u32 %v11291_v5, %v9007_v6  ;;  %3350 = vmatpush.bf16.msrb.mxu1 %v8754_v10 }
  0xb9   :  { %v9263_v8 = vld [vmem:[%s17638_s29 + $0xfa0] sm:$0xf0] }
  0xba   :  { %v11155_v12 = vld [vmem:[%s17638_s29 + $0x944] sm:$0xf]  ;;  %v9266_v15 = vor.u32 %v11355_v7, %v9263_v8  ;;  %3363 = vmatpush.bf16.msrb.mxu2 %v9010_v11 }
  0xbb   :  { %v8463_v13 = vld [vmem:[%s17638_s29 + $0x960] sm:$0xf0] }
  0xbc   :  { %v11219_v14 = vld [vmem:[%s17638_s29 + $0xb44] sm:$0xf]  ;;  %v8466_v24 = vor.u32 %v11155_v12, %v8463_v13  ;;  %3376 = vmatpush.bf16.msrb.mxu3 %v9266_v15 }
  0xbd   :  { %v8719_v16 = vld [vmem:[%s17638_s29 + $0xb60] sm:$0xf0] }
  0xbe   :  { %v11283_v17 = vld [vmem:[%s17638_s29 + $0xd44] sm:$0xf]  ;;  %v8722_v25 = vor.u32 %v11219_v14, %v8719_v16  ;;  %3338 = vmatpush.bf16.msrb.mxu0 %v8466_v24 }
  0xbf   :  { %v8975_v18 = vld [vmem:[%s17638_s29 + $0xd60] sm:$0xf0] }
  0xc0   :  { %v11347_v19 = vld [vmem:[%s17638_s29 + $0xf44] sm:$0xf]  ;;  %v8978_v27 = vor.u32 %v11283_v17, %v8975_v18  ;;  %3351 = vmatpush.bf16.msrb.mxu1 %v8722_v25 }
  0xc1   :  { %v9231_v23 = vld [vmem:[%s17638_s29 + $0xf60] sm:$0xf0] }
  0xc2   :  { %v11147_v28 = vld [vmem:[%s17638_s29 + $0x904] sm:$0xf]  ;;  %v9234_v34 = vor.u32 %v11347_v19, %v9231_v23  ;;  %3364 = vmatpush.bf16.msrb.mxu2 %v8978_v27 }
  0xc3   :  { %v8431_v30 = vld [vmem:[%s17638_s29 + $0x920] sm:$0xf0] }
  0xc4   :  { %v11211_v33 = vld [vmem:[%s17638_s29 + $0xb04] sm:$0xf]  ;;  %v8434_v41 = vor.u32 %v11147_v28, %v8431_v30  ;;  %3377 = vmatpush.bf16.msrb.mxu3 %v9234_v34  ;;  %v7509_v30 = vld [vmem:[%s17638_s29 + $0x1c8] sm:$0xf] }
  0xc5   :  { %v8687_v35 = vld [vmem:[%s17638_s29 + $0xb20] sm:$0xf0]  ;;  %v7765_v34 = vld [vmem:[%s17638_s29 + $0x3c8] sm:$0xf] }
  0xc6   :  { %v11275_v36 = vld [vmem:[%s17638_s29 + $0xd04] sm:$0xf]  ;;  %v8690_v42 = vor.u32 %v11211_v33, %v8687_v35  ;;  %3339 = vmatpush.bf16.msrb.mxu0 %v8434_v41  ;;  %v10920_v33 = vld [vmem:[%s17638_s29 + $0x1e4] sm:$0xf0] }
  0xc7   :  { %v8943_v37 = vld [vmem:[%s17638_s29 + $0xd20] sm:$0xf0] }
  0xc8   :  { %v11339_v39 = vld [vmem:[%s17638_s29 + $0xf04] sm:$0xf]  ;;  %v8946_v43 = vor.u32 %v11275_v36, %v8943_v37  ;;  %3352 = vmatpush.bf16.msrb.mxu1 %v8690_v42  ;;  %v10984_v36 = vld [vmem:[%s17638_s29 + $0x3e4] sm:$0xf0] }
  0xc9   :  { %v9199_v40 = vld [vmem:[%s17638_s29 + $0xf20] sm:$0xf0]  ;;  %v8021_v37 = vld [vmem:[%s17638_s29 + $0x5c8] sm:$0xf] }
  0xca   :  { %v11139_v44 = vld [vmem:[%s17638_s29 + $0x8c4] sm:$0xf]  ;;  %v9202_v47 = vor.u32 %v11339_v39, %v9199_v40  ;;  %3365 = vmatpush.bf16.msrb.mxu2 %v8946_v43  ;;  %v11048_v39 = vld [vmem:[%s17638_s29 + $0x5e4] sm:$0xf0] }
  0xcb   :  { %v8399_v45 = vld [vmem:[%s17638_s29 + $0x8e0] sm:$0xf0]  ;;  %v8277_v42 = vld [vmem:[%s17638_s29 + $0x7c8] sm:$0xf] }
  0xcc   :  { %v11203_v46 = vld [vmem:[%s17638_s29 + $0xac4] sm:$0xf]  ;;  %v8402_v53 = vor.u32 %v11139_v44, %v8399_v45  ;;  %3378 = vmatpush.bf16.msrb.mxu3 %v9202_v47  ;;  %v11112_v43 = vld [vmem:[%s17638_s29 + $0x7e4] sm:$0xf0]  ;;  %v7510_v45 = vor.u32 %v10920_v33, %v7509_v30  ;;  %v8022_v47 = vor.u32 %v11048_v39, %v8021_v37 }
  0xcd   :  { %v8655_v48 = vld [vmem:[%s17638_s29 + $0xae0] sm:$0xf0]  ;;  %v7605_v37 = vld [vmem:[%s17638_s29 + $0x288] sm:$0xf] }
  0xce   :  { %v11267_v49 = vld [vmem:[%s17638_s29 + $0xcc4] sm:$0xf]  ;;  %v8658_v54 = vor.u32 %v11203_v46, %v8655_v48  ;;  %3340 = vmatpush.bf16.msrb.mxu0 %v8402_v53  ;;  %v7766_v46 = vor.u32 %v10984_v36, %v7765_v34  ;;  %v7477_v48 = vld [vmem:[%s17638_s29 + $0x188] sm:$0xf] }
  0xcf   :  { %v8911_v50 = vld [vmem:[%s17638_s29 + $0xce0] sm:$0xf0]  ;;  %v7989_v53 = vld [vmem:[%s17638_s29 + $0x588] sm:$0xf] }
  0xd0   :  { %v11331_v51 = vld [vmem:[%s17638_s29 + $0xec4] sm:$0xf]  ;;  %v8914_v55 = vor.u32 %v11267_v49, %v8911_v50  ;;  %3353 = vmatpush.bf16.msrb.mxu1 %v8658_v54  ;;  %v10912_v49 = vld [vmem:[%s17638_s29 + $0x1a4] sm:$0xf0] }
  0xd1   :  { %v9167_v52 = vld [vmem:[%s17638_s29 + $0xee0] sm:$0xf0]  ;;  %v7733_v50 = vld [vmem:[%s17638_s29 + $0x388] sm:$0xf] }
  0xd2   :  { %v11131_v56 = vld [vmem:[%s17638_s29 + $0x884] sm:$0xf]  ;;  %v9170_v59 = vor.u32 %v11331_v51, %v9167_v52  ;;  %3366 = vmatpush.bf16.msrb.mxu2 %v8914_v55  ;;  %v8278_v51 = vor.u32 %v11112_v43, %v8277_v42  ;;  %v10976_v52 = vld [vmem:[%s17638_s29 + $0x3a4] sm:$0xf0] }
  0xd3   :  { %v8367_v57 = vld [vmem:[%s17638_s29 + $0x8a0] sm:$0xf0]  ;;  %v11040_v54 = vld [vmem:[%s17638_s29 + $0x5a4] sm:$0xf0] }
  0xd4   :  { %v11195_v58 = vld [vmem:[%s17638_s29 + $0xa84] sm:$0xf]  ;;  %v8370_v1 = vor.u32 %v11131_v56, %v8367_v57  ;;  %3379 = vmatpush.bf16.msrb.mxu3 %v9170_v59  ;;  %v8245_v55 = vld [vmem:[%s17638_s29 + $0x788] sm:$0xf]  ;;  %v7478_v57 = vor.u32 %v10912_v49, %v7477_v48  ;;  %v7990_v59 = vor.u32 %v11040_v54, %v7989_v53 }
  0xd5   :  { %v8623_v60 = vld [vmem:[%s17638_s29 + $0xaa0] sm:$0xf0]  ;;  %v11104_v56 = vld [vmem:[%s17638_s29 + $0x7a4] sm:$0xf0] }
  0xd6   :  { %v11259_v61 = vld [vmem:[%s17638_s29 + $0xc84] sm:$0xf]  ;;  %v8626_v2 = vor.u32 %v11195_v58, %v8623_v60  ;;  %3341 = vmatpush.bf16.msrb.mxu0 %v8370_v1  ;;  %v7734_v58 = vor.u32 %v10976_v52, %v7733_v50  ;;  %v7445_v60 = vld [vmem:[%s17638_s29 + $0x148] sm:$0xf] }
  0xd7   :  { %v8879_v62 = vld [vmem:[%s17638_s29 + $0xca0] sm:$0xf0]  ;;  %v7957_v1 = vld [vmem:[%s17638_s29 + $0x548] sm:$0xf] }
  0xd8   :  { %v11323_v63 = vld [vmem:[%s17638_s29 + $0xe84] sm:$0xf]  ;;  %v8882_v3 = vor.u32 %v11259_v61, %v8879_v62  ;;  %3354 = vmatpush.bf16.msrb.mxu1 %v8626_v2  ;;  %v10904_v61 = vld [vmem:[%s17638_s29 + $0x164] sm:$0xf0] }
  0xd9   :  { %v9135_v0 = vld [vmem:[%s17638_s29 + $0xea0] sm:$0xf0]  ;;  %v7701_v62 = vld [vmem:[%s17638_s29 + $0x348] sm:$0xf] }
  0xda   :  { %v11123_v4 = vld [vmem:[%s17638_s29 + $0x844] sm:$0xf]  ;;  %v9138_v7 = vor.u32 %v11323_v63, %v9135_v0  ;;  %3367 = vmatpush.bf16.msrb.mxu2 %v8882_v3  ;;  %v8246_v63 = vor.u32 %v11104_v56, %v8245_v55  ;;  %v10968_v0 = vld [vmem:[%s17638_s29 + $0x364] sm:$0xf0] }
  0xdb   :  { %v8335_v5 = vld [vmem:[%s17638_s29 + $0x860] sm:$0xf0]  ;;  %v11032_v2 = vld [vmem:[%s17638_s29 + $0x564] sm:$0xf0] }
  0xdc   :  { %v11187_v6 = vld [vmem:[%s17638_s29 + $0xa44] sm:$0xf]  ;;  %v8338_v13 = vor.u32 %v11123_v4, %v8335_v5  ;;  %3380 = vmatpush.bf16.msrb.mxu3 %v9138_v7  ;;  %v11096_v3 = vld [vmem:[%s17638_s29 + $0x764] sm:$0xf0]  ;;  %v7446_v4 = vor.u32 %v10904_v61, %v7445_v60  ;;  %v7702_v5 = vor.u32 %v10968_v0, %v7701_v62 }
  0xdd   :  { %v8591_v8 = vld [vmem:[%s17638_s29 + $0xa60] sm:$0xf0]  ;;  %v7669_v7 = vld [vmem:[%s17638_s29 + $0x308] sm:$0xf] }
  0xde   :  { %v11251_v9 = vld [vmem:[%s17638_s29 + $0xc44] sm:$0xf]  ;;  %v8594_v16 = vor.u32 %v11187_v6, %v8591_v8  ;;  %3342 = vmatpush.bf16.msrb.mxu0 %v8338_v13  ;;  %v7958_v6 = vor.u32 %v11032_v2, %v7957_v1  ;;  %v10880_v36 = vld [vmem:[%s17638_s29 + $0xa4] sm:$0xf0] }
  0xdf   :  { %v8847_v10 = vld [vmem:[%s17638_s29 + $0xc60] sm:$0xf0]  ;;  %v11008_v42 = vld [vmem:[%s17638_s29 + $0x4a4] sm:$0xf0] }
  0xe0   :  { %v11315_v11 = vld [vmem:[%s17638_s29 + $0xe44] sm:$0xf]  ;;  %v8850_v17 = vor.u32 %v11251_v9, %v8847_v10  ;;  %3355 = vmatpush.bf16.msrb.mxu1 %v8594_v16  ;;  %v7925_v9 = vld [vmem:[%s17638_s29 + $0x508] sm:$0xf] }
  0xe1   :  { %v9103_v12 = vld [vmem:[%s17638_s29 + $0xe60] sm:$0xf0]  ;;  %v11024_v10 = vld [vmem:[%s17638_s29 + $0x524] sm:$0xf0] }
  0xe2   :  { %v11115_v14 = vld [vmem:[%s17638_s29 + $0x804] sm:$0xf]  ;;  %v9106_v24 = vor.u32 %v11315_v11, %v9103_v12  ;;  %3368 = vmatpush.bf16.msrb.mxu2 %v8850_v17  ;;  %v8181_v11 = vld [vmem:[%s17638_s29 + $0x708] sm:$0xf] }
  0xe3   :  { %v8303_v15 = vld [vmem:[%s17638_s29 + $0x820] sm:$0xf0]  ;;  %v11088_v12 = vld [vmem:[%s17638_s29 + $0x724] sm:$0xf0] }
  0xe4   :  { %v11179_v18 = vld [vmem:[%s17638_s29 + $0xa04] sm:$0xf]  ;;  %v8306_v35 = vor.u32 %v11115_v14, %v8303_v15  ;;  %3381 = vmatpush.bf16.msrb.mxu3 %v9106_v24  ;;  %v7926_v15 = vor.u32 %v11024_v10, %v7925_v9  ;;  %v7381_v16 = vld [vmem:[%s17638_s29 + $0xc8] sm:$0xf] }
  0xe5   :  { %v8559_v19 = vld [vmem:[%s17638_s29 + $0xa20] sm:$0xf0]  ;;  %v10888_v17 = vld [vmem:[%s17638_s29 + $0xe4] sm:$0xf0] }
  0xe6   :  { %v11243_v23 = vld [vmem:[%s17638_s29 + $0xc04] sm:$0xf]  ;;  %v8562_v40 = vor.u32 %v11179_v18, %v8559_v19  ;;  %3343 = vmatpush.bf16.msrb.mxu0 %v8306_v35  ;;  %v7637_v18 = vld [vmem:[%s17638_s29 + $0x2c8] sm:$0xf]  ;;  %v8182_v19 = vor.u32 %v11088_v12, %v8181_v11  ;;  %v7382_v30 = vor.u32 %v10888_v17, %v7381_v16 }
  0xe7   :  { %v8815_v25 = vld [vmem:[%s17638_s29 + $0xc20] sm:$0xf0]  ;;  %v7893_v24 = vld [vmem:[%s17638_s29 + $0x4c8] sm:$0xf] }
  0xe8   :  { %v11307_v27 = vld [vmem:[%s17638_s29 + $0xe04] sm:$0xf]  ;;  %v8818_v41 = vor.u32 %v11243_v23, %v8815_v25  ;;  %3356 = vmatpush.bf16.msrb.mxu1 %v8562_v40  ;;  %v10952_v23 = vld [vmem:[%s17638_s29 + $0x2e4] sm:$0xf0] }
  0xe9   :  { %v9071_v28 = vld [vmem:[%s17638_s29 + $0xe20] sm:$0xf0]  ;;  %3344 = vmatmul.bf16.vlgmr.msrb.gmra.mxu0 %v12357_v31  ;;  %v7413_v31 = vld [vmem:[%s17638_s29 + $0x108] sm:$0xf]  ;;  %v7638_v33 = vor.u32 %v10952_v23, %v7637_v18 }
  0xea   :  { %v9074_v44 = vor.u32 %v11307_v27, %v9071_v28  ;;  %3369 = vmatpush.bf16.msrb.mxu2 %v8818_v41  ;;  %3388 = vmatpush.bf16.msra.mxu0 %v7510_v45  ;;  %v11016_v25 = vld [vmem:[%s17638_s29 + $0x4e4] sm:$0xf0] }
  0xeb   :  { %3357 = vmatmul.bf16.vlgmr.msrb.gmra.mxu1 %v12370_v38  ;;  %v10960_v38 = vld [vmem:[%s17638_s29 + $0x324] sm:$0xf0]  ;;  %v7894_v34 = vor.u32 %v11016_v25, %v7893_v24 }
  0xec   :  { %3382 = vmatpush.bf16.msrb.mxu3 %v9074_v44  ;;  %3401 = vmatpush.bf16.msra.mxu1 %v7766_v46  ;;  %v7670_v14 = vor.u32 %v10960_v38, %v7669_v7  ;;  %v8149_v27 = vld [vmem:[%s17638_s29 + $0x6c8] sm:$0xf] }
  0xed   :  { %3370 = vmatmul.bf16.vlgmr.msrb.gmra.mxu2 %v12355_v29  ;;  %v8213_v29 = vld [vmem:[%s17638_s29 + $0x748] sm:$0xf] }
  0xee   :  { %3414 = vmatpush.bf16.msra.mxu2 %v8022_v47  ;;  %3389 = vmatpush.bf16.msra.mxu0 %v7478_v57  ;;  %v8214_v8 = vor.u32 %v11096_v3, %v8213_v29  ;;  %v11080_v28 = vld [vmem:[%s17638_s29 + $0x6e4] sm:$0xf0] }
  0xef   :  { %3383 = vmatmul.bf16.vlgmr.msrb.gmra.mxu3 %v12359_v32  ;;  %v10896_v32 = vld [vmem:[%s17638_s29 + $0x124] sm:$0xf0]  ;;  %v8150_v39 = vor.u32 %v11080_v28, %v8149_v27 }
  0xf0   :  { %3427 = vmatpush.bf16.msra.mxu3 %v8278_v51  ;;  %3402 = vmatpush.bf16.msra.mxu1 %v7734_v58  ;;  %v7414_v13 = vor.u32 %v10896_v32, %v7413_v31  ;;  %v7349_v35 = vld [vmem:[%s17638_s29 + $0x88] sm:$0xf] }
  0xf1   :  { %v10944_v40 = vld [vmem:[%s17638_s29 + $0x2a4] sm:$0xf0]  ;;  %v7350_v45 = vor.u32 %v10880_v36, %v7349_v35 }
  0xf2   :  { %3415 = vmatpush.bf16.msra.mxu2 %v7990_v59  ;;  %3390 = vmatpush.bf16.msra.mxu0 %v7446_v4  ;;  %v7861_v41 = vld [vmem:[%s17638_s29 + $0x488] sm:$0xf]  ;;  %v7606_v46 = vor.u32 %v10944_v40, %v7605_v37 }
  0xf3   :  { %v8117_v43 = vld [vmem:[%s17638_s29 + $0x688] sm:$0xf]  ;;  %v7862_v47 = vor.u32 %v11008_v42, %v7861_v41 }
  0xf4   :  { %3428 = vmatpush.bf16.msra.mxu3 %v8246_v63  ;;  %3403 = vmatpush.bf16.msra.mxu1 %v7702_v5  ;;  %v11072_v44 = vld [vmem:[%s17638_s29 + $0x6a4] sm:$0xf0] }
  0xf5   :  { %v7317_v48 = vld [vmem:[%s17638_s29 + $0x48] sm:$0xf]  ;;  %v8118_v51 = vor.u32 %v11072_v44, %v8117_v43 }
  0xf6   :  { %3416 = vmatpush.bf16.msra.mxu2 %v7958_v6  ;;  %3391 = vmatpush.bf16.msra.mxu0 %v7414_v13  ;;  %v10872_v49 = vld [vmem:[%s17638_s29 + $0x64] sm:$0xf0] }
  0xf7   :  { %v7573_v50 = vld [vmem:[%s17638_s29 + $0x248] sm:$0xf]  ;;  %v7318_v57 = vor.u32 %v10872_v49, %v7317_v48 }
  0xf8   :  { %3429 = vmatpush.bf16.msra.mxu3 %v8214_v8  ;;  %3404 = vmatpush.bf16.msra.mxu1 %v7670_v14  ;;  %v10936_v52 = vld [vmem:[%s17638_s29 + $0x264] sm:$0xf0] }
  0xf9   :  { %v7829_v53 = vld [vmem:[%s17638_s29 + $0x448] sm:$0xf]  ;;  %v7574_v60 = vor.u32 %v10936_v52, %v7573_v50 }
  0xfa   :  { %3417 = vmatpush.bf16.msra.mxu2 %v7926_v15  ;;  %3392 = vmatpush.bf16.msra.mxu0 %v7382_v30  ;;  %v11000_v54 = vld [vmem:[%s17638_s29 + $0x464] sm:$0xf0] }
  0xfb   :  { %v8085_v55 = vld [vmem:[%s17638_s29 + $0x648] sm:$0xf]  ;;  %v7830_v61 = vor.u32 %v11000_v54, %v7829_v53 }
  0xfc   :  { %3430 = vmatpush.bf16.msra.mxu3 %v8182_v19  ;;  %3405 = vmatpush.bf16.msra.mxu1 %v7638_v33  ;;  %v11064_v56 = vld [vmem:[%s17638_s29 + $0x664] sm:$0xf0] }
  0xfd   :  { %v7285_v58 = vld [vmem:[%s17638_s29 + $0x8] sm:$0xf]  ;;  %v8086_v1 = vor.u32 %v11064_v56, %v8085_v55 }
  0xfe   :  { %3418 = vmatpush.bf16.msra.mxu2 %v7894_v34  ;;  %3393 = vmatpush.bf16.msra.mxu0 %v7350_v45  ;;  %v10864_v59 = vld [vmem:[%s17638_s29 + $0x24] sm:$0xf0] }
  0xff   :  { %v7541_v62 = vld [vmem:[%s17638_s29 + $0x208] sm:$0xf]  ;;  %v7286_v31 = vor.u32 %v10864_v59, %v7285_v58 }
 0x100   :  { %3431 = vmatpush.bf16.msra.mxu3 %v8150_v39  ;;  %3406 = vmatpush.bf16.msra.mxu1 %v7606_v46  ;;  %v10928_v63 = vld [vmem:[%s17638_s29 + $0x224] sm:$0xf0] }
 0x101   :  { %v7797_v0 = vld [vmem:[%s17638_s29 + $0x408] sm:$0xf]  ;;  %v7542_v38 = vor.u32 %v10928_v63, %v7541_v62  ;;  %v13024_v63 = vld [vmem:[%s17640_s4] sm:$0xff] }
 0x102   :  { %3419 = vmatpush.bf16.msra.mxu2 %v7862_v47  ;;  %v10992_v2 = vld [vmem:[%s17638_s29 + $0x424] sm:$0xf0]  ;;  %3394 = vmatpush.bf16.msra.mxu0 %v7318_v57 }
 0x103   :  { %v8053_v29 = vld [vmem:[%s17638_s29 + $0x608] sm:$0xf]  ;;  %v7798_v9 = vor.u32 %v10992_v2, %v7797_v0 }
 0x104   :  { %3432 = vmatpush.bf16.msra.mxu3 %v8118_v51  ;;  %v11056_v3 = vld [vmem:[%s17638_s29 + $0x624] sm:$0xf0]  ;;  %3407 = vmatpush.bf16.msra.mxu1 %v7574_v60 }
 0x105   :  { %v8533_v4 = vld [vmem:[%s17638_s29 + $0x9c8] sm:$0xf]  ;;  %v8054_v12 = vor.u32 %v11056_v3, %v8053_v29 }
 0x106   :  { %v11176_v5 = vld [vmem:[%s17638_s29 + $0x9e4] sm:$0xf0]  ;;  %3420 = vmatpush.bf16.msra.mxu2 %v7830_v61  ;;  %3395 = vmatpush.bf16.msra.mxu0 %v7286_v31  ;;  %v586_v31 = vperm.slane %v13024_v63, 0 }
 0x107   :  { %v8789_v6 = vld [vmem:[%s17638_s29 + $0xbc8] sm:$0xf]  ;;  %v8534_v13 = vor.u32 %v11176_v5, %v8533_v4 }
 0x108   :  { %v11240_v32 = vld [vmem:[%s17638_s29 + $0xbe4] sm:$0xf0]  ;;  %3433 = vmatpush.bf16.msra.mxu3 %v8086_v1  ;;  %3408 = vmatpush.bf16.msra.mxu1 %v7542_v38 }
 0x109   :  { %v9045_v7 = vld [vmem:[%s17638_s29 + $0xdc8] sm:$0xf]  ;;  %v8790_v14 = vor.u32 %v11240_v32, %v8789_v6  ;;  %3396 = vmatmul.bf16.vlgmr.msra.gmra.mxu0 %v12213_v21 }
 0x10a   :  { %v11304_v8 = vld [vmem:[%s17638_s29 + $0xde4] sm:$0xf0]  ;;  %3421 = vmatpush.bf16.msra.mxu2 %v7798_v9  ;;  %3440 = vmatpush.bf16.msrb.mxu0 %v8534_v13 }
 0x10b   :  { %v9301_v10 = vld [vmem:[%s17638_s29 + $0xfc8] sm:$0xf]  ;;  %v9046_v15 = vor.u32 %v11304_v8, %v9045_v7  ;;  %3409 = vmatmul.bf16.vlgmr.msra.gmra.mxu1 %v12224_v26 }
 0x10c   :  { %v11368_v11 = vld [vmem:[%s17638_s29 + $0xfe4] sm:$0xf0]  ;;  %3434 = vmatpush.bf16.msra.mxu3 %v8054_v12  ;;  %3453 = vmatpush.bf16.msrb.mxu1 %v8790_v14  ;;  %v3189_v12 = vpop.f32.mrf.mxu0 }
 0x10d   :  { %v8501_v16 = vld [vmem:[%s17638_s29 + $0x988] sm:$0xf]  ;;  %v9302_v19 = vor.u32 %v11368_v11, %v9301_v10  ;;  %3422 = vmatmul.bf16.vlgmr.msra.gmra.mxu2 %v12211_v20 }
 0x10e   :  { %v11168_v17 = vld [vmem:[%s17638_s29 + $0x9a4] sm:$0xf0]  ;;  %3466 = vmatpush.bf16.msrb.mxu2 %v9046_v15 }
 0x10f   :  { %v8757_v18 = vld [vmem:[%s17638_s29 + $0xb88] sm:$0xf]  ;;  %v8502_v30 = vor.u32 %v11168_v17, %v8501_v16  ;;  %3435 = vmatmul.bf16.vlgmr.msra.gmra.mxu3 %v12215_v22 }
 0x110   :  { %v11232_v23 = vld [vmem:[%s17638_s29 + $0xba4] sm:$0xf0]  ;;  %3479 = vmatpush.bf16.msrb.mxu3 %v9302_v19  ;;  %v3202_v19 = vpop.f32.mrf.mxu1 }
 0x111   :  { %v9013_v24 = vld [vmem:[%s17638_s29 + $0xd88] sm:$0xf]  ;;  %v8758_v33 = vor.u32 %v11232_v23, %v8757_v18  ;;  %3441 = vmatpush.bf16.msrb.mxu0 %v8502_v30  ;;  %v3190_v18 = vadd.f32 %v3189_v12, %v586_v31  ;;  %v11100_v31 = vld [vmem:[%s17638_s29 + $0x78c] sm:$0xf] }
 0x112   :  { %v11296_v25 = vld [vmem:[%s17638_s29 + $0xda4] sm:$0xf0]  ;;  %v7447_v12 = vld [vmem:[%s17638_s29 + $0x168] sm:$0xf0] }
 0x113   :  { %v9269_v27 = vld [vmem:[%s17638_s29 + $0xf88] sm:$0xf]  ;;  %v9014_v34 = vor.u32 %v11296_v25, %v9013_v24  ;;  %3454 = vmatpush.bf16.msrb.mxu1 %v8758_v33  ;;  %v3203_v33 = vadd.f32 %v3202_v19, %v3190_v18  ;;  %v7959_v18 = vld [vmem:[%s17638_s29 + $0x568] sm:$0xf0] }
 0x114   :  { %v11360_v28 = vld [vmem:[%s17638_s29 + $0xfa4] sm:$0xf0] }
 0x115   :  { %v8469_v35 = vld [vmem:[%s17638_s29 + $0x948] sm:$0xf]  ;;  %v9270_v39 = vor.u32 %v11360_v28, %v9269_v27  ;;  %3467 = vmatpush.bf16.msrb.mxu2 %v9014_v34 }
 0x116   :  { %v11160_v36 = vld [vmem:[%s17638_s29 + $0x964] sm:$0xf0] }
 0x117   :  { %v8725_v37 = vld [vmem:[%s17638_s29 + $0xb48] sm:$0xf]  ;;  %v8470_v45 = vor.u32 %v11160_v36, %v8469_v35  ;;  %3480 = vmatpush.bf16.msrb.mxu3 %v9270_v39 }
 0x118   :  { %v11224_v40 = vld [vmem:[%s17638_s29 + $0xb64] sm:$0xf0] }
 0x119   :  { %v8981_v41 = vld [vmem:[%s17638_s29 + $0xd48] sm:$0xf]  ;;  %v8726_v46 = vor.u32 %v11224_v40, %v8725_v37  ;;  %3442 = vmatpush.bf16.msrb.mxu0 %v8470_v45 }
 0x11a   :  { %v11288_v42 = vld [vmem:[%s17638_s29 + $0xd64] sm:$0xf0] }
 0x11b   :  { %v9237_v43 = vld [vmem:[%s17638_s29 + $0xf48] sm:$0xf]  ;;  %v8982_v20 = vor.u32 %v11288_v42, %v8981_v41  ;;  %3455 = vmatpush.bf16.msrb.mxu1 %v8726_v46 }
 0x11c   :  { %v11352_v44 = vld [vmem:[%s17638_s29 + $0xf64] sm:$0xf0] }
 0x11d   :  { %v8437_v47 = vld [vmem:[%s17638_s29 + $0x908] sm:$0xf]  ;;  %v9238_v22 = vor.u32 %v11352_v44, %v9237_v43  ;;  %3468 = vmatpush.bf16.msrb.mxu2 %v8982_v20  ;;  %v3215_v43 = vpop.f32.mrf.mxu2 }
 0x11e   :  { %v11152_v48 = vld [vmem:[%s17638_s29 + $0x924] sm:$0xf0] }
 0x11f   :  { %v8693_v21 = vld [vmem:[%s17638_s29 + $0xb08] sm:$0xf]  ;;  %v8438_v53 = vor.u32 %v11152_v48, %v8437_v47  ;;  %3481 = vmatpush.bf16.msrb.mxu3 %v9238_v22  ;;  %v3216_v47 = vadd.f32 %v3215_v43, %v3203_v33  ;;  %v3228_v48 = vpop.f32.mrf.mxu3  ;;  %v7511_v22 = vld [vmem:[%s17638_s29 + $0x1e8] sm:$0xf0] }
 0x120   :  { %v11216_v26 = vld [vmem:[%s17638_s29 + $0xb24] sm:$0xf0]  ;;  %v8183_v43 = vld [vmem:[%s17638_s29 + $0x728] sm:$0xf0] }
 0x121   :  { %v8949_v49 = vld [vmem:[%s17638_s29 + $0xd08] sm:$0xf]  ;;  %v8694_v55 = vor.u32 %v11216_v26, %v8693_v21  ;;  %3443 = vmatpush.bf16.msrb.mxu0 %v8438_v53  ;;  %v10916_v21 = vld [vmem:[%s17638_s29 + $0x1cc] sm:$0xf]  ;;  %v13123_v53 = vadd.f32 %v3228_v48, %v3216_v47 }
 0x122   :  { %v11280_v50 = vld [vmem:[%s17638_s29 + $0xd24] sm:$0xf0]  ;;  %v10980_v26 = vld [vmem:[%s17638_s29 + $0x3cc] sm:$0xf] }
 0x123   :  { %v9205_v51 = vld [vmem:[%s17638_s29 + $0xf08] sm:$0xf]  ;;  %v8950_v56 = vor.u32 %v11280_v50, %v8949_v49  ;;  %3456 = vmatpush.bf16.msrb.mxu1 %v8694_v55  ;;  %v7767_v50 = vld [vmem:[%s17638_s29 + $0x3e8] sm:$0xf0] }
 0x124   :  { %v11344_v52 = vld [vmem:[%s17638_s29 + $0xf24] sm:$0xf0]  ;;  %v10884_v47 = vld [vmem:[%s17638_s29 + $0xcc] sm:$0xf] }
 0x125   :  { %v8405_v54 = vld [vmem:[%s17638_s29 + $0x8c8] sm:$0xf]  ;;  %v9206_v60 = vor.u32 %v11344_v52, %v9205_v51  ;;  %3469 = vmatpush.bf16.msrb.mxu2 %v8950_v56  ;;  %v11044_v51 = vld [vmem:[%s17638_s29 + $0x5cc] sm:$0xf] }
 0x126   :  { %v11144_v57 = vld [vmem:[%s17638_s29 + $0x8e4] sm:$0xf0]  ;;  %v8023_v52 = vld [vmem:[%s17638_s29 + $0x5e8] sm:$0xf0] }
 0x127   :  { %v8661_v58 = vld [vmem:[%s17638_s29 + $0xac8] sm:$0xf]  ;;  %v8406_v2 = vor.u32 %v11144_v57, %v8405_v54  ;;  %3482 = vmatpush.bf16.msrb.mxu3 %v9206_v60  ;;  %v3191_v54 = vpop.f32.mrf.mxu0  ;;  %v11108_v57 = vld [vmem:[%s17638_s29 + $0x7cc] sm:$0xf] }
 0x128   :  { %v11208_v59 = vld [vmem:[%s17638_s29 + $0xae4] sm:$0xf0]  ;;  %v7383_v48 = vld [vmem:[%s17638_s29 + $0xe8] sm:$0xf0] }
 0x129   :  { %v8917_v61 = vld [vmem:[%s17638_s29 + $0xcc8] sm:$0xf]  ;;  %v8662_v3 = vor.u32 %v11208_v59, %v8661_v58  ;;  %3444 = vmatpush.bf16.msrb.mxu0 %v8406_v2  ;;  %v8279_v58 = vld [vmem:[%s17638_s29 + $0x7e8] sm:$0xf0]  ;;  %v3204_v59 = vpop.f32.mrf.mxu1 }
 0x12a   :  { %v11272_v62 = vld [vmem:[%s17638_s29 + $0xce4] sm:$0xf0]  ;;  %v7479_v2 = vld [vmem:[%s17638_s29 + $0x1a8] sm:$0xf0] }
 0x12b   :  { %v9173_v0 = vld [vmem:[%s17638_s29 + $0xec8] sm:$0xf]  ;;  %v8918_v4 = vor.u32 %v11272_v62, %v8917_v61  ;;  %3457 = vmatpush.bf16.msrb.mxu1 %v8662_v3  ;;  %v7514_v61 = vor.u32 %v10916_v21, %v7511_v22  ;;  %v7770_v62 = vor.u32 %v10980_v26, %v7767_v50  ;;  %v8282_v3 = vor.u32 %v11108_v57, %v8279_v58  ;;  %v10948_v21 = vld [vmem:[%s17638_s29 + $0x2cc] sm:$0xf] }
 0x12c   :  { %v11336_v1 = vld [vmem:[%s17638_s29 + $0xee4] sm:$0xf0]  ;;  %v7639_v50 = vld [vmem:[%s17638_s29 + $0x2e8] sm:$0xf0] }
 0x12d   :  { %v8373_v29 = vld [vmem:[%s17638_s29 + $0x888] sm:$0xf]  ;;  %v9174_v32 = vor.u32 %v11336_v1, %v9173_v0  ;;  %3470 = vmatpush.bf16.msrb.mxu2 %v8918_v4  ;;  %v8026_v0 = vor.u32 %v11044_v51, %v8023_v52  ;;  %v10908_v1 = vld [vmem:[%s17638_s29 + $0x18c] sm:$0xf]  ;;  %v7642_v57 = vor.u32 %v10948_v21, %v7639_v50 }
 0x12e   :  { %v11136_v5 = vld [vmem:[%s17638_s29 + $0x8a4] sm:$0xf0]  ;;  %v7735_v4 = vld [vmem:[%s17638_s29 + $0x3a8] sm:$0xf0] }
 0x12f   :  { %v8629_v6 = vld [vmem:[%s17638_s29 + $0xa88] sm:$0xf]  ;;  %v8374_v11 = vor.u32 %v11136_v5, %v8373_v29  ;;  %3483 = vmatpush.bf16.msrb.mxu3 %v9174_v32  ;;  %v10972_v29 = vld [vmem:[%s17638_s29 + $0x38c] sm:$0xf] }
 0x130   :  { %v11200_v7 = vld [vmem:[%s17638_s29 + $0xaa4] sm:$0xf0]  ;;  %v11036_v5 = vld [vmem:[%s17638_s29 + $0x58c] sm:$0xf] }
 0x131   :  { %v8885_v8 = vld [vmem:[%s17638_s29 + $0xc88] sm:$0xf]  ;;  %v8630_v13 = vor.u32 %v11200_v7, %v8629_v6  ;;  %3445 = vmatpush.bf16.msrb.mxu0 %v8374_v11  ;;  %v7991_v6 = vld [vmem:[%s17638_s29 + $0x5a8] sm:$0xf0]  ;;  %v3217_v7 = vpop.f32.mrf.mxu2  ;;  %v3254_v26 = vpop.f32.mrf.mxu1 }
 0x132   :  { %v11264_v38 = vld [vmem:[%s17638_s29 + $0xca4] sm:$0xf0]  ;;  %v8247_v32 = vld [vmem:[%s17638_s29 + $0x7a8] sm:$0xf0] }
 0x133   :  { %v9141_v9 = vld [vmem:[%s17638_s29 + $0xe88] sm:$0xf]  ;;  %v8886_v14 = vor.u32 %v11264_v38, %v8885_v8  ;;  %3458 = vmatpush.bf16.msrb.mxu1 %v8630_v13  ;;  %v7482_v8 = vor.u32 %v10908_v1, %v7479_v2  ;;  %v3230_v38 = vpop.f32.mrf.mxu3  ;;  %v10900_v11 = vld [vmem:[%s17638_s29 + $0x14c] sm:$0xf] }
 0x134   :  { %v11328_v10 = vld [vmem:[%s17638_s29 + $0xea4] sm:$0xf0]  ;;  %v10964_v13 = vld [vmem:[%s17638_s29 + $0x34c] sm:$0xf] }
 0x135   :  { %v8341_v15 = vld [vmem:[%s17638_s29 + $0x848] sm:$0xf]  ;;  %v9142_v23 = vor.u32 %v11328_v10, %v9141_v9  ;;  %3471 = vmatpush.bf16.msrb.mxu2 %v8886_v14  ;;  %v7738_v9 = vor.u32 %v10972_v29, %v7735_v4  ;;  %v7994_v10 = vor.u32 %v11036_v5, %v7991_v6  ;;  %v8250_v14 = vor.u32 %v11100_v31, %v8247_v32  ;;  %v11012_v51 = vld [vmem:[%s17638_s29 + $0x4cc] sm:$0xf] }
 0x136   :  { %v11128_v16 = vld [vmem:[%s17638_s29 + $0x864] sm:$0xf0]  ;;  %v7895_v52 = vld [vmem:[%s17638_s29 + $0x4e8] sm:$0xf0] }
 0x137   :  { %v8597_v17 = vld [vmem:[%s17638_s29 + $0xa48] sm:$0xf]  ;;  %v8342_v34 = vor.u32 %v11128_v16, %v8341_v15  ;;  %3484 = vmatpush.bf16.msrb.mxu3 %v9142_v23  ;;  %v13164_v15 = vld [vmem:[#allocation1 + $0x36] sm:$0xff]  ;;  %v7703_v16 = vld [vmem:[%s17638_s29 + $0x368] sm:$0xf0]  ;;  %v7898_v58 = vor.u32 %v11012_v51, %v7895_v52 }
 0x138   :  { %v11192_v24 = vld [vmem:[%s17638_s29 + $0xa64] sm:$0xf0]  ;;  %v13179_v23 = vld [vmem:[#allocation1 + $0x3f] sm:$0xff]  ;;  %v11076_v54 = vld [vmem:[%s17638_s29 + $0x6cc] sm:$0xf] }
 0x139   :  { %v8853_v25 = vld [vmem:[%s17638_s29 + $0xc48] sm:$0xf]  ;;  %v8598_v37 = vor.u32 %v11192_v24, %v8597_v17  ;;  %3446 = vmatpush.bf16.msrb.mxu0 %v8342_v34  ;;  %v11028_v17 = vld [vmem:[%s17638_s29 + $0x54c] sm:$0xf] }
 0x13a   :  { %v11256_v27 = vld [vmem:[%s17638_s29 + $0xc64] sm:$0xf0]  ;;  %v11092_v24 = vld [vmem:[%s17638_s29 + $0x74c] sm:$0xf]  ;;  %v7962_v33 = vor.u32 %v11028_v17, %v7959_v18 }
 0x13b   :  { %v9109_v28 = vld [vmem:[%s17638_s29 + $0xe48] sm:$0xf]  ;;  %v8854_v39 = vor.u32 %v11256_v27, %v8853_v25  ;;  %3459 = vmatpush.bf16.msrb.mxu1 %v8598_v37  ;;  %v8215_v25 = vld [vmem:[%s17638_s29 + $0x768] sm:$0xf0]  ;;  %v7450_v27 = vor.u32 %v10900_v11, %v7447_v12  ;;  %v3280_v4 = vpop.f32.mrf.mxu3  ;;  %v3256_v12 = vpop.f32.mrf.mxu1 }
 0x13c   :  { %v11320_v30 = vld [vmem:[%s17638_s29 + $0xe64] sm:$0xf0]  ;;  %v10892_v34 = vld [vmem:[%s17638_s29 + $0x10c] sm:$0xf]  ;;  %v8218_v37 = vor.u32 %v11092_v24, %v8215_v25  ;;  %v13389_v12 = vld [vmem:[#allocation1] sm:$0xff] }
 0x13d   :  { %v8309_v35 = vld [vmem:[%s17638_s29 + $0x808] sm:$0xf]  ;;  %v9110_v44 = vor.u32 %v11320_v30, %v9109_v28  ;;  %3472 = vmatpush.bf16.msrb.mxu2 %v8854_v39  ;;  %v13188_v28 = vld [vmem:[#allocation1 + $0x2d] sm:$0xff]  ;;  %v7706_v30 = vor.u32 %v10964_v13, %v7703_v16 }
 0x13e   :  { %v11120_v36 = vld [vmem:[%s17638_s29 + $0x824] sm:$0xf0]  ;;  %v7671_v39 = vld [vmem:[%s17638_s29 + $0x328] sm:$0xf0] }
 0x13f   :  { %v8565_v40 = vld [vmem:[%s17638_s29 + $0xa08] sm:$0xf]  ;;  %v8310_v49 = vor.u32 %v11120_v36, %v8309_v35  ;;  %3485 = vmatpush.bf16.msrb.mxu3 %v9110_v44  ;;  %v7415_v35 = vld [vmem:[%s17638_s29 + $0x128] sm:$0xf0] }
 0x140   :  { %v11184_v41 = vld [vmem:[%s17638_s29 + $0xa24] sm:$0xf0]  ;;  %v10956_v36 = vld [vmem:[%s17638_s29 + $0x30c] sm:$0xf]  ;;  %v7418_v44 = vor.u32 %v10892_v34, %v7415_v35 }
 0x141   :  { %v8821_v42 = vld [vmem:[%s17638_s29 + $0xc08] sm:$0xf]  ;;  %v8566_v55 = vor.u32 %v11184_v41, %v8565_v40  ;;  %3447 = vmatpush.bf16.msrb.mxu0 %v8310_v49  ;;  %v11020_v40 = vld [vmem:[%s17638_s29 + $0x50c] sm:$0xf] }
 0x142   :  { %v11248_v45 = vld [vmem:[%s17638_s29 + $0xc24] sm:$0xf0]  ;;  %v7927_v41 = vld [vmem:[%s17638_s29 + $0x528] sm:$0xf0] }
 0x143   :  { %v9077_v46 = vld [vmem:[%s17638_s29 + $0xe08] sm:$0xf]  ;;  %v8822_v56 = vor.u32 %v11248_v45, %v8821_v42  ;;  %3460 = vmatpush.bf16.msrb.mxu1 %v8566_v55  ;;  %v11084_v42 = vld [vmem:[%s17638_s29 + $0x70c] sm:$0xf]  ;;  %v3241_v45 = vpop.f32.mrf.mxu0 }
 0x144   :  { %v11312_v20 = vld [vmem:[%s17638_s29 + $0xe24] sm:$0xf0]  ;;  %v3242_v22 = vadd.f32 %v3241_v45, %v13123_v53  ;;  %v8186_v49 = vor.u32 %v11084_v42, %v8183_v43  ;;  %v8151_v53 = vld [vmem:[%s17638_s29 + $0x6e8] sm:$0xf0] }
 0x145   :  { %v9078_v60 = vor.u32 %v11312_v20, %v9077_v46  ;;  %3473 = vmatpush.bf16.msrb.mxu2 %v8822_v56  ;;  %3492 = vmatpush.bf16.msra.mxu0 %v7514_v61  ;;  %v13176_v19 = vld [vmem:[#allocation1 + $0x24] sm:$0xff]  ;;  %v7674_v46 = vor.u32 %v10956_v36, %v7671_v39  ;;  %v7930_v20 = vor.u32 %v11020_v40, %v7927_v41  ;;  %v10876_v59 = vld [vmem:[%s17638_s29 + $0x8c] sm:$0xf] }
 0x146   :  { %3448 = vmatmul.bf16.vlgmr.msrb.gmra.mxu0 %v13176_v19  ;;  %3461 = vmatmul.bf16.vlgmr.msrb.gmra.mxu1 %v13188_v28  ;;  %v3255_v55 = vadd.f32 %v3254_v26, %v3242_v22  ;;  %v7386_v56 = vor.u32 %v10884_v47, %v7383_v48  ;;  %v10940_v61 = vld [vmem:[%s17638_s29 + $0x28c] sm:$0xf] }
 0x147   :  { %3486 = vmatpush.bf16.msrb.mxu3 %v9078_v60  ;;  %3505 = vmatpush.bf16.msra.mxu1 %v7770_v62  ;;  %v7351_v60 = vld [vmem:[%s17638_s29 + $0xa8] sm:$0xf0]  ;;  %v3267_v62 = vpop.f32.mrf.mxu2 }
 0x148   :  { %3474 = vmatmul.bf16.vlgmr.msrb.gmra.mxu2 %v13164_v15  ;;  %v7607_v1 = vld [vmem:[%s17638_s29 + $0x2a8] sm:$0xf0]  ;;  %v7354_v31 = vor.u32 %v10876_v59, %v7351_v60 }
 0x149   :  { %3518 = vmatpush.bf16.msra.mxu2 %v8026_v0  ;;  %3493 = vmatpush.bf16.msra.mxu0 %v7482_v8  ;;  %v8154_v0 = vor.u32 %v11076_v54, %v8151_v53  ;;  %v11004_v2 = vld [vmem:[%s17638_s29 + $0x48c] sm:$0xf]  ;;  %v7610_v8 = vor.u32 %v10940_v61, %v7607_v1 }
 0x14a   :  { %3487 = vmatmul.bf16.vlgmr.msrb.gmra.mxu3 %v13179_v23  ;;  %v7863_v29 = vld [vmem:[%s17638_s29 + $0x4a8] sm:$0xf0] }
 0x14b   :  { %3531 = vmatpush.bf16.msra.mxu3 %v8282_v3  ;;  %3506 = vmatpush.bf16.msra.mxu1 %v7738_v9  ;;  %v3268_v3 = vadd.f32 %v3267_v62, %v3255_v55  ;;  %v11068_v5 = vld [vmem:[%s17638_s29 + $0x68c] sm:$0xf]  ;;  %v3243_v7 = vpop.f32.mrf.mxu0  ;;  %v7866_v38 = vor.u32 %v11004_v2, %v7863_v29 }
 0x14c   :  { %v8119_v6 = vld [vmem:[%s17638_s29 + $0x6a8] sm:$0xf0] }
 0x14d   :  { %3519 = vmatpush.bf16.msra.mxu2 %v7994_v10  ;;  %3494 = vmatpush.bf16.msra.mxu0 %v7450_v27  ;;  %v13264_v32 = vadd.f32 %v3280_v4, %v3268_v3  ;;  %v10868_v9 = vld [vmem:[%s17638_s29 + $0x4c] sm:$0xf]  ;;  %v8122_v13 = vor.u32 %v11068_v5, %v8119_v6 }
 0x14e   :  { %v7319_v10 = vld [vmem:[%s17638_s29 + $0x68] sm:$0xf0] }
 0x14f   :  { %3532 = vmatpush.bf16.msra.mxu3 %v8250_v14  ;;  %3507 = vmatpush.bf16.msra.mxu1 %v7706_v30  ;;  %v10932_v11 = vld [vmem:[%s17638_s29 + $0x24c] sm:$0xf]  ;;  %v7322_v25 = vor.u32 %v10868_v9, %v7319_v10  ;;  %v3269_v39 = vpop.f32.mrf.mxu2  ;;  %v13380_v9 = vld [vmem:[#allocation1 + $0x12] sm:$0xff] }
 0x150   :  { %v7575_v14 = vld [vmem:[%s17638_s29 + $0x268] sm:$0xf0] }
 0x151   :  { %3520 = vmatpush.bf16.msra.mxu2 %v7962_v33  ;;  %3495 = vmatpush.bf16.msra.mxu0 %v7418_v44  ;;  %v10996_v16 = vld [vmem:[%s17638_s29 + $0x44c] sm:$0xf]  ;;  %v7578_v33 = vor.u32 %v10932_v11, %v7575_v14  ;;  %v3282_v44 = vpop.f32.mrf.mxu3 }
 0x152   :  { %v7831_v17 = vld [vmem:[%s17638_s29 + $0x468] sm:$0xf0] }
 0x153   :  { %3533 = vmatpush.bf16.msra.mxu3 %v8218_v37  ;;  %3508 = vmatpush.bf16.msra.mxu1 %v7674_v46  ;;  %v11060_v18 = vld [vmem:[%s17638_s29 + $0x64c] sm:$0xf]  ;;  %v7834_v34 = vor.u32 %v10996_v16, %v7831_v17 }
 0x154   :  { %v8087_v24 = vld [vmem:[%s17638_s29 + $0x668] sm:$0xf0] }
 0x155   :  { %3521 = vmatpush.bf16.msra.mxu2 %v7930_v20  ;;  %3496 = vmatpush.bf16.msra.mxu0 %v7386_v56  ;;  %v10860_v27 = vld [vmem:[%s17638_s29 + $0xc] sm:$0xf]  ;;  %v8090_v40 = vor.u32 %v11060_v18, %v8087_v24 }
 0x156   :  { %v7287_v30 = vld [vmem:[%s17638_s29 + $0x28] sm:$0xf0] }
 0x157   :  { %3534 = vmatpush.bf16.msra.mxu3 %v8186_v49  ;;  %3509 = vmatpush.bf16.msra.mxu1 %v7642_v57  ;;  %v10924_v35 = vld [vmem:[%s17638_s29 + $0x20c] sm:$0xf]  ;;  %v7290_v47 = vor.u32 %v10860_v27, %v7287_v30  ;;  %v587_v30 = vperm.slane %v13024_v63, 1 }
 0x158   :  { %v7543_v36 = vld [vmem:[%s17638_s29 + $0x228] sm:$0xf0] }
 0x159   :  { %3522 = vmatpush.bf16.msra.mxu2 %v7898_v58  ;;  %3497 = vmatpush.bf16.msra.mxu0 %v7354_v31  ;;  %v10988_v37 = vld [vmem:[%s17638_s29 + $0x40c] sm:$0xf]  ;;  %v7546_v26 = vor.u32 %v10924_v35, %v7543_v36 }
 0x15a   :  { %v7799_v41 = vld [vmem:[%s17638_s29 + $0x428] sm:$0xf0] }
 0x15b   :  { %3535 = vmatpush.bf16.msra.mxu3 %v8154_v0  ;;  %3510 = vmatpush.bf16.msra.mxu1 %v7610_v8  ;;  %v11052_v42 = vld [vmem:[%s17638_s29 + $0x60c] sm:$0xf]  ;;  %v7802_v49 = vor.u32 %v10988_v37, %v7799_v41 }
 0x15c   :  { %v8055_v43 = vld [vmem:[%s17638_s29 + $0x628] sm:$0xf0] }
 0x15d   :  { %3523 = vmatpush.bf16.msra.mxu2 %v7866_v38  ;;  %v11172_v45 = vld [vmem:[%s17638_s29 + $0x9cc] sm:$0xf]  ;;  %3498 = vmatpush.bf16.msra.mxu0 %v7322_v25  ;;  %v8058_v52 = vor.u32 %v11052_v42, %v8055_v43 }
 0x15e   :  { %v8535_v46 = vld [vmem:[%s17638_s29 + $0x9e8] sm:$0xf0] }
 0x15f   :  { %3536 = vmatpush.bf16.msra.mxu3 %v8122_v13  ;;  %v11236_v20 = vld [vmem:[%s17638_s29 + $0xbcc] sm:$0xf]  ;;  %3511 = vmatpush.bf16.msra.mxu1 %v7578_v33  ;;  %v8538_v54 = vor.u32 %v11172_v45, %v8535_v46  ;;  %v13392_v13 = vld [vmem:[#allocation1 + $0x1b] sm:$0xff] }
 0x160   :  { %v8791_v48 = vld [vmem:[%s17638_s29 + $0xbe8] sm:$0xf0] }
 0x161   :  { %v11300_v21 = vld [vmem:[%s17638_s29 + $0xdcc] sm:$0xf]  ;;  %3524 = vmatpush.bf16.msra.mxu2 %v7834_v34  ;;  %v8794_v53 = vor.u32 %v11236_v20, %v8791_v48  ;;  %3499 = vmatpush.bf16.msra.mxu0 %v7290_v47  ;;  %v3306_v20 = vpop.f32.mrf.mxu1 }
 0x162   :  { %v9047_v22 = vld [vmem:[%s17638_s29 + $0xde8] sm:$0xf0] }
 0x163   :  { %v11364_v50 = vld [vmem:[%s17638_s29 + $0xfcc] sm:$0xf]  ;;  %3537 = vmatpush.bf16.msra.mxu3 %v8090_v40  ;;  %v9050_v55 = vor.u32 %v11300_v21, %v9047_v22  ;;  %3512 = vmatpush.bf16.msra.mxu1 %v7546_v26  ;;  %v3293_v40 = vpop.f32.mrf.mxu0 }
 0x164   :  { %v9303_v51 = vld [vmem:[%s17638_s29 + $0xfe8] sm:$0xf0]  ;;  %3500 = vmatmul.bf16.vlgmr.msra.gmra.mxu0 %v13389_v12  ;;  %v3294_v46 = vadd.f32 %v3293_v40, %v587_v30 }
 0x165   :  { %v11164_v56 = vld [vmem:[%s17638_s29 + $0x98c] sm:$0xf]  ;;  %v9306_v59 = vor.u32 %v11364_v50, %v9303_v51  ;;  %3525 = vmatpush.bf16.msra.mxu2 %v7802_v49  ;;  %3544 = vmatpush.bf16.msrb.mxu0 %v8538_v54 }
 0x166   :  { %v8503_v57 = vld [vmem:[%s17638_s29 + $0x9a8] sm:$0xf0]  ;;  %v3307_v50 = vadd.f32 %v3306_v20, %v3294_v46  ;;  %v7773_v46 = vld [vmem:[%s17638_s29 + $0x3d0] sm:$0xf] }
 0x167   :  { %v11228_v58 = vld [vmem:[%s17638_s29 + $0xb8c] sm:$0xf]  ;;  %3538 = vmatpush.bf16.msra.mxu3 %v8058_v52  ;;  %v8506_v2 = vor.u32 %v11164_v56, %v8503_v57  ;;  %3557 = vmatpush.bf16.msrb.mxu1 %v8794_v53  ;;  %v3319_v57 = vpop.f32.mrf.mxu2 }
 0x168   :  { %v8759_v60 = vld [vmem:[%s17638_s29 + $0xba8] sm:$0xf0]  ;;  %3526 = vmatmul.bf16.vlgmr.msra.gmra.mxu2 %v13380_v9 }
 0x169   :  { %v11292_v61 = vld [vmem:[%s17638_s29 + $0xd8c] sm:$0xf]  ;;  %3570 = vmatpush.bf16.msrb.mxu2 %v9050_v55  ;;  %v8762_v29 = vor.u32 %v11228_v58, %v8759_v60  ;;  %3545 = vmatpush.bf16.msrb.mxu0 %v8506_v2 }
 0x16a   :  { %v9015_v62 = vld [vmem:[%s17638_s29 + $0xda8] sm:$0xf0]  ;;  %3539 = vmatmul.bf16.vlgmr.msra.gmra.mxu3 %v13392_v13 }
 0x16b   :  { %v11356_v0 = vld [vmem:[%s17638_s29 + $0xf8c] sm:$0xf]  ;;  %v9018_v3 = vor.u32 %v11292_v61, %v9015_v62  ;;  %3583 = vmatpush.bf16.msrb.mxu3 %v9306_v59  ;;  %3558 = vmatpush.bf16.msrb.mxu1 %v8762_v29  ;;  %v3320_v62 = vadd.f32 %v3319_v57, %v3307_v50  ;;  %v11113_v50 = vld [vmem:[%s17638_s29 + $0x7ec] sm:$0xf0] }
 0x16c   :  { %v9271_v1 = vld [vmem:[%s17638_s29 + $0xfa8] sm:$0xf0]  ;;  %v7741_v57 = vld [vmem:[%s17638_s29 + $0x390] sm:$0xf] }
 0x16d   :  { %v11156_v4 = vld [vmem:[%s17638_s29 + $0x94c] sm:$0xf]  ;;  %v9274_v31 = vor.u32 %v11356_v0, %v9271_v1  ;;  %3571 = vmatpush.bf16.msrb.mxu2 %v9018_v3  ;;  %v3332_v0 = vpop.f32.mrf.mxu3 }
 0x16e   :  { %v8471_v5 = vld [vmem:[%s17638_s29 + $0x968] sm:$0xf0]  ;;  %v13471_v3 = vadd.f32 %v3332_v0, %v3320_v62  ;;  %v8253_v62 = vld [vmem:[%s17638_s29 + $0x790] sm:$0xf] }
 0x16f   :  { %v11220_v6 = vld [vmem:[%s17638_s29 + $0xb4c] sm:$0xf]  ;;  %v8474_v14 = vor.u32 %v11156_v4, %v8471_v5  ;;  %3584 = vmatpush.bf16.msrb.mxu3 %v9274_v31  ;;  %v3295_v4 = vpop.f32.mrf.mxu0  ;;  %v11105_v0 = vld [vmem:[%s17638_s29 + $0x7ac] sm:$0xf0] }
 0x170   :  { %v8727_v7 = vld [vmem:[%s17638_s29 + $0xb68] sm:$0xf0]  ;;  %v7453_v4 = vld [vmem:[%s17638_s29 + $0x150] sm:$0xf] }
 0x171   :  { %v11284_v8 = vld [vmem:[%s17638_s29 + $0xd4c] sm:$0xf]  ;;  %v8730_v18 = vor.u32 %v11220_v6, %v8727_v7  ;;  %3546 = vmatpush.bf16.msrb.mxu0 %v8474_v14 }
 0x172   :  { %v8983_v38 = vld [vmem:[%s17638_s29 + $0xd68] sm:$0xf0] }
 0x173   :  { %v11348_v10 = vld [vmem:[%s17638_s29 + $0xf4c] sm:$0xf]  ;;  %v8986_v24 = vor.u32 %v11284_v8, %v8983_v38  ;;  %3559 = vmatpush.bf16.msrb.mxu1 %v8730_v18  ;;  %v3308_v38 = vpop.f32.mrf.mxu1 }
 0x174   :  { %v9239_v11 = vld [vmem:[%s17638_s29 + $0xf68] sm:$0xf0]  ;;  %v11033_v38 = vld [vmem:[%s17638_s29 + $0x56c] sm:$0xf0] }
 0x175   :  { %v11148_v16 = vld [vmem:[%s17638_s29 + $0x90c] sm:$0xf]  ;;  %v9242_v33 = vor.u32 %v11348_v10, %v9239_v11  ;;  %3572 = vmatpush.bf16.msrb.mxu2 %v8986_v24 }
 0x176   :  { %v13398_v17 = vld [vmem:[#allocation1 + $0x9] sm:$0xff] }
 0x177   :  { %3513 = vmatmul.bf16.vlgmr.msra.gmra.mxu1 %v13398_v17  ;;  %v8439_v25 = vld [vmem:[%s17638_s29 + $0x928] sm:$0xf0]  ;;  %3585 = vmatpush.bf16.msrb.mxu3 %v9242_v33 }
 0x178   :  { %v11212_v27 = vld [vmem:[%s17638_s29 + $0xb0c] sm:$0xf]  ;;  %v8442_v39 = vor.u32 %v11148_v16, %v8439_v25 }
 0x179   :  { %v8695_v34 = vld [vmem:[%s17638_s29 + $0xb28] sm:$0xf0] }
 0x17a   :  { %v11276_v35 = vld [vmem:[%s17638_s29 + $0xd0c] sm:$0xf]  ;;  %v8698_v41 = vor.u32 %v11212_v27, %v8695_v34  ;;  %3547 = vmatpush.bf16.msrb.mxu0 %v8442_v39 }
 0x17b   :  { %v8951_v36 = vld [vmem:[%s17638_s29 + $0xd28] sm:$0xf0] }
 0x17c   :  { %v11340_v37 = vld [vmem:[%s17638_s29 + $0xf0c] sm:$0xf]  ;;  %v8954_v42 = vor.u32 %v11276_v35, %v8951_v36  ;;  %3560 = vmatpush.bf16.msrb.mxu1 %v8698_v41 }
 0x17d   :  { %v9207_v63 = vld [vmem:[%s17638_s29 + $0xf28] sm:$0xf0] }
 0x17e   :  { %v11140_v43 = vld [vmem:[%s17638_s29 + $0x8cc] sm:$0xf]  ;;  %v9210_v47 = vor.u32 %v11340_v37, %v9207_v63  ;;  %3573 = vmatpush.bf16.msrb.mxu2 %v8954_v42  ;;  %v3321_v63 = vpop.f32.mrf.mxu2 }
 0x17f   :  { %v8407_v44 = vld [vmem:[%s17638_s29 + $0x8e8] sm:$0xf0]  ;;  %v7389_v63 = vld [vmem:[%s17638_s29 + $0xd0] sm:$0xf] }
 0x180   :  { %v11204_v45 = vld [vmem:[%s17638_s29 + $0xacc] sm:$0xf]  ;;  %v8410_v51 = vor.u32 %v11140_v43, %v8407_v44  ;;  %3586 = vmatpush.bf16.msrb.mxu3 %v9210_v47  ;;  %v3334_v43 = vpop.f32.mrf.mxu3  ;;  %v7517_v44 = vld [vmem:[%s17638_s29 + $0x1d0] sm:$0xf] }
 0x181   :  { %v8663_v48 = vld [vmem:[%s17638_s29 + $0xae8] sm:$0xf0]  ;;  %v10985_v47 = vld [vmem:[%s17638_s29 + $0x3ec] sm:$0xf0] }
 0x182   :  { %v11268_v21 = vld [vmem:[%s17638_s29 + $0xccc] sm:$0xf]  ;;  %v8666_v52 = vor.u32 %v11204_v45, %v8663_v48  ;;  %3548 = vmatpush.bf16.msrb.mxu0 %v8410_v51  ;;  %v10921_v45 = vld [vmem:[%s17638_s29 + $0x1ec] sm:$0xf0] }
 0x183   :  { %v8919_v22 = vld [vmem:[%s17638_s29 + $0xce8] sm:$0xf0]  ;;  %v8029_v48 = vld [vmem:[%s17638_s29 + $0x5d0] sm:$0xf] }
 0x184   :  { %v11332_v26 = vld [vmem:[%s17638_s29 + $0xecc] sm:$0xf]  ;;  %v8922_v54 = vor.u32 %v11268_v21, %v8919_v22  ;;  %3561 = vmatpush.bf16.msrb.mxu1 %v8666_v52  ;;  %v11049_v21 = vld [vmem:[%s17638_s29 + $0x5ec] sm:$0xf0]  ;;  %v7518_v52 = vor.u32 %v10921_v45, %v7517_v44 }
 0x185   :  { %v9175_v49 = vld [vmem:[%s17638_s29 + $0xee8] sm:$0xf0]  ;;  %v10953_v44 = vld [vmem:[%s17638_s29 + $0x2ec] sm:$0xf0] }
 0x186   :  { %v11132_v53 = vld [vmem:[%s17638_s29 + $0x88c] sm:$0xf]  ;;  %v9178_v58 = vor.u32 %v11332_v26, %v9175_v49  ;;  %3574 = vmatpush.bf16.msrb.mxu2 %v8922_v54  ;;  %v8285_v49 = vld [vmem:[%s17638_s29 + $0x7d0] sm:$0xf]  ;;  %v7774_v54 = vor.u32 %v10985_v47, %v7773_v46 }
 0x187   :  { %v8375_v55 = vld [vmem:[%s17638_s29 + $0x8a8] sm:$0xf0]  ;;  %v7901_v45 = vld [vmem:[%s17638_s29 + $0x4d0] sm:$0xf] }
 0x188   :  { %v11196_v56 = vld [vmem:[%s17638_s29 + $0xa8c] sm:$0xf]  ;;  %v8378_v29 = vor.u32 %v11132_v53, %v8375_v55  ;;  %3587 = vmatpush.bf16.msrb.mxu3 %v9178_v58  ;;  %v8030_v53 = vor.u32 %v11049_v21, %v8029_v48  ;;  %v7485_v55 = vld [vmem:[%s17638_s29 + $0x190] sm:$0xf]  ;;  %v8286_v58 = vor.u32 %v11113_v50, %v8285_v49 }
 0x189   :  { %v8631_v59 = vld [vmem:[%s17638_s29 + $0xaa8] sm:$0xf0]  ;;  %v11017_v46 = vld [vmem:[%s17638_s29 + $0x4ec] sm:$0xf0] }
 0x18a   :  { %v11260_v60 = vld [vmem:[%s17638_s29 + $0xc8c] sm:$0xf]  ;;  %v8634_v5 = vor.u32 %v11196_v56, %v8631_v59  ;;  %3549 = vmatpush.bf16.msrb.mxu0 %v8378_v29  ;;  %v10913_v56 = vld [vmem:[%s17638_s29 + $0x1ac] sm:$0xf0] }
 0x18b   :  { %v8887_v61 = vld [vmem:[%s17638_s29 + $0xca8] sm:$0xf0]  ;;  %v10977_v59 = vld [vmem:[%s17638_s29 + $0x3ac] sm:$0xf0] }
 0x18c   :  { %v11324_v1 = vld [vmem:[%s17638_s29 + $0xe8c] sm:$0xf]  ;;  %v8890_v6 = vor.u32 %v11260_v60, %v8887_v61  ;;  %3562 = vmatpush.bf16.msrb.mxu1 %v8634_v5  ;;  %v7997_v60 = vld [vmem:[%s17638_s29 + $0x590] sm:$0xf] }
 0x18d   :  { %v9143_v2 = vld [vmem:[%s17638_s29 + $0xea8] sm:$0xf0]  ;;  %v11041_v61 = vld [vmem:[%s17638_s29 + $0x5ac] sm:$0xf0] }
 0x18e   :  { %v11124_v31 = vld [vmem:[%s17638_s29 + $0x84c] sm:$0xf]  ;;  %v9146_v10 = vor.u32 %v11324_v1, %v9143_v2  ;;  %3575 = vmatpush.bf16.msrb.mxu2 %v8890_v6  ;;  %v7486_v1 = vor.u32 %v10913_v56, %v7485_v55  ;;  %v7742_v2 = vor.u32 %v10977_v59, %v7741_v57  ;;  %v7998_v29 = vor.u32 %v11041_v61, %v7997_v60  ;;  %v10905_v5 = vld [vmem:[%s17638_s29 + $0x16c] sm:$0xf0]  ;;  %v3384_v57 = vpop.f32.mrf.mxu3 }
 0x18f   :  { %v8343_v7 = vld [vmem:[%s17638_s29 + $0x868] sm:$0xf0]  ;;  %v7709_v6 = vld [vmem:[%s17638_s29 + $0x350] sm:$0xf] }
 0x190   :  { %v11188_v8 = vld [vmem:[%s17638_s29 + $0xa4c] sm:$0xf]  ;;  %v8346_v25 = vor.u32 %v11124_v31, %v8343_v7  ;;  %3588 = vmatpush.bf16.msrb.mxu3 %v9146_v10  ;;  %v8254_v31 = vor.u32 %v11105_v0, %v8253_v62  ;;  %v10969_v7 = vld [vmem:[%s17638_s29 + $0x36c] sm:$0xf0] }
 0x191   :  { %v8599_v11 = vld [vmem:[%s17638_s29 + $0xa68] sm:$0xf0]  ;;  %v11097_v10 = vld [vmem:[%s17638_s29 + $0x76c] sm:$0xf0] }
 0x192   :  { %v11252_v14 = vld [vmem:[%s17638_s29 + $0xc4c] sm:$0xf]  ;;  %v8602_v33 = vor.u32 %v11188_v8, %v8599_v11  ;;  %3550 = vmatpush.bf16.msrb.mxu0 %v8346_v25  ;;  %v7965_v8 = vld [vmem:[%s17638_s29 + $0x550] sm:$0xf]  ;;  %v7454_v11 = vor.u32 %v10905_v5, %v7453_v4 }
 0x193   :  { %v8855_v16 = vld [vmem:[%s17638_s29 + $0xc68] sm:$0xf0]  ;;  %v7933_v25 = vld [vmem:[%s17638_s29 + $0x510] sm:$0xf] }
 0x194   :  { %v11316_v18 = vld [vmem:[%s17638_s29 + $0xe4c] sm:$0xf]  ;;  %v8858_v34 = vor.u32 %v11252_v14, %v8855_v16  ;;  %3563 = vmatpush.bf16.msrb.mxu1 %v8602_v33  ;;  %v7710_v14 = vor.u32 %v10969_v7, %v7709_v6  ;;  %v7966_v16 = vor.u32 %v11033_v38, %v7965_v8  ;;  %v11089_v33 = vld [vmem:[%s17638_s29 + $0x72c] sm:$0xf0] }
 0x195   :  { %v9111_v24 = vld [vmem:[%s17638_s29 + $0xe68] sm:$0xf0]  ;;  %v10881_v49 = vld [vmem:[%s17638_s29 + $0xac] sm:$0xf0] }
 0x196   :  { %v11116_v27 = vld [vmem:[%s17638_s29 + $0x80c] sm:$0xf]  ;;  %v9114_v39 = vor.u32 %v11316_v18, %v9111_v24  ;;  %3576 = vmatpush.bf16.msrb.mxu2 %v8858_v34  ;;  %v7677_v18 = vld [vmem:[%s17638_s29 + $0x310] sm:$0xf] }
 0x197   :  { %v8311_v30 = vld [vmem:[%s17638_s29 + $0x828] sm:$0xf0]  ;;  %v7613_v50 = vld [vmem:[%s17638_s29 + $0x290] sm:$0xf] }
 0x198   :  { %v11180_v35 = vld [vmem:[%s17638_s29 + $0xa0c] sm:$0xf]  ;;  %v8314_v20 = vor.u32 %v11116_v27, %v8311_v30  ;;  %3589 = vmatpush.bf16.msrb.mxu3 %v9114_v39  ;;  %v11025_v27 = vld [vmem:[%s17638_s29 + $0x52c] sm:$0xf0] }
 0x199   :  { %v8567_v36 = vld [vmem:[%s17638_s29 + $0xa28] sm:$0xf0]  ;;  %v8189_v30 = vld [vmem:[%s17638_s29 + $0x710] sm:$0xf] }
 0x19a   :  { %v11244_v37 = vld [vmem:[%s17638_s29 + $0xc0c] sm:$0xf]  ;;  %v8570_v22 = vor.u32 %v11180_v35, %v8567_v36  ;;  %3551 = vmatpush.bf16.msrb.mxu0 %v8314_v20  ;;  %v3345_v35 = vpop.f32.mrf.mxu0  ;;  %v10889_v39 = vld [vmem:[%s17638_s29 + $0xec] sm:$0xf0]  ;;  %v8190_v43 = vor.u32 %v11089_v33, %v8189_v30 }
 0x19b   :  { %v8823_v40 = vld [vmem:[%s17638_s29 + $0xc28] sm:$0xf0]  ;;  %v8157_v20 = vld [vmem:[%s17638_s29 + $0x6d0] sm:$0xf]  ;;  %v7390_v48 = vor.u32 %v10889_v39, %v7389_v63 }
 0x19c   :  { %v11308_v41 = vld [vmem:[%s17638_s29 + $0xe0c] sm:$0xf]  ;;  %v8826_v26 = vor.u32 %v11244_v37, %v8823_v40  ;;  %3564 = vmatpush.bf16.msrb.mxu1 %v8570_v22  ;;  %v7934_v37 = vor.u32 %v11025_v27, %v7933_v25  ;;  %v7645_v40 = vld [vmem:[%s17638_s29 + $0x2d0] sm:$0xf]  ;;  %v7902_v22 = vor.u32 %v11017_v46, %v7901_v45 }
 0x19d   :  { %v9079_v42 = vld [vmem:[%s17638_s29 + $0xe28] sm:$0xf0]  ;;  %3552 = vmatmul.bf16.vlgmr.msrb.gmra.mxu0 %v13176_v19  ;;  %v7421_v19 = vld [vmem:[%s17638_s29 + $0x110] sm:$0xf]  ;;  %v7646_v21 = vor.u32 %v10953_v44, %v7645_v40 }
 0x19e   :  { %v9082_v51 = vor.u32 %v11308_v41, %v9079_v42  ;;  %3577 = vmatpush.bf16.msrb.mxu2 %v8826_v26  ;;  %3596 = vmatpush.bf16.msra.mxu0 %v7518_v52  ;;  %v3346_v41 = vadd.f32 %v3345_v35, %v13471_v3  ;;  %v3358_v42 = vpop.f32.mrf.mxu1  ;;  %v11081_v3 = vld [vmem:[%s17638_s29 + $0x6ec] sm:$0xf0] }
 0x19f   :  { %3565 = vmatmul.bf16.vlgmr.msrb.gmra.mxu1 %v13188_v28  ;;  %v10961_v28 = vld [vmem:[%s17638_s29 + $0x32c] sm:$0xf0]  ;;  %v8158_v52 = vor.u32 %v11081_v3, %v8157_v20 }
 0x1a0   :  { %3590 = vmatpush.bf16.msrb.mxu3 %v9082_v51  ;;  %3609 = vmatpush.bf16.msra.mxu1 %v7774_v54  ;;  %v7678_v36 = vor.u32 %v10961_v28, %v7677_v18  ;;  %v3359_v47 = vadd.f32 %v3358_v42, %v3346_v41  ;;  %v7357_v26 = vld [vmem:[%s17638_s29 + $0x90] sm:$0xf]  ;;  %v3371_v51 = vpop.f32.mrf.mxu2 }
 0x1a1   :  { %3578 = vmatmul.bf16.vlgmr.msrb.gmra.mxu2 %v13164_v15  ;;  %v8221_v15 = vld [vmem:[%s17638_s29 + $0x750] sm:$0xf]  ;;  %v7358_v60 = vor.u32 %v10881_v49, %v7357_v26 }
 0x1a2   :  { %3622 = vmatpush.bf16.msra.mxu2 %v8030_v53  ;;  %3597 = vmatpush.bf16.msra.mxu0 %v7486_v1  ;;  %v8222_v24 = vor.u32 %v11097_v10, %v8221_v15  ;;  %v10945_v54 = vld [vmem:[%s17638_s29 + $0x2ac] sm:$0xf0]  ;;  %v3372_v56 = vadd.f32 %v3371_v51, %v3359_v47  ;;  %v3347_v62 = vpop.f32.mrf.mxu0 }
 0x1a3   :  { %3591 = vmatmul.bf16.vlgmr.msrb.gmra.mxu3 %v13179_v23  ;;  %v10897_v23 = vld [vmem:[%s17638_s29 + $0x12c] sm:$0xf0]  ;;  %v7614_v0 = vor.u32 %v10945_v54, %v7613_v50 }
 0x1a4   :  { %3635 = vmatpush.bf16.msra.mxu3 %v8286_v58  ;;  %3610 = vmatpush.bf16.msra.mxu1 %v7742_v2  ;;  %v7422_v34 = vor.u32 %v10897_v23, %v7421_v19  ;;  %v7869_v53 = vld [vmem:[%s17638_s29 + $0x490] sm:$0xf]  ;;  %v13670_v61 = vadd.f32 %v3384_v57, %v3372_v56 }
 0x1a5   :  { %v11009_v55 = vld [vmem:[%s17638_s29 + $0x4ac] sm:$0xf0] }
 0x1a6   :  { %3623 = vmatpush.bf16.msra.mxu2 %v7998_v29  ;;  %3598 = vmatpush.bf16.msra.mxu0 %v7454_v11  ;;  %v8125_v58 = vld [vmem:[%s17638_s29 + $0x690] sm:$0xf]  ;;  %v7870_v1 = vor.u32 %v11009_v55, %v7869_v53  ;;  %v3360_v5 = vpop.f32.mrf.mxu1 }
 0x1a7   :  { %v11073_v59 = vld [vmem:[%s17638_s29 + $0x6ac] sm:$0xf0] }
 0x1a8   :  { %3636 = vmatpush.bf16.msra.mxu3 %v8254_v31  ;;  %3611 = vmatpush.bf16.msra.mxu1 %v7710_v14  ;;  %v7325_v2 = vld [vmem:[%s17638_s29 + $0x50] sm:$0xf]  ;;  %v8126_v6 = vor.u32 %v11073_v59, %v8125_v58  ;;  %v3373_v28 = vpop.f32.mrf.mxu2 }
 0x1a9   :  { %v10873_v29 = vld [vmem:[%s17638_s29 + $0x6c] sm:$0xf0] }
 0x1aa   :  { %3624 = vmatpush.bf16.msra.mxu2 %v7966_v16  ;;  %3599 = vmatpush.bf16.msra.mxu0 %v7422_v34  ;;  %v7581_v4 = vld [vmem:[%s17638_s29 + $0x250] sm:$0xf]  ;;  %v7326_v10 = vor.u32 %v10873_v29, %v7325_v2  ;;  %v3386_v34 = vpop.f32.mrf.mxu3 }
 0x1ab   :  { %v10937_v31 = vld [vmem:[%s17638_s29 + $0x26c] sm:$0xf0] }
 0x1ac   :  { %3637 = vmatpush.bf16.msra.mxu3 %v8222_v24  ;;  %3612 = vmatpush.bf16.msra.mxu1 %v7678_v36  ;;  %v7837_v7 = vld [vmem:[%s17638_s29 + $0x450] sm:$0xf]  ;;  %v7582_v16 = vor.u32 %v10937_v31, %v7581_v4 }
 0x1ad   :  { %v11001_v8 = vld [vmem:[%s17638_s29 + $0x46c] sm:$0xf0] }
 0x1ae   :  { %3625 = vmatpush.bf16.msra.mxu2 %v7934_v37  ;;  %3600 = vmatpush.bf16.msra.mxu0 %v7390_v48  ;;  %v8093_v38 = vld [vmem:[%s17638_s29 + $0x650] sm:$0xf]  ;;  %v7838_v19 = vor.u32 %v11001_v8, %v7837_v7 }
 0x1af   :  { %v11065_v15 = vld [vmem:[%s17638_s29 + $0x66c] sm:$0xf0] }
 0x1b0   :  { %3638 = vmatpush.bf16.msra.mxu3 %v8190_v43  ;;  %3613 = vmatpush.bf16.msra.mxu1 %v7646_v21  ;;  %v7293_v11 = vld [vmem:[%s17638_s29 + $0x10] sm:$0xf]  ;;  %v8094_v25 = vor.u32 %v11065_v15, %v8093_v38 }
 0x1b1   :  { %v10865_v14 = vld [vmem:[%s17638_s29 + $0x2c] sm:$0xf0] }
 0x1b2   :  { %3626 = vmatpush.bf16.msra.mxu2 %v7902_v22  ;;  %3601 = vmatpush.bf16.msra.mxu0 %v7358_v60  ;;  %v7549_v23 = vld [vmem:[%s17638_s29 + $0x210] sm:$0xf]  ;;  %v7294_v63 = vor.u32 %v10865_v14, %v7293_v11 }
 0x1b3   :  { %v10929_v18 = vld [vmem:[%s17638_s29 + $0x22c] sm:$0xf0] }
 0x1b4   :  { %3639 = vmatpush.bf16.msra.mxu3 %v8158_v52  ;;  %3614 = vmatpush.bf16.msra.mxu1 %v7614_v0  ;;  %v7805_v24 = vld [vmem:[%s17638_s29 + $0x410] sm:$0xf]  ;;  %v7550_v42 = vor.u32 %v10929_v18, %v7549_v23 }
 0x1b5   :  { %v10993_v27 = vld [vmem:[%s17638_s29 + $0x42c] sm:$0xf0] }
 0x1b6   :  { %3627 = vmatpush.bf16.msra.mxu2 %v7870_v1  ;;  %v8061_v30 = vld [vmem:[%s17638_s29 + $0x610] sm:$0xf]  ;;  %3602 = vmatpush.bf16.msra.mxu0 %v7326_v10  ;;  %v7806_v43 = vor.u32 %v10993_v27, %v7805_v24  ;;  %v3410_v27 = vpop.f32.mrf.mxu1 }
 0x1b7   :  { %v11057_v33 = vld [vmem:[%s17638_s29 + $0x62c] sm:$0xf0] }
 0x1b8   :  { %3640 = vmatpush.bf16.msra.mxu3 %v8126_v6  ;;  %v8541_v35 = vld [vmem:[%s17638_s29 + $0x9d0] sm:$0xf]  ;;  %3615 = vmatpush.bf16.msra.mxu1 %v7582_v16  ;;  %v8062_v46 = vor.u32 %v11057_v33, %v8061_v30  ;;  %v3397_v16 = vpop.f32.mrf.mxu0 }
 0x1b9   :  { %v11177_v36 = vld [vmem:[%s17638_s29 + $0x9ec] sm:$0xf0] }
 0x1ba   :  { %v8797_v37 = vld [vmem:[%s17638_s29 + $0xbd0] sm:$0xf]  ;;  %3628 = vmatpush.bf16.msra.mxu2 %v7838_v19  ;;  %v8542_v20 = vor.u32 %v11177_v36, %v8541_v35  ;;  %3603 = vmatpush.bf16.msra.mxu0 %v7294_v63 }
 0x1bb   :  { %v11241_v39 = vld [vmem:[%s17638_s29 + $0xbec] sm:$0xf0] }
 0x1bc   :  { %v9053_v40 = vld [vmem:[%s17638_s29 + $0xdd0] sm:$0xf]  ;;  %3641 = vmatpush.bf16.msra.mxu3 %v8094_v25  ;;  %v8798_v3 = vor.u32 %v11241_v39, %v8797_v37  ;;  %3616 = vmatpush.bf16.msra.mxu1 %v7550_v42 }
 0x1bd   :  { %v11305_v41 = vld [vmem:[%s17638_s29 + $0xdec] sm:$0xf0]  ;;  %3604 = vmatmul.bf16.vlgmr.msra.gmra.mxu0 %v13389_v12 }
 0x1be   :  { %v9309_v44 = vld [vmem:[%s17638_s29 + $0xfd0] sm:$0xf]  ;;  %v9054_v47 = vor.u32 %v11305_v41, %v9053_v40  ;;  %3629 = vmatpush.bf16.msra.mxu2 %v7806_v43  ;;  %3648 = vmatpush.bf16.msrb.mxu0 %v8542_v20 }
 0x1bf   :  { %v11369_v45 = vld [vmem:[%s17638_s29 + $0xfec] sm:$0xf0]  ;;  %3617 = vmatmul.bf16.vlgmr.msra.gmra.mxu1 %v13398_v17 }
 0x1c0   :  { %v8509_v48 = vld [vmem:[%s17638_s29 + $0x990] sm:$0xf]  ;;  %v9310_v26 = vor.u32 %v11369_v45, %v9309_v44  ;;  %3642 = vmatpush.bf16.msra.mxu3 %v8062_v46  ;;  %3661 = vmatpush.bf16.msrb.mxu1 %v8798_v3  ;;  %v3423_v45 = vpop.f32.mrf.mxu2 }
 0x1c1   :  { %v11169_v21 = vld [vmem:[%s17638_s29 + $0x9ac] sm:$0xf0]  ;;  %3630 = vmatmul.bf16.vlgmr.msra.gmra.mxu2 %v13380_v9 }
 0x1c2   :  { %v8765_v22 = vld [vmem:[%s17638_s29 + $0xb90] sm:$0xf]  ;;  %v8510_v53 = vor.u32 %v11169_v21, %v8509_v48  ;;  %3674 = vmatpush.bf16.msrb.mxu2 %v9054_v47  ;;  %v3436_v21 = vpop.f32.mrf.mxu3 }
 0x1c3   :  { %v11233_v49 = vld [vmem:[%s17638_s29 + $0xbac] sm:$0xf0]  ;;  %3643 = vmatmul.bf16.vlgmr.msra.gmra.mxu3 %v13392_v13  ;;  %v13808_v13 = vld [vmem:[%s17640_s4] sm:$0xff] }
 0x1c4   :  { %v9021_v50 = vld [vmem:[%s17638_s29 + $0xd90] sm:$0xf]  ;;  %v8766_v55 = vor.u32 %v11233_v49, %v8765_v22  ;;  %3687 = vmatpush.bf16.msrb.mxu3 %v9310_v26  ;;  %3649 = vmatpush.bf16.msrb.mxu0 %v8510_v53  ;;  %v588_v7 = vperm.slane %v13808_v13, 2 }
 0x1c5   :  { %v11297_v51 = vld [vmem:[%s17638_s29 + $0xdac] sm:$0xf0] }
 0x1c6   :  { %v9277_v52 = vld [vmem:[%s17638_s29 + $0xf90] sm:$0xf]  ;;  %v9022_v56 = vor.u32 %v11297_v51, %v9021_v50  ;;  %3662 = vmatpush.bf16.msrb.mxu1 %v8766_v55  ;;  %v3398_v25 = vadd.f32 %v3397_v16, %v588_v7  ;;  %v3399_v51 = vpop.f32.mrf.mxu0  ;;  %v10981_v16 = vld [vmem:[%s17638_s29 + $0x3d4] sm:$0xf] }
 0x1c7   :  { %v11361_v54 = vld [vmem:[%s17638_s29 + $0xfac] sm:$0xf0]  ;;  %v11029_v51 = vld [vmem:[%s17638_s29 + $0x554] sm:$0xf] }
 0x1c8   :  { %v8477_v57 = vld [vmem:[%s17638_s29 + $0x950] sm:$0xf]  ;;  %v9278_v60 = vor.u32 %v11361_v54, %v9277_v52  ;;  %3675 = vmatpush.bf16.msrb.mxu2 %v9022_v56  ;;  %v3411_v63 = vadd.f32 %v3410_v27, %v3398_v25  ;;  %v3425_v7 = vpop.f32.mrf.mxu2  ;;  %v11109_v27 = vld [vmem:[%s17638_s29 + $0x7d4] sm:$0xf] }
 0x1c9   :  { %v11161_v58 = vld [vmem:[%s17638_s29 + $0x96c] sm:$0xf0] }
 0x1ca   :  { %v8733_v59 = vld [vmem:[%s17638_s29 + $0xb50] sm:$0xf]  ;;  %v8478_v4 = vor.u32 %v11161_v58, %v8477_v57  ;;  %3688 = vmatpush.bf16.msrb.mxu3 %v9278_v60  ;;  %v3424_v48 = vadd.f32 %v3423_v45, %v3411_v63  ;;  %v3412_v57 = vpop.f32.mrf.mxu1  ;;  %v7487_v63 = vld [vmem:[%s17638_s29 + $0x1b0] sm:$0xf0] }
 0x1cb   :  { %v11225_v62 = vld [vmem:[%s17638_s29 + $0xb6c] sm:$0xf0]  ;;  %v8255_v45 = vld [vmem:[%s17638_s29 + $0x7b0] sm:$0xf0] }
 0x1cc   :  { %v8989_v0 = vld [vmem:[%s17638_s29 + $0xd50] sm:$0xf]  ;;  %v8734_v9 = vor.u32 %v11225_v62, %v8733_v59  ;;  %3650 = vmatpush.bf16.msrb.mxu0 %v8478_v4  ;;  %v13874_v50 = vadd.f32 %v3436_v21, %v3424_v48  ;;  %v7455_v48 = vld [vmem:[%s17638_s29 + $0x170] sm:$0xf0] }
 0x1cd   :  { %v11289_v1 = vld [vmem:[%s17638_s29 + $0xd6c] sm:$0xf0]  ;;  %v10965_v21 = vld [vmem:[%s17638_s29 + $0x354] sm:$0xf] }
 0x1ce   :  { %v9245_v2 = vld [vmem:[%s17638_s29 + $0xf50] sm:$0xf]  ;;  %v8990_v6 = vor.u32 %v11289_v1, %v8989_v0  ;;  %3663 = vmatpush.bf16.msrb.mxu1 %v8734_v9 }
 0x1cf   :  { %v11353_v29 = vld [vmem:[%s17638_s29 + $0xf6c] sm:$0xf0] }
 0x1d0   :  { %v8445_v5 = vld [vmem:[%s17638_s29 + $0x910] sm:$0xf]  ;;  %v9246_v17 = vor.u32 %v11353_v29, %v9245_v2  ;;  %3676 = vmatpush.bf16.msrb.mxu2 %v8990_v6 }
 0x1d1   :  { %v11153_v31 = vld [vmem:[%s17638_s29 + $0x92c] sm:$0xf0] }
 0x1d2   :  { %v8701_v12 = vld [vmem:[%s17638_s29 + $0xb10] sm:$0xf]  ;;  %v8446_v14 = vor.u32 %v11153_v31, %v8445_v5  ;;  %3689 = vmatpush.bf16.msrb.mxu3 %v9246_v17 }
 0x1d3   :  { %v11217_v8 = vld [vmem:[%s17638_s29 + $0xb2c] sm:$0xf0] }
 0x1d4   :  { %v8957_v38 = vld [vmem:[%s17638_s29 + $0xd10] sm:$0xf]  ;;  %v8702_v19 = vor.u32 %v11217_v8, %v8701_v12  ;;  %3651 = vmatpush.bf16.msrb.mxu0 %v8446_v14  ;;  %v7519_v14 = vld [vmem:[%s17638_s29 + $0x1f0] sm:$0xf0] }
 0x1d5   :  { %v11281_v15 = vld [vmem:[%s17638_s29 + $0xd2c] sm:$0xf0] }
 0x1d6   :  { %v9213_v10 = vld [vmem:[%s17638_s29 + $0xf10] sm:$0xf]  ;;  %v8958_v23 = vor.u32 %v11281_v15, %v8957_v38  ;;  %3664 = vmatpush.bf16.msrb.mxu1 %v8702_v19 }
 0x1d7   :  { %v11345_v11 = vld [vmem:[%s17638_s29 + $0xf2c] sm:$0xf0] }
 0x1d8   :  { %v8413_v18 = vld [vmem:[%s17638_s29 + $0x8d0] sm:$0xf]  ;;  %v9214_v30 = vor.u32 %v11345_v11, %v9213_v10  ;;  %3677 = vmatpush.bf16.msrb.mxu2 %v8958_v23  ;;  %v3438_v10 = vpop.f32.mrf.mxu3  ;;  %v10917_v11 = vld [vmem:[%s17638_s29 + $0x1d4] sm:$0xf] }
 0x1d9   :  { %v11145_v24 = vld [vmem:[%s17638_s29 + $0x8ec] sm:$0xf0]  ;;  %v7775_v23 = vld [vmem:[%s17638_s29 + $0x3f0] sm:$0xf0] }
 0x1da   :  { %v8669_v28 = vld [vmem:[%s17638_s29 + $0xad0] sm:$0xf]  ;;  %v8414_v39 = vor.u32 %v11145_v24, %v8413_v18  ;;  %3690 = vmatpush.bf16.msrb.mxu3 %v9214_v30  ;;  %v11045_v18 = vld [vmem:[%s17638_s29 + $0x5d4] sm:$0xf] }
 0x1db   :  { %v11209_v33 = vld [vmem:[%s17638_s29 + $0xaec] sm:$0xf0]  ;;  %v8031_v24 = vld [vmem:[%s17638_s29 + $0x5f0] sm:$0xf0] }
 0x1dc   :  { %v8925_v34 = vld [vmem:[%s17638_s29 + $0xcd0] sm:$0xf]  ;;  %v8670_v40 = vor.u32 %v11209_v33, %v8669_v28  ;;  %3652 = vmatpush.bf16.msrb.mxu0 %v8414_v39  ;;  %v8287_v30 = vld [vmem:[%s17638_s29 + $0x7f0] sm:$0xf0] }
 0x1dd   :  { %v11273_v35 = vld [vmem:[%s17638_s29 + $0xcec] sm:$0xf0]  ;;  %v10973_v39 = vld [vmem:[%s17638_s29 + $0x394] sm:$0xf] }
 0x1de   :  { %v9181_v36 = vld [vmem:[%s17638_s29 + $0xed0] sm:$0xf]  ;;  %v8926_v41 = vor.u32 %v11273_v35, %v8925_v34  ;;  %3665 = vmatpush.bf16.msrb.mxu1 %v8670_v40  ;;  %v7522_v34 = vor.u32 %v10917_v11, %v7519_v14  ;;  %v7778_v35 = vor.u32 %v10981_v16, %v7775_v23  ;;  %v8290_v40 = vor.u32 %v11109_v27, %v8287_v30  ;;  %v3462_v11 = vpop.f32.mrf.mxu1  ;;  %v7647_v16 = vld [vmem:[%s17638_s29 + $0x2f0] sm:$0xf0] }
 0x1df   :  { %v11337_v37 = vld [vmem:[%s17638_s29 + $0xeec] sm:$0xf0]  ;;  %v7903_v23 = vld [vmem:[%s17638_s29 + $0x4f0] sm:$0xf0] }
 0x1e0   :  { %v8381_v42 = vld [vmem:[%s17638_s29 + $0x890] sm:$0xf]  ;;  %v9182_v46 = vor.u32 %v11337_v37, %v9181_v36  ;;  %3678 = vmatpush.bf16.msrb.mxu2 %v8926_v41  ;;  %v8034_v36 = vor.u32 %v11045_v18, %v8031_v24  ;;  %v10909_v37 = vld [vmem:[%s17638_s29 + $0x194] sm:$0xf] }
 0x1e1   :  { %v11137_v43 = vld [vmem:[%s17638_s29 + $0x8ac] sm:$0xf0]  ;;  %v7743_v41 = vld [vmem:[%s17638_s29 + $0x3b0] sm:$0xf0] }
 0x1e2   :  { %v8637_v44 = vld [vmem:[%s17638_s29 + $0xa90] sm:$0xf]  ;;  %v8382_v49 = vor.u32 %v11137_v43, %v8381_v42  ;;  %3691 = vmatpush.bf16.msrb.mxu3 %v9182_v46  ;;  %v11037_v42 = vld [vmem:[%s17638_s29 + $0x594] sm:$0xf]  ;;  %v7490_v46 = vor.u32 %v10909_v37, %v7487_v63 }
 0x1e3   :  { %v11201_v20 = vld [vmem:[%s17638_s29 + $0xaac] sm:$0xf0]  ;;  %v7999_v43 = vld [vmem:[%s17638_s29 + $0x5b0] sm:$0xf0] }
 0x1e4   :  { %v8893_v3 = vld [vmem:[%s17638_s29 + $0xc90] sm:$0xf]  ;;  %v8638_v52 = vor.u32 %v11201_v20, %v8637_v44  ;;  %3653 = vmatpush.bf16.msrb.mxu0 %v8382_v49  ;;  %v11101_v44 = vld [vmem:[%s17638_s29 + $0x794] sm:$0xf]  ;;  %v7746_v20 = vor.u32 %v10973_v39, %v7743_v41  ;;  %v3488_v41 = vpop.f32.mrf.mxu3 }
 0x1e5   :  { %v11265_v47 = vld [vmem:[%s17638_s29 + $0xcac] sm:$0xf0]  ;;  %v7711_v49 = vld [vmem:[%s17638_s29 + $0x370] sm:$0xf0] }
 0x1e6   :  { %v9149_v22 = vld [vmem:[%s17638_s29 + $0xe90] sm:$0xf]  ;;  %v8894_v54 = vor.u32 %v11265_v47, %v8893_v3  ;;  %3666 = vmatpush.bf16.msrb.mxu1 %v8638_v52  ;;  %v8002_v3 = vor.u32 %v11037_v42, %v7999_v43  ;;  %v10901_v47 = vld [vmem:[%s17638_s29 + $0x154] sm:$0xf] }
 0x1e7   :  { %v11329_v26 = vld [vmem:[%s17638_s29 + $0xeac] sm:$0xf0]  ;;  %v7967_v52 = vld [vmem:[%s17638_s29 + $0x570] sm:$0xf0]  ;;  %v7458_v57 = vor.u32 %v10901_v47, %v7455_v48 }
 0x1e8   :  { %v8349_v53 = vld [vmem:[%s17638_s29 + $0x850] sm:$0xf]  ;;  %v9150_v58 = vor.u32 %v11329_v26, %v9149_v22  ;;  %3679 = vmatpush.bf16.msrb.mxu2 %v8894_v54  ;;  %v8258_v22 = vor.u32 %v11101_v44, %v8255_v45  ;;  %v13981_v26 = vld [vmem:[#allocation1 + $0x36] sm:$0xff]  ;;  %v13993_v54 = vld [vmem:[#allocation1 + $0x24] sm:$0xff] }
 0x1e9   :  { %v11129_v55 = vld [vmem:[%s17638_s29 + $0x86c] sm:$0xf0]  ;;  %v11077_v18 = vld [vmem:[%s17638_s29 + $0x6d4] sm:$0xf] }
 0x1ea   :  { %v8605_v56 = vld [vmem:[%s17638_s29 + $0xa50] sm:$0xf]  ;;  %v8350_v2 = vor.u32 %v11129_v55, %v8349_v53  ;;  %3692 = vmatpush.bf16.msrb.mxu3 %v9150_v58  ;;  %v13996_v53 = vld [vmem:[#allocation1 + $0x3f] sm:$0xff]  ;;  %v11093_v55 = vld [vmem:[%s17638_s29 + $0x754] sm:$0xf] }
 0x1eb   :  { %v11193_v59 = vld [vmem:[%s17638_s29 + $0xa6c] sm:$0xf0]  ;;  %v10877_v30 = vld [vmem:[%s17638_s29 + $0x94] sm:$0xf] }
 0x1ec   :  { %v8861_v60 = vld [vmem:[%s17638_s29 + $0xc50] sm:$0xf]  ;;  %v8606_v5 = vor.u32 %v11193_v59, %v8605_v56  ;;  %3654 = vmatpush.bf16.msrb.mxu0 %v8350_v2  ;;  %v8223_v56 = vld [vmem:[%s17638_s29 + $0x770] sm:$0xf0]  ;;  %v7714_v59 = vor.u32 %v10965_v21, %v7711_v49 }
 0x1ed   :  { %v11257_v62 = vld [vmem:[%s17638_s29 + $0xc6c] sm:$0xf0]  ;;  %v8226_v2 = vor.u32 %v11093_v55, %v8223_v56  ;;  %v7615_v37 = vld [vmem:[%s17638_s29 + $0x2b0] sm:$0xf0] }
 0x1ee   :  { %v9117_v0 = vld [vmem:[%s17638_s29 + $0xe50] sm:$0xf]  ;;  %v8862_v9 = vor.u32 %v11257_v62, %v8861_v60  ;;  %3667 = vmatpush.bf16.msrb.mxu1 %v8606_v5  ;;  %v7970_v60 = vor.u32 %v11029_v51, %v7967_v52  ;;  %v10893_v62 = vld [vmem:[%s17638_s29 + $0x114] sm:$0xf] }
 0x1ef   :  { %v11321_v1 = vld [vmem:[%s17638_s29 + $0xe6c] sm:$0xf0]  ;;  %v7935_v5 = vld [vmem:[%s17638_s29 + $0x530] sm:$0xf0] }
 0x1f0   :  { %v8317_v29 = vld [vmem:[%s17638_s29 + $0x810] sm:$0xf]  ;;  %v9118_v17 = vor.u32 %v11321_v1, %v9117_v0  ;;  %3680 = vmatpush.bf16.msrb.mxu2 %v8862_v9  ;;  %v7423_v0 = vld [vmem:[%s17638_s29 + $0x130] sm:$0xf0] }
 0x1f1   :  { %v11121_v4 = vld [vmem:[%s17638_s29 + $0x82c] sm:$0xf0]  ;;  %v10957_v1 = vld [vmem:[%s17638_s29 + $0x314] sm:$0xf] }
 0x1f2   :  { %v8573_v6 = vld [vmem:[%s17638_s29 + $0xa10] sm:$0xf]  ;;  %v8318_v19 = vor.u32 %v11121_v4, %v8317_v29  ;;  %3693 = vmatpush.bf16.msrb.mxu3 %v9118_v17  ;;  %v7679_v29 = vld [vmem:[%s17638_s29 + $0x330] sm:$0xf0] }
 0x1f3   :  { %v11185_v31 = vld [vmem:[%s17638_s29 + $0xa2c] sm:$0xf0]  ;;  %v11021_v4 = vld [vmem:[%s17638_s29 + $0x514] sm:$0xf]  ;;  %v7682_v7 = vor.u32 %v10957_v1, %v7679_v29 }
 0x1f4   :  { %v8829_v12 = vld [vmem:[%s17638_s29 + $0xc10] sm:$0xf]  ;;  %v8574_v28 = vor.u32 %v11185_v31, %v8573_v6  ;;  %3655 = vmatpush.bf16.msrb.mxu0 %v8318_v19  ;;  %v11085_v9 = vld [vmem:[%s17638_s29 + $0x714] sm:$0xf]  ;;  %v7426_v31 = vor.u32 %v10893_v62, %v7423_v0  ;;  %v7938_v17 = vor.u32 %v11021_v4, %v7935_v5 }
 0x1f5   :  { %v11249_v8 = vld [vmem:[%s17638_s29 + $0xc2c] sm:$0xf0]  ;;  %v8191_v6 = vld [vmem:[%s17638_s29 + $0x730] sm:$0xf0] }
 0x1f6   :  { %v9085_v38 = vld [vmem:[%s17638_s29 + $0xe10] sm:$0xf]  ;;  %v8830_v25 = vor.u32 %v11249_v8, %v8829_v12  ;;  %3668 = vmatpush.bf16.msrb.mxu1 %v8574_v28  ;;  %v3449_v12 = vpop.f32.mrf.mxu0  ;;  %v10885_v8 = vld [vmem:[%s17638_s29 + $0xd4] sm:$0xf]  ;;  %v8194_v14 = vor.u32 %v11085_v9, %v8191_v6 }
 0x1f7   :  { %v11313_v15 = vld [vmem:[%s17638_s29 + $0xe2c] sm:$0xf0]  ;;  %3656 = vmatmul.bf16.vlgmr.msrb.gmra.mxu0 %v13993_v54  ;;  %v3450_v10 = vadd.f32 %v3449_v12, %v13874_v50  ;;  %v11013_v19 = vld [vmem:[%s17638_s29 + $0x4d4] sm:$0xf] }
 0x1f8   :  { %v9086_v33 = vor.u32 %v11313_v15, %v9085_v38  ;;  %3681 = vmatpush.bf16.msrb.mxu2 %v8830_v25  ;;  %3700 = vmatpush.bf16.msra.mxu0 %v7522_v34  ;;  %v14005_v58 = vld [vmem:[#allocation1 + $0x2d] sm:$0xff]  ;;  %v7906_v27 = vor.u32 %v11013_v19, %v7903_v23 }
 0x1f9   :  { %3669 = vmatmul.bf16.vlgmr.msrb.gmra.mxu1 %v14005_v58  ;;  %v7391_v38 = vld [vmem:[%s17638_s29 + $0xf0] sm:$0xf0]  ;;  %v3463_v24 = vadd.f32 %v3462_v11, %v3450_v10 }
 0x1fa   :  { %3694 = vmatpush.bf16.msrb.mxu3 %v9086_v33  ;;  %3713 = vmatpush.bf16.msra.mxu1 %v7778_v35  ;;  %v10949_v15 = vld [vmem:[%s17638_s29 + $0x2d4] sm:$0xf]  ;;  %v7394_v28 = vor.u32 %v10885_v8, %v7391_v38  ;;  %v3475_v35 = vpop.f32.mrf.mxu2 }
 0x1fb   :  { %3682 = vmatmul.bf16.vlgmr.msrb.gmra.mxu2 %v13981_v26  ;;  %v8159_v50 = vld [vmem:[%s17638_s29 + $0x6f0] sm:$0xf0]  ;;  %v7650_v25 = vor.u32 %v10949_v15, %v7647_v16 }
 0x1fc   :  { %3726 = vmatpush.bf16.msra.mxu2 %v8034_v36  ;;  %3701 = vmatpush.bf16.msra.mxu0 %v7490_v46  ;;  %v7359_v33 = vld [vmem:[%s17638_s29 + $0xb0] sm:$0xf0]  ;;  %v8162_v36 = vor.u32 %v11077_v18, %v8159_v50 }
 0x1fd   :  { %3695 = vmatmul.bf16.vlgmr.msrb.gmra.mxu3 %v13996_v53  ;;  %v10941_v34 = vld [vmem:[%s17638_s29 + $0x294] sm:$0xf]  ;;  %v7362_v44 = vor.u32 %v10877_v30, %v7359_v33 }
 0x1fe   :  { %3739 = vmatpush.bf16.msra.mxu3 %v8290_v40  ;;  %3714 = vmatpush.bf16.msra.mxu1 %v7746_v20  ;;  %v11005_v63 = vld [vmem:[%s17638_s29 + $0x494] sm:$0xf]  ;;  %v3476_v40 = vadd.f32 %v3475_v35, %v3463_v24  ;;  %v3451_v46 = vpop.f32.mrf.mxu0  ;;  %v7618_v20 = vor.u32 %v10941_v34, %v7615_v37 }
 0x1ff   :  { %v7871_v39 = vld [vmem:[%s17638_s29 + $0x4b0] sm:$0xf0] }
 0x200   :  { %3727 = vmatpush.bf16.msra.mxu2 %v8002_v3  ;;  %3702 = vmatpush.bf16.msra.mxu0 %v7458_v57  ;;  %v11069_v42 = vld [vmem:[%s17638_s29 + $0x694] sm:$0xf]  ;;  %v14081_v45 = vadd.f32 %v3488_v41, %v3476_v40  ;;  %v7874_v3 = vor.u32 %v11005_v63, %v7871_v39 }
 0x201   :  { %v8127_v43 = vld [vmem:[%s17638_s29 + $0x6b0] sm:$0xf0] }
 0x202   :  { %3740 = vmatpush.bf16.msra.mxu3 %v8258_v22  ;;  %3715 = vmatpush.bf16.msra.mxu1 %v7714_v59  ;;  %v10869_v47 = vld [vmem:[%s17638_s29 + $0x54] sm:$0xf]  ;;  %v3464_v22 = vpop.f32.mrf.mxu1  ;;  %v8130_v49 = vor.u32 %v11069_v42, %v8127_v43  ;;  %v3477_v5 = vpop.f32.mrf.mxu2 }
 0x203   :  { %v7327_v48 = vld [vmem:[%s17638_s29 + $0x70] sm:$0xf0] }
 0x204   :  { %3728 = vmatpush.bf16.msra.mxu2 %v7970_v60  ;;  %3703 = vmatpush.bf16.msra.mxu0 %v7426_v31  ;;  %v10933_v21 = vld [vmem:[%s17638_s29 + $0x254] sm:$0xf]  ;;  %v7330_v59 = vor.u32 %v10869_v47, %v7327_v48 }
 0x205   :  { %v7583_v51 = vld [vmem:[%s17638_s29 + $0x270] sm:$0xf0] }
 0x206   :  { %3741 = vmatpush.bf16.msra.mxu3 %v8226_v2  ;;  %3716 = vmatpush.bf16.msra.mxu1 %v7682_v7  ;;  %v10997_v52 = vld [vmem:[%s17638_s29 + $0x454] sm:$0xf]  ;;  %v7586_v0 = vor.u32 %v10933_v21, %v7583_v51  ;;  %v3490_v7 = vpop.f32.mrf.mxu3  ;;  %v14206_v51 = vld [vmem:[#allocation1] sm:$0xff] }
 0x207   :  { %v7839_v55 = vld [vmem:[%s17638_s29 + $0x470] sm:$0xf0] }
 0x208   :  { %3729 = vmatpush.bf16.msra.mxu2 %v7938_v17  ;;  %3704 = vmatpush.bf16.msra.mxu0 %v7394_v28  ;;  %v11061_v56 = vld [vmem:[%s17638_s29 + $0x654] sm:$0xf]  ;;  %v7842_v1 = vor.u32 %v10997_v52, %v7839_v55  ;;  %v14209_v52 = vld [vmem:[#allocation1 + $0x1b] sm:$0xff] }
 0x209   :  { %v8095_v57 = vld [vmem:[%s17638_s29 + $0x670] sm:$0xf0] }
 0x20a   :  { %3742 = vmatpush.bf16.msra.mxu3 %v8194_v14  ;;  %3717 = vmatpush.bf16.msra.mxu1 %v7650_v25  ;;  %v10861_v60 = vld [vmem:[%s17638_s29 + $0x14] sm:$0xf]  ;;  %v8098_v9 = vor.u32 %v11061_v56, %v8095_v57  ;;  %v14215_v57 = vld [vmem:[#allocation1 + $0x9] sm:$0xff] }
 0x20b   :  { %v7295_v62 = vld [vmem:[%s17638_s29 + $0x30] sm:$0xf0] }
 0x20c   :  { %3730 = vmatpush.bf16.msra.mxu2 %v7906_v27  ;;  %3705 = vmatpush.bf16.msra.mxu0 %v7362_v44  ;;  %v10925_v2 = vld [vmem:[%s17638_s29 + $0x214] sm:$0xf]  ;;  %v7298_v15 = vor.u32 %v10861_v60, %v7295_v62 }
 0x20d   :  { %v7551_v29 = vld [vmem:[%s17638_s29 + $0x230] sm:$0xf0] }
 0x20e   :  { %3743 = vmatpush.bf16.msra.mxu3 %v8162_v36  ;;  %3718 = vmatpush.bf16.msra.mxu1 %v7618_v20  ;;  %v10989_v4 = vld [vmem:[%s17638_s29 + $0x414] sm:$0xf]  ;;  %v7554_v16 = vor.u32 %v10925_v2, %v7551_v29 }
 0x20f   :  { %v7807_v6 = vld [vmem:[%s17638_s29 + $0x430] sm:$0xf0] }
 0x210   :  { %3731 = vmatpush.bf16.msra.mxu2 %v7874_v3  ;;  %v11053_v31 = vld [vmem:[%s17638_s29 + $0x614] sm:$0xf]  ;;  %3706 = vmatpush.bf16.msra.mxu0 %v7330_v59  ;;  %v7810_v19 = vor.u32 %v10989_v4, %v7807_v6 }
 0x211   :  { %v8063_v12 = vld [vmem:[%s17638_s29 + $0x630] sm:$0xf0] }
 0x212   :  { %3744 = vmatpush.bf16.msra.mxu3 %v8130_v49  ;;  %v11173_v17 = vld [vmem:[%s17638_s29 + $0x9d4] sm:$0xf]  ;;  %3719 = vmatpush.bf16.msra.mxu1 %v7586_v0  ;;  %v8066_v50 = vor.u32 %v11053_v31, %v8063_v12  ;;  %v3501_v31 = vpop.f32.mrf.mxu0 }
 0x213   :  { %v8543_v8 = vld [vmem:[%s17638_s29 + $0x9f0] sm:$0xf0] }
 0x214   :  { %v11237_v38 = vld [vmem:[%s17638_s29 + $0xbd4] sm:$0xf]  ;;  %3732 = vmatpush.bf16.msra.mxu2 %v7842_v1  ;;  %v8546_v24 = vor.u32 %v11173_v17, %v8543_v8  ;;  %3707 = vmatpush.bf16.msra.mxu0 %v7298_v15  ;;  %v589_v1 = vperm.slane %v13808_v13, 3 }
 0x215   :  { %v8799_v10 = vld [vmem:[%s17638_s29 + $0xbf0] sm:$0xf0] }
 0x216   :  { %v11301_v11 = vld [vmem:[%s17638_s29 + $0xdd4] sm:$0xf]  ;;  %3745 = vmatpush.bf16.msra.mxu3 %v8098_v9  ;;  %v8802_v28 = vor.u32 %v11237_v38, %v8799_v10  ;;  %3720 = vmatpush.bf16.msra.mxu1 %v7554_v16  ;;  %v3502_v15 = vadd.f32 %v3501_v31, %v589_v1  ;;  %v3514_v10 = vpop.f32.mrf.mxu1 }
 0x217   :  { %v9055_v14 = vld [vmem:[%s17638_s29 + $0xdf0] sm:$0xf0]  ;;  %3708 = vmatmul.bf16.vlgmr.msra.gmra.mxu0 %v14206_v51 }
 0x218   :  { %v11365_v23 = vld [vmem:[%s17638_s29 + $0xfd4] sm:$0xf]  ;;  %v9058_v25 = vor.u32 %v11301_v11, %v9055_v14  ;;  %3733 = vmatpush.bf16.msra.mxu2 %v7810_v19  ;;  %3752 = vmatpush.bf16.msrb.mxu0 %v8546_v24 }
 0x219   :  { %v9311_v18 = vld [vmem:[%s17638_s29 + $0xff0] sm:$0xf0]  ;;  %3721 = vmatmul.bf16.vlgmr.msra.gmra.mxu1 %v14215_v57 }
 0x21a   :  { %v11165_v27 = vld [vmem:[%s17638_s29 + $0x994] sm:$0xf]  ;;  %v9314_v34 = vor.u32 %v11365_v23, %v9311_v18  ;;  %3746 = vmatpush.bf16.msra.mxu3 %v8066_v50  ;;  %3765 = vmatpush.bf16.msrb.mxu1 %v8802_v28  ;;  %v3515_v50 = vadd.f32 %v3514_v10, %v3502_v15  ;;  %v7525_v15 = vld [vmem:[%s17638_s29 + $0x1d8] sm:$0xf] }
 0x21b   :  { %v8511_v30 = vld [vmem:[%s17638_s29 + $0x9b0] sm:$0xf0]  ;;  %v10922_v10 = vld [vmem:[%s17638_s29 + $0x1f4] sm:$0xf0] }
 0x21c   :  { %v11229_v33 = vld [vmem:[%s17638_s29 + $0xb94] sm:$0xf]  ;;  %v8514_v40 = vor.u32 %v11165_v27, %v8511_v30  ;;  %3778 = vmatpush.bf16.msrb.mxu2 %v9058_v25 }
 0x21d   :  { %v8767_v35 = vld [vmem:[%s17638_s29 + $0xbb0] sm:$0xf0]  ;;  %3747 = vmatmul.bf16.vlgmr.msra.gmra.mxu3 %v14209_v52 }
 0x21e   :  { %v11293_v36 = vld [vmem:[%s17638_s29 + $0xd94] sm:$0xf]  ;;  %v8770_v41 = vor.u32 %v11229_v33, %v8767_v35  ;;  %3791 = vmatpush.bf16.msrb.mxu3 %v9314_v34  ;;  %3753 = vmatpush.bf16.msrb.mxu0 %v8514_v40  ;;  %v3527_v34 = vpop.f32.mrf.mxu2  ;;  %v3540_v40 = vpop.f32.mrf.mxu3 }
 0x21f   :  { %v9023_v37 = vld [vmem:[%s17638_s29 + $0xdb0] sm:$0xf0] }
 0x220   :  { %v11357_v63 = vld [vmem:[%s17638_s29 + $0xf94] sm:$0xf]  ;;  %v9026_v42 = vor.u32 %v11293_v36, %v9023_v37  ;;  %3766 = vmatpush.bf16.msrb.mxu1 %v8770_v41 }
 0x221   :  { %v9279_v39 = vld [vmem:[%s17638_s29 + $0xfb0] sm:$0xf0] }
 0x222   :  { %v11157_v43 = vld [vmem:[%s17638_s29 + $0x954] sm:$0xf]  ;;  %v9282_v20 = vor.u32 %v11357_v63, %v9279_v39  ;;  %3779 = vmatpush.bf16.msrb.mxu2 %v9026_v42  ;;  %v3528_v39 = vadd.f32 %v3527_v34, %v3515_v50  ;;  %v7493_v34 = vld [vmem:[%s17638_s29 + $0x198] sm:$0xf] }
 0x223   :  { %v8479_v44 = vld [vmem:[%s17638_s29 + $0x970] sm:$0xf0] }
 0x224   :  { %v11221_v46 = vld [vmem:[%s17638_s29 + $0xb54] sm:$0xf]  ;;  %v8482_v55 = vor.u32 %v11157_v43, %v8479_v44  ;;  %3792 = vmatpush.bf16.msrb.mxu3 %v9282_v20  ;;  %v14288_v44 = vadd.f32 %v3540_v40, %v3528_v39  ;;  %v8005_v39 = vld [vmem:[%s17638_s29 + $0x598] sm:$0xf] }
 0x225   :  { %v8735_v3 = vld [vmem:[%s17638_s29 + $0xb70] sm:$0xf0]  ;;  %v11042_v40 = vld [vmem:[%s17638_s29 + $0x5b4] sm:$0xf0] }
 0x226   :  { %v11285_v47 = vld [vmem:[%s17638_s29 + $0xd54] sm:$0xf]  ;;  %v8738_v59 = vor.u32 %v11221_v46, %v8735_v3  ;;  %3754 = vmatpush.bf16.msrb.mxu0 %v8482_v55  ;;  %v3503_v46 = vpop.f32.mrf.mxu0  ;;  %v3529_v31 = vpop.f32.mrf.mxu2 }
 0x227   :  { %v8991_v48 = vld [vmem:[%s17638_s29 + $0xd70] sm:$0xf0] }
 0x228   :  { %v14197_v21 = vld [vmem:[#allocation1 + $0x12] sm:$0xff]  ;;  %v8994_v60 = vor.u32 %v11285_v47, %v8991_v48  ;;  %3767 = vmatpush.bf16.msrb.mxu1 %v8738_v59 }
 0x229   :  { %3734 = vmatmul.bf16.vlgmr.msra.gmra.mxu2 %v14197_v21  ;;  %v11349_v22 = vld [vmem:[%s17638_s29 + $0xf54] sm:$0xf] }
 0x22a   :  { %v9247_v49 = vld [vmem:[%s17638_s29 + $0xf70] sm:$0xf0]  ;;  %3780 = vmatpush.bf16.msrb.mxu2 %v8994_v60 }
 0x22b   :  { %v11149_v56 = vld [vmem:[%s17638_s29 + $0x914] sm:$0xf]  ;;  %v9250_v2 = vor.u32 %v11349_v22, %v9247_v49  ;;  %v3516_v49 = vpop.f32.mrf.mxu1 }
 0x22c   :  { %v8447_v62 = vld [vmem:[%s17638_s29 + $0x930] sm:$0xf0]  ;;  %v10970_v49 = vld [vmem:[%s17638_s29 + $0x374] sm:$0xf0] }
 0x22d   :  { %v11213_v0 = vld [vmem:[%s17638_s29 + $0xb14] sm:$0xf]  ;;  %v8450_v6 = vor.u32 %v11149_v56, %v8447_v62  ;;  %3793 = vmatpush.bf16.msrb.mxu3 %v9250_v2 }
 0x22e   :  { %v8703_v29 = vld [vmem:[%s17638_s29 + $0xb30] sm:$0xf0] }
 0x22f   :  { %v11277_v4 = vld [vmem:[%s17638_s29 + $0xd14] sm:$0xf]  ;;  %v8706_v12 = vor.u32 %v11213_v0, %v8703_v29  ;;  %3755 = vmatpush.bf16.msrb.mxu0 %v8450_v6 }
 0x230   :  { %v8959_v5 = vld [vmem:[%s17638_s29 + $0xd30] sm:$0xf0] }
 0x231   :  { %v11341_v9 = vld [vmem:[%s17638_s29 + $0xf14] sm:$0xf]  ;;  %v8962_v7 = vor.u32 %v11277_v4, %v8959_v5  ;;  %3768 = vmatpush.bf16.msrb.mxu1 %v8706_v12 }
 0x232   :  { %v9215_v13 = vld [vmem:[%s17638_s29 + $0xf30] sm:$0xf0] }
 0x233   :  { %v11141_v17 = vld [vmem:[%s17638_s29 + $0x8d4] sm:$0xf]  ;;  %v9218_v11 = vor.u32 %v11341_v9, %v9215_v13  ;;  %3781 = vmatpush.bf16.msrb.mxu2 %v8962_v7 }
 0x234   :  { %v8415_v8 = vld [vmem:[%s17638_s29 + $0x8f0] sm:$0xf0] }
 0x235   :  { %v11205_v38 = vld [vmem:[%s17638_s29 + $0xad4] sm:$0xf]  ;;  %v8418_v24 = vor.u32 %v11141_v17, %v8415_v8  ;;  %3794 = vmatpush.bf16.msrb.mxu3 %v9218_v11  ;;  %v7781_v11 = vld [vmem:[%s17638_s29 + $0x3d8] sm:$0xf] }
 0x236   :  { %v8671_v14 = vld [vmem:[%s17638_s29 + $0xaf0] sm:$0xf0] }
 0x237   :  { %v11269_v16 = vld [vmem:[%s17638_s29 + $0xcd4] sm:$0xf]  ;;  %v8674_v28 = vor.u32 %v11205_v38, %v8671_v14  ;;  %3756 = vmatpush.bf16.msrb.mxu0 %v8418_v24  ;;  %v3542_v38 = vpop.f32.mrf.mxu3  ;;  %v8293_v24 = vld [vmem:[%s17638_s29 + $0x7d8] sm:$0xf] }
 0x238   :  { %v8927_v19 = vld [vmem:[%s17638_s29 + $0xcf0] sm:$0xf0] }
 0x239   :  { %v11333_v23 = vld [vmem:[%s17638_s29 + $0xed4] sm:$0xf]  ;;  %v8930_v25 = vor.u32 %v11269_v16, %v8927_v19  ;;  %3769 = vmatpush.bf16.msrb.mxu1 %v8674_v28  ;;  %v10986_v16 = vld [vmem:[%s17638_s29 + $0x3f4] sm:$0xf0] }
 0x23a   :  { %v9183_v18 = vld [vmem:[%s17638_s29 + $0xef0] sm:$0xf0]  ;;  %v8037_v19 = vld [vmem:[%s17638_s29 + $0x5d8] sm:$0xf] }
 0x23b   :  { %v11133_v27 = vld [vmem:[%s17638_s29 + $0x894] sm:$0xf]  ;;  %v9186_v35 = vor.u32 %v11333_v23, %v9183_v18  ;;  %3782 = vmatpush.bf16.msrb.mxu2 %v8930_v25  ;;  %v11050_v23 = vld [vmem:[%s17638_s29 + $0x5f4] sm:$0xf0] }
 0x23c   :  { %v8383_v30 = vld [vmem:[%s17638_s29 + $0x8b0] sm:$0xf0]  ;;  %v11114_v28 = vld [vmem:[%s17638_s29 + $0x7f4] sm:$0xf0] }
 0x23d   :  { %v11197_v33 = vld [vmem:[%s17638_s29 + $0xa94] sm:$0xf]  ;;  %v8386_v43 = vor.u32 %v11133_v27, %v8383_v30  ;;  %3795 = vmatpush.bf16.msrb.mxu3 %v9186_v35  ;;  %v7526_v27 = vor.u32 %v10922_v10, %v7525_v15  ;;  %v7782_v30 = vor.u32 %v10986_v16, %v7781_v11  ;;  %v10914_v35 = vld [vmem:[%s17638_s29 + $0x1b4] sm:$0xf0]  ;;  %v3566_v15 = vpop.f32.mrf.mxu1 }
 0x23e   :  { %v8639_v36 = vld [vmem:[%s17638_s29 + $0xab0] sm:$0xf0]  ;;  %v10954_v11 = vld [vmem:[%s17638_s29 + $0x2f4] sm:$0xf0] }
 0x23f   :  { %v11261_v37 = vld [vmem:[%s17638_s29 + $0xc94] sm:$0xf]  ;;  %v8642_v20 = vor.u32 %v11197_v33, %v8639_v36  ;;  %3757 = vmatpush.bf16.msrb.mxu0 %v8386_v43  ;;  %v8038_v33 = vor.u32 %v11050_v23, %v8037_v19  ;;  %v7749_v36 = vld [vmem:[%s17638_s29 + $0x398] sm:$0xf]  ;;  %v7494_v43 = vor.u32 %v10914_v35, %v7493_v34 }
 0x240   :  { %v8895_v63 = vld [vmem:[%s17638_s29 + $0xcb0] sm:$0xf0]  ;;  %v11018_v16 = vld [vmem:[%s17638_s29 + $0x4f4] sm:$0xf0] }
 0x241   :  { %v11325_v41 = vld [vmem:[%s17638_s29 + $0xe94] sm:$0xf]  ;;  %v8898_v3 = vor.u32 %v11261_v37, %v8895_v63  ;;  %3770 = vmatpush.bf16.msrb.mxu1 %v8642_v20  ;;  %v8294_v37 = vor.u32 %v11114_v28, %v8293_v24  ;;  %v10978_v63 = vld [vmem:[%s17638_s29 + $0x3b4] sm:$0xf0]  ;;  %v8006_v20 = vor.u32 %v11042_v40, %v8005_v39 }
 0x242   :  { %v9151_v42 = vld [vmem:[%s17638_s29 + $0xeb0] sm:$0xf0]  ;;  %v7750_v46 = vor.u32 %v10978_v63, %v7749_v36  ;;  %v8165_v19 = vld [vmem:[%s17638_s29 + $0x6d8] sm:$0xf]  ;;  %v3592_v63 = vpop.f32.mrf.mxu3 }
 0x243   :  { %v11125_v47 = vld [vmem:[%s17638_s29 + $0x854] sm:$0xf]  ;;  %v9154_v55 = vor.u32 %v11325_v41, %v9151_v42  ;;  %3783 = vmatpush.bf16.msrb.mxu2 %v8898_v3  ;;  %v8261_v41 = vld [vmem:[%s17638_s29 + $0x798] sm:$0xf] }
 0x244   :  { %v8351_v48 = vld [vmem:[%s17638_s29 + $0x870] sm:$0xf0]  ;;  %v11106_v42 = vld [vmem:[%s17638_s29 + $0x7b4] sm:$0xf0] }
 0x245   :  { %v11189_v22 = vld [vmem:[%s17638_s29 + $0xa54] sm:$0xf]  ;;  %v8354_v1 = vor.u32 %v11125_v47, %v8351_v48  ;;  %3796 = vmatpush.bf16.msrb.mxu3 %v9154_v55  ;;  %v7461_v3 = vld [vmem:[%s17638_s29 + $0x158] sm:$0xf] }
 0x246   :  { %v8607_v56 = vld [vmem:[%s17638_s29 + $0xa70] sm:$0xf0]  ;;  %v10906_v47 = vld [vmem:[%s17638_s29 + $0x174] sm:$0xf0] }
 0x247   :  { %v11253_v59 = vld [vmem:[%s17638_s29 + $0xc54] sm:$0xf]  ;;  %v8610_v4 = vor.u32 %v11189_v22, %v8607_v56  ;;  %3758 = vmatpush.bf16.msrb.mxu0 %v8354_v1  ;;  %v7717_v48 = vld [vmem:[%s17638_s29 + $0x358] sm:$0xf]  ;;  %v8262_v22 = vor.u32 %v11106_v42, %v8261_v41 }
 0x248   :  { %v8863_v60 = vld [vmem:[%s17638_s29 + $0xc70] sm:$0xf0]  ;;  %v7973_v55 = vld [vmem:[%s17638_s29 + $0x558] sm:$0xf] }
 0x249   :  { %v11317_v62 = vld [vmem:[%s17638_s29 + $0xe54] sm:$0xf]  ;;  %v8866_v5 = vor.u32 %v11253_v59, %v8863_v60  ;;  %3771 = vmatpush.bf16.msrb.mxu1 %v8610_v4  ;;  %v11034_v56 = vld [vmem:[%s17638_s29 + $0x574] sm:$0xf0]  ;;  %v7462_v60 = vor.u32 %v10906_v47, %v7461_v3 }
 0x24a   :  { %v9119_v0 = vld [vmem:[%s17638_s29 + $0xe70] sm:$0xf0]  ;;  %v11098_v59 = vld [vmem:[%s17638_s29 + $0x774] sm:$0xf0] }
 0x24b   :  { %v11117_v2 = vld [vmem:[%s17638_s29 + $0x814] sm:$0xf]  ;;  %v9122_v12 = vor.u32 %v11317_v62, %v9119_v0  ;;  %3784 = vmatpush.bf16.msrb.mxu2 %v8866_v5  ;;  %v7718_v62 = vor.u32 %v10970_v49, %v7717_v48  ;;  %v7974_v0 = vor.u32 %v11034_v56, %v7973_v55  ;;  %v7685_v1 = vld [vmem:[%s17638_s29 + $0x318] sm:$0xf] }
 0x24c   :  { %v8319_v29 = vld [vmem:[%s17638_s29 + $0x830] sm:$0xf0]  ;;  %v11026_v4 = vld [vmem:[%s17638_s29 + $0x534] sm:$0xf0] }
 0x24d   :  { %v11181_v9 = vld [vmem:[%s17638_s29 + $0xa14] sm:$0xf]  ;;  %v8322_v14 = vor.u32 %v11117_v2, %v8319_v29  ;;  %3797 = vmatpush.bf16.msrb.mxu3 %v9122_v12  ;;  %v7941_v29 = vld [vmem:[%s17638_s29 + $0x518] sm:$0xf] }
 0x24e   :  { %v8575_v13 = vld [vmem:[%s17638_s29 + $0xa30] sm:$0xf0]  ;;  %v8197_v5 = vld [vmem:[%s17638_s29 + $0x718] sm:$0xf]  ;;  %v7942_v12 = vor.u32 %v11026_v4, %v7941_v29 }
 0x24f   :  { %v11245_v6 = vld [vmem:[%s17638_s29 + $0xc14] sm:$0xf]  ;;  %v8578_v18 = vor.u32 %v11181_v9, %v8575_v13  ;;  %3759 = vmatpush.bf16.msrb.mxu0 %v8322_v14  ;;  %v11090_v9 = vld [vmem:[%s17638_s29 + $0x734] sm:$0xf0] }
 0x250   :  { %v8831_v7 = vld [vmem:[%s17638_s29 + $0xc30] sm:$0xf0]  ;;  %v8198_v10 = vor.u32 %v11090_v9, %v8197_v5  ;;  %v7909_v14 = vld [vmem:[%s17638_s29 + $0x4d8] sm:$0xf] }
 0x251   :  { %v11309_v17 = vld [vmem:[%s17638_s29 + $0xe14] sm:$0xf]  ;;  %v8834_v50 = vor.u32 %v11245_v6, %v8831_v7  ;;  %3772 = vmatpush.bf16.msrb.mxu1 %v8578_v18  ;;  %v3553_v6 = vpop.f32.mrf.mxu0  ;;  %v7397_v7 = vld [vmem:[%s17638_s29 + $0xd8] sm:$0xf]  ;;  %v7910_v24 = vor.u32 %v11018_v16, %v7909_v14 }
 0x252   :  { %v9087_v8 = vld [vmem:[%s17638_s29 + $0xe30] sm:$0xf0]  ;;  %3760 = vmatmul.bf16.vlgmr.msrb.gmra.mxu0 %v13993_v54  ;;  %v7429_v54 = vld [vmem:[%s17638_s29 + $0x118] sm:$0xf]  ;;  %v3554_v38 = vadd.f32 %v3553_v6, %v14288_v44 }
 0x253   :  { %v9090_v25 = vor.u32 %v11309_v17, %v9087_v8  ;;  %3785 = vmatpush.bf16.msrb.mxu2 %v8834_v50  ;;  %3804 = vmatpush.bf16.msra.mxu0 %v7526_v27  ;;  %v10890_v17 = vld [vmem:[%s17638_s29 + $0xf4] sm:$0xf0] }
 0x254   :  { %3773 = vmatmul.bf16.vlgmr.msrb.gmra.mxu1 %v14005_v58  ;;  %v10962_v58 = vld [vmem:[%s17638_s29 + $0x334] sm:$0xf0]  ;;  %v3567_v23 = vadd.f32 %v3566_v15, %v3554_v38  ;;  %v7398_v18 = vor.u32 %v10890_v17, %v7397_v7 }
 0x255   :  { %3798 = vmatpush.bf16.msrb.mxu3 %v9090_v25  ;;  %3817 = vmatpush.bf16.msra.mxu1 %v7782_v30  ;;  %v7686_v31 = vor.u32 %v10962_v58, %v7685_v1  ;;  %v7653_v8 = vld [vmem:[%s17638_s29 + $0x2d8] sm:$0xf]  ;;  %v3579_v30 = vpop.f32.mrf.mxu2 }
 0x256   :  { %3786 = vmatmul.bf16.vlgmr.msrb.gmra.mxu2 %v13981_v26  ;;  %v8229_v26 = vld [vmem:[%s17638_s29 + $0x758] sm:$0xf]  ;;  %v7654_v50 = vor.u32 %v10954_v11, %v7653_v8 }
 0x257   :  { %3830 = vmatpush.bf16.msra.mxu2 %v8038_v33  ;;  %3805 = vmatpush.bf16.msra.mxu0 %v7494_v43  ;;  %v8230_v2 = vor.u32 %v11098_v59, %v8229_v26  ;;  %v11082_v44 = vld [vmem:[%s17638_s29 + $0x6f4] sm:$0xf0] }
 0x258   :  { %3799 = vmatmul.bf16.vlgmr.msrb.gmra.mxu3 %v13996_v53  ;;  %v10898_v53 = vld [vmem:[%s17638_s29 + $0x134] sm:$0xf0]  ;;  %v8166_v33 = vor.u32 %v11082_v44, %v8165_v19 }
 0x259   :  { %3843 = vmatpush.bf16.msra.mxu3 %v8294_v37  ;;  %3818 = vmatpush.bf16.msra.mxu1 %v7750_v46  ;;  %v7430_v13 = vor.u32 %v10898_v53, %v7429_v54  ;;  %v7365_v28 = vld [vmem:[%s17638_s29 + $0x98] sm:$0xf]  ;;  %v3580_v37 = vadd.f32 %v3579_v30, %v3567_v23  ;;  %v3555_v43 = vpop.f32.mrf.mxu0 }
 0x25a   :  { %v10882_v25 = vld [vmem:[%s17638_s29 + $0xb4] sm:$0xf0] }
 0x25b   :  { %3831 = vmatpush.bf16.msra.mxu2 %v8006_v20  ;;  %3806 = vmatpush.bf16.msra.mxu0 %v7462_v60  ;;  %v7621_v27 = vld [vmem:[%s17638_s29 + $0x298] sm:$0xf]  ;;  %v7366_v41 = vor.u32 %v10882_v25, %v7365_v28  ;;  %v14487_v42 = vadd.f32 %v3592_v63, %v3580_v37 }
 0x25c   :  { %v10946_v34 = vld [vmem:[%s17638_s29 + $0x2b4] sm:$0xf0] }
 0x25d   :  { %3844 = vmatpush.bf16.msra.mxu3 %v8262_v22  ;;  %3819 = vmatpush.bf16.msra.mxu1 %v7718_v62  ;;  %v7877_v35 = vld [vmem:[%s17638_s29 + $0x498] sm:$0xf]  ;;  %v7622_v46 = vor.u32 %v10946_v34, %v7621_v27  ;;  %v3568_v22 = vpop.f32.mrf.mxu1  ;;  %v3581_v4 = vpop.f32.mrf.mxu2 }
 0x25e   :  { %v11010_v36 = vld [vmem:[%s17638_s29 + $0x4b4] sm:$0xf0] }
 0x25f   :  { %3832 = vmatpush.bf16.msra.mxu2 %v7974_v0  ;;  %3807 = vmatpush.bf16.msra.mxu0 %v7430_v13  ;;  %v8133_v39 = vld [vmem:[%s17638_s29 + $0x698] sm:$0xf]  ;;  %v7878_v20 = vor.u32 %v11010_v36, %v7877_v35 }
 0x260   :  { %v11074_v40 = vld [vmem:[%s17638_s29 + $0x6b4] sm:$0xf0] }
 0x261   :  { %3845 = vmatpush.bf16.msra.mxu3 %v8230_v2  ;;  %3820 = vmatpush.bf16.msra.mxu1 %v7686_v31  ;;  %v7333_v3 = vld [vmem:[%s17638_s29 + $0x58] sm:$0xf]  ;;  %v8134_v49 = vor.u32 %v11074_v40, %v8133_v39  ;;  %v3594_v31 = vpop.f32.mrf.mxu3 }
 0x262   :  { %v10874_v47 = vld [vmem:[%s17638_s29 + $0x74] sm:$0xf0] }
 0x263   :  { %3833 = vmatpush.bf16.msra.mxu2 %v7942_v12  ;;  %3808 = vmatpush.bf16.msra.mxu0 %v7398_v18  ;;  %v7589_v48 = vld [vmem:[%s17638_s29 + $0x258] sm:$0xf]  ;;  %v7334_v62 = vor.u32 %v10874_v47, %v7333_v3 }
 0x264   :  { %v10938_v55 = vld [vmem:[%s17638_s29 + $0x274] sm:$0xf0] }
 0x265   :  { %3846 = vmatpush.bf16.msra.mxu3 %v8198_v10  ;;  %3821 = vmatpush.bf16.msra.mxu1 %v7654_v50  ;;  %v7845_v56 = vld [vmem:[%s17638_s29 + $0x458] sm:$0xf]  ;;  %v7590_v53 = vor.u32 %v10938_v55, %v7589_v48 }
 0x266   :  { %v11002_v26 = vld [vmem:[%s17638_s29 + $0x474] sm:$0xf0] }
 0x267   :  { %3834 = vmatpush.bf16.msra.mxu2 %v7910_v24  ;;  %v8101_v59 = vld [vmem:[%s17638_s29 + $0x658] sm:$0xf]  ;;  %3809 = vmatpush.bf16.msra.mxu0 %v7366_v41  ;;  %v7846_v1 = vor.u32 %v11002_v26, %v7845_v56 }
 0x268   :  { %v11066_v60 = vld [vmem:[%s17638_s29 + $0x674] sm:$0xf0] }
 0x269   :  { %3847 = vmatpush.bf16.msra.mxu3 %v8166_v33  ;;  %v7301_v0 = vld [vmem:[%s17638_s29 + $0x18] sm:$0xf]  ;;  %3822 = vmatpush.bf16.msra.mxu1 %v7622_v46  ;;  %v8102_v5 = vor.u32 %v11066_v60, %v8101_v59 }
 0x26a   :  { %v10866_v54 = vld [vmem:[%s17638_s29 + $0x34] sm:$0xf0] }
 0x26b   :  { %3835 = vmatpush.bf16.msra.mxu2 %v7878_v20  ;;  %v7557_v2 = vld [vmem:[%s17638_s29 + $0x218] sm:$0xf]  ;;  %3810 = vmatpush.bf16.msra.mxu0 %v7334_v62  ;;  %v7302_v8 = vor.u32 %v10866_v54, %v7301_v0 }
 0x26c   :  { %v10930_v58 = vld [vmem:[%s17638_s29 + $0x234] sm:$0xf0] }
 0x26d   :  { %v7813_v29 = vld [vmem:[%s17638_s29 + $0x418] sm:$0xf]  ;;  %3848 = vmatpush.bf16.msra.mxu3 %v8134_v49  ;;  %3823 = vmatpush.bf16.msra.mxu1 %v7590_v53  ;;  %v7558_v11 = vor.u32 %v10930_v58, %v7557_v2  ;;  %v3605_v2 = vpop.f32.mrf.mxu0 }
 0x26e   :  { %v10994_v9 = vld [vmem:[%s17638_s29 + $0x434] sm:$0xf0] }
 0x26f   :  { %v8069_v13 = vld [vmem:[%s17638_s29 + $0x618] sm:$0xf]  ;;  %3836 = vmatpush.bf16.msra.mxu2 %v7846_v1  ;;  %v7814_v14 = vor.u32 %v10994_v9, %v7813_v29  ;;  %3811 = vmatpush.bf16.msra.mxu0 %v7302_v8 }
 0x270   :  { %v11058_v6 = vld [vmem:[%s17638_s29 + $0x634] sm:$0xf0] }
 0x271   :  { %v8549_v12 = vld [vmem:[%s17638_s29 + $0x9d8] sm:$0xf]  ;;  %3849 = vmatpush.bf16.msra.mxu3 %v8102_v5  ;;  %v8070_v44 = vor.u32 %v11058_v6, %v8069_v13  ;;  %3824 = vmatpush.bf16.msra.mxu1 %v7558_v11  ;;  %v3618_v6 = vpop.f32.mrf.mxu1 }
 0x272   :  { %v11178_v7 = vld [vmem:[%s17638_s29 + $0x9f4] sm:$0xf0]  ;;  %3812 = vmatmul.bf16.vlgmr.msra.gmra.mxu0 %v14206_v51 }
 0x273   :  { %v8805_v17 = vld [vmem:[%s17638_s29 + $0xbd8] sm:$0xf]  ;;  %v8550_v23 = vor.u32 %v11178_v7, %v8549_v12  ;;  %3837 = vmatpush.bf16.msra.mxu2 %v7814_v14 }
 0x274   :  { %v11242_v38 = vld [vmem:[%s17638_s29 + $0xbf4] sm:$0xf0]  ;;  %3825 = vmatmul.bf16.vlgmr.msra.gmra.mxu1 %v14215_v57 }
 0x275   :  { %v9061_v15 = vld [vmem:[%s17638_s29 + $0xdd8] sm:$0xf]  ;;  %v8806_v18 = vor.u32 %v11242_v38, %v8805_v17  ;;  %3850 = vmatpush.bf16.msra.mxu3 %v8070_v44  ;;  %3856 = vmatpush.bf16.msrb.mxu0 %v8550_v23  ;;  %v3631_v23 = vpop.f32.mrf.mxu2 }
 0x276   :  { %v11306_v10 = vld [vmem:[%s17638_s29 + $0xdf4] sm:$0xf0]  ;;  %3838 = vmatmul.bf16.vlgmr.msra.gmra.mxu2 %v14197_v21 }
 0x277   :  { %v9317_v16 = vld [vmem:[%s17638_s29 + $0xfd8] sm:$0xf]  ;;  %v9062_v50 = vor.u32 %v11306_v10, %v9061_v15  ;;  %3869 = vmatpush.bf16.msrb.mxu1 %v8806_v18 }
 0x278   :  { %v11370_v19 = vld [vmem:[%s17638_s29 + $0xff4] sm:$0xf0]  ;;  %3851 = vmatmul.bf16.vlgmr.msra.gmra.mxu3 %v14209_v52  ;;  %v14625_v52 = vld [vmem:[%s17640_s4] sm:$0xff] }
 0x279   :  { %v8517_v24 = vld [vmem:[%s17638_s29 + $0x998] sm:$0xf]  ;;  %v9318_v27 = vor.u32 %v11370_v19, %v9317_v16  ;;  %3882 = vmatpush.bf16.msrb.mxu2 %v9062_v50  ;;  %v590_v59 = vperm.slane %v14625_v52, 4 }
 0x27a   :  { %v11170_v28 = vld [vmem:[%s17638_s29 + $0x9b4] sm:$0xf0] }
 0x27b   :  { %v8773_v25 = vld [vmem:[%s17638_s29 + $0xb98] sm:$0xf]  ;;  %v8518_v37 = vor.u32 %v11170_v28, %v8517_v24  ;;  %3895 = vmatpush.bf16.msrb.mxu3 %v9318_v27  ;;  %v3606_v13 = vadd.f32 %v3605_v2, %v590_v59  ;;  %v3644_v27 = vpop.f32.mrf.mxu3  ;;  %v10918_v2 = vld [vmem:[%s17638_s29 + $0x1dc] sm:$0xf] }
 0x27c   :  { %v11234_v30 = vld [vmem:[%s17638_s29 + $0xbb4] sm:$0xf0] }
 0x27d   :  { %v9029_v33 = vld [vmem:[%s17638_s29 + $0xd98] sm:$0xf]  ;;  %v8774_v63 = vor.u32 %v11234_v30, %v8773_v25  ;;  %3857 = vmatpush.bf16.msrb.mxu0 %v8518_v37  ;;  %v3619_v15 = vadd.f32 %v3618_v6, %v3606_v13  ;;  %v8039_v13 = vld [vmem:[%s17638_s29 + $0x5f8] sm:$0xf0] }
 0x27e   :  { %v11298_v34 = vld [vmem:[%s17638_s29 + $0xdb4] sm:$0xf0] }
 0x27f   :  { %v9285_v35 = vld [vmem:[%s17638_s29 + $0xf98] sm:$0xf]  ;;  %v9030_v39 = vor.u32 %v11298_v34, %v9029_v33  ;;  %3870 = vmatpush.bf16.msrb.mxu1 %v8774_v63  ;;  %v3632_v25 = vadd.f32 %v3631_v23, %v3619_v15  ;;  %v8007_v23 = vld [vmem:[%s17638_s29 + $0x5b8] sm:$0xf0] }
 0x280   :  { %v11362_v36 = vld [vmem:[%s17638_s29 + $0xfb4] sm:$0xf0] }
 0x281   :  { %v8485_v40 = vld [vmem:[%s17638_s29 + $0x958] sm:$0xf]  ;;  %v9286_v46 = vor.u32 %v11362_v36, %v9285_v35  ;;  %3883 = vmatpush.bf16.msrb.mxu2 %v9030_v39  ;;  %v14691_v35 = vadd.f32 %v3644_v27, %v3632_v25  ;;  %v3607_v36 = vpop.f32.mrf.mxu0  ;;  %v10902_v27 = vld [vmem:[%s17638_s29 + $0x15c] sm:$0xf] }
 0x282   :  { %v11162_v41 = vld [vmem:[%s17638_s29 + $0x974] sm:$0xf0] }
 0x283   :  { %v8741_v43 = vld [vmem:[%s17638_s29 + $0xb58] sm:$0xf]  ;;  %v8486_v49 = vor.u32 %v11162_v41, %v8485_v40  ;;  %3896 = vmatpush.bf16.msrb.mxu3 %v9286_v46 }
 0x284   :  { %v11226_v20 = vld [vmem:[%s17638_s29 + $0xb74] sm:$0xf0] }
 0x285   :  { %v8997_v3 = vld [vmem:[%s17638_s29 + $0xd58] sm:$0xf]  ;;  %v8742_v21 = vor.u32 %v11226_v20, %v8741_v43  ;;  %3858 = vmatpush.bf16.msrb.mxu0 %v8486_v49  ;;  %v3620_v43 = vpop.f32.mrf.mxu1 }
 0x286   :  { %v11290_v47 = vld [vmem:[%s17638_s29 + $0xd74] sm:$0xf0]  ;;  %v11094_v43 = vld [vmem:[%s17638_s29 + $0x75c] sm:$0xf] }
 0x287   :  { %v9253_v48 = vld [vmem:[%s17638_s29 + $0xf58] sm:$0xf]  ;;  %v8998_v56 = vor.u32 %v11290_v47, %v8997_v3  ;;  %3871 = vmatpush.bf16.msrb.mxu1 %v8742_v21 }
 0x288   :  { %v11354_v22 = vld [vmem:[%s17638_s29 + $0xf74] sm:$0xf0] }
 0x289   :  { %v8453_v55 = vld [vmem:[%s17638_s29 + $0x918] sm:$0xf]  ;;  %v9254_v57 = vor.u32 %v11354_v22, %v9253_v48  ;;  %3884 = vmatpush.bf16.msrb.mxu2 %v8998_v56 }
 0x28a   :  { %v11154_v26 = vld [vmem:[%s17638_s29 + $0x934] sm:$0xf0] }
 0x28b   :  { %v8709_v51 = vld [vmem:[%s17638_s29 + $0xb18] sm:$0xf]  ;;  %v8454_v1 = vor.u32 %v11154_v26, %v8453_v55  ;;  %3897 = vmatpush.bf16.msrb.mxu3 %v9254_v57 }
 0x28c   :  { %v11218_v60 = vld [vmem:[%s17638_s29 + $0xb34] sm:$0xf0] }
 0x28d   :  { %v8965_v62 = vld [vmem:[%s17638_s29 + $0xd18] sm:$0xf]  ;;  %v8710_v58 = vor.u32 %v11218_v60, %v8709_v51  ;;  %3859 = vmatpush.bf16.msrb.mxu0 %v8454_v1  ;;  %v3633_v60 = vpop.f32.mrf.mxu2  ;;  %v3646_v1 = vpop.f32.mrf.mxu3 }
 0x28e   :  { %v11282_v0 = vld [vmem:[%s17638_s29 + $0xd34] sm:$0xf0]  ;;  %v7399_v1 = vld [vmem:[%s17638_s29 + $0xf8] sm:$0xf0] }
 0x28f   :  { %v9221_v54 = vld [vmem:[%s17638_s29 + $0xf18] sm:$0xf]  ;;  %v8966_v29 = vor.u32 %v11282_v0, %v8965_v62  ;;  %3872 = vmatpush.bf16.msrb.mxu1 %v8710_v58  ;;  %v7527_v58 = vld [vmem:[%s17638_s29 + $0x1f8] sm:$0xf0] }
 0x290   :  { %v11346_v53 = vld [vmem:[%s17638_s29 + $0xf34] sm:$0xf0] }
 0x291   :  { %v8421_v4 = vld [vmem:[%s17638_s29 + $0x8d8] sm:$0xf]  ;;  %v9222_v31 = vor.u32 %v11346_v53, %v9221_v54  ;;  %3885 = vmatpush.bf16.msrb.mxu2 %v8966_v29  ;;  %v10982_v29 = vld [vmem:[%s17638_s29 + $0x3dc] sm:$0xf] }
 0x292   :  { %v11146_v5 = vld [vmem:[%s17638_s29 + $0x8f4] sm:$0xf0] }
 0x293   :  { %v8677_v9 = vld [vmem:[%s17638_s29 + $0xad8] sm:$0xf]  ;;  %v8422_v10 = vor.u32 %v11146_v5, %v8421_v4  ;;  %3898 = vmatpush.bf16.msrb.mxu3 %v9222_v31  ;;  %v7783_v5 = vld [vmem:[%s17638_s29 + $0x3f8] sm:$0xf0] }
 0x294   :  { %v11210_v12 = vld [vmem:[%s17638_s29 + $0xaf4] sm:$0xf0] }
 0x295   :  { %v8933_v7 = vld [vmem:[%s17638_s29 + $0xcd8] sm:$0xf]  ;;  %v8678_v11 = vor.u32 %v11210_v12, %v8677_v9  ;;  %3860 = vmatpush.bf16.msrb.mxu0 %v8422_v10  ;;  %v11046_v9 = vld [vmem:[%s17638_s29 + $0x5dc] sm:$0xf] }
 0x296   :  { %v11274_v17 = vld [vmem:[%s17638_s29 + $0xcf4] sm:$0xf0]  ;;  %v11110_v12 = vld [vmem:[%s17638_s29 + $0x7dc] sm:$0xf]  ;;  %v8042_v15 = vor.u32 %v11046_v9, %v8039_v13 }
 0x297   :  { %v9189_v8 = vld [vmem:[%s17638_s29 + $0xed8] sm:$0xf]  ;;  %v8934_v14 = vor.u32 %v11274_v17, %v8933_v7  ;;  %3873 = vmatpush.bf16.msrb.mxu1 %v8678_v11  ;;  %v8295_v7 = vld [vmem:[%s17638_s29 + $0x7f8] sm:$0xf0] }
 0x298   :  { %v11338_v38 = vld [vmem:[%s17638_s29 + $0xef4] sm:$0xf0]  ;;  %v10910_v10 = vld [vmem:[%s17638_s29 + $0x19c] sm:$0xf] }
 0x299   :  { %v8389_v16 = vld [vmem:[%s17638_s29 + $0x898] sm:$0xf]  ;;  %v9190_v18 = vor.u32 %v11338_v38, %v9189_v8  ;;  %3886 = vmatpush.bf16.msrb.mxu2 %v8934_v14  ;;  %v7530_v8 = vor.u32 %v10918_v2, %v7527_v58  ;;  %v7786_v38 = vor.u32 %v10982_v29, %v7783_v5  ;;  %v7495_v11 = vld [vmem:[%s17638_s29 + $0x1b8] sm:$0xf0]  ;;  %v3670_v29 = vpop.f32.mrf.mxu1 }
 0x29a   :  { %v11138_v19 = vld [vmem:[%s17638_s29 + $0x8b4] sm:$0xf0]  ;;  %v10974_v14 = vld [vmem:[%s17638_s29 + $0x39c] sm:$0xf] }
 0x29b   :  { %v8645_v44 = vld [vmem:[%s17638_s29 + $0xa98] sm:$0xf]  ;;  %v8390_v34 = vor.u32 %v11138_v19, %v8389_v16  ;;  %3899 = vmatpush.bf16.msrb.mxu3 %v9190_v18  ;;  %v8298_v16 = vor.u32 %v11110_v12, %v8295_v7  ;;  %v7751_v19 = vld [vmem:[%s17638_s29 + $0x3b8] sm:$0xf0] }
 0x29c   :  { %v11202_v50 = vld [vmem:[%s17638_s29 + $0xab4] sm:$0xf0]  ;;  %v11102_v18 = vld [vmem:[%s17638_s29 + $0x79c] sm:$0xf] }
 0x29d   :  { %v8901_v24 = vld [vmem:[%s17638_s29 + $0xc98] sm:$0xf]  ;;  %v8646_v37 = vor.u32 %v11202_v50, %v8645_v44  ;;  %3861 = vmatpush.bf16.msrb.mxu0 %v8390_v34  ;;  %v11038_v44 = vld [vmem:[%s17638_s29 + $0x59c] sm:$0xf] }
 0x29e   :  { %v11266_v28 = vld [vmem:[%s17638_s29 + $0xcb4] sm:$0xf0]  ;;  %v8263_v50 = vld [vmem:[%s17638_s29 + $0x7b8] sm:$0xf0]  ;;  %v8010_v25 = vor.u32 %v11038_v44, %v8007_v23  ;;  %v3696_v23 = vpop.f32.mrf.mxu3 }
 0x29f   :  { %v9157_v30 = vld [vmem:[%s17638_s29 + $0xe98] sm:$0xf]  ;;  %v8902_v63 = vor.u32 %v11266_v28, %v8901_v24  ;;  %3874 = vmatpush.bf16.msrb.mxu1 %v8646_v37  ;;  %v7498_v24 = vor.u32 %v10910_v10, %v7495_v11  ;;  %v7754_v28 = vor.u32 %v10974_v14, %v7751_v19  ;;  %v8266_v36 = vor.u32 %v11102_v18, %v8263_v50  ;;  %v7719_v37 = vld [vmem:[%s17638_s29 + $0x378] sm:$0xf0]  ;;  %v3683_v10 = vpop.f32.mrf.mxu2 }
 0x2a0   :  { %v11330_v33 = vld [vmem:[%s17638_s29 + $0xeb4] sm:$0xf0]  ;;  %v10950_v2 = vld [vmem:[%s17638_s29 + $0x2dc] sm:$0xf] }
 0x2a1   :  { %v8357_v39 = vld [vmem:[%s17638_s29 + $0x858] sm:$0xf]  ;;  %v9158_v46 = vor.u32 %v11330_v33, %v9157_v30  ;;  %3887 = vmatpush.bf16.msrb.mxu2 %v8902_v63  ;;  %v7463_v30 = vld [vmem:[%s17638_s29 + $0x178] sm:$0xf0] }
 0x2a2   :  { %v11130_v40 = vld [vmem:[%s17638_s29 + $0x874] sm:$0xf0]  ;;  %v10966_v33 = vld [vmem:[%s17638_s29 + $0x35c] sm:$0xf] }
 0x2a3   :  { %v8613_v41 = vld [vmem:[%s17638_s29 + $0xa58] sm:$0xf]  ;;  %v8358_v49 = vor.u32 %v11130_v40, %v8357_v39  ;;  %3900 = vmatpush.bf16.msrb.mxu3 %v9158_v46  ;;  %v11030_v63 = vld [vmem:[%s17638_s29 + $0x55c] sm:$0xf]  ;;  %v14810_v40 = vld [vmem:[#allocation1 + $0x24] sm:$0xff] }
 0x2a4   :  { %v11194_v20 = vld [vmem:[%s17638_s29 + $0xa74] sm:$0xf0]  ;;  %v7975_v39 = vld [vmem:[%s17638_s29 + $0x578] sm:$0xf0] }
 0x2a5   :  { %v8869_v3 = vld [vmem:[%s17638_s29 + $0xc58] sm:$0xf]  ;;  %v8614_v56 = vor.u32 %v11194_v20, %v8613_v41  ;;  %3862 = vmatpush.bf16.msrb.mxu0 %v8358_v49  ;;  %v14813_v41 = vld [vmem:[#allocation1 + $0x3f] sm:$0xff]  ;;  %v14822_v20 = vld [vmem:[#allocation1 + $0x2d] sm:$0xff] }
 0x2a6   :  { %v11258_v47 = vld [vmem:[%s17638_s29 + $0xc74] sm:$0xf0]  ;;  %v8231_v46 = vld [vmem:[%s17638_s29 + $0x778] sm:$0xf0] }
 0x2a7   :  { %v9125_v48 = vld [vmem:[%s17638_s29 + $0xe58] sm:$0xf]  ;;  %v8870_v26 = vor.u32 %v11258_v47, %v8869_v3  ;;  %3875 = vmatpush.bf16.msrb.mxu1 %v8614_v56  ;;  %v7466_v3 = vor.u32 %v10902_v27, %v7463_v30  ;;  %v7722_v47 = vor.u32 %v10966_v33, %v7719_v37  ;;  %v7431_v49 = vld [vmem:[%s17638_s29 + $0x138] sm:$0xf0] }
 0x2a8   :  { %v11322_v22 = vld [vmem:[%s17638_s29 + $0xe74] sm:$0xf0]  ;;  %v7687_v56 = vld [vmem:[%s17638_s29 + $0x338] sm:$0xf0] }
 0x2a9   :  { %v8325_v55 = vld [vmem:[%s17638_s29 + $0x818] sm:$0xf]  ;;  %v9126_v62 = vor.u32 %v11322_v22, %v9125_v48  ;;  %3888 = vmatpush.bf16.msrb.mxu2 %v8870_v26  ;;  %v7978_v48 = vor.u32 %v11030_v63, %v7975_v39  ;;  %v10894_v22 = vld [vmem:[%s17638_s29 + $0x11c] sm:$0xf]  ;;  %v3672_v63 = vpop.f32.mrf.mxu1 }
 0x2aa   :  { %v11122_v21 = vld [vmem:[%s17638_s29 + $0x834] sm:$0xf0]  ;;  %v11022_v26 = vld [vmem:[%s17638_s29 + $0x51c] sm:$0xf]  ;;  %v7434_v60 = vor.u32 %v10894_v22, %v7431_v49 }
 0x2ab   :  { %v8581_v51 = vld [vmem:[%s17638_s29 + $0xa18] sm:$0xf]  ;;  %v8326_v4 = vor.u32 %v11122_v21, %v8325_v55  ;;  %3901 = vmatpush.bf16.msrb.mxu3 %v9126_v62  ;;  %v10958_v55 = vld [vmem:[%s17638_s29 + $0x31c] sm:$0xf]  ;;  %v8234_v21 = vor.u32 %v11094_v43, %v8231_v46  ;;  %v3657_v62 = vpop.f32.mrf.mxu0 }
 0x2ac   :  { %v11186_v59 = vld [vmem:[%s17638_s29 + $0xa34] sm:$0xf0]  ;;  %v3658_v58 = vadd.f32 %v3657_v62, %v14691_v35  ;;  %v7655_v5 = vld [vmem:[%s17638_s29 + $0x2f8] sm:$0xf0] }
 0x2ad   :  { %v8837_v57 = vld [vmem:[%s17638_s29 + $0xc18] sm:$0xf]  ;;  %v8582_v6 = vor.u32 %v11186_v59, %v8581_v51  ;;  %3863 = vmatpush.bf16.msrb.mxu0 %v8326_v4  ;;  %v7943_v51 = vld [vmem:[%s17638_s29 + $0x538] sm:$0xf0]  ;;  %v7658_v7 = vor.u32 %v10950_v2, %v7655_v5 }
 0x2ae   :  { %v11250_v0 = vld [vmem:[%s17638_s29 + $0xc34] sm:$0xf0]  ;;  %v11086_v59 = vld [vmem:[%s17638_s29 + $0x71c] sm:$0xf] }
 0x2af   :  { %v9093_v54 = vld [vmem:[%s17638_s29 + $0xe18] sm:$0xf]  ;;  %v8838_v31 = vor.u32 %v11250_v0, %v8837_v57  ;;  %3876 = vmatpush.bf16.msrb.mxu1 %v8582_v6  ;;  %v8199_v57 = vld [vmem:[%s17638_s29 + $0x738] sm:$0xf0]  ;;  %v7690_v0 = vor.u32 %v10958_v55, %v7687_v56 }
 0x2b0   :  { %v11314_v53 = vld [vmem:[%s17638_s29 + $0xe34] sm:$0xf0]  ;;  %3864 = vmatmul.bf16.vlgmr.msrb.gmra.mxu0 %v14810_v40  ;;  %v8202_v4 = vor.u32 %v11086_v59, %v8199_v57  ;;  %v11014_v9 = vld [vmem:[%s17638_s29 + $0x4dc] sm:$0xf]  ;;  %v3685_v57 = vpop.f32.mrf.mxu2 }
 0x2b1   :  { %v9094_v17 = vor.u32 %v11314_v53, %v9093_v54  ;;  %3889 = vmatpush.bf16.msrb.mxu2 %v8838_v31  ;;  %3908 = vmatpush.bf16.msra.mxu0 %v7530_v8  ;;  %v14798_v34 = vld [vmem:[#allocation1 + $0x36] sm:$0xff]  ;;  %v7946_v54 = vor.u32 %v11022_v26, %v7943_v51  ;;  %v3671_v31 = vadd.f32 %v3670_v29, %v3658_v58 }
 0x2b2   :  { %3877 = vmatmul.bf16.vlgmr.msrb.gmra.mxu1 %v14822_v20  ;;  %v10886_v53 = vld [vmem:[%s17638_s29 + $0xdc] sm:$0xf] }
 0x2b3   :  { %3902 = vmatpush.bf16.msrb.mxu3 %v9094_v17  ;;  %3921 = vmatpush.bf16.msra.mxu1 %v7786_v38  ;;  %v7911_v13 = vld [vmem:[%s17638_s29 + $0x4f8] sm:$0xf0]  ;;  %v7402_v12 = vor.u32 %v10886_v53, %v7399_v1  ;;  %v3684_v44 = vadd.f32 %v3683_v10, %v3671_v31  ;;  %v3698_v53 = vpop.f32.mrf.mxu3 }
 0x2b4   :  { %3890 = vmatmul.bf16.vlgmr.msrb.gmra.mxu2 %v14798_v34  ;;  %v11078_v6 = vld [vmem:[%s17638_s29 + $0x6dc] sm:$0xf]  ;;  %v7914_v17 = vor.u32 %v11014_v9, %v7911_v13 }
 0x2b5   :  { %3934 = vmatpush.bf16.msra.mxu2 %v8042_v15  ;;  %3909 = vmatpush.bf16.msra.mxu0 %v7498_v24  ;;  %v8167_v35 = vld [vmem:[%s17638_s29 + $0x6f8] sm:$0xf0] }
 0x2b6   :  { %3903 = vmatmul.bf16.vlgmr.msrb.gmra.mxu3 %v14813_v41  ;;  %v10878_v8 = vld [vmem:[%s17638_s29 + $0x9c] sm:$0xf]  ;;  %v8170_v11 = vor.u32 %v11078_v6, %v8167_v35 }
 0x2b7   :  { %3947 = vmatpush.bf16.msra.mxu3 %v8298_v16  ;;  %3922 = vmatpush.bf16.msra.mxu1 %v7754_v28  ;;  %v7367_v38 = vld [vmem:[%s17638_s29 + $0xb8] sm:$0xf0]  ;;  %v14898_v28 = vadd.f32 %v3696_v23, %v3684_v44 }
 0x2b8   :  { %v10942_v15 = vld [vmem:[%s17638_s29 + $0x29c] sm:$0xf]  ;;  %v7370_v24 = vor.u32 %v10878_v8, %v7367_v38 }
 0x2b9   :  { %3935 = vmatpush.bf16.msra.mxu2 %v8010_v25  ;;  %3910 = vmatpush.bf16.msra.mxu0 %v7466_v3  ;;  %v7623_v14 = vld [vmem:[%s17638_s29 + $0x2b8] sm:$0xf0]  ;;  %v3659_v25 = vpop.f32.mrf.mxu0 }
 0x2ba   :  { %v11006_v16 = vld [vmem:[%s17638_s29 + $0x49c] sm:$0xf]  ;;  %v7626_v27 = vor.u32 %v10942_v15, %v7623_v14 }
 0x2bb   :  { %3948 = vmatpush.bf16.msra.mxu3 %v8266_v36  ;;  %3923 = vmatpush.bf16.msra.mxu1 %v7722_v47  ;;  %v7879_v19 = vld [vmem:[%s17638_s29 + $0x4b8] sm:$0xf0] }
 0x2bc   :  { %v11070_v18 = vld [vmem:[%s17638_s29 + $0x69c] sm:$0xf]  ;;  %v7882_v30 = vor.u32 %v11006_v16, %v7879_v19 }
 0x2bd   :  { %3936 = vmatpush.bf16.msra.mxu2 %v7978_v48  ;;  %3911 = vmatpush.bf16.msra.mxu0 %v7434_v60  ;;  %v8135_v50 = vld [vmem:[%s17638_s29 + $0x6b8] sm:$0xf0] }
 0x2be   :  { %v10870_v33 = vld [vmem:[%s17638_s29 + $0x5c] sm:$0xf]  ;;  %v8138_v39 = vor.u32 %v11070_v18, %v8135_v50 }
 0x2bf   :  { %3949 = vmatpush.bf16.msra.mxu3 %v8234_v21  ;;  %3924 = vmatpush.bf16.msra.mxu1 %v7690_v0  ;;  %v7335_v36 = vld [vmem:[%s17638_s29 + $0x78] sm:$0xf0] }
 0x2c0   :  { %v10934_v37 = vld [vmem:[%s17638_s29 + $0x25c] sm:$0xf]  ;;  %v7338_v22 = vor.u32 %v10870_v33, %v7335_v36  ;;  %v11785_v36 = vld [vmem:[#allocation1 + $0x12] sm:$0xff] }
 0x2c1   :  { %3937 = vmatpush.bf16.msra.mxu2 %v7946_v54  ;;  %3912 = vmatpush.bf16.msra.mxu0 %v7402_v12  ;;  %v7591_v43 = vld [vmem:[%s17638_s29 + $0x278] sm:$0xf0]  ;;  %v15044_v53 = vpop.f32.mrf.mxu0 }
 0x2c2   :  { %v10998_v46 = vld [vmem:[%s17638_s29 + $0x45c] sm:$0xf]  ;;  %v7594_v21 = vor.u32 %v10934_v37, %v7591_v43 }
 0x2c3   :  { %3950 = vmatpush.bf16.msra.mxu3 %v8202_v4  ;;  %3925 = vmatpush.bf16.msra.mxu1 %v7658_v7  ;;  %v7847_v3 = vld [vmem:[%s17638_s29 + $0x478] sm:$0xf0] }
 0x2c4   :  { %v11062_v47 = vld [vmem:[%s17638_s29 + $0x65c] sm:$0xf]  ;;  %v7850_v56 = vor.u32 %v10998_v46, %v7847_v3  ;;  %v11786_v3 = vld [vmem:[#allocation1] sm:$0xff] }
 0x2c5   :  { %3938 = vmatpush.bf16.msra.mxu2 %v7914_v17  ;;  %v8103_v48 = vld [vmem:[%s17638_s29 + $0x678] sm:$0xf0]  ;;  %3913 = vmatpush.bf16.msra.mxu0 %v7370_v24 }
 0x2c6   :  { %v10862_v49 = vld [vmem:[%s17638_s29 + $0x1c] sm:$0xf]  ;;  %v8106_v60 = vor.u32 %v11062_v47, %v8103_v48 }
 0x2c7   :  { %3951 = vmatpush.bf16.msra.mxu3 %v8170_v11  ;;  %v7303_v55 = vld [vmem:[%s17638_s29 + $0x38] sm:$0xf0]  ;;  %3926 = vmatpush.bf16.msra.mxu1 %v7626_v27 }
 0x2c8   :  { %v10926_v26 = vld [vmem:[%s17638_s29 + $0x21c] sm:$0xf]  ;;  %v7306_v29 = vor.u32 %v10862_v49, %v7303_v55 }
 0x2c9   :  { %3939 = vmatpush.bf16.msra.mxu2 %v7882_v30  ;;  %v7559_v51 = vld [vmem:[%s17638_s29 + $0x238] sm:$0xf0]  ;;  %3914 = vmatpush.bf16.msra.mxu0 %v7338_v22  ;;  %v11788_v22 = vld [vmem:[#allocation1 + $0x9] sm:$0xff] }
 0x2ca   :  { %v10990_v59 = vld [vmem:[%s17638_s29 + $0x41c] sm:$0xf]  ;;  %v7562_v13 = vor.u32 %v10926_v26, %v7559_v51 }
 0x2cb   :  { %3952 = vmatpush.bf16.msra.mxu3 %v8138_v39  ;;  %v7815_v62 = vld [vmem:[%s17638_s29 + $0x438] sm:$0xf0]  ;;  %3927 = vmatpush.bf16.msra.mxu1 %v7594_v21 }
 0x2cc   :  { %v11054_v0 = vld [vmem:[%s17638_s29 + $0x61c] sm:$0xf]  ;;  %v7818_v6 = vor.u32 %v10990_v59, %v7815_v62 }
 0x2cd   :  { %v8071_v54 = vld [vmem:[%s17638_s29 + $0x638] sm:$0xf0]  ;;  %3940 = vmatpush.bf16.msra.mxu2 %v7850_v56  ;;  %3915 = vmatpush.bf16.msra.mxu0 %v7306_v29 }
 0x2ce   :  { %v11174_v1 = vld [vmem:[%s17638_s29 + $0x9dc] sm:$0xf]  ;;  %v8074_v12 = vor.u32 %v11054_v0, %v8071_v54 }
 0x2cf   :  { %v8551_v2 = vld [vmem:[%s17638_s29 + $0x9f8] sm:$0xf0]  ;;  %3953 = vmatpush.bf16.msra.mxu3 %v8106_v60  ;;  %3928 = vmatpush.bf16.msra.mxu1 %v7562_v13 }
 0x2d0   :  { %v11238_v58 = vld [vmem:[%s17638_s29 + $0xbdc] sm:$0xf]  ;;  %v8554_v7 = vor.u32 %v11174_v1, %v8551_v2  ;;  %3916 = vmatmul.bf16.vlgmr.msra.gmra.mxu0 %v11786_v3 }
 0x2d1   :  { %v8807_v4 = vld [vmem:[%s17638_s29 + $0xbf8] sm:$0xf0]  ;;  %3941 = vmatpush.bf16.msra.mxu2 %v7818_v6 }
 0x2d2   :  { %v11302_v5 = vld [vmem:[%s17638_s29 + $0xddc] sm:$0xf]  ;;  %v8810_v17 = vor.u32 %v11238_v58, %v8807_v4  ;;  %3960 = vmatpush.bf16.msrb.mxu0 %v8554_v7  ;;  %3929 = vmatmul.bf16.vlgmr.msra.gmra.mxu1 %v11788_v22 }
 0x2d3   :  { %v9063_v9 = vld [vmem:[%s17638_s29 + $0xdf8] sm:$0xf0]  ;;  %3954 = vmatpush.bf16.msra.mxu3 %v8074_v12 }
 0x2d4   :  { %v11366_v35 = vld [vmem:[%s17638_s29 + $0xfdc] sm:$0xf]  ;;  %v9066_v8 = vor.u32 %v11302_v5, %v9063_v9  ;;  %3973 = vmatpush.bf16.msrb.mxu1 %v8810_v17  ;;  %3942 = vmatmul.bf16.vlgmr.msra.gmra.mxu2 %v11785_v36  ;;  %v15055_v5 = vpop.f32.mrf.mxu1 }
 0x2d5   :  { %v9319_v31 = vld [vmem:[%s17638_s29 + $0xff8] sm:$0xf0] }
 0x2d6   :  { %v11166_v38 = vld [vmem:[%s17638_s29 + $0x99c] sm:$0xf]  ;;  %v9322_v11 = vor.u32 %v11366_v35, %v9319_v31  ;;  %3986 = vmatpush.bf16.msrb.mxu2 %v9066_v8 }
 0x2d7   :  { %v8519_v15 = vld [vmem:[%s17638_s29 + $0x9b8] sm:$0xf0] }
 0x2d8   :  { %v11230_v10 = vld [vmem:[%s17638_s29 + $0xb9c] sm:$0xf]  ;;  %v8522_v18 = vor.u32 %v11166_v38, %v8519_v15  ;;  %3999 = vmatpush.bf16.msrb.mxu3 %v9322_v11  ;;  %v15081_v11 = vpop.f32.mrf.mxu2 }
 0x2d9   :  { %v8775_v14 = vld [vmem:[%s17638_s29 + $0xbb8] sm:$0xf0] }
 0x2da   :  { %v11294_v16 = vld [vmem:[%s17638_s29 + $0xd9c] sm:$0xf]  ;;  %v8778_v50 = vor.u32 %v11230_v10, %v8775_v14  ;;  %3961 = vmatpush.bf16.msrb.mxu0 %v8522_v18 }
 0x2db   :  { %v9031_v19 = vld [vmem:[%s17638_s29 + $0xdb8] sm:$0xf0] }
 0x2dc   :  { %v11358_v44 = vld [vmem:[%s17638_s29 + $0xf9c] sm:$0xf]  ;;  %v9034_v24 = vor.u32 %v11294_v16, %v9031_v19  ;;  %3974 = vmatpush.bf16.msrb.mxu1 %v8778_v50 }
 0x2dd   :  { %v9287_v23 = vld [vmem:[%s17638_s29 + $0xfb8] sm:$0xf0] }
 0x2de   :  { %v11158_v25 = vld [vmem:[%s17638_s29 + $0x95c] sm:$0xf]  ;;  %v9290_v33 = vor.u32 %v11358_v44, %v9287_v23  ;;  %3987 = vmatpush.bf16.msrb.mxu2 %v9034_v24  ;;  %v15092_v23 = vpop.f32.mrf.mxu3 }
 0x2df   :  { %v8487_v27 = vld [vmem:[%s17638_s29 + $0x978] sm:$0xf0] }
 0x2e0   :  { %v11222_v30 = vld [vmem:[%s17638_s29 + $0xb5c] sm:$0xf]  ;;  %v8490_v48 = vor.u32 %v11158_v25, %v8487_v27  ;;  %4000 = vmatpush.bf16.msrb.mxu3 %v9290_v33  ;;  %v3711_v25 = vpop.f32.mrf.mxu0 }
 0x2e1   :  { %v8743_v37 = vld [vmem:[%s17638_s29 + $0xb78] sm:$0xf0]  ;;  %v11493_v25 = vld [vmem:[%s17641_s0 + $0x3cc] sm:$0xf0] }
 0x2e2   :  { %v11286_v63 = vld [vmem:[%s17638_s29 + $0xd5c] sm:$0xf]  ;;  %v8746_v49 = vor.u32 %v11222_v30, %v8743_v37  ;;  %3962 = vmatpush.bf16.msrb.mxu0 %v8490_v48 }
 0x2e3   :  { %v8999_v39 = vld [vmem:[%s17638_s29 + $0xd78] sm:$0xf0] }
 0x2e4   :  { %v11350_v43 = vld [vmem:[%s17638_s29 + $0xf5c] sm:$0xf]  ;;  %v9002_v55 = vor.u32 %v11286_v63, %v8999_v39  ;;  %3975 = vmatpush.bf16.msrb.mxu1 %v8746_v49  ;;  %v3724_v63 = vpop.f32.mrf.mxu1 }
 0x2e5   :  { %v9255_v46 = vld [vmem:[%s17638_s29 + $0xf78] sm:$0xf0]  ;;  %v9533_v63 = vld [vmem:[%s17641_s0 + $0x1a0] sm:$0xf] }
 0x2e6   :  { %v11787_v47 = vld [vmem:[#allocation1 + $0x1b] sm:$0xff]  ;;  %v9258_v51 = vor.u32 %v11350_v43, %v9255_v46  ;;  %3988 = vmatpush.bf16.msrb.mxu2 %v9002_v55 }
 0x2e7   :  { %3955 = vmatmul.bf16.vlgmr.msra.gmra.mxu3 %v11787_v47  ;;  %v11150_v21 = vld [vmem:[%s17638_s29 + $0x91c] sm:$0xf] }
 0x2e8   :  { %v8455_v56 = vld [vmem:[%s17638_s29 + $0x938] sm:$0xf0]  ;;  %4001 = vmatpush.bf16.msrb.mxu3 %v9258_v51 }
 0x2e9   :  { %v11214_v26 = vld [vmem:[%s17638_s29 + $0xb1c] sm:$0xf]  ;;  %v8458_v54 = vor.u32 %v11150_v21, %v8455_v56 }
 0x2ea   :  { %v8711_v59 = vld [vmem:[%s17638_s29 + $0xb38] sm:$0xf0] }
 0x2eb   :  { %v11278_v57 = vld [vmem:[%s17638_s29 + $0xd1c] sm:$0xf]  ;;  %v8714_v1 = vor.u32 %v11214_v26, %v8711_v59  ;;  %3963 = vmatpush.bf16.msrb.mxu0 %v8458_v54 }
 0x2ec   :  { %v8967_v60 = vld [vmem:[%s17638_s29 + $0xd38] sm:$0xf0] }
 0x2ed   :  { %v11342_v62 = vld [vmem:[%s17638_s29 + $0xf1c] sm:$0xf]  ;;  %v8970_v2 = vor.u32 %v11278_v57, %v8967_v60  ;;  %3976 = vmatpush.bf16.msrb.mxu1 %v8714_v1  ;;  %v3737_v57 = vpop.f32.mrf.mxu2  ;;  %v3750_v1 = vpop.f32.mrf.mxu3 }
 0x2ee   :  { %v9223_v0 = vld [vmem:[%s17638_s29 + $0xf38] sm:$0xf0]  ;;  %v9773_v57 = vld [vmem:[%s17641_s0 + $0x380] sm:$0xf] }
 0x2ef   :  { %v11142_v58 = vld [vmem:[%s17638_s29 + $0x8dc] sm:$0xf]  ;;  %v9226_v9 = vor.u32 %v11342_v62, %v9223_v0  ;;  %3989 = vmatpush.bf16.msrb.mxu2 %v8970_v2  ;;  %v9437_v2 = vld [vmem:[%s17641_s0 + $0xe0] sm:$0xf] }
 0x2f0   :  { %v8423_v29 = vld [vmem:[%s17638_s29 + $0x8f8] sm:$0xf0] }
 0x2f1   :  { %v11206_v4 = vld [vmem:[%s17638_s29 + $0xadc] sm:$0xf]  ;;  %v8426_v7 = vor.u32 %v11142_v58, %v8423_v29  ;;  %4002 = vmatpush.bf16.msrb.mxu3 %v9226_v9  ;;  %v11401_v58 = vld [vmem:[%s17641_s0 + $0xec] sm:$0xf0]  ;;  %v9565_v29 = vld [vmem:[%s17641_s0 + $0x1e0] sm:$0xf] }
 0x2f2   :  { %v8679_v13 = vld [vmem:[%s17638_s29 + $0xaf8] sm:$0xf0]  ;;  %v11433_v9 = vld [vmem:[%s17641_s0 + $0x1ec] sm:$0xf0] }
 0x2f3   :  { %v11270_v6 = vld [vmem:[%s17638_s29 + $0xcdc] sm:$0xf]  ;;  %v8682_v17 = vor.u32 %v11206_v4, %v8679_v13  ;;  %3964 = vmatpush.bf16.msrb.mxu0 %v8426_v7  ;;  %v9693_v13 = vld [vmem:[%s17641_s0 + $0x2e0] sm:$0xf]  ;;  %v11497_v7 = vld [vmem:[%s17641_s0 + $0x3ec] sm:$0xf0] }
 0x2f4   :  { %v8935_v35 = vld [vmem:[%s17638_s29 + $0xcf8] sm:$0xf0] }
 0x2f5   :  { %v11334_v31 = vld [vmem:[%s17638_s29 + $0xedc] sm:$0xf]  ;;  %v8938_v8 = vor.u32 %v11270_v6, %v8935_v35  ;;  %3977 = vmatpush.bf16.msrb.mxu1 %v8682_v17  ;;  %v11465_v6 = vld [vmem:[%s17641_s0 + $0x2ec] sm:$0xf0] }
 0x2f6   :  { %v9191_v12 = vld [vmem:[%s17638_s29 + $0xef8] sm:$0xf0] }
 0x2f7   :  { %v11134_v38 = vld [vmem:[%s17638_s29 + $0x89c] sm:$0xf]  ;;  %v9194_v14 = vor.u32 %v11334_v31, %v9191_v12  ;;  %3990 = vmatpush.bf16.msrb.mxu2 %v8938_v8  ;;  %v9821_v12 = vld [vmem:[%s17641_s0 + $0x3e0] sm:$0xf]  ;;  %v9438_v8 = vor.u32 %v11401_v58, %v9437_v2  ;;  %v15261_v2 = vpop.f32.mrf.mxu0 }
 0x2f8   :  { %v8391_v15 = vld [vmem:[%s17638_s29 + $0x8b8] sm:$0xf0] }
 0x2f9   :  { %v11198_v10 = vld [vmem:[%s17638_s29 + $0xa9c] sm:$0xf]  ;;  %v8394_v24 = vor.u32 %v11134_v38, %v8391_v15  ;;  %4003 = vmatpush.bf16.msrb.mxu3 %v9194_v14  ;;  %v9566_v38 = vor.u32 %v11433_v9, %v9565_v29  ;;  %v9694_v15 = vor.u32 %v11465_v6, %v9693_v13  ;;  %v11397_v14 = vld [vmem:[%s17641_s0 + $0xcc] sm:$0xf0]  ;;  %v15272_v13 = vpop.f32.mrf.mxu1 }
 0x2fa   :  { %v8647_v16 = vld [vmem:[%s17638_s29 + $0xab8] sm:$0xf0]  ;;  %v11385_v9 = vld [vmem:[%s17641_s0 + $0x6c] sm:$0xf0] }
 0x2fb   :  { %v11262_v19 = vld [vmem:[%s17638_s29 + $0xc9c] sm:$0xf]  ;;  %v8650_v27 = vor.u32 %v11198_v10, %v8647_v16  ;;  %3965 = vmatpush.bf16.msrb.mxu0 %v8394_v24  ;;  %v9421_v10 = vld [vmem:[%s17641_s0 + $0xc0] sm:$0xf] }
 0x2fc   :  { %v8903_v44 = vld [vmem:[%s17638_s29 + $0xcb8] sm:$0xf0]  ;;  %v9549_v16 = vld [vmem:[%s17641_s0 + $0x1c0] sm:$0xf] }
 0x2fd   :  { %v11326_v18 = vld [vmem:[%s17638_s29 + $0xe9c] sm:$0xf]  ;;  %v8906_v30 = vor.u32 %v11262_v19, %v8903_v44  ;;  %3978 = vmatpush.bf16.msrb.mxu1 %v8650_v27  ;;  %v9822_v19 = vor.u32 %v11497_v7, %v9821_v12  ;;  %v11429_v44 = vld [vmem:[%s17641_s0 + $0x1cc] sm:$0xf0]  ;;  %v9805_v24 = vld [vmem:[%s17641_s0 + $0x3c0] sm:$0xf]  ;;  %v9422_v27 = vor.u32 %v11397_v14, %v9421_v10 }
 0x2fe   :  { %v9159_v50 = vld [vmem:[%s17638_s29 + $0xeb8] sm:$0xf0]  ;;  %v11449_v12 = vld [vmem:[%s17641_s0 + $0x26c] sm:$0xf0]  ;;  %v4012_v7 = vmul.f32 0.2, %v13264_v32 }
 0x2ff   :  { %v11126_v33 = vld [vmem:[%s17638_s29 + $0x85c] sm:$0xf]  ;;  %v9162_v39 = vor.u32 %v11326_v18, %v9159_v50  ;;  %3991 = vmatpush.bf16.msrb.mxu2 %v8906_v30  ;;  %v9677_v18 = vld [vmem:[%s17641_s0 + $0x2c0] sm:$0xf]  ;;  %v11461_v50 = vld [vmem:[%s17641_s0 + $0x2cc] sm:$0xf0]  ;;  %v9550_v30 = vor.u32 %v11429_v44, %v9549_v16 }
 0x300   :  { %v8359_v36 = vld [vmem:[%s17638_s29 + $0x878] sm:$0xf0]  ;;  %v9357_v44 = vld [vmem:[%s17641_s0 + $0x40] sm:$0xf] }
 0x301   :  { %v11190_v37 = vld [vmem:[%s17638_s29 + $0xa5c] sm:$0xf]  ;;  %v8362_v22 = vor.u32 %v11126_v33, %v8359_v36  ;;  %4004 = vmatpush.bf16.msrb.mxu3 %v9162_v39  ;;  %v9678_v33 = vor.u32 %v11461_v50, %v9677_v18  ;;  %v9405_v36 = vld [vmem:[%s17641_s0 + $0xa0] sm:$0xf]  ;;  %v9806_v39 = vor.u32 %v11493_v25, %v9805_v24  ;;  %v11381_v18 = vld [vmem:[%s17641_s0 + $0x4c] sm:$0xf0]  ;;  %v15306_v24 = vpop.f32.mrf.mxu2 }
 0x302   :  { %v8615_v43 = vld [vmem:[%s17638_s29 + $0xa78] sm:$0xf0]  ;;  %v9485_v50 = vld [vmem:[%s17641_s0 + $0x140] sm:$0xf]  ;;  %v11413_v25 = vld [vmem:[%s17641_s0 + $0x14c] sm:$0xf0] }
 0x303   :  { %v11254_v46 = vld [vmem:[%s17638_s29 + $0xc5c] sm:$0xf]  ;;  %v8618_v21 = vor.u32 %v11190_v37, %v8615_v43  ;;  %3966 = vmatpush.bf16.msrb.mxu0 %v8362_v22  ;;  %v11393_v37 = vld [vmem:[%s17641_s0 + $0xac] sm:$0xf0]  ;;  %v15231_v22 = vld [vmem:[%s17643_s23] sm:$0xff] }
 0x304   :  { %v8871_v3 = vld [vmem:[%s17638_s29 + $0xc78] sm:$0xf0]  ;;  %v11425_v43 = vld [vmem:[%s17641_s0 + $0x1ac] sm:$0xf0] }
 0x305   :  { %v11318_v47 = vld [vmem:[%s17638_s29 + $0xe5c] sm:$0xf]  ;;  %v8874_v56 = vor.u32 %v11254_v46, %v8871_v3  ;;  %3979 = vmatpush.bf16.msrb.mxu1 %v8618_v21  ;;  %v9661_v46 = vld [vmem:[%s17641_s0 + $0x2a0] sm:$0xf]  ;;  %v11457_v3 = vld [vmem:[%s17641_s0 + $0x2ac] sm:$0xf0] }
 0x306   :  { %v9127_v48 = vld [vmem:[%s17638_s29 + $0xe78] sm:$0xf0]  ;;  %v11389_v21 = vld [vmem:[%s17641_s0 + $0x8c] sm:$0xf0] }
 0x307   :  { %v11118_v49 = vld [vmem:[%s17638_s29 + $0x81c] sm:$0xf]  ;;  %v9130_v60 = vor.u32 %v11318_v47, %v9127_v48  ;;  %3992 = vmatpush.bf16.msrb.mxu2 %v8874_v56  ;;  %v11489_v47 = vld [vmem:[%s17641_s0 + $0x3ac] sm:$0xf0]  ;;  %v15226_v48 = vld [vmem:[%s17642_s30] sm:$0xff] }
 0x308   :  { %v8327_v55 = vld [vmem:[%s17638_s29 + $0x838] sm:$0xf0]  ;;  %v9517_v56 = vld [vmem:[%s17641_s0 + $0x180] sm:$0xf] }
 0x309   :  { %v11182_v26 = vld [vmem:[%s17638_s29 + $0xa1c] sm:$0xf]  ;;  %v8330_v4 = vor.u32 %v11118_v49, %v8327_v55  ;;  %4005 = vmatpush.bf16.msrb.mxu3 %v9130_v60  ;;  %v9662_v49 = vor.u32 %v11457_v3, %v9661_v46  ;;  %v9389_v55 = vld [vmem:[%s17641_s0 + $0x80] sm:$0xf]  ;;  %v11485_v60 = vld [vmem:[%s17641_s0 + $0x38c] sm:$0xf0]  ;;  %v9358_v3 = vor.u32 %v11381_v18, %v9357_v44 }
 0x30a   :  { %v8583_v51 = vld [vmem:[%s17638_s29 + $0xa38] sm:$0xf0]  ;;  %v9390_v1 = vor.u32 %v11389_v21, %v9389_v55  ;;  %v9774_v6 = vor.u32 %v11485_v60, %v9773_v57  ;;  %v11377_v55 = vld [vmem:[%s17641_s0 + $0x2c] sm:$0xf0]  ;;  %v3776_v21 = vpop.f32.mrf.mxu1  ;;  %v4057_v57 = vperm.slane %v15231_v22, 1 }
 0x30b   :  { %v11246_v59 = vld [vmem:[%s17638_s29 + $0xc1c] sm:$0xf]  ;;  %v8586_v35 = vor.u32 %v11182_v26, %v8583_v51  ;;  %3967 = vmatpush.bf16.msrb.mxu0 %v8330_v4  ;;  %v11421_v26 = vld [vmem:[%s17641_s0 + $0x18c] sm:$0xf0]  ;;  %v9645_v51 = vld [vmem:[%s17641_s0 + $0x280] sm:$0xf] }
 0x30c   :  { %v8839_v62 = vld [vmem:[%s17638_s29 + $0xc38] sm:$0xf0]  ;;  %v9518_v58 = vor.u32 %v11421_v26, %v9517_v56  ;;  %v9373_v4 = vld [vmem:[%s17641_s0 + $0x60] sm:$0xf]  ;;  %v11409_v26 = vld [vmem:[%s17641_s0 + $0x12c] sm:$0xf0] }
 0x30d   :  { %v11310_v0 = vld [vmem:[%s17638_s29 + $0xe1c] sm:$0xf]  ;;  %v8842_v31 = vor.u32 %v11246_v59, %v8839_v62  ;;  %3980 = vmatpush.bf16.msrb.mxu1 %v8586_v35  ;;  %v11453_v59 = vld [vmem:[%s17641_s0 + $0x28c] sm:$0xf0]  ;;  %v4030_v62 = vperm.slane %v15226_v48, 0  ;;  %v9374_v14 = vor.u32 %v11385_v9, %v9373_v4 }
 0x30e   :  { %v9095_v54 = vld [vmem:[%s17638_s29 + $0xe38] sm:$0xf0]  ;;  %3968 = vmatmul.bf16.vlgmr.msrb.gmra.mxu0 %v14810_v40  ;;  %v9789_v40 = vld [vmem:[%s17641_s0 + $0x3a0] sm:$0xf]  ;;  %v9646_v29 = vor.u32 %v11453_v59, %v9645_v51  ;;  %v11417_v35 = vld [vmem:[%s17641_s0 + $0x16c] sm:$0xf0] }
 0x30f   :  { %v9098_v17 = vor.u32 %v11310_v0, %v9095_v54  ;;  %3993 = vmatpush.bf16.msrb.mxu2 %v8842_v31  ;;  %5634 = vmatpush.bf16.msra.mxu0 %v9438_v8  ;;  %v4056_v0 = vperm.slane %v15231_v22, 0  ;;  %v591_v54 = vperm.slane %v14625_v52, 5  ;;  %v9501_v52 = vld [vmem:[%s17641_s0 + $0x160] sm:$0xf]  ;;  %v11481_v8 = vld [vmem:[%s17641_s0 + $0x36c] sm:$0xf0] }
 0x310   :  { %3981 = vmatmul.bf16.vlgmr.msrb.gmra.mxu1 %v14822_v20  ;;  %v9534_v20 = vor.u32 %v11425_v43, %v9533_v63  ;;  %v9629_v31 = vld [vmem:[%s17641_s0 + $0x260] sm:$0xf]  ;;  %v9502_v16 = vor.u32 %v11417_v35, %v9501_v52  ;;  %v11477_v63 = vld [vmem:[%s17641_s0 + $0x34c] sm:$0xf0]  ;;  %v4032_v43 = vperm.slane %v15226_v48, 2 }
 0x311   :  { %4006 = vmatpush.bf16.msrb.mxu3 %v9098_v17  ;;  %5647 = vmatpush.bf16.msra.mxu1 %v9566_v38  ;;  %v9757_v17 = vld [vmem:[%s17641_s0 + $0x360] sm:$0xf]  ;;  %v15291_v38 = vmul.f32 0.2, %v13670_v61  ;;  %v3710_v10 = vadd.f32 %v15044_v53, %v591_v54  ;;  %v11441_v59 = vld [vmem:[%s17641_s0 + $0x22c] sm:$0xf0] }
 0x312   :  { %3994 = vmatmul.bf16.vlgmr.msrb.gmra.mxu2 %v14798_v34  ;;  %v9406_v34 = vor.u32 %v11393_v37, %v9405_v36  ;;  %v9758_v53 = vor.u32 %v11481_v8, %v9757_v17  ;;  %v4015_v36 = vmul.f32 0.2, %v14487_v42  ;;  %v9741_v37 = vld [vmem:[%s17641_s0 + $0x340] sm:$0xf]  ;;  %v11473_v54 = vld [vmem:[%s17641_s0 + $0x32c] sm:$0xf0] }
 0x313   :  { %5660 = vmatpush.bf16.msra.mxu2 %v9694_v15  ;;  %5635 = vmatpush.bf16.msra.mxu0 %v9422_v27  ;;  %v15294_v15 = vmul.f32 0.2, %v14081_v45  ;;  %v9613_v27 = vld [vmem:[%s17641_s0 + $0x240] sm:$0xf]  ;;  %v3723_v46 = vadd.f32 %v15055_v5, %v3710_v10  ;;  %v11373_v35 = vld [vmem:[%s17641_s0 + $0xc] sm:$0xf0] }
 0x314   :  { %4007 = vmatmul.bf16.vlgmr.msrb.gmra.mxu3 %v14813_v41  ;;  %v9790_v41 = vor.u32 %v11489_v47, %v9789_v40  ;;  %v3763_v40 = vpop.f32.mrf.mxu0  ;;  %v4020_v47 = vmax.f32 %v13264_v32, %v4012_v7  ;;  %v9469_v5 = vld [vmem:[%s17641_s0 + $0x120] sm:$0xf]  ;;  %v4021_v32 = vmax.f32 %v13670_v61, %v15291_v38  ;;  %v4023_v61 = vmax.f32 %v14487_v42, %v4015_v36  ;;  %v11437_v38 = vld [vmem:[%s17641_s0 + $0x20c] sm:$0xf0] }
 0x315   :  { %5673 = vmatpush.bf16.msra.mxu3 %v9822_v19  ;;  %5648 = vmatpush.bf16.msra.mxu1 %v9550_v30  ;;  %v9630_v19 = vor.u32 %v11449_v12, %v9629_v31  ;;  %v11445_v30 = vld [vmem:[%s17641_s0 + $0x24c] sm:$0xf0]  ;;  %v4022_v56 = vmax.f32 %v14081_v45, %v15294_v15  ;;  %v9597_v51 = vld [vmem:[%s17641_s0 + $0x220] sm:$0xf]  ;;  %v4033_v45 = vperm.slane %v15226_v48, 3  ;;  %v9470_v52 = vor.u32 %v11409_v26, %v9469_v5  ;;  %v3789_v12 = vpop.f32.mrf.mxu2 }
 0x316   :  { %v9725_v60 = vld [vmem:[%s17641_s0 + $0x320] sm:$0xf]  ;;  %v4046_v9 = vmul.f32 %v4030_v62, %v4020_v47  ;;  %v11405_v31 = vld [vmem:[%s17641_s0 + $0x10c] sm:$0xf0] }
 0x317   :  { %5661 = vmatpush.bf16.msra.mxu2 %v9678_v33  ;;  %5636 = vmatpush.bf16.msra.mxu0 %v9406_v34  ;;  %v15317_v33 = vpop.f32.mrf.mxu3  ;;  %v9486_v34 = vor.u32 %v11413_v25, %v9485_v50  ;;  %v9325_v42 = vld [vmem:[%s17641_s0] sm:$0xf]  ;;  %v4048_v17 = vmul.f32 %v4032_v43, %v4022_v56  ;;  %v9726_v62 = vor.u32 %v11473_v54, %v9725_v60  ;;  %v11529_v44 = vld [vmem:[%s17641_s0 + $0x4ec] sm:$0xf0] }
 0x318   :  { %v9581_v8 = vld [vmem:[%s17641_s0 + $0x200] sm:$0xf]  ;;  %v9326_v50 = vor.u32 %v11373_v35, %v9325_v42  ;;  %v11561_v25 = vld [vmem:[%s17641_s0 + $0x5ec] sm:$0xf0] }
 0x319   :  { %5674 = vmatpush.bf16.msra.mxu3 %v9806_v39  ;;  %5649 = vmatpush.bf16.msra.mxu1 %v9534_v20  ;;  %v4031_v39 = vperm.slane %v15226_v48, 1  ;;  %v9614_v20 = vor.u32 %v11445_v30, %v9613_v27  ;;  %v9709_v15 = vld [vmem:[%s17641_s0 + $0x300] sm:$0xf]  ;;  %v4072_v27 = vadd.f32 %v4056_v0, %v4046_v9  ;;  %v9582_v36 = vor.u32 %v11437_v38, %v9581_v8  ;;  %v11525_v47 = vld [vmem:[%s17641_s0 + $0x4cc] sm:$0xf0]  ;;  %v15488_v8 = vpop.f32.mrf.mxu1 }
 0x31a   :  { %v10205_v43 = vld [vmem:[%s17641_s0 + $0x6e0] sm:$0xf]  ;;  %v11553_v60 = vld [vmem:[%s17641_s0 + $0x5ac] sm:$0xf0] }
 0x31b   :  { %5662 = vmatpush.bf16.msra.mxu2 %v9662_v49  ;;  %5637 = vmatpush.bf16.msra.mxu0 %v9390_v1  ;;  %v9341_v49 = vld [vmem:[%s17641_s0 + $0x20] sm:$0xf]  ;;  %v4058_v1 = vperm.slane %v15231_v22, 2  ;;  %v4047_v7 = vmul.f32 %v4031_v39, %v4021_v32  ;;  %v11517_v42 = vld [vmem:[%s17641_s0 + $0x48c] sm:$0xf0] }
 0x31c   :  { %v9342_v4 = vor.u32 %v11377_v55, %v9341_v49  ;;  %v9933_v0 = vld [vmem:[%s17641_s0 + $0x4c0] sm:$0xf]  ;;  %v11557_v49 = vld [vmem:[%s17641_s0 + $0x5cc] sm:$0xf0]  ;;  %v15424_v55 = vpack.c.bf16 %v4072_v27, %v4072_v27  ;;  %v15480_v12 = vpop.f32.mrf.mxu0 }
 0x31d   :  { %5675 = vmatpush.bf16.msra.mxu3 %v9790_v41  ;;  %5650 = vmatpush.bf16.msra.mxu1 %v9518_v58  ;;  %v9742_v41 = vor.u32 %v11477_v63, %v9741_v37  ;;  %v4059_v58 = vperm.slane %v15231_v22, 3  ;;  %v4073_v37 = vadd.f32 %v4057_v57, %v4047_v7  ;;  %v4074_v63 = vadd.f32 %v4058_v1, %v4048_v17  ;;  %v10189_v56 = vld [vmem:[%s17641_s0 + $0x6c0] sm:$0xf]  ;;  %v11521_v57 = vld [vmem:[%s17641_s0 + $0x4ac] sm:$0xf0] }
 0x31e   :  { %v9885_v17 = vld [vmem:[%s17641_s0 + $0x460] sm:$0xf] }
 0x31f   :  { %5663 = vmatpush.bf16.msra.mxu2 %v9646_v29  ;;  %5638 = vmatpush.bf16.msra.mxu0 %v9374_v14  ;;  %v3736_v29 = vadd.f32 %v15081_v11, %v3723_v46  ;;  %v9453_v11 = vld [vmem:[%s17641_s0 + $0x100] sm:$0xf]  ;;  %v3802_v10 = vpop.f32.mrf.mxu3  ;;  %v4049_v14 = vmul.f32 %v4033_v45, %v4023_v61  ;;  %v11593_v46 = vld [vmem:[%s17641_s0 + $0x6ec] sm:$0xf0]  ;;  %v15426_v21 = vpack.c.bf16 %v4073_v37, %v4073_v37 }
 0x320   :  { %v9454_v30 = vor.u32 %v11405_v31, %v9453_v11  ;;  %v10206_v5 = vor.u32 %v11593_v46, %v10205_v43  ;;  %v15428_v32 = vpack.c.bf16 %v4074_v63, %v4074_v63  ;;  %v10045_v45 = vld [vmem:[%s17641_s0 + $0x5a0] sm:$0xf]  ;;  %v11545_v10 = vld [vmem:[%s17641_s0 + $0x56c] sm:$0xf0] }
 0x321   :  { %5676 = vmatpush.bf16.msra.mxu3 %v9774_v6  ;;  %5651 = vmatpush.bf16.msra.mxu1 %v9502_v16  ;;  %v9598_v6 = vor.u32 %v11441_v59, %v9597_v51  ;;  %v11469_v16 = vld [vmem:[%s17641_s0 + $0x30c] sm:$0xf0]  ;;  %v3749_v18 = vadd.f32 %v15092_v23, %v3736_v29  ;;  %v9917_v59 = vld [vmem:[%s17641_s0 + $0x4a0] sm:$0xf]  ;;  %v10046_v29 = vor.u32 %v11553_v60, %v10045_v45 }
 0x322   :  { %v9710_v23 = vor.u32 %v11469_v16, %v9709_v15  ;;  %v9918_v1 = vor.u32 %v11521_v57, %v9917_v59  ;;  %v10157_v31 = vld [vmem:[%s17641_s0 + $0x680] sm:$0xf]  ;;  %v11573_v43 = vld [vmem:[%s17641_s0 + $0x64c] sm:$0xf0]  ;;  %v4060_v59 = vperm.slane %v15231_v22, 4  ;;  %v4061_v57 = vperm.slane %v15231_v22, 5 }
 0x323   :  { %5664 = vmatpush.bf16.msra.mxu2 %v9630_v19  ;;  %5639 = vmatpush.bf16.msra.mxu0 %v9358_v3  ;;  %v9949_v19 = vld [vmem:[%s17641_s0 + $0x4e0] sm:$0xf]  ;;  %v4075_v3 = vadd.f32 %v4059_v58, %v4049_v14  ;;  %v11585_v58 = vld [vmem:[%s17641_s0 + $0x6ac] sm:$0xf0] }
 0x324   :  { %v9950_v39 = vor.u32 %v11529_v44, %v9949_v19  ;;  %v10013_v15 = vld [vmem:[%s17641_s0 + $0x560] sm:$0xf]  ;;  %v4016_v44 = vmul.f32 0.2, %v14898_v28  ;;  %v3815_v46 = vpop.f32.mrf.mxu0  ;;  %v11569_v60 = vld [vmem:[%s17641_s0 + $0x62c] sm:$0xf0] }
 0x325   :  { %5677 = vmatpush.bf16.msra.mxu3 %v9758_v53  ;;  %5652 = vmatpush.bf16.msra.mxu1 %v9486_v34  ;;  %v10077_v53 = vld [vmem:[%s17641_s0 + $0x5e0] sm:$0xf]  ;;  %v3762_v34 = vadd.f32 %v15261_v2, %v3749_v18  ;;  %v9934_v2 = vor.u32 %v11525_v47, %v9933_v0  ;;  %v15436_v26 = vpack.c.bf16 %v4075_v3, %v4075_v3  ;;  %v11459_v46 = vld [vmem:[%s17641_s0 + $0x2c4] sm:$0xf] }
 0x326   :  { %v10078_v40 = vor.u32 %v11561_v25, %v10077_v53  ;;  %v10141_v19 = vld [vmem:[%s17641_s0 + $0x660] sm:$0xf]  ;;  %v10014_v18 = vor.u32 %v11545_v10, %v10013_v15  ;;  %v11509_v53 = vld [vmem:[%s17641_s0 + $0x44c] sm:$0xf0]  ;;  %v15510_v25 = vpop.f32.mrf.mxu2  ;;  %v4024_v3 = vmax.f32 %v14898_v28, %v4016_v44  ;;  %v11395_v44 = vld [vmem:[%s17641_s0 + $0xc4] sm:$0xf] }
 0x327   :  { %5665 = vmatpush.bf16.msra.mxu2 %v9614_v20  ;;  %5640 = vmatpush.bf16.msra.mxu0 %v9342_v4  ;;  %v10061_v20 = vld [vmem:[%s17641_s0 + $0x5c0] sm:$0xf]  ;;  %v3775_v61 = vadd.f32 %v15272_v13, %v3762_v34  ;;  %v15518_v37 = vpop.f32.mrf.mxu3  ;;  %v11505_v34 = vld [vmem:[%s17641_s0 + $0x42c] sm:$0xf0] }
 0x328   :  { %v10062_v51 = vor.u32 %v11557_v49, %v10061_v20  ;;  %v10173_v13 = vld [vmem:[%s17641_s0 + $0x6a0] sm:$0xf]  ;;  %v3828_v20 = vpop.f32.mrf.mxu1 }
 0x329   :  { %5678 = vmatpush.bf16.msra.mxu3 %v9742_v41  ;;  %5653 = vmatpush.bf16.msra.mxu1 %v9470_v52  ;;  %v11589_v41 = vld [vmem:[%s17641_s0 + $0x6cc] sm:$0xf0]  ;;  %v9901_v4 = vld [vmem:[%s17641_s0 + $0x480] sm:$0xf]  ;;  %v3788_v9 = vadd.f32 %v15306_v24, %v3775_v61  ;;  %v10174_v35 = vor.u32 %v11585_v58, %v10173_v13  ;;  %v11423_v20 = vld [vmem:[%s17641_s0 + $0x1a4] sm:$0xf] }
 0x32a   :  { %v10190_v54 = vor.u32 %v11589_v41, %v10189_v56  ;;  %v10029_v52 = vld [vmem:[%s17641_s0 + $0x580] sm:$0xf]  ;;  %v9902_v11 = vor.u32 %v11517_v42, %v9901_v4  ;;  %v11581_v24 = vld [vmem:[%s17641_s0 + $0x68c] sm:$0xf0] }
 0x32b   :  { %5666 = vmatpush.bf16.msra.mxu2 %v9598_v6  ;;  %5641 = vmatpush.bf16.msra.mxu0 %v9326_v50  ;;  %v11549_v6 = vld [vmem:[%s17641_s0 + $0x58c] sm:$0xf0]  ;;  %v3801_v38 = vadd.f32 %v15317_v33, %v3788_v9  ;;  %v10158_v14 = vor.u32 %v11581_v24, %v10157_v31  ;;  %v9869_v50 = vld [vmem:[%s17641_s0 + $0x440] sm:$0xf]  ;;  %v11431_v24 = vld [vmem:[%s17641_s0 + $0x1e4] sm:$0xf] }
 0x32c   :  { %v10030_v7 = vor.u32 %v11549_v6, %v10029_v52  ;;  %v11577_v33 = vld [vmem:[%s17641_s0 + $0x66c] sm:$0xf0]  ;;  %v9853_v47 = vld [vmem:[%s17641_s0 + $0x420] sm:$0xf]  ;;  %v11399_v52 = vld [vmem:[%s17641_s0 + $0xe4] sm:$0xf] }
 0x32d   :  { %5679 = vmatpush.bf16.msra.mxu3 %v9726_v62  ;;  %5654 = vmatpush.bf16.msra.mxu1 %v9454_v30  ;;  %v11513_v62 = vld [vmem:[%s17641_s0 + $0x46c] sm:$0xf0]  ;;  %v4017_v27 = vmul.f32 0.2, %v3801_v38  ;;  %v9997_v30 = vld [vmem:[%s17641_s0 + $0x540] sm:$0xf]  ;;  %v10142_v63 = vor.u32 %v11577_v33, %v10141_v19  ;;  %v9854_v61 = vor.u32 %v11505_v34, %v9853_v47 }
 0x32e   :  { %5642 = vmatmul.bf16.vlgmr.msra.gmra.mxu0 %v15424_v55  ;;  %v9886_v16 = vor.u32 %v11513_v62, %v9885_v17  ;;  %v9981_v28 = vld [vmem:[%s17641_s0 + $0x520] sm:$0xf]  ;;  %v11501_v58 = vld [vmem:[%s17641_s0 + $0x40c] sm:$0xf0]  ;;  %v3841_v4 = vpop.f32.mrf.mxu2  ;;  %v9439_v6 = vld [vmem:[%s17641_s0 + $0xf0] sm:$0xf0] }
 0x32f   :  { %5667 = vmatpush.bf16.msra.mxu2 %v9582_v36  ;;  %5686 = vmatpush.bf16.msrb.mxu0 %v9950_v39  ;;  %v11541_v36 = vld [vmem:[%s17641_s0 + $0x54c] sm:$0xf0]  ;;  %v10125_v39 = vld [vmem:[%s17641_s0 + $0x640] sm:$0xf]  ;;  %v4025_v49 = vmax.f32 %v3801_v38, %v4017_v27  ;;  %v9442_v10 = vor.u32 %v11399_v52, %v9439_v6  ;;  %v11391_v47 = vld [vmem:[%s17641_s0 + $0xa4] sm:$0xf] }
 0x330   :  { %5655 = vmatmul.bf16.vlgmr.msra.gmra.mxu1 %v15426_v21  ;;  %v9998_v0 = vor.u32 %v11541_v36, %v9997_v30  ;;  %v10126_v56 = vor.u32 %v11573_v43, %v10125_v39  ;;  %v15544_v41 = vld [vmem:[%s17640_s4] sm:$0xff]  ;;  %v11533_v9 = vld [vmem:[%s17641_s0 + $0x50c] sm:$0xf0]  ;;  %v9551_v30 = vld [vmem:[%s17641_s0 + $0x1d0] sm:$0xf0] }
 0x331   :  { %5680 = vmatpush.bf16.msra.mxu3 %v9710_v23  ;;  %5699 = vmatpush.bf16.msrb.mxu1 %v10078_v40  ;;  %v9870_v23 = vor.u32 %v11509_v53, %v9869_v50  ;;  %v4034_v40 = vperm.slane %v15226_v48, 4  ;;  %v10109_v45 = vld [vmem:[%s17641_s0 + $0x620] sm:$0xf]  ;;  %v11565_v38 = vld [vmem:[%s17641_s0 + $0x60c] sm:$0xf0] }
 0x332   :  { %5668 = vmatmul.bf16.vlgmr.msra.gmra.mxu2 %v15428_v32  ;;  %v9837_v13 = vld [vmem:[%s17641_s0 + $0x400] sm:$0xf]  ;;  %v10110_v31 = vor.u32 %v11569_v60, %v10109_v45  ;;  %v11427_v50 = vld [vmem:[%s17641_s0 + $0x1c4] sm:$0xf]  ;;  %v9407_v34 = vld [vmem:[%s17641_s0 + $0xb0] sm:$0xf0] }
 0x333   :  { %5712 = vmatpush.bf16.msrb.mxu2 %v10206_v5  ;;  %5687 = vmatpush.bf16.msrb.mxu0 %v9934_v2  ;;  %v4035_v5 = vperm.slane %v15226_v48, 5  ;;  %v11537_v2 = vld [vmem:[%s17641_s0 + $0x52c] sm:$0xf0]  ;;  %v9838_v17 = vor.u32 %v11501_v58, %v9837_v13  ;;  %v10093_v62 = vld [vmem:[%s17641_s0 + $0x600] sm:$0xf] }
 0x334   :  { %5681 = vmatmul.bf16.vlgmr.msra.gmra.mxu3 %v15436_v26  ;;  %v10094_v27 = vor.u32 %v11565_v38, %v10093_v62  ;;  %v10333_v36 = vld [vmem:[%s17641_s0 + $0x7e0] sm:$0xf]  ;;  %v11387_v45 = vld [vmem:[%s17641_s0 + $0x84] sm:$0xf]  ;;  %v9391_v60 = vld [vmem:[%s17641_s0 + $0x90] sm:$0xf0] }
 0x335   :  { %5700 = vmatpush.bf16.msrb.mxu1 %v10062_v51  ;;  %v592_v51 = vperm.slane %v15544_v41, 6  ;;  %v4051_v42 = vmul.f32 %v4035_v5, %v4025_v49  ;;  %v9535_v5 = vld [vmem:[%s17641_s0 + $0x1b0] sm:$0xf0]  ;;  %v10301_v58 = vld [vmem:[%s17641_s0 + $0x7a0] sm:$0xf] }
 0x336   :  { %v9519_v13 = vld [vmem:[%s17641_s0 + $0x190] sm:$0xf0]  ;;  %v10285_v38 = vld [vmem:[%s17641_s0 + $0x780] sm:$0xf] }
 0x337   :  { %5713 = vmatpush.bf16.msrb.mxu2 %v10190_v54  ;;  %5688 = vmatpush.bf16.msrb.mxu0 %v9918_v1  ;;  %v4050_v54 = vmul.f32 %v4034_v40, %v4024_v3  ;;  %v9982_v1 = vor.u32 %v11537_v2, %v9981_v28  ;;  %v4077_v19 = vadd.f32 %v4061_v57, %v4051_v42  ;;  %v9679_v3 = vld [vmem:[%s17641_s0 + $0x2d0] sm:$0xf0]  ;;  %v10317_v28 = vld [vmem:[%s17641_s0 + $0x7c0] sm:$0xf]  ;;  %v11621_v2 = vld [vmem:[%s17641_s0 + $0x7cc] sm:$0xf0] }
 0x338   :  { %v9663_v57 = vld [vmem:[%s17641_s0 + $0x2b0] sm:$0xf0] }
 0x339   :  { %5701 = vmatpush.bf16.msrb.mxu1 %v10046_v29  ;;  %v9965_v29 = vld [vmem:[%s17641_s0 + $0x500] sm:$0xf]  ;;  %v15619_v40 = vpack.c.bf16 %v4077_v19, %v4077_v19  ;;  %v9647_v52 = vld [vmem:[%s17641_s0 + $0x290] sm:$0xf0]  ;;  %v11447_v19 = vld [vmem:[%s17641_s0 + $0x264] sm:$0xf] }
 0x33a   :  { %v9966_v15 = vor.u32 %v11533_v9, %v9965_v29  ;;  %v11617_v29 = vld [vmem:[%s17641_s0 + $0x7ac] sm:$0xf0]  ;;  %v9394_v9 = vor.u32 %v11387_v45, %v9391_v60  ;;  %v9503_v62 = vld [vmem:[%s17641_s0 + $0x170] sm:$0xf0]  ;;  %v11439_v60 = vld [vmem:[%s17641_s0 + $0x224] sm:$0xf] }
 0x33b   :  { %5714 = vmatpush.bf16.msrb.mxu2 %v10174_v35  ;;  %5689 = vmatpush.bf16.msrb.mxu0 %v9902_v11  ;;  %v3854_v35 = vpop.f32.mrf.mxu3  ;;  %v3814_v11 = vadd.f32 %v15480_v12, %v592_v51  ;;  %v4076_v12 = vadd.f32 %v4060_v59, %v4050_v54  ;;  %v9410_v51 = vor.u32 %v11391_v47, %v9407_v34  ;;  %v11455_v59 = vld [vmem:[%s17641_s0 + $0x2a4] sm:$0xf]  ;;  %v9615_v34 = vld [vmem:[%s17641_s0 + $0x250] sm:$0xf0] }
 0x33c   :  { %v11419_v54 = vld [vmem:[%s17641_s0 + $0x184] sm:$0xf]  ;;  %v9666_v4 = vor.u32 %v11455_v59, %v9663_v57  ;;  %v10302_v42 = vor.u32 %v11617_v29, %v10301_v58  ;;  %v3865_v35 = vpop.f32.mrf.mxu0  ;;  %v11605_v59 = vld [vmem:[%s17641_s0 + $0x74c] sm:$0xf0] }
 0x33d   :  { %5702 = vmatpush.bf16.msrb.mxu1 %v10030_v7  ;;  %v9567_v7 = vld [vmem:[%s17641_s0 + $0x1f0] sm:$0xf0]  ;;  %v3827_v53 = vadd.f32 %v15488_v8, %v3814_v11  ;;  %v15611_v43 = vpack.c.bf16 %v4076_v12, %v4076_v12  ;;  %v9522_v6 = vor.u32 %v11419_v54, %v9519_v13  ;;  %v11383_v11 = vld [vmem:[%s17641_s0 + $0x64] sm:$0xf]  ;;  %v11613_v12 = vld [vmem:[%s17641_s0 + $0x78c] sm:$0xf0] }
 0x33e   :  { %v9570_v33 = vor.u32 %v11431_v24, %v9567_v7  ;;  %v11415_v24 = vld [vmem:[%s17641_s0 + $0x164] sm:$0xf]  ;;  %v9599_v13 = vld [vmem:[%s17641_s0 + $0x230] sm:$0xf0] }
 0x33f   :  { %5715 = vmatpush.bf16.msrb.mxu2 %v10158_v14  ;;  %5690 = vmatpush.bf16.msrb.mxu0 %v9886_v16  ;;  %v11463_v14 = vld [vmem:[%s17641_s0 + $0x2e4] sm:$0xf]  ;;  %v9695_v16 = vld [vmem:[%s17641_s0 + $0x2f0] sm:$0xf0]  ;;  %v3840_v49 = vadd.f32 %v15510_v25, %v3827_v53  ;;  %v10318_v25 = vor.u32 %v11621_v2, %v10317_v28 }
 0x340   :  { %v11411_v53 = vld [vmem:[%s17641_s0 + $0x144] sm:$0xf] }
 0x341   :  { %5703 = vmatpush.bf16.msrb.mxu1 %v10014_v18  ;;  %v9423_v18 = vld [vmem:[%s17641_s0 + $0xd0] sm:$0xf0]  ;;  %v11443_v47 = vld [vmem:[%s17641_s0 + $0x244] sm:$0xf] }
 0x342   :  { %v9426_v8 = vor.u32 %v11395_v44, %v9423_v18  ;;  %v9506_v44 = vor.u32 %v11415_v24, %v9503_v62  ;;  %v11379_v18 = vld [vmem:[%s17641_s0 + $0x44] sm:$0xf]  ;;  %v9618_v45 = vor.u32 %v11443_v47, %v9615_v34  ;;  %v9602_v24 = vor.u32 %v11439_v60, %v9599_v13  ;;  %v10191_v34 = vld [vmem:[%s17641_s0 + $0x6d0] sm:$0xf0] }
 0x343   :  { %5716 = vmatpush.bf16.msrb.mxu2 %v10142_v63  ;;  %5691 = vmatpush.bf16.msrb.mxu0 %v9870_v23  ;;  %v11625_v63 = vld [vmem:[%s17641_s0 + $0x7ec] sm:$0xf0]  ;;  %v9698_v23 = vor.u32 %v11463_v14, %v9695_v16  ;;  %v11407_v28 = vld [vmem:[%s17641_s0 + $0x124] sm:$0xf] }
 0x344   :  { %v10334_v39 = vor.u32 %v11625_v63, %v10333_v36  ;;  %v10269_v36 = vld [vmem:[%s17641_s0 + $0x760] sm:$0xf]  ;;  %v11609_v63 = vld [vmem:[%s17641_s0 + $0x76c] sm:$0xf0]  ;;  %v3867_v2 = vpop.f32.mrf.mxu0  ;;  %v11371_v58 = vld [vmem:[%s17641_s0 + $0x4] sm:$0xf] }
 0x345   :  { %5704 = vmatpush.bf16.msrb.mxu1 %v9998_v0  ;;  %v9554_v0 = vor.u32 %v11427_v50, %v9551_v30  ;;  %v9359_v50 = vld [vmem:[%s17641_s0 + $0x50] sm:$0xf0]  ;;  %v11587_v47 = vld [vmem:[%s17641_s0 + $0x6c4] sm:$0xf] }
 0x346   :  { %5725 = vmatpush.bf16.msrb.mxu3 %v10334_v39  ;;  %v9487_v30 = vld [vmem:[%s17641_s0 + $0x150] sm:$0xf0]  ;;  %v3904_v39 = vpop.f32.mrf.mxu3  ;;  %v11547_v13 = vld [vmem:[%s17641_s0 + $0x584] sm:$0xf] }
 0x347   :  { %5717 = vmatpush.bf16.msrb.mxu2 %v10126_v56  ;;  %5692 = vmatpush.bf16.msrb.mxu0 %v9854_v61  ;;  %v9682_v56 = vor.u32 %v11459_v46, %v9679_v3  ;;  %v9538_v61 = vor.u32 %v11423_v20, %v9535_v5  ;;  %v10270_v46 = vor.u32 %v11609_v63, %v10269_v36  ;;  %v4036_v3 = vperm.slane %v15226_v48, 6  ;;  %v11375_v5 = vld [vmem:[%s17641_s0 + $0x24] sm:$0xf]  ;;  %v9343_v48 = vld [vmem:[%s17641_s0 + $0x30] sm:$0xf0] }
 0x348   :  { %v11597_v36 = vld [vmem:[%s17641_s0 + $0x70c] sm:$0xf0] }
 0x349   :  { %5705 = vmatpush.bf16.msrb.mxu1 %v9982_v1  ;;  %v3853_v1 = vadd.f32 %v15518_v37, %v3840_v49  ;;  %v11451_v37 = vld [vmem:[%s17641_s0 + $0x284] sm:$0xf]  ;;  %v9490_v49 = vor.u32 %v11411_v53, %v9487_v30  ;;  %v10221_v30 = vld [vmem:[%s17641_s0 + $0x700] sm:$0xf] }
 0x34a   :  { %5726 = vmatpush.bf16.msrb.mxu3 %v10318_v25 }
 0x34b   :  { %5718 = vmatpush.bf16.msrb.mxu2 %v10110_v31  ;;  %5693 = vmatpush.bf16.msrb.mxu0 %v9838_v17  ;;  %v9375_v31 = vld [vmem:[%s17641_s0 + $0x70] sm:$0xf0]  ;;  %v3866_v7 = vadd.f32 %v3865_v35, %v3853_v1  ;;  %v3878_v17 = vpop.f32.mrf.mxu1  ;;  %v9346_v1 = vor.u32 %v11375_v5, %v9343_v48  ;;  %v10237_v35 = vld [vmem:[%s17641_s0 + $0x720] sm:$0xf]  ;;  %v11519_v5 = vld [vmem:[%s17641_s0 + $0x4a4] sm:$0xf] }
 0x34c   :  { %v9378_v16 = vor.u32 %v11383_v11, %v9375_v31  ;;  %v11601_v11 = vld [vmem:[%s17641_s0 + $0x72c] sm:$0xf0]  ;;  %v9919_v48 = vld [vmem:[%s17641_s0 + $0x4b0] sm:$0xf0] }
 0x34d   :  { %5706 = vmatpush.bf16.msrb.mxu1 %v9966_v15  ;;  %v9650_v15 = vor.u32 %v11451_v37, %v9647_v52  ;;  %v3879_v14 = vadd.f32 %v3878_v17, %v3866_v7  ;;  %v11527_v37 = vld [vmem:[%s17641_s0 + $0x4e4] sm:$0xf]  ;;  %v9951_v52 = vld [vmem:[%s17641_s0 + $0x4f0] sm:$0xf0] }
 0x34e   :  { %5694 = vmatmul.bf16.vlgmr.msrb.gmra.mxu0 %v15611_v43  ;;  %5727 = vmatpush.bf16.msrb.mxu3 %v10302_v42  ;;  %v11403_v42 = vld [vmem:[%s17641_s0 + $0x104] sm:$0xf]  ;;  %v10079_v17 = vld [vmem:[%s17641_s0 + $0x5f0] sm:$0xf0]  ;;  %v3906_v62 = vpop.f32.mrf.mxu3 }
 0x34f   :  { %5738 = vmatpush.bf16.msra.mxu0 %v9442_v10  ;;  %5719 = vmatpush.bf16.msrb.mxu2 %v10094_v27  ;;  %v10286_v10 = vor.u32 %v11613_v12, %v10285_v38  ;;  %v3891_v27 = vpop.f32.mrf.mxu2  ;;  %v11559_v7 = vld [vmem:[%s17641_s0 + $0x5e4] sm:$0xf]  ;;  %v10238_v38 = vor.u32 %v11601_v11, %v10237_v35  ;;  %v9887_v11 = vld [vmem:[%s17641_s0 + $0x470] sm:$0xf0] }
 0x350   :  { %5707 = vmatmul.bf16.vlgmr.msrb.gmra.mxu1 %v15619_v40  ;;  %v10082_v53 = vor.u32 %v11559_v7, %v10079_v17  ;;  %v11511_v35 = vld [vmem:[%s17641_s0 + $0x464] sm:$0xf]  ;;  %v10015_v7 = vld [vmem:[%s17641_s0 + $0x570] sm:$0xf0]  ;;  %v15884_v17 = vpop.f32.mrf.mxu0 }
 0x351   :  { %5751 = vmatpush.bf16.msra.mxu1 %v9570_v33  ;;  %v9631_v33 = vld [vmem:[%s17641_s0 + $0x270] sm:$0xf0] }
 0x352   :  { %5728 = vmatpush.bf16.msrb.mxu3 %v10286_v10  ;;  %v9583_v10 = vld [vmem:[%s17641_s0 + $0x210] sm:$0xf0] }
 0x353   :  { %5764 = vmatpush.bf16.msra.mxu2 %v9698_v23  ;;  %5739 = vmatpush.bf16.msra.mxu0 %v9426_v8  ;;  %v3892_v23 = vadd.f32 %v3891_v27, %v3879_v14  ;;  %v9634_v8 = vor.u32 %v11447_v19, %v9631_v33  ;;  %v3880_v25 = vpop.f32.mrf.mxu1  ;;  %v11591_v14 = vld [vmem:[%s17641_s0 + $0x6e4] sm:$0xf]  ;;  %v9954_v33 = vor.u32 %v11527_v37, %v9951_v52  ;;  %v10159_v52 = vld [vmem:[%s17641_s0 + $0x690] sm:$0xf0] }
 0x354   :  { %v11555_v27 = vld [vmem:[%s17641_s0 + $0x5c4] sm:$0xf] }
 0x355   :  { %5752 = vmatpush.bf16.msra.mxu1 %v9554_v0  ;;  %v9362_v0 = vor.u32 %v11379_v18, %v9359_v50  ;;  %v3905_v20 = vadd.f32 %v3904_v39, %v3892_v23  ;;  %v11523_v18 = vld [vmem:[%s17641_s0 + $0x4c4] sm:$0xf]  ;;  %v9935_v50 = vld [vmem:[%s17641_s0 + $0x4d0] sm:$0xf0] }
 0x356   :  { %5729 = vmatpush.bf16.msrb.mxu3 %v10270_v46  ;;  %v10063_v39 = vld [vmem:[%s17641_s0 + $0x5d0] sm:$0xf0]  ;;  %v11491_v25 = vld [vmem:[%s17641_s0 + $0x3c4] sm:$0xf] }
 0x357   :  { %5765 = vmatpush.bf16.msra.mxu2 %v9682_v56  ;;  %5740 = vmatpush.bf16.msra.mxu0 %v9410_v51  ;;  %v9471_v56 = vld [vmem:[%s17641_s0 + $0x130] sm:$0xf0]  ;;  %v10253_v51 = vld [vmem:[%s17641_s0 + $0x740] sm:$0xf]  ;;  %v4018_v57 = vmul.f32 0.2, %v3905_v20 }
 0x358   :  { %v10254_v54 = vor.u32 %v11605_v59, %v10253_v51  ;;  %v9823_v46 = vld [vmem:[%s17641_s0 + $0x3f0] sm:$0xf0]  ;;  %v10194_v59 = vor.u32 %v11587_v47, %v10191_v34  ;;  %v11579_v37 = vld [vmem:[%s17641_s0 + $0x684] sm:$0xf] }
 0x359   :  { %5753 = vmatpush.bf16.msra.mxu1 %v9538_v61  ;;  %v4062_v61 = vperm.slane %v15231_v22, 6  ;;  %v9327_v22 = vld [vmem:[%s17641_s0 + $0x10] sm:$0xf0]  ;;  %v4026_v29 = vmax.f32 %v3905_v20, %v4018_v57  ;;  %v10222_v20 = vor.u32 %v11597_v36, %v10221_v30  ;;  %v9922_v57 = vor.u32 %v11519_v5, %v9919_v48  ;;  %v11479_v36 = vld [vmem:[%s17641_s0 + $0x364] sm:$0xf]  ;;  %v3919_v5 = vpop.f32.mrf.mxu0 }
 0x35a   :  { %5730 = vmatpush.bf16.msrb.mxu3 %v10254_v54  ;;  %v9330_v12 = vor.u32 %v11371_v58, %v9327_v22  ;;  %v9807_v51 = vld [vmem:[%s17641_s0 + $0x3d0] sm:$0xf0]  ;;  %v11515_v54 = vld [vmem:[%s17641_s0 + $0x484] sm:$0xf]  ;;  %v10162_v62 = vor.u32 %v11579_v37, %v10159_v52 }
 0x35b   :  { %5766 = vmatpush.bf16.msra.mxu2 %v9666_v4  ;;  %5741 = vmatpush.bf16.msra.mxu0 %v9394_v9  ;;  %v9474_v4 = vor.u32 %v11407_v28, %v9471_v56  ;;  %v9455_v9 = vld [vmem:[%s17641_s0 + $0x110] sm:$0xf0]  ;;  %v4052_v31 = vmul.f32 %v4036_v3, %v4026_v29  ;;  %v11551_v28 = vld [vmem:[%s17641_s0 + $0x5a4] sm:$0xf]  ;;  %v9810_v58 = vor.u32 %v11491_v25, %v9807_v51 }
 0x35c   :  { %v9458_v19 = vor.u32 %v11403_v42, %v9455_v9  ;;  %v10047_v56 = vld [vmem:[%s17641_s0 + $0x5b0] sm:$0xf0]  ;;  %v11487_v29 = vld [vmem:[%s17641_s0 + $0x3a4] sm:$0xf] }
 0x35d   :  { %5754 = vmatpush.bf16.msra.mxu1 %v9522_v6  ;;  %v3893_v6 = vpop.f32.mrf.mxu2  ;;  %v10050_v60 = vor.u32 %v11551_v28, %v10047_v56  ;;  %v10031_v22 = vld [vmem:[%s17641_s0 + $0x590] sm:$0xf0]  ;;  %v11503_v47 = vld [vmem:[%s17641_s0 + $0x424] sm:$0xf]  ;;  %v593_v28 = vperm.slane %v15544_v41, 7 }
 0x35e   :  { %5731 = vmatpush.bf16.msrb.mxu3 %v10238_v38  ;;  %v10034_v6 = vor.u32 %v11547_v13, %v10031_v22  ;;  %v15886_v38 = vpop.f32.mrf.mxu1  ;;  %v9855_v34 = vld [vmem:[%s17641_s0 + $0x430] sm:$0xf0]  ;;  %v11475_v25 = vld [vmem:[%s17641_s0 + $0x344] sm:$0xf]  ;;  %v9445_v13 = vld [vmem:[%s17641_s0 + $0xe8] sm:$0xf] }
 0x35f   :  { %5767 = vmatpush.bf16.msra.mxu2 %v9650_v15  ;;  %5742 = vmatpush.bf16.msra.mxu0 %v9378_v16  ;;  %v11435_v15 = vld [vmem:[%s17641_s0 + $0x204] sm:$0xf]  ;;  %v4078_v16 = vadd.f32 %v4062_v61, %v4052_v31  ;;  %v9743_v51 = vld [vmem:[%s17641_s0 + $0x350] sm:$0xf0]  ;;  %v9573_v22 = vld [vmem:[%s17641_s0 + $0x1e8] sm:$0xf] }
 0x360   :  { %v9586_v23 = vor.u32 %v11435_v15, %v9583_v10  ;;  %v11583_v61 = vld [vmem:[%s17641_s0 + $0x6a4] sm:$0xf]  ;;  %v9775_v15 = vld [vmem:[%s17641_s0 + $0x390] sm:$0xf0]  ;;  %v9890_v10 = vor.u32 %v11511_v35, %v9887_v11 }
 0x361   :  { %5755 = vmatpush.bf16.msra.mxu1 %v9506_v44  ;;  %v10207_v44 = vld [vmem:[%s17641_s0 + $0x6f0] sm:$0xf0]  ;;  %v15804_v63 = vpack.c.bf16 %v4078_v16, %v4078_v16  ;;  %v11471_v37 = vld [vmem:[%s17641_s0 + $0x324] sm:$0xf] }
 0x362   :  { %v10210_v3 = vor.u32 %v11591_v14, %v10207_v44  ;;  %5732 = vmatpush.bf16.msrb.mxu3 %v10222_v20  ;;  %v11575_v14 = vld [vmem:[%s17641_s0 + $0x664] sm:$0xf]  ;;  %v10143_v16 = vld [vmem:[%s17641_s0 + $0x670] sm:$0xf0] }
 0x363   :  { %5768 = vmatpush.bf16.msra.mxu2 %v9634_v8  ;;  %5743 = vmatpush.bf16.msra.mxu0 %v9362_v0  ;;  %v11495_v8 = vld [vmem:[%s17641_s0 + $0x3e4] sm:$0xf]  ;;  %v9938_v0 = vor.u32 %v11523_v18, %v9935_v50  ;;  %v9871_v44 = vld [vmem:[%s17641_s0 + $0x450] sm:$0xf0] }
 0x364   :  { %5720 = vmatmul.bf16.vlgmr.msrb.gmra.mxu2 %v15804_v63  ;;  %v9826_v2 = vor.u32 %v11495_v8, %v9823_v46  ;;  %v11539_v18 = vld [vmem:[%s17641_s0 + $0x544] sm:$0xf]  ;;  %v9999_v50 = vld [vmem:[%s17641_s0 + $0x550] sm:$0xf0] }
 0x365   :  { %5756 = vmatpush.bf16.msra.mxu1 %v9490_v49  ;;  %v10066_v49 = vor.u32 %v11555_v27, %v10063_v39  ;;  %v10146_v27 = vor.u32 %v11575_v14, %v10143_v16  ;;  %v15912_v30 = vpop.f32.mrf.mxu2  ;;  %v11571_v8 = vld [vmem:[%s17641_s0 + $0x644] sm:$0xf]  ;;  %v10127_v46 = vld [vmem:[%s17641_s0 + $0x650] sm:$0xf0]  ;;  %v11398_v14 = vld [vmem:[%s17641_s0 + $0xd4] sm:$0xf0] }
 0x366   :  { %5777 = vmatpush.bf16.msra.mxu3 %v9826_v2  ;;  %v11535_v20 = vld [vmem:[%s17641_s0 + $0x524] sm:$0xf]  ;;  %v10130_v2 = vor.u32 %v11571_v8, %v10127_v46  ;;  %v3932_v56 = vpop.f32.mrf.mxu1  ;;  %v10111_v41 = vld [vmem:[%s17641_s0 + $0x630] sm:$0xf0]  ;;  %v9413_v8 = vld [vmem:[%s17641_s0 + $0xa8] sm:$0xf] }
 0x367   :  { %5769 = vmatpush.bf16.msra.mxu2 %v9618_v45  ;;  %5744 = vmatpush.bf16.msra.mxu0 %v9346_v1  ;;  %v10175_v45 = vld [vmem:[%s17641_s0 + $0x6b0] sm:$0xf0]  ;;  %v11563_v35 = vld [vmem:[%s17641_s0 + $0x604] sm:$0xf]  ;;  %v11394_v46 = vld [vmem:[%s17641_s0 + $0xb4] sm:$0xf0] }
 0x368   :  { %v9903_v1 = vld [vmem:[%s17641_s0 + $0x490] sm:$0xf0]  ;;  %v10178_v42 = vor.u32 %v11583_v61, %v10175_v45  ;;  %v11499_v61 = vld [vmem:[%s17641_s0 + $0x404] sm:$0xf]  ;;  %v9414_v5 = vor.u32 %v11394_v46, %v9413_v8  ;;  %v11390_v56 = vld [vmem:[%s17641_s0 + $0x94] sm:$0xf0] }
 0x369   :  { %5757 = vmatpush.bf16.msra.mxu1 %v9474_v4  ;;  %v9791_v4 = vld [vmem:[%s17641_s0 + $0x3b0] sm:$0xf0]  ;;  %v9906_v9 = vor.u32 %v11515_v54, %v9903_v1  ;;  %v11531_v54 = vld [vmem:[%s17641_s0 + $0x504] sm:$0xf]  ;;  %v9605_v46 = vld [vmem:[%s17641_s0 + $0x228] sm:$0xf] }
 0x36a   :  { %5778 = vmatpush.bf16.msra.mxu3 %v9810_v58  ;;  %v9794_v31 = vor.u32 %v11487_v29, %v9791_v4  ;;  %v9967_v1 = vld [vmem:[%s17641_s0 + $0x510] sm:$0xf0]  ;;  %v11402_v58 = vld [vmem:[%s17641_s0 + $0xf4] sm:$0xf0]  ;;  %v9746_v29 = vor.u32 %v11475_v25, %v9743_v51  ;;  %v9525_v51 = vld [vmem:[%s17641_s0 + $0x188] sm:$0xf] }
 0x36b   :  { %5770 = vmatpush.bf16.msra.mxu2 %v9602_v24  ;;  %5745 = vmatpush.bf16.msra.mxu0 %v9330_v12  ;;  %v11543_v24 = vld [vmem:[%s17641_s0 + $0x564] sm:$0xf]  ;;  %v9727_v52 = vld [vmem:[%s17641_s0 + $0x330] sm:$0xf0] }
 0x36c   :  { %v11483_v12 = vld [vmem:[%s17641_s0 + $0x384] sm:$0xf]  ;;  %v10095_v11 = vld [vmem:[%s17641_s0 + $0x610] sm:$0xf0]  ;;  %v9730_v16 = vor.u32 %v11471_v37, %v9727_v52  ;;  %v9637_v37 = vld [vmem:[%s17641_s0 + $0x268] sm:$0xf] }
 0x36d   :  { %5758 = vmatpush.bf16.msra.mxu1 %v9458_v19  ;;  %v10018_v19 = vor.u32 %v11543_v24, %v10015_v7  ;;  %v9970_v24 = vor.u32 %v11531_v54, %v9967_v1  ;;  %v9446_v7 = vor.u32 %v11402_v58, %v9445_v13  ;;  %v11386_v54 = vld [vmem:[%s17641_s0 + $0x74] sm:$0xf0]  ;;  %v9509_v58 = vld [vmem:[%s17641_s0 + $0x168] sm:$0xf] }
 0x36e   :  { %5746 = vmatmul.bf16.vlgmr.msra.gmra.mxu0 %v15424_v55  ;;  %5779 = vmatpush.bf16.msra.mxu3 %v9794_v31 }
 0x36f   :  { %5790 = vmatpush.bf16.msrb.mxu0 %v9954_v33  ;;  %5771 = vmatpush.bf16.msra.mxu2 %v9586_v23  ;;  %v11507_v33 = vld [vmem:[%s17641_s0 + $0x444] sm:$0xf]  ;;  %v9759_v23 = vld [vmem:[%s17641_s0 + $0x370] sm:$0xf0] }
 0x370   :  { %5759 = vmatmul.bf16.vlgmr.msra.gmra.mxu1 %v15426_v21  ;;  %v9874_v39 = vor.u32 %v11507_v33, %v9871_v44  ;;  %v9762_v48 = vor.u32 %v11479_v36, %v9759_v23  ;;  %v10098_v33 = vor.u32 %v11563_v35, %v10095_v11  ;;  %v9557_v44 = vld [vmem:[%s17641_s0 + $0x1c8] sm:$0xf]  ;;  %v11462_v23 = vld [vmem:[%s17641_s0 + $0x2d4] sm:$0xf0] }
 0x371   :  { %5803 = vmatpush.bf16.msrb.mxu1 %v10082_v53  ;;  %v9778_v53 = vor.u32 %v11483_v12, %v9775_v15  ;;  %v11466_v12 = vld [vmem:[%s17641_s0 + $0x2f4] sm:$0xf0]  ;;  %v9685_v36 = vld [vmem:[%s17641_s0 + $0x2c8] sm:$0xf] }
 0x372   :  { %v11382_v35 = vld [vmem:[%s17641_s0 + $0x54] sm:$0xf0]  ;;  %v9493_v11 = vld [vmem:[%s17641_s0 + $0x148] sm:$0xf] }
 0x373   :  { %5816 = vmatpush.bf16.msrb.mxu2 %v10210_v3  ;;  %5791 = vmatpush.bf16.msrb.mxu0 %v9938_v0  ;;  %v15926_v3 = vpop.f32.mrf.mxu3  ;;  %v10002_v0 = vor.u32 %v11539_v18, %v9999_v50  ;;  %v11430_v18 = vld [vmem:[%s17641_s0 + $0x1d4] sm:$0xf0] }
 0x374   :  { %5772 = vmatmul.bf16.vlgmr.msra.gmra.mxu2 %v15428_v32  ;;  %5780 = vmatpush.bf16.msra.mxu3 %v9778_v53  ;;  %v11467_v53 = vld [vmem:[%s17641_s0 + $0x304] sm:$0xf] }
 0x375   :  { %5804 = vmatpush.bf16.msrb.mxu1 %v10066_v49  ;;  %v9983_v49 = vld [vmem:[%s17641_s0 + $0x530] sm:$0xf0] }
 0x376   :  { %v9986_v45 = vor.u32 %v11535_v20, %v9983_v49  ;;  %v9686_v49 = vor.u32 %v11462_v23, %v9685_v36 }
 0x377   :  { %5817 = vmatpush.bf16.msrb.mxu2 %v10194_v59  ;;  %5792 = vmatpush.bf16.msrb.mxu0 %v9922_v57  ;;  %v9858_v59 = vor.u32 %v11503_v47, %v9855_v34  ;;  %v11567_v57 = vld [vmem:[%s17641_s0 + $0x624] sm:$0xf]  ;;  %v9541_v47 = vld [vmem:[%s17641_s0 + $0x1a8] sm:$0xf]  ;;  %v11426_v34 = vld [vmem:[%s17641_s0 + $0x1b4] sm:$0xf0] }
 0x378   :  { %5781 = vmatpush.bf16.msra.mxu3 %v9762_v48  ;;  %v10114_v4 = vor.u32 %v11567_v57, %v10111_v41  ;;  %v11458_v48 = vld [vmem:[%s17641_s0 + $0x2b4] sm:$0xf0] }
 0x379   :  { %5805 = vmatpush.bf16.msrb.mxu1 %v10050_v60  ;;  %v9839_v60 = vld [vmem:[%s17641_s0 + $0x410] sm:$0xf0] }
 0x37b   :  { %5818 = vmatpush.bf16.msrb.mxu2 %v10178_v42  ;;  %5793 = vmatpush.bf16.msrb.mxu0 %v9906_v9  ;;  %v11434_v42 = vld [vmem:[%s17641_s0 + $0x1f4] sm:$0xf0]  ;;  %v3945_v9 = vpop.f32.mrf.mxu2  ;;  %v3958_v31 = vpop.f32.mrf.mxu3 }
 0x37c   :  { %v9574_v15 = vor.u32 %v11434_v42, %v9573_v22  ;;  %5782 = vmatpush.bf16.msra.mxu3 %v9746_v29  ;;  %v11418_v22 = vld [vmem:[%s17641_s0 + $0x174] sm:$0xf0] }
 0x37d   :  { %5806 = vmatpush.bf16.msrb.mxu1 %v10034_v6  ;;  %v9842_v6 = vor.u32 %v11499_v61, %v9839_v60  ;;  %v9653_v61 = vld [vmem:[%s17641_s0 + $0x288] sm:$0xf]  ;;  %v9510_v52 = vor.u32 %v11418_v22, %v9509_v58  ;;  %v11414_v31 = vld [vmem:[%s17641_s0 + $0x154] sm:$0xf0] }
 0x37e   :  { %v9381_v60 = vld [vmem:[%s17641_s0 + $0x68] sm:$0xf] }
 0x37f   :  { %5819 = vmatpush.bf16.msrb.mxu2 %v10162_v62  ;;  %5794 = vmatpush.bf16.msrb.mxu0 %v9890_v10  ;;  %v9701_v62 = vld [vmem:[%s17641_s0 + $0x2e8] sm:$0xf]  ;;  %v9382_v9 = vor.u32 %v11386_v54, %v9381_v60 }
 0x380   :  { %v9429_v10 = vld [vmem:[%s17641_s0 + $0xc8] sm:$0xf]  ;;  %v9702_v50 = vor.u32 %v11466_v12, %v9701_v62  ;;  %5783 = vmatpush.bf16.msra.mxu3 %v9730_v16 }
 0x381   :  { %5807 = vmatpush.bf16.msrb.mxu1 %v10018_v19  ;;  %v3918_v19 = vadd.f32 %v15884_v17, %v593_v28  ;;  %v9711_v17 = vld [vmem:[%s17641_s0 + $0x310] sm:$0xf0]  ;;  %v9542_v28 = vor.u32 %v11426_v34, %v9541_v47  ;;  %v9621_v12 = vld [vmem:[%s17641_s0 + $0x248] sm:$0xf] }
 0x382   :  { %v9714_v20 = vor.u32 %v11467_v53, %v9711_v17  ;;  %v9349_v16 = vld [vmem:[%s17641_s0 + $0x28] sm:$0xf]  ;;  %v11410_v53 = vld [vmem:[%s17641_s0 + $0x134] sm:$0xf0]  ;;  %v11790_v17 = vld [vmem:[%s17642_s30] sm:$0xff] }
 0x383   :  { %5820 = vmatpush.bf16.msrb.mxu2 %v10146_v27  ;;  %5795 = vmatpush.bf16.msrb.mxu0 %v9874_v39  ;;  %v9430_v27 = vor.u32 %v11398_v14, %v9429_v10  ;;  %v9558_v39 = vor.u32 %v11430_v18, %v9557_v44  ;;  %v9494_v14 = vor.u32 %v11414_v31, %v9493_v11  ;;  %v9333_v47 = vld [vmem:[%s17641_s0 + $0x8] sm:$0xf] }
 0x384   :  { %5784 = vmatpush.bf16.msra.mxu3 %v9714_v20  ;;  %v11374_v20 = vld [vmem:[%s17641_s0 + $0x14] sm:$0xf0] }
 0x385   :  { %5808 = vmatpush.bf16.msrb.mxu1 %v10002_v0  ;;  %v3931_v0 = vadd.f32 %v15886_v38, %v3918_v19  ;;  %v9669_v38 = vld [vmem:[%s17641_s0 + $0x2a8] sm:$0xf]  ;;  %v11378_v19 = vld [vmem:[%s17641_s0 + $0x34] sm:$0xf0] }
 0x386   :  { %v9670_v57 = vor.u32 %v11458_v48, %v9669_v38  ;;  %v9350_v8 = vor.u32 %v11378_v19, %v9349_v16  ;;  %v9957_v48 = vld [vmem:[%s17641_s0 + $0x4e8] sm:$0xf]  ;;  %v11522_v19 = vld [vmem:[%s17641_s0 + $0x4b4] sm:$0xf0] }
 0x387   :  { %5821 = vmatpush.bf16.msrb.mxu2 %v10130_v2  ;;  %5796 = vmatpush.bf16.msrb.mxu0 %v9858_v59  ;;  %v9397_v2 = vld [vmem:[%s17641_s0 + $0x88] sm:$0xf]  ;;  %v3944_v25 = vadd.f32 %v15912_v30, %v3931_v0  ;;  %v11422_v59 = vld [vmem:[%s17641_s0 + $0x194] sm:$0xf0] }
 0x388   :  { %v9398_v41 = vor.u32 %v11390_v56, %v9397_v2  ;;  %v11454_v30 = vld [vmem:[%s17641_s0 + $0x294] sm:$0xf0]  ;;  %v10085_v56 = vld [vmem:[%s17641_s0 + $0x5e8] sm:$0xf] }
 0x389   :  { %5809 = vmatpush.bf16.msrb.mxu1 %v9986_v45  ;;  %v9526_v45 = vor.u32 %v11422_v59, %v9525_v51  ;;  %v3957_v1 = vadd.f32 %v15926_v3, %v3944_v25  ;;  %v11450_v3 = vld [vmem:[%s17641_s0 + $0x274] sm:$0xf0]  ;;  %v11791_v59 = vld [vmem:[%s17643_s23] sm:$0xff]  ;;  %v9925_v16 = vld [vmem:[%s17641_s0 + $0x4a8] sm:$0xf] }
 0x38a   :  { %v11442_v0 = vld [vmem:[%s17641_s0 + $0x234] sm:$0xf0] }
 0x38b   :  { %5822 = vmatpush.bf16.msrb.mxu2 %v10114_v4  ;;  %5797 = vmatpush.bf16.msrb.mxu0 %v9842_v6  ;;  %v3969_v13 = vpop.f32.mrf.mxu0  ;;  %v9654_v4 = vor.u32 %v11454_v30, %v9653_v61  ;;  %v9365_v6 = vld [vmem:[%s17641_s0 + $0x48] sm:$0xf]  ;;  %v9606_v2 = vor.u32 %v11442_v0, %v9605_v46  ;;  %v11562_v25 = vld [vmem:[%s17641_s0 + $0x5f4] sm:$0xf0] }
 0x38c   :  { %v3970_v42 = vadd.f32 %v3969_v13, %v3957_v1  ;;  %v9366_v62 = vor.u32 %v11382_v35, %v9365_v6  ;;  %v9589_v61 = vld [vmem:[%s17641_s0 + $0x208] sm:$0xf]  ;;  %v11438_v30 = vld [vmem:[%s17641_s0 + $0x214] sm:$0xf0]  ;;  %v11623_v1 = vld [vmem:[%s17641_s0 + $0x7e4] sm:$0xf] }
 0x38d   :  { %5810 = vmatpush.bf16.msrb.mxu1 %v9970_v24  ;;  %v3982_v29 = vpop.f32.mrf.mxu1  ;;  %v9638_v24 = vor.u32 %v11450_v3, %v9637_v37  ;;  %v10335_v13 = vld [vmem:[%s17641_s0 + $0x7f0] sm:$0xf0]  ;;  %v9590_v37 = vor.u32 %v11438_v30, %v9589_v61  ;;  %v11526_v3 = vld [vmem:[%s17641_s0 + $0x4d4] sm:$0xf0]  ;;  %v9909_v46 = vld [vmem:[%s17641_s0 + $0x488] sm:$0xf] }
 0x38e   :  { %5798 = vmatmul.bf16.vlgmr.msrb.gmra.mxu0 %v15611_v43  ;;  %v11558_v6 = vld [vmem:[%s17641_s0 + $0x5d4] sm:$0xf0]  ;;  %v10338_v11 = vor.u32 %v11623_v1, %v10335_v13  ;;  %v11607_v1 = vld [vmem:[%s17641_s0 + $0x764] sm:$0xf]  ;;  %v10271_v13 = vld [vmem:[%s17641_s0 + $0x770] sm:$0xf0] }
 0x38f   :  { %5842 = vmatpush.bf16.msra.mxu0 %v9446_v7  ;;  %5823 = vmatpush.bf16.msrb.mxu2 %v10098_v33  ;;  %v3983_v7 = vadd.f32 %v3982_v29, %v3970_v42  ;;  %v10086_v29 = vor.u32 %v11562_v25, %v10085_v56  ;;  %v11594_v42 = vld [vmem:[%s17641_s0 + $0x6f4] sm:$0xf0]  ;;  %v10165_v56 = vld [vmem:[%s17641_s0 + $0x688] sm:$0xf] }
 0x390   :  { %5811 = vmatmul.bf16.vlgmr.msrb.gmra.mxu1 %v15619_v40  ;;  %v11518_v0 = vld [vmem:[%s17641_s0 + $0x494] sm:$0xf0] }
 0x391   :  { %5855 = vmatpush.bf16.msra.mxu1 %v9574_v15  ;;  %v11446_v15 = vld [vmem:[%s17641_s0 + $0x254] sm:$0xf0] }
 0x392   :  { %5824 = vmatmul.bf16.vlgmr.msrb.gmra.mxu2 %v15804_v63  ;;  %v9622_v23 = vor.u32 %v11446_v15, %v9621_v12  ;;  %v11582_v25 = vld [vmem:[%s17641_s0 + $0x694] sm:$0xf0] }
 0x393   :  { %5868 = vmatpush.bf16.msra.mxu2 %v9702_v50  ;;  %5843 = vmatpush.bf16.msra.mxu0 %v9430_v27  ;;  %v3971_v18 = vpop.f32.mrf.mxu0  ;;  %v9477_v50 = vld [vmem:[%s17641_s0 + $0x128] sm:$0xf]  ;;  %v4037_v27 = vperm.slane %v11790_v17, 7  ;;  %v11615_v17 = vld [vmem:[%s17641_s0 + $0x7a4] sm:$0xf] }
 0x394   :  { %v9478_v34 = vor.u32 %v11410_v53, %v9477_v50  ;;  %v16209_v53 = vld [vmem:[%s17644_s5] sm:$0xf]  ;;  %v11546_v61 = vld [vmem:[%s17641_s0 + $0x574] sm:$0xf0] }
 0x395   :  { %5856 = vmatpush.bf16.msra.mxu1 %v9558_v39  ;;  %v3995_v10 = vpop.f32.mrf.mxu2  ;;  %v3984_v36 = vpop.f32.mrf.mxu1 }
 0x396   :  { %v3996_v33 = vadd.f32 %v3995_v10, %v3983_v7  ;;  %v10319_v7 = vld [vmem:[%s17641_s0 + $0x7d0] sm:$0xf0]  ;;  %v10197_v10 = vld [vmem:[%s17641_s0 + $0x6c8] sm:$0xf]  ;;  %v9926_v36 = vor.u32 %v11522_v19, %v9925_v16 }
 0x397   :  { %5869 = vmatpush.bf16.msra.mxu2 %v9686_v49  ;;  %5844 = vmatpush.bf16.msra.mxu0 %v9414_v5  ;;  %v4008_v44 = vpop.f32.mrf.mxu3  ;;  %v9461_v49 = vld [vmem:[%s17641_s0 + $0x108] sm:$0xf]  ;;  %v11406_v5 = vld [vmem:[%s17641_s0 + $0x114] sm:$0xf0] }
 0x398   :  { %v4009_v39 = vadd.f32 %v4008_v44, %v3996_v33  ;;  %v9462_v60 = vor.u32 %v11406_v5, %v9461_v49  ;;  %v10053_v33 = vld [vmem:[%s17641_s0 + $0x5a8] sm:$0xf]  ;;  %v11554_v44 = vld [vmem:[%s17641_s0 + $0x5b4] sm:$0xf0] }
 0x399   :  { %5857 = vmatpush.bf16.msra.mxu1 %v9542_v28  ;;  %v11530_v28 = vld [vmem:[%s17641_s0 + $0x4f4] sm:$0xf0] }
 0x39a   :  { %v4019_v38 = vmul.f32 0.2, %v4009_v39  ;;  %v9958_v54 = vor.u32 %v11530_v28, %v9957_v48  ;;  %v10287_v48 = vld [vmem:[%s17641_s0 + $0x790] sm:$0xf0]  ;;  %v9910_v28 = vor.u32 %v11518_v0, %v9909_v46  ;;  %v10117_v46 = vld [vmem:[%s17641_s0 + $0x628] sm:$0xf] }
 0x39b   :  { %5870 = vmatpush.bf16.msra.mxu2 %v9670_v57  ;;  %5845 = vmatpush.bf16.msra.mxu0 %v9398_v41  ;;  %v4063_v57 = vperm.slane %v11791_v59, 7  ;;  %v9334_v41 = vor.u32 %v11374_v20, %v9333_v47  ;;  %v10037_v47 = vld [vmem:[%s17641_s0 + $0x588] sm:$0xf]  ;;  %v4346_v20 = vperm.slane %v16209_v53, 0 }
 0x39c   :  { %v4027_v51 = vmax.f32 %v4009_v39, %v4019_v38  ;;  %v10181_v39 = vld [vmem:[%s17641_s0 + $0x6a8] sm:$0xf]  ;;  %v11611_v38 = vld [vmem:[%s17641_s0 + $0x784] sm:$0xf] }
 0x39d   :  { %5858 = vmatpush.bf16.msra.mxu1 %v9526_v45  ;;  %v3997_v45 = vpop.f32.mrf.mxu2 }
 0x39e   :  { %v4053_v58 = vmul.f32 %v4037_v27, %v4027_v51  ;;  %v10303_v27 = vld [vmem:[%s17641_s0 + $0x7b0] sm:$0xf0]  ;;  %v9893_v51 = vld [vmem:[%s17641_s0 + $0x468] sm:$0xf] }
 0x39f   :  { %5871 = vmatpush.bf16.msra.mxu2 %v9654_v4  ;;  %5846 = vmatpush.bf16.msra.mxu0 %v9382_v9  ;;  %v4010_v22 = vpop.f32.mrf.mxu3  ;;  %v10213_v4 = vld [vmem:[%s17641_s0 + $0x6e8] sm:$0xf]  ;;  %v10306_v49 = vor.u32 %v11615_v17, %v10303_v27 }
 0x3a0   :  { %v9941_v9 = vld [vmem:[%s17641_s0 + $0x4c8] sm:$0xf]  ;;  %v4079_v35 = vadd.f32 %v4063_v57, %v4053_v58  ;;  %v10214_v31 = vor.u32 %v11594_v42, %v10213_v4  ;;  %v11514_v57 = vld [vmem:[%s17641_s0 + $0x474] sm:$0xf0] }
 0x3a1   :  { %5859 = vmatpush.bf16.msra.mxu1 %v9510_v52  ;;  %v10069_v52 = vld [vmem:[%s17641_s0 + $0x5c8] sm:$0xf]  ;;  %v9942_v12 = vor.u32 %v11526_v3, %v9941_v9  ;;  %v9894_v22 = vor.u32 %v11514_v57, %v9893_v51  ;;  %v11578_v42 = vld [vmem:[%s17641_s0 + $0x674] sm:$0xf0] }
 0x3a2   :  { %v10070_v15 = vor.u32 %v11558_v6, %v10069_v52  ;;  %v10149_v4 = vld [vmem:[%s17641_s0 + $0x668] sm:$0xf]  ;;  %v11542_v52 = vld [vmem:[%s17641_s0 + $0x554] sm:$0xf0]  ;;  %v10274_v6 = vor.u32 %v11607_v1, %v10271_v13 }
 0x3a3   :  { %5872 = vmatpush.bf16.msra.mxu2 %v9638_v24  ;;  %5847 = vmatpush.bf16.msra.mxu0 %v9366_v62  ;;  %v11619_v24 = vld [vmem:[%s17641_s0 + $0x7c4] sm:$0xf]  ;;  %v16183_v62 = vpack.c.bf16 %v4079_v35, %v4079_v35  ;;  %v9877_v9 = vld [vmem:[%s17641_s0 + $0x448] sm:$0xf]  ;;  %v10150_v35 = vor.u32 %v11578_v42, %v10149_v4  ;;  %v11566_v13 = vld [vmem:[%s17641_s0 + $0x614] sm:$0xf0] }
 0x3a4   :  { %v10322_v18 = vor.u32 %v11619_v24, %v10319_v7  ;;  %v10005_v3 = vld [vmem:[%s17641_s0 + $0x548] sm:$0xf]  ;;  %v9703_v4 = vld [vmem:[%s17641_s0 + $0x2f8] sm:$0xf0]  ;;  %v11396_v42 = vld [vmem:[%s17641_s0 + $0xcc] sm:$0xf] }
 0x3a5   :  { %5860 = vmatpush.bf16.msra.mxu1 %v9494_v14  ;;  %v11590_v14 = vld [vmem:[%s17641_s0 + $0x6d4] sm:$0xf0]  ;;  %5733 = vmatmul.bf16.vlgmr.msrb.gmra.mxu3 %v16183_v62 }
 0x3a6   :  { %5829 = vmatpush.bf16.msrb.mxu3 %v10338_v11  ;;  %v10198_v50 = vor.u32 %v11590_v14, %v10197_v10  ;;  %v11603_v11 = vld [vmem:[%s17641_s0 + $0x744] sm:$0xf]  ;;  %v11574_v10 = vld [vmem:[%s17641_s0 + $0x654] sm:$0xf0]  ;;  %v9861_v14 = vld [vmem:[%s17641_s0 + $0x428] sm:$0xf] }
 0x3a7   :  { %5873 = vmatpush.bf16.msra.mxu2 %v9622_v23  ;;  %5848 = vmatpush.bf16.msra.mxu0 %v9350_v8  ;;  %v10054_v23 = vor.u32 %v11554_v44, %v10053_v33  ;;  %v11586_v8 = vld [vmem:[%s17641_s0 + $0x6b4] sm:$0xf0] }
 0x3a8   :  { %v10182_v5 = vor.u32 %v11586_v8, %v10181_v39  ;;  %v11506_v44 = vld [vmem:[%s17641_s0 + $0x434] sm:$0xf0]  ;;  %v11599_v39 = vld [vmem:[%s17641_s0 + $0x724] sm:$0xf]  ;;  %v10239_v8 = vld [vmem:[%s17641_s0 + $0x730] sm:$0xf0] }
 0x3a9   :  { %5861 = vmatpush.bf16.msra.mxu1 %v9478_v34  ;;  %v11550_v34 = vld [vmem:[%s17641_s0 + $0x594] sm:$0xf0]  ;;  %v9862_v0 = vor.u32 %v11506_v44, %v9861_v14  ;;  %v11392_v14 = vld [vmem:[%s17641_s0 + $0xac] sm:$0xf] }
 0x3aa   :  { %5830 = vmatpush.bf16.msrb.mxu3 %v10322_v18  ;;  %v9989_v18 = vld [vmem:[%s17641_s0 + $0x528] sm:$0xf] }
 0x3ab   :  { %5874 = vmatpush.bf16.msra.mxu2 %v9606_v2  ;;  %5849 = vmatpush.bf16.msra.mxu0 %v9334_v41  ;;  %v10038_v2 = vor.u32 %v11550_v34, %v10037_v47  ;;  %v5643_v59 = vpop.f32.mrf.mxu0  ;;  %v10021_v41 = vld [vmem:[%s17641_s0 + $0x568] sm:$0xf]  ;;  %v11570_v34 = vld [vmem:[%s17641_s0 + $0x634] sm:$0xf0] }
 0x3ac   :  { %v5644_v30 = vadd.f32 %v5643_v59, %v4346_v20  ;;  %v9845_v20 = vld [vmem:[%s17641_s0 + $0x408] sm:$0xf]  ;;  %v10118_v51 = vor.u32 %v11570_v34, %v10117_v46  ;;  %v11388_v46 = vld [vmem:[%s17641_s0 + $0x8c] sm:$0xf]  ;;  %v9527_v34 = vld [vmem:[%s17641_s0 + $0x198] sm:$0xf0] }
 0x3ad   :  { %5862 = vmatpush.bf16.msra.mxu1 %v9462_v60  ;;  %v5656_v45 = vpop.f32.mrf.mxu1  ;;  %v10290_v60 = vor.u32 %v11611_v38, %v10287_v48  ;;  %v11534_v38 = vld [vmem:[%s17641_s0 + $0x514] sm:$0xf0]  ;;  %v11400_v48 = vld [vmem:[%s17641_s0 + $0xec] sm:$0xf] }
 0x3ae   :  { %5850 = vmatmul.bf16.vlgmr.msra.gmra.mxu0 %v15424_v55  ;;  %5831 = vmatpush.bf16.msrb.mxu3 %v10306_v49  ;;  %v5657_v58 = vadd.f32 %v5656_v45, %v5644_v30  ;;  %v11502_v49 = vld [vmem:[%s17641_s0 + $0x414] sm:$0xf0]  ;;  %v10223_v30 = vld [vmem:[%s17641_s0 + $0x710] sm:$0xf0]  ;;  %v10101_v45 = vld [vmem:[%s17641_s0 + $0x608] sm:$0xf] }
 0x3af   :  { %5894 = vmatpush.bf16.msrb.mxu0 %v9958_v54  ;;  %5875 = vmatpush.bf16.msra.mxu2 %v9590_v37  ;;  %v10166_v54 = vor.u32 %v11582_v25, %v10165_v56  ;;  %v11510_v37 = vld [vmem:[%s17641_s0 + $0x454] sm:$0xf0]  ;;  %v9575_v56 = vld [vmem:[%s17641_s0 + $0x1f8] sm:$0xf0]  ;;  %v10242_v25 = vor.u32 %v11599_v39, %v10239_v8  ;;  %v9846_v57 = vor.u32 %v11502_v49, %v9845_v20  ;;  %v11456_v39 = vld [vmem:[%s17641_s0 + $0x2ac] sm:$0xf] }
 0x3b0   :  { %5863 = vmatmul.bf16.vlgmr.msra.gmra.mxu1 %v15426_v21  ;;  %v9878_v7 = vor.u32 %v11510_v37, %v9877_v9  ;;  %v9431_v37 = vld [vmem:[%s17641_s0 + $0xd8] sm:$0xf0] }
 0x3b1   :  { %5907 = vmatpush.bf16.msrb.mxu1 %v10086_v29  ;;  %v10022_v29 = vor.u32 %v11546_v61, %v10021_v41  ;;  %v11595_v61 = vld [vmem:[%s17641_s0 + $0x704] sm:$0xf]  ;;  %v9671_v8 = vld [vmem:[%s17641_s0 + $0x2b8] sm:$0xf0] }
 0x3b2   :  { %5876 = vmatmul.bf16.vlgmr.msra.gmra.mxu2 %v15428_v32  ;;  %5832 = vmatpush.bf16.msrb.mxu3 %v10290_v60  ;;  %v10226_v9 = vor.u32 %v11595_v61, %v10223_v30  ;;  %v9674_v49 = vor.u32 %v11456_v39, %v9671_v8  ;;  %v9607_v39 = vld [vmem:[%s17641_s0 + $0x238] sm:$0xf0]  ;;  %v11372_v8 = vld [vmem:[%s17641_s0 + $0xc] sm:$0xf] }
 0x3b3   :  { %5920 = vmatpush.bf16.msrb.mxu2 %v10214_v31  ;;  %5895 = vmatpush.bf16.msrb.mxu0 %v9942_v12  ;;  %v10255_v31 = vld [vmem:[%s17641_s0 + $0x750] sm:$0xf0]  ;;  %v10006_v12 = vor.u32 %v11542_v52, %v10005_v3  ;;  %v5645_v33 = vpop.f32.mrf.mxu0  ;;  %v11428_v3 = vld [vmem:[%s17641_s0 + $0x1cc] sm:$0xf]  ;;  %v9559_v52 = vld [vmem:[%s17641_s0 + $0x1d8] sm:$0xf0] }
 0x3b4   :  { %v9543_v33 = vld [vmem:[%s17641_s0 + $0x1b8] sm:$0xf0] }
 0x3b5   :  { %5908 = vmatpush.bf16.msrb.mxu1 %v10070_v15  ;;  %v5669_v24 = vpop.f32.mrf.mxu2  ;;  %v10133_v15 = vld [vmem:[%s17641_s0 + $0x648] sm:$0xf]  ;;  %v5658_v17 = vpop.f32.mrf.mxu1  ;;  %5785 = vmatmul.bf16.vlgmr.msra.gmra.mxu3 %v15436_v26 }
 0x3b6   :  { %v5670_v16 = vadd.f32 %v5669_v24, %v5657_v58  ;;  %5833 = vmatpush.bf16.msrb.mxu3 %v10274_v6  ;;  %v9829_v58 = vld [vmem:[%s17641_s0 + $0x3e8] sm:$0xf]  ;;  %v10102_v6 = vor.u32 %v11566_v13, %v10101_v45  ;;  %v11494_v24 = vld [vmem:[%s17641_s0 + $0x3d4] sm:$0xf0] }
 0x3b7   :  { %5921 = vmatpush.bf16.msrb.mxu2 %v10198_v50  ;;  %5896 = vmatpush.bf16.msrb.mxu0 %v9926_v36  ;;  %v5682_v19 = vpop.f32.mrf.mxu3  ;;  %v11538_v50 = vld [vmem:[%s17641_s0 + $0x534] sm:$0xf0]  ;;  %v10258_v36 = vor.u32 %v11603_v11, %v10255_v31  ;;  %v9813_v31 = vld [vmem:[%s17641_s0 + $0x3c8] sm:$0xf] }
 0x3b8   :  { %v16310_v27 = vadd.f32 %v5682_v19, %v5670_v16  ;;  %v9990_v47 = vor.u32 %v11538_v50, %v9989_v18  ;;  %v9415_v16 = vld [vmem:[%s17641_s0 + $0xb8] sm:$0xf0]  ;;  %v11424_v19 = vld [vmem:[%s17641_s0 + $0x1ac] sm:$0xf]  ;;  %v9814_v44 = vor.u32 %v11494_v24, %v9813_v31  ;;  %v9797_v50 = vld [vmem:[%s17641_s0 + $0x3a8] sm:$0xf] }
 0x3b9   :  { %5909 = vmatpush.bf16.msrb.mxu1 %v10054_v23  ;;  %v10134_v23 = vor.u32 %v11574_v10, %v10133_v15  ;;  %v11460_v15 = vld [vmem:[%s17641_s0 + $0x2cc] sm:$0xf]  ;;  %v9687_v10 = vld [vmem:[%s17641_s0 + $0x2d8] sm:$0xf0]  ;;  %v11490_v17 = vld [vmem:[%s17641_s0 + $0x3b4] sm:$0xf0] }
 0x3ba   :  { %5834 = vmatpush.bf16.msrb.mxu3 %v10258_v36  ;;  %v9690_v18 = vor.u32 %v11460_v15, %v9687_v10  ;;  %v9418_v36 = vor.u32 %v11392_v14, %v9415_v16  ;;  %v9798_v20 = vor.u32 %v11490_v17, %v9797_v50  ;;  %v11444_v24 = vld [vmem:[%s17641_s0 + $0x24c] sm:$0xf]  ;;  %v9351_v10 = vld [vmem:[%s17641_s0 + $0x38] sm:$0xf0]  ;;  %v11474_v50 = vld [vmem:[%s17641_s0 + $0x334] sm:$0xf0] }
 0x3bb   :  { %5922 = vmatpush.bf16.msrb.mxu2 %v10182_v5  ;;  %5897 = vmatpush.bf16.msrb.mxu0 %v9910_v28  ;;  %v9973_v5 = vld [vmem:[%s17641_s0 + $0x508] sm:$0xf]  ;;  %v9447_v28 = vld [vmem:[%s17641_s0 + $0xf8] sm:$0xf0]  ;;  %v11408_v14 = vld [vmem:[%s17641_s0 + $0x12c] sm:$0xf] }
 0x3bc   :  { %v9974_v41 = vor.u32 %v11534_v38, %v9973_v5  ;;  %v9781_v5 = vld [vmem:[%s17641_s0 + $0x388] sm:$0xf]  ;;  %v11486_v38 = vld [vmem:[%s17641_s0 + $0x394] sm:$0xf0]  ;;  %v9479_v16 = vld [vmem:[%s17641_s0 + $0x138] sm:$0xf0] }
 0x3bd   :  { %5910 = vmatpush.bf16.msrb.mxu1 %v10038_v2  ;;  %v11432_v2 = vld [vmem:[%s17641_s0 + $0x1ec] sm:$0xf]  ;;  %v5671_v59 = vpop.f32.mrf.mxu2  ;;  %v9782_v45 = vor.u32 %v11486_v38, %v9781_v5  ;;  %v10087_v5 = vld [vmem:[%s17641_s0 + $0x5f8] sm:$0xf0] }
 0x3be   :  { %v9578_v1 = vor.u32 %v11432_v2, %v9575_v56  ;;  %5835 = vmatpush.bf16.msrb.mxu3 %v10242_v25  ;;  %v11452_v2 = vld [vmem:[%s17641_s0 + $0x28c] sm:$0xf]  ;;  %v9655_v56 = vld [vmem:[%s17641_s0 + $0x298] sm:$0xf0] }
 0x3bf   :  { %5923 = vmatpush.bf16.msrb.mxu2 %v10166_v54  ;;  %5898 = vmatpush.bf16.msrb.mxu0 %v9894_v22  ;;  %v5684_v60 = vpop.f32.mrf.mxu3  ;;  %v9450_v54 = vor.u32 %v11400_v48, %v9447_v28  ;;  %v11498_v22 = vld [vmem:[%s17641_s0 + $0x3f4] sm:$0xf0]  ;;  %v11384_v25 = vld [vmem:[%s17641_s0 + $0x6c] sm:$0xf]  ;;  %v9383_v59 = vld [vmem:[%s17641_s0 + $0x78] sm:$0xf0] }
 0x3c0   :  { %v9658_v60 = vor.u32 %v11452_v2, %v9655_v56  ;;  %v11440_v17 = vld [vmem:[%s17641_s0 + $0x22c] sm:$0xf]  ;;  %v9717_v56 = vld [vmem:[%s17641_s0 + $0x308] sm:$0xf] }
 0x3c1   :  { %5911 = vmatpush.bf16.msrb.mxu1 %v10022_v29  ;;  %v11464_v29 = vld [vmem:[%s17641_s0 + $0x2ec] sm:$0xf] }
 0x3c2   :  { %v9706_v11 = vor.u32 %v11464_v29, %v9703_v4  ;;  %5836 = vmatpush.bf16.msrb.mxu3 %v10226_v9  ;;  %v9639_v29 = vld [vmem:[%s17641_s0 + $0x278] sm:$0xf0]  ;;  %v11380_v4 = vld [vmem:[%s17641_s0 + $0x4c] sm:$0xf] }
 0x3c3   :  { %5924 = vmatpush.bf16.msrb.mxu2 %v10150_v35  ;;  %5899 = vmatpush.bf16.msrb.mxu0 %v9878_v7  ;;  %v9830_v35 = vor.u32 %v11498_v22, %v9829_v58  ;;  %v9434_v7 = vor.u32 %v11396_v42, %v9431_v37  ;;  %v9386_v58 = vor.u32 %v11384_v25, %v9383_v59  ;;  %v9367_v42 = vld [vmem:[%s17641_s0 + $0x58] sm:$0xf0]  ;;  %v11412_v9 = vld [vmem:[%s17641_s0 + $0x14c] sm:$0xf]  ;;  %v11470_v25 = vld [vmem:[%s17641_s0 + $0x314] sm:$0xf0] }
 0x3c4   :  { %v9495_v37 = vld [vmem:[%s17641_s0 + $0x158] sm:$0xf0] }
 0x3c5   :  { %5912 = vmatpush.bf16.msrb.mxu1 %v10006_v12  ;;  %v9562_v12 = vor.u32 %v11428_v3, %v9559_v52  ;;  %5837 = vmatmul.bf16.vlgmr.msrb.gmra.mxu3 %v16183_v62  ;;  %v9498_v31 = vor.u32 %v11412_v9, %v9495_v37  ;;  %v10325_v9 = vld [vmem:[%s17641_s0 + $0x7c8] sm:$0xf]  ;;  %v11622_v37 = vld [vmem:[%s17641_s0 + $0x7d4] sm:$0xf0] }
 0x3c6   :  { %5881 = vmatpush.bf16.msra.mxu3 %v9830_v35  ;;  %v11478_v35 = vld [vmem:[%s17641_s0 + $0x354] sm:$0xf0] }
 0x3c7   :  { %5925 = vmatpush.bf16.msrb.mxu2 %v10134_v23  ;;  %5900 = vmatpush.bf16.msrb.mxu0 %v9862_v0  ;;  %v9546_v23 = vor.u32 %v11424_v19, %v9543_v33  ;;  %v9399_v0 = vld [vmem:[%s17641_s0 + $0x98] sm:$0xf0] }
 0x3c8   :  { %v9402_v48 = vor.u32 %v11388_v46, %v9399_v0  ;;  %v9335_v46 = vld [vmem:[%s17641_s0 + $0x18] sm:$0xf0]  ;;  %v11404_v0 = vld [vmem:[%s17641_s0 + $0x10c] sm:$0xf] }
 0x3c9   :  { %5913 = vmatpush.bf16.msrb.mxu1 %v9990_v47  ;;  %v11420_v47 = vld [vmem:[%s17641_s0 + $0x18c] sm:$0xf] }
 0x3ca   :  { %5882 = vmatpush.bf16.msra.mxu3 %v9814_v44  ;;  %v9530_v28 = vor.u32 %v11420_v47, %v9527_v34  ;;  %v9463_v47 = vld [vmem:[%s17641_s0 + $0x118] sm:$0xf0]  ;;  %v11528_v34 = vld [vmem:[%s17641_s0 + $0x4ec] sm:$0xf] }
 0x3cb   :  { %5926 = vmatpush.bf16.msrb.mxu2 %v10118_v51  ;;  %5901 = vmatpush.bf16.msrb.mxu0 %v9846_v57  ;;  %v5695_v51 = vpop.f32.mrf.mxu0  ;;  %v11416_v57 = vld [vmem:[%s17641_s0 + $0x16c] sm:$0xf]  ;;  %v9466_v2 = vor.u32 %v11404_v0, %v9463_v47 }
 0x3cc   :  { %v5696_v61 = vadd.f32 %v5695_v51, %v16310_v27  ;;  %v11448_v27 = vld [vmem:[%s17641_s0 + $0x26c] sm:$0xf] }
 0x3cd   :  { %5914 = vmatpush.bf16.msrb.mxu1 %v9974_v41  ;;  %v9511_v41 = vld [vmem:[%s17641_s0 + $0x178] sm:$0xf0]  ;;  %v5708_v30 = vpop.f32.mrf.mxu1  ;;  %v9642_v52 = vor.u32 %v11448_v27, %v9639_v29  ;;  %v11436_v51 = vld [vmem:[%s17641_s0 + $0x20c] sm:$0xf] }
 0x3ce   :  { %5902 = vmatmul.bf16.vlgmr.msrb.gmra.mxu0 %v15611_v43  ;;  %5883 = vmatpush.bf16.msra.mxu3 %v9798_v20  ;;  %v16467_v13 = vadd.f32 %v5708_v30, %v5696_v61  ;;  %v9514_v22 = vor.u32 %v11416_v57, %v9511_v41  ;;  %v9959_v20 = vld [vmem:[%s17641_s0 + $0x4f8] sm:$0xf0]  ;;  %v10341_v61 = vld [vmem:[%s17641_s0 + $0x7e8] sm:$0xf]  ;;  %v11626_v30 = vld [vmem:[%s17641_s0 + $0x7f4] sm:$0xf0] }
 0x3cf   :  { %5946 = vmatpush.bf16.msra.mxu0 %v9450_v54  ;;  %5927 = vmatpush.bf16.msrb.mxu2 %v10102_v6  ;;  %v9765_v54 = vld [vmem:[%s17641_s0 + $0x368] sm:$0xf]  ;;  %v9962_v59 = vor.u32 %v11528_v34, %v9959_v20  ;;  %v9591_v41 = vld [vmem:[%s17641_s0 + $0x218] sm:$0xf0]  ;;  %v11580_v47 = vld [vmem:[%s17641_s0 + $0x68c] sm:$0xf] }
 0x3d0   :  { %5915 = vmatmul.bf16.vlgmr.msrb.gmra.mxu1 %v15619_v40  ;;  %v9749_v6 = vld [vmem:[%s17641_s0 + $0x348] sm:$0xf]  ;;  %v10071_v27 = vld [vmem:[%s17641_s0 + $0x5d8] sm:$0xf0]  ;;  %v9594_v29 = vor.u32 %v11436_v51, %v9591_v41  ;;  %v11512_v20 = vld [vmem:[%s17641_s0 + $0x46c] sm:$0xf] }
 0x3d1   :  { %5959 = vmatpush.bf16.msra.mxu1 %v9578_v1  ;;  %v11482_v1 = vld [vmem:[%s17641_s0 + $0x374] sm:$0xf0]  ;;  %v9750_v33 = vor.u32 %v11478_v35, %v9749_v6  ;;  %v11588_v6 = vld [vmem:[%s17641_s0 + $0x6cc] sm:$0xf]  ;;  %v10199_v35 = vld [vmem:[%s17641_s0 + $0x6d8] sm:$0xf0] }
 0x3d2   :  { %5928 = vmatmul.bf16.vlgmr.msrb.gmra.mxu2 %v15804_v63  ;;  %5884 = vmatpush.bf16.msra.mxu3 %v9782_v45  ;;  %v9766_v3 = vor.u32 %v11482_v1, %v9765_v54  ;;  %v11592_v45 = vld [vmem:[%s17641_s0 + $0x6ec] sm:$0xf]  ;;  %v9718_v1 = vor.u32 %v11470_v25, %v9717_v56  ;;  %v10167_v34 = vld [vmem:[%s17641_s0 + $0x698] sm:$0xf0]  ;;  %v10277_v51 = vld [vmem:[%s17641_s0 + $0x768] sm:$0xf] }
 0x3d3   :  { %5972 = vmatpush.bf16.msra.mxu2 %v9706_v11  ;;  %5947 = vmatpush.bf16.msra.mxu0 %v9434_v7  ;;  %v9370_v11 = vor.u32 %v11380_v4, %v9367_v42  ;;  %v9623_v7 = vld [vmem:[%s17641_s0 + $0x258] sm:$0xf0]  ;;  %v5697_v15 = vpop.f32.mrf.mxu0  ;;  %v11524_v54 = vld [vmem:[%s17641_s0 + $0x4cc] sm:$0xf]  ;;  %v10342_v4 = vor.u32 %v11626_v30, %v10341_v61  ;;  %v10170_v25 = vor.u32 %v11580_v47, %v10167_v34 }
 0x3d4   :  { %v9626_v44 = vor.u32 %v11444_v24, %v9623_v7  ;;  %v11552_v24 = vld [vmem:[%s17641_s0 + $0x5ac] sm:$0xf]  ;;  %v10055_v7 = vld [vmem:[%s17641_s0 + $0x5b8] sm:$0xf0]  ;;  %v10202_v15 = vor.u32 %v11588_v6, %v10199_v35 }
 0x3d5   :  { %5960 = vmatpush.bf16.msra.mxu1 %v9562_v12  ;;  %v11376_v12 = vld [vmem:[%s17641_s0 + $0x2c] sm:$0xf]  ;;  %v5710_v19 = vpop.f32.mrf.mxu1  ;;  %v10151_v30 = vld [vmem:[%s17641_s0 + $0x678] sm:$0xf0] }
 0x3d6   :  { %5885 = vmatpush.bf16.msra.mxu3 %v9766_v3  ;;  %v10058_v19 = vor.u32 %v11552_v24, %v10055_v7  ;;  %v11576_v61 = vld [vmem:[%s17641_s0 + $0x66c] sm:$0xf]  ;;  %v9991_v24 = vld [vmem:[%s17641_s0 + $0x538] sm:$0xf0] }
 0x3d7   :  { %5973 = vmatpush.bf16.msra.mxu2 %v9690_v18  ;;  %5948 = vmatpush.bf16.msra.mxu0 %v9418_v36  ;;  %v9733_v18 = vld [vmem:[%s17641_s0 + $0x328] sm:$0xf]  ;;  %v9354_v36 = vor.u32 %v11376_v12, %v9351_v10  ;;  %v10326_v12 = vor.u32 %v11622_v37, %v10325_v9  ;;  %v11504_v6 = vld [vmem:[%s17641_s0 + $0x42c] sm:$0xf]  ;;  %v10103_v34 = vld [vmem:[%s17641_s0 + $0x618] sm:$0xf0] }
 0x3d8   :  { %v9734_v38 = vor.u32 %v11474_v50, %v9733_v18  ;;  %v10309_v10 = vld [vmem:[%s17641_s0 + $0x7a8] sm:$0xf]  ;;  %v9911_v18 = vld [vmem:[%s17641_s0 + $0x498] sm:$0xf0]  ;;  %v11548_v50 = vld [vmem:[%s17641_s0 + $0x58c] sm:$0xf] }
 0x3d9   :  { %5961 = vmatpush.bf16.msra.mxu1 %v9546_v23  ;;  %v9482_v23 = vor.u32 %v11408_v14, %v9479_v16  ;;  %v11618_v14 = vld [vmem:[%s17641_s0 + $0x7b4] sm:$0xf0]  ;;  %v11564_v47 = vld [vmem:[%s17641_s0 + $0x60c] sm:$0xf] }
 0x3da   :  { %5886 = vmatpush.bf16.msra.mxu3 %v9750_v33  ;;  %v10183_v33 = vld [vmem:[%s17641_s0 + $0x6b8] sm:$0xf0] }
 0x3db   :  { %5974 = vmatpush.bf16.msra.mxu2 %v9674_v49  ;;  %5949 = vmatpush.bf16.msra.mxu0 %v9402_v48  ;;  %v11560_v49 = vld [vmem:[%s17641_s0 + $0x5ec] sm:$0xf]  ;;  %v9610_v48 = vor.u32 %v11440_v17, %v9607_v39  ;;  %v10039_v17 = vld [vmem:[%s17641_s0 + $0x598] sm:$0xf0]  ;;  %v11614_v39 = vld [vmem:[%s17641_s0 + $0x794] sm:$0xf0] }
 0x3dc   :  { %v10090_v57 = vor.u32 %v11560_v49, %v10087_v5  ;;  %v10042_v0 = vor.u32 %v11548_v50, %v10039_v17  ;;  %v9975_v50 = vld [vmem:[%s17641_s0 + $0x518] sm:$0xf0]  ;;  %v10405_v17 = vld [vmem:[%s17609_s9 + $0x70] sm:$0xf] }
 0x3dd   :  { %5962 = vmatpush.bf16.msra.mxu1 %v9530_v28  ;;  %v9338_v28 = vor.u32 %v11372_v8, %v9335_v46 }
 0x3de   :  { %5887 = vmatpush.bf16.msra.mxu3 %v9734_v38  ;;  %v9895_v38 = vld [vmem:[%s17641_s0 + $0x478] sm:$0xf0] }
 0x3df   :  { %5975 = vmatpush.bf16.msra.mxu2 %v9658_v60  ;;  %5950 = vmatpush.bf16.msra.mxu0 %v9386_v58  ;;  %v10215_v60 = vld [vmem:[%s17641_s0 + $0x6f8] sm:$0xf0] }
 0x3e0   :  { %v9943_v58 = vld [vmem:[%s17641_s0 + $0x4d8] sm:$0xf0]  ;;  %v10218_v42 = vor.u32 %v11592_v45, %v10215_v60  ;;  %v11508_v45 = vld [vmem:[%s17641_s0 + $0x44c] sm:$0xf] }
 0x3e1   :  { %5963 = vmatpush.bf16.msra.mxu1 %v9514_v22  ;;  %v11556_v22 = vld [vmem:[%s17641_s0 + $0x5cc] sm:$0xf]  ;;  %v9946_v3 = vor.u32 %v11524_v54, %v9943_v58  ;;  %v9879_v54 = vld [vmem:[%s17641_s0 + $0x458] sm:$0xf0] }
 0x3e2   :  { %5888 = vmatpush.bf16.msra.mxu3 %v9718_v1  ;;  %v11540_v1 = vld [vmem:[%s17641_s0 + $0x54c] sm:$0xf]  ;;  %v10007_v58 = vld [vmem:[%s17641_s0 + $0x558] sm:$0xf0]  ;;  %v9882_v9 = vor.u32 %v11508_v45, %v9879_v54  ;;  %v11638_v45 = vld [vmem:[%s17609_s9 + $0x54] sm:$0xf0] }
 0x3e3   :  { %5976 = vmatpush.bf16.msra.mxu2 %v9642_v52  ;;  %5951 = vmatpush.bf16.msra.mxu0 %v9370_v11  ;;  %v10074_v52 = vor.u32 %v11556_v22, %v10071_v27  ;;  %v11520_v11 = vld [vmem:[%s17641_s0 + $0x4ac] sm:$0xf]  ;;  %v10154_v27 = vor.u32 %v11576_v61, %v10151_v30  ;;  %v10010_v37 = vor.u32 %v11540_v1, %v10007_v58  ;;  %v9815_v61 = vld [vmem:[%s17641_s0 + $0x3d8] sm:$0xf0]  ;;  %v10389_v30 = vld [vmem:[%s17609_s9 + $0x50] sm:$0xf] }
 0x3e4   :  { %v11488_v54 = vld [vmem:[%s17641_s0 + $0x3ac] sm:$0xf]  ;;  %v10390_v1 = vor.u32 %v11638_v45, %v10389_v30  ;;  %v9799_v58 = vld [vmem:[%s17641_s0 + $0x3b8] sm:$0xf0]  ;;  %v10445_v45 = vld [vmem:[%s17609_s9 + $0xc0] sm:$0xf] }
 0x3e5   :  { %5964 = vmatpush.bf16.msra.mxu1 %v9498_v31  ;;  %v9927_v31 = vld [vmem:[%s17641_s0 + $0x4b8] sm:$0xf0]  ;;  %5889 = vmatmul.bf16.vlgmr.msra.gmra.mxu3 %v15436_v26  ;;  %v10399_v30 = vld [vmem:[%s17609_s9 + $0x68] sm:$0xf0] }
 0x3e6   :  { %5933 = vmatpush.bf16.msrb.mxu3 %v10342_v4  ;;  %v9930_v16 = vor.u32 %v11520_v11, %v9927_v31  ;;  %v11606_v4 = vld [vmem:[%s17641_s0 + $0x754] sm:$0xf0]  ;;  %v9863_v11 = vld [vmem:[%s17641_s0 + $0x438] sm:$0xf0]  ;;  %v11536_v31 = vld [vmem:[%s17641_s0 + $0x52c] sm:$0xf] }
 0x3e7   :  { %5977 = vmatpush.bf16.msra.mxu2 %v9626_v44  ;;  %5952 = vmatpush.bf16.msra.mxu0 %v9354_v36  ;;  %v11516_v44 = vld [vmem:[%s17641_s0 + $0x48c] sm:$0xf]  ;;  %v10310_v36 = vor.u32 %v11618_v14, %v10309_v10  ;;  %v16677_v60 = vpop.f32.mrf.mxu2  ;;  %v9866_v10 = vor.u32 %v11504_v6, %v9863_v11  ;;  %v9994_v14 = vor.u32 %v11536_v31, %v9991_v24  ;;  %v9767_v11 = vld [vmem:[%s17641_s0 + $0x378] sm:$0xf0]  ;;  %v10365_v31 = vld [vmem:[%s17609_s9 + $0x20] sm:$0xf] }
 0x3e8   :  { %v9914_v46 = vor.u32 %v11516_v44, %v9911_v18  ;;  %v9847_v44 = vld [vmem:[%s17641_s0 + $0x418] sm:$0xf0]  ;;  %v11532_v18 = vld [vmem:[%s17641_s0 + $0x50c] sm:$0xf]  ;;  %v11632_v24 = vld [vmem:[%s17609_s9 + $0x24] sm:$0xf0] }
 0x3e9   :  { %5965 = vmatpush.bf16.msra.mxu1 %v9482_v23  ;;  %v11480_v6 = vld [vmem:[%s17641_s0 + $0x36c] sm:$0xf] }
 0x3ea   :  { %5934 = vmatpush.bf16.msrb.mxu3 %v10326_v12 }
 0x3eb   :  { %5978 = vmatpush.bf16.msra.mxu2 %v9610_v48  ;;  %5953 = vmatpush.bf16.msra.mxu0 %v9338_v28  ;;  %v5747_v8 = vpop.f32.mrf.mxu0  ;;  %v11544_v48 = vld [vmem:[%s17641_s0 + $0x56c] sm:$0xf]  ;;  %v10023_v28 = vld [vmem:[%s17641_s0 + $0x578] sm:$0xf0] }
 0x3ec   :  { %v10026_v41 = vor.u32 %v11544_v48, %v10023_v28  ;;  %v11640_v48 = vld [vmem:[%s17609_s9 + $0x64] sm:$0xf0] }
 0x3ed   :  { %5966 = vmatpush.bf16.msra.mxu1 %v9466_v2  ;;  %v5760_v5 = vpop.f32.mrf.mxu1 }
 0x3ee   :  { %5954 = vmatmul.bf16.vlgmr.msra.gmra.mxu0 %v15424_v55  ;;  %v4347_v55 = vperm.slane %v16209_v53, 1  ;;  %5935 = vmatpush.bf16.msrb.mxu3 %v10310_v36  ;;  %v11642_v36 = vld [vmem:[%s17609_s9 + $0x74] sm:$0xf0] }
 0x3ef   :  { %5998 = vmatpush.bf16.msrb.mxu0 %v9962_v59  ;;  %5979 = vmatpush.bf16.msra.mxu2 %v9594_v29  ;;  %v11610_v59 = vld [vmem:[%s17641_s0 + $0x774] sm:$0xf0]  ;;  %v10261_v29 = vld [vmem:[%s17641_s0 + $0x748] sm:$0xf] }
 0x3f0   :  { %5967 = vmatmul.bf16.vlgmr.msra.gmra.mxu1 %v15426_v21  ;;  %v11584_v21 = vld [vmem:[%s17641_s0 + $0x6ac] sm:$0xf]  ;;  %v5748_v49 = vadd.f32 %v5747_v8, %v4347_v55  ;;  %v10278_v22 = vor.u32 %v11610_v59, %v10277_v51  ;;  %v10262_v7 = vor.u32 %v11606_v4, %v10261_v29  ;;  %v11602_v55 = vld [vmem:[%s17641_s0 + $0x734] sm:$0xf0]  ;;  %v9978_v8 = vor.u32 %v11532_v18, %v9975_v50  ;;  %v10461_v50 = vld [vmem:[%s17609_s9 + $0xe0] sm:$0xf] }
 0x3f1   :  { %6011 = vmatpush.bf16.msrb.mxu1 %v10090_v57  ;;  %v10186_v23 = vor.u32 %v11584_v21, %v10183_v33  ;;  %v9898_v57 = vor.u32 %v11512_v20, %v9895_v38  ;;  %v11500_v21 = vld [vmem:[%s17641_s0 + $0x40c] sm:$0xf]  ;;  %v5723_v33 = vpop.f32.mrf.mxu2  ;;  %v10397_v38 = vld [vmem:[%s17609_s9 + $0x60] sm:$0xf]  ;;  %v11630_v18 = vld [vmem:[%s17609_s9 + $0x14] sm:$0xf0] }
 0x3f2   :  { %5980 = vmatmul.bf16.vlgmr.msra.gmra.mxu2 %v15428_v32  ;;  %v10293_v32 = vld [vmem:[%s17641_s0 + $0x788] sm:$0xf]  ;;  %v16660_v2 = vadd.f32 %v5760_v5, %v5748_v49  ;;  %v11496_v20 = vld [vmem:[%s17641_s0 + $0x3ec] sm:$0xf]  ;;  %v10406_v49 = vor.u32 %v11642_v36, %v10405_v17  ;;  %v9831_v5 = vld [vmem:[%s17641_s0 + $0x3f8] sm:$0xf0] }
 0x3f3   :  { %6024 = vmatpush.bf16.msrb.mxu2 %v10218_v42  ;;  %5999 = vmatpush.bf16.msrb.mxu0 %v9946_v3  ;;  %v10294_v56 = vor.u32 %v11614_v39, %v10293_v32  ;;  %v5749_v42 = vpop.f32.mrf.mxu0  ;;  %v11572_v3 = vld [vmem:[%s17641_s0 + $0x64c] sm:$0xf]  ;;  %v9850_v39 = vor.u32 %v11500_v21, %v9847_v44  ;;  %v9751_v33 = vld [vmem:[%s17641_s0 + $0x358] sm:$0xf0]  ;;  %v10357_v44 = vld [vmem:[%s17609_s9 + $0x10] sm:$0xf] }
 0x3f4   :  { %v11492_v59 = vld [vmem:[%s17641_s0 + $0x3cc] sm:$0xf]  ;;  %v11656_v17 = vld [vmem:[%s17609_s9 + $0xe4] sm:$0xf0] }
 0x3f5   :  { %6012 = vmatpush.bf16.msrb.mxu1 %v10074_v52  ;;  %5936 = vmatpush.bf16.msrb.mxu3 %v10294_v56  ;;  %v10135_v52 = vld [vmem:[%s17641_s0 + $0x658] sm:$0xf0]  ;;  %v5762_v35 = vpop.f32.mrf.mxu1  ;;  %v10106_v56 = vor.u32 %v11564_v47, %v10103_v34  ;;  %v11484_v4 = vld [vmem:[%s17641_s0 + $0x38c] sm:$0xf]  ;;  %v11641_v47 = vld [vmem:[%s17609_s9 + $0x74] sm:$0xf] }
 0x3f6   :  { %v10138_v12 = vor.u32 %v11572_v3, %v10135_v52  ;;  %v11634_v3 = vld [vmem:[%s17609_s9 + $0x34] sm:$0xf0]  ;;  %v10407_v34 = vld [vmem:[%s17609_s9 + $0x78] sm:$0xf0] }
 0x3f7   :  { %6025 = vmatpush.bf16.msrb.mxu2 %v10202_v15  ;;  %6000 = vmatpush.bf16.msrb.mxu0 %v9930_v16  ;;  %v10245_v15 = vld [vmem:[%s17641_s0 + $0x728] sm:$0xf]  ;;  %v11568_v16 = vld [vmem:[%s17641_s0 + $0x62c] sm:$0xf] }
 0x3f9   :  { %6013 = vmatpush.bf16.msrb.mxu1 %v10058_v19  ;;  %5937 = vmatpush.bf16.msrb.mxu3 %v10278_v22  ;;  %v10119_v19 = vld [vmem:[%s17641_s0 + $0x638] sm:$0xf0]  ;;  %v5773_v51 = vpop.f32.mrf.mxu2 }
 0x3fa   :  { %v10122_v32 = vor.u32 %v11568_v16, %v10119_v19 }
 0x3fb   :  { %6026 = vmatpush.bf16.msrb.mxu2 %v10186_v23  ;;  %6001 = vmatpush.bf16.msrb.mxu0 %v9914_v46  ;;  %v10246_v23 = vor.u32 %v11602_v55, %v10245_v15  ;;  %v10229_v46 = vld [vmem:[%s17641_s0 + $0x708] sm:$0xf]  ;;  %v9770_v55 = vor.u32 %v11480_v6, %v9767_v11  ;;  %v11616_v11 = vld [vmem:[%s17641_s0 + $0x7ac] sm:$0xf] }
 0x3fd   :  { %6014 = vmatpush.bf16.msrb.mxu1 %v10042_v0  ;;  %5938 = vmatpush.bf16.msrb.mxu3 %v10262_v7  ;;  %v11598_v0 = vld [vmem:[%s17641_s0 + $0x714] sm:$0xf0]  ;;  %v10469_v7 = vld [vmem:[%s17609_s9 + $0xf0] sm:$0xf] }
 0x3fe   :  { %v10230_v28 = vor.u32 %v11598_v0, %v10229_v46  ;;  %v10349_v46 = vld [vmem:[%s17609_s9] sm:$0xf]  ;;  %v11628_v0 = vld [vmem:[%s17609_s9 + $0x4] sm:$0xf0] }
 0x3ff   :  { %6027 = vmatpush.bf16.msrb.mxu2 %v10170_v25  ;;  %6002 = vmatpush.bf16.msrb.mxu0 %v9898_v57  ;;  %v9834_v25 = vor.u32 %v11496_v20, %v9831_v5  ;;  %v10398_v57 = vor.u32 %v11640_v48, %v10397_v38  ;;  %v10453_v20 = vld [vmem:[%s17609_s9 + $0xd0] sm:$0xf]  ;;  %v11468_v38 = vld [vmem:[%s17641_s0 + $0x30c] sm:$0xf]  ;;  %v9719_v48 = vld [vmem:[%s17641_s0 + $0x318] sm:$0xf0] }
 0x401   :  { %6015 = vmatpush.bf16.msrb.mxu1 %v10026_v41  ;;  %5939 = vmatpush.bf16.msrb.mxu3 %v10246_v23  ;;  %v16770_v41 = vadd.f32 %v5773_v51, %v16660_v2  ;;  %v9818_v2 = vor.u32 %v11492_v59, %v9815_v61  ;;  %v5775_v29 = vpop.f32.mrf.mxu2  ;;  %v11472_v23 = vld [vmem:[%s17641_s0 + $0x32c] sm:$0xf]  ;;  %v10343_v59 = vld [vmem:[%s17641_s0 + $0x7f8] sm:$0xf0]  ;;  %v11639_v61 = vld [vmem:[%s17609_s9 + $0x64] sm:$0xf] }
 0x402   :  { %v11624_v51 = vld [vmem:[%s17641_s0 + $0x7ec] sm:$0xf]  ;;  %v11637_v29 = vld [vmem:[%s17609_s9 + $0x54] sm:$0xf] }
 0x403   :  { %6028 = vmatpush.bf16.msrb.mxu2 %v10154_v27  ;;  %6003 = vmatpush.bf16.msrb.mxu0 %v9882_v9  ;;  %v9802_v27 = vor.u32 %v11488_v54, %v9799_v58  ;;  %v10346_v58 = vor.u32 %v11624_v51, %v10343_v59 }
 0x405   :  { %6016 = vmatpush.bf16.msrb.mxu1 %v10010_v37  ;;  %5940 = vmatpush.bf16.msrb.mxu3 %v10230_v28  ;;  %v9783_v37 = vld [vmem:[%s17641_s0 + $0x398] sm:$0xf0]  ;;  %v10350_v28 = vor.u32 %v11628_v0, %v10349_v46 }
 0x406   :  { %v9786_v52 = vor.u32 %v11484_v4, %v9783_v37  ;;  %v10391_v4 = vld [vmem:[%s17609_s9 + $0x58] sm:$0xf0]  ;;  %v11650_v37 = vld [vmem:[%s17609_s9 + $0xb4] sm:$0xf0] }
 0x407   :  { %6029 = vmatpush.bf16.msrb.mxu2 %v10138_v12  ;;  %6004 = vmatpush.bf16.msrb.mxu0 %v9866_v10  ;;  %v11658_v12 = vld [vmem:[%s17609_s9 + $0xf4] sm:$0xf0]  ;;  %v11476_v10 = vld [vmem:[%s17641_s0 + $0x34c] sm:$0xf]  ;;  %v10279_v46 = vld [vmem:[%s17641_s0 + $0x778] sm:$0xf0] }
 0x408   :  { %5941 = vmatmul.bf16.vlgmr.msrb.gmra.mxu3 %v16183_v62  ;;  %v10470_v16 = vor.u32 %v11658_v12, %v10469_v7  ;;  %v9754_v36 = vor.u32 %v11476_v10, %v9751_v33  ;;  %v11635_v7 = vld [vmem:[%s17609_s9 + $0x44] sm:$0xf]  ;;  %v10383_v12 = vld [vmem:[%s17609_s9 + $0x48] sm:$0xf0] }
 0x409   :  { %6017 = vmatpush.bf16.msrb.mxu1 %v9994_v14  ;;  %5985 = vmatpush.bf16.msra.mxu3 %v9834_v25  ;;  %v10366_v14 = vor.u32 %v11632_v24, %v10365_v31  ;;  %v10394_v31 = vor.u32 %v11637_v29, %v10391_v4  ;;  %v10311_v24 = vld [vmem:[%s17641_s0 + $0x7b8] sm:$0xf0] }
 0x40b   :  { %6030 = vmatpush.bf16.msrb.mxu2 %v10122_v32  ;;  %6005 = vmatpush.bf16.msrb.mxu0 %v9850_v39  ;;  %v16797_v22 = vpop.f32.mrf.mxu0  ;;  %v10358_v32 = vor.u32 %v11630_v18, %v10357_v44  ;;  %v10462_v39 = vor.u32 %v11656_v17, %v10461_v50  ;;  %v11633_v18 = vld [vmem:[%s17609_s9 + $0x34] sm:$0xf]  ;;  %v10375_v50 = vld [vmem:[%s17609_s9 + $0x38] sm:$0xf0] }
 0x40c   :  { %v10378_v0 = vor.u32 %v11633_v18, %v10375_v50  ;;  %v11649_v50 = vld [vmem:[%s17609_s9 + $0xb4] sm:$0xf] }
 0x40d   :  { %6018 = vmatpush.bf16.msrb.mxu1 %v9978_v8  ;;  %5986 = vmatpush.bf16.msra.mxu3 %v9818_v2  ;;  %v16802_v9 = vpop.f32.mrf.mxu1  ;;  %v9735_v8 = vld [vmem:[%s17641_s0 + $0x338] sm:$0xf0]  ;;  %v11652_v2 = vld [vmem:[%s17609_s9 + $0xc4] sm:$0xf0] }
 0x40e   :  { %6006 = vmatmul.bf16.vlgmr.msrb.gmra.mxu0 %v15611_v43  ;;  %v10381_v43 = vld [vmem:[%s17609_s9 + $0x40] sm:$0xf]  ;;  %v9738_v5 = vor.u32 %v11472_v23, %v9735_v8  ;;  %v10446_v54 = vor.u32 %v11652_v2, %v10445_v45  ;;  %v11644_v23 = vld [vmem:[%s17609_s9 + $0x84] sm:$0xf0]  ;;  %v11608_v8 = vld [vmem:[%s17641_s0 + $0x76c] sm:$0xf] }
 0x40f   :  { %6480 = vmatpush.bf16.msra.mxu0 %v10406_v49  ;;  %6031 = vmatpush.bf16.msrb.mxu2 %v10106_v56  ;;  %v11654_v49 = vld [vmem:[%s17609_s9 + $0xd4] sm:$0xf0]  ;;  %v11629_v2 = vld [vmem:[%s17609_s9 + $0x14] sm:$0xf] }
 0x410   :  { %6019 = vmatmul.bf16.vlgmr.msrb.gmra.mxu1 %v15619_v40  ;;  %v11636_v40 = vld [vmem:[%s17609_s9 + $0x44] sm:$0xf0]  ;;  %v10454_v56 = vor.u32 %v11654_v49, %v10453_v20  ;;  %v10367_v20 = vld [vmem:[%s17609_s9 + $0x28] sm:$0xf0] }
 0x411   :  { %v10382_v42 = vor.u32 %v11636_v40, %v10381_v43  ;;  %5987 = vmatpush.bf16.msra.mxu3 %v9802_v27  ;;  %6493 = vmatpush.bf16.msra.mxu1 %v10470_v16  ;;  %v11620_v43 = vld [vmem:[%s17641_s0 + $0x7cc] sm:$0xf]  ;;  %v10327_v40 = vld [vmem:[%s17641_s0 + $0x7d8] sm:$0xf0]  ;;  %v10402_v27 = vor.u32 %v11639_v61, %v10399_v30  ;;  %v16996_v30 = vld [vmem:[%s17611_s8] sm:$0xf] }
 0x412   :  { %6032 = vmatmul.bf16.vlgmr.msrb.gmra.mxu2 %v15804_v63  ;;  %v10373_v63 = vld [vmem:[%s17609_s9 + $0x30] sm:$0xf]  ;;  %v10330_v6 = vor.u32 %v11620_v43, %v10327_v40  ;;  %v11612_v16 = vld [vmem:[%s17641_s0 + $0x78c] sm:$0xf]  ;;  %v11655_v43 = vld [vmem:[%s17609_s9 + $0xe4] sm:$0xf] }
 0x413   :  { %6481 = vmatpush.bf16.msra.mxu0 %v10398_v57  ;;  %v10374_v35 = vor.u32 %v11634_v3, %v10373_v63  ;;  %v5801_v15 = vpop.f32.mrf.mxu0  ;;  %v10410_v57 = vor.u32 %v11641_v47, %v10407_v34  ;;  %v10429_v3 = vld [vmem:[%s17609_s9 + $0xa0] sm:$0xf]  ;;  %v11631_v34 = vld [vmem:[%s17609_s9 + $0x24] sm:$0xf]  ;;  %v10463_v40 = vld [vmem:[%s17609_s9 + $0xe8] sm:$0xf0] }
 0x414   :  { %v10421_v15 = vld [vmem:[%s17609_s9 + $0x90] sm:$0xf]  ;;  %v16970_v47 = vld [vmem:[%s17610_s7] sm:$0xf]  ;;  %v10370_v61 = vor.u32 %v11631_v34, %v10367_v20  ;;  %v10466_v29 = vor.u32 %v11655_v43, %v10463_v40 }
 0x415   :  { %5988 = vmatpush.bf16.msra.mxu3 %v9786_v52  ;;  %v5814_v19 = vpop.f32.mrf.mxu1  ;;  %v16834_v21 = vpop.f32.mrf.mxu2  ;;  %6494 = vmatpush.bf16.msra.mxu1 %v10462_v39  ;;  %v11648_v52 = vld [vmem:[%s17609_s9 + $0xa4] sm:$0xf0]  ;;  %v6060_v51 = vperm.slane %v16970_v47, 0 }
 0x416   :  { %v10386_v19 = vor.u32 %v11635_v7, %v10383_v12 }
 0x417   :  { %6482 = vmatpush.bf16.msra.mxu0 %v10390_v1  ;;  %v9722_v1 = vor.u32 %v11468_v38, %v9719_v48  ;;  %v11657_v38 = vld [vmem:[%s17609_s9 + $0xf4] sm:$0xf]  ;;  %v10471_v48 = vld [vmem:[%s17609_s9 + $0xf8] sm:$0xf0] }
 0x419   :  { %5989 = vmatpush.bf16.msra.mxu3 %v9770_v55  ;;  %6495 = vmatpush.bf16.msra.mxu1 %v10454_v56  ;;  %v11646_v55 = vld [vmem:[%s17609_s9 + $0x94] sm:$0xf0]  ;;  %v10474_v56 = vor.u32 %v11657_v38, %v10471_v48  ;;  %v11643_v48 = vld [vmem:[%s17609_s9 + $0x84] sm:$0xf] }
 0x41a   :  { %v10422_v17 = vor.u32 %v11646_v55, %v10421_v15  ;;  %v11596_v55 = vld [vmem:[%s17641_s0 + $0x70c] sm:$0xf] }
 0x41b   :  { %6483 = vmatpush.bf16.msra.mxu0 %v10382_v42  ;;  %v10437_v42 = vld [vmem:[%s17609_s9 + $0xb0] sm:$0xf] }
 0x41c   :  { %v10438_v63 = vor.u32 %v11650_v37, %v10437_v42  ;;  %v6074_v42 = vperm.slane %v16996_v30, 0 }
 0x41d   :  { %5990 = vmatpush.bf16.msra.mxu3 %v9754_v36  ;;  %v5827_v25 = vpop.f32.mrf.mxu2  ;;  %6496 = vmatpush.bf16.msra.mxu1 %v10446_v54  ;;  %v10413_v36 = vld [vmem:[%s17609_s9 + $0x80] sm:$0xf]  ;;  %v10359_v54 = vld [vmem:[%s17609_s9 + $0x18] sm:$0xf0] }
 0x41e   :  { %v10414_v49 = vor.u32 %v11644_v23, %v10413_v36 }
 0x41f   :  { %6484 = vmatpush.bf16.msra.mxu0 %v10374_v35  ;;  %v4348_v35 = vperm.slane %v16209_v53, 2  ;;  %v10430_v53 = vor.u32 %v11648_v52, %v10429_v3  ;;  %v11600_v3 = vld [vmem:[%s17641_s0 + $0x72c] sm:$0xf]  ;;  %v10247_v52 = vld [vmem:[%s17641_s0 + $0x738] sm:$0xf0] }
 0x420   :  { %v10250_v15 = vor.u32 %v11600_v3, %v10247_v52 }
 0x421   :  { %5991 = vmatpush.bf16.msra.mxu3 %v9738_v5  ;;  %6497 = vmatpush.bf16.msra.mxu1 %v10438_v63  ;;  %v5722_v5 = vadd.f32 %v16677_v60, %v16467_v13  ;;  %v11604_v13 = vld [vmem:[%s17641_s0 + $0x74c] sm:$0xf]  ;;  %v10263_v60 = vld [vmem:[%s17641_s0 + $0x758] sm:$0xf0]  ;;  %v10362_v63 = vor.u32 %v11629_v2, %v10359_v54 }
 0x422   :  { %v10266_v37 = vor.u32 %v11604_v13, %v10263_v60 }
 0x423   :  { %6485 = vmatpush.bf16.msra.mxu0 %v10366_v14  ;;  %v10314_v14 = vor.u32 %v11616_v11, %v10311_v24  ;;  %v10351_v11 = vld [vmem:[%s17609_s9 + $0x8] sm:$0xf0]  ;;  %v10455_v24 = vld [vmem:[%s17609_s9 + $0xd8] sm:$0xf0] }
 0x425   :  { %5992 = vmatpush.bf16.msra.mxu3 %v9722_v1  ;;  %6498 = vmatpush.bf16.msra.mxu1 %v10430_v53 }
 0x427   :  { %6486 = vmatpush.bf16.msra.mxu0 %v10358_v32 }
 0x428   :  { %5993 = vmatmul.bf16.vlgmr.msra.gmra.mxu3 %v15436_v26  ;;  %v10295_v26 = vld [vmem:[%s17641_s0 + $0x798] sm:$0xf0] }
 0x429   :  { %6037 = vmatpush.bf16.msrb.mxu3 %v10346_v58  ;;  %v10298_v39 = vor.u32 %v11612_v16, %v10295_v26  ;;  %6499 = vmatpush.bf16.msra.mxu1 %v10422_v17  ;;  %v10439_v17 = vld [vmem:[%s17609_s9 + $0xb8] sm:$0xf0] }
 0x42a   :  { %v10442_v36 = vor.u32 %v11649_v50, %v10439_v17  ;;  %v10535_v50 = vld [vmem:[%s17609_s9 + $0x178] sm:$0xf0] }
 0x42b   :  { %6487 = vmatpush.bf16.msra.mxu0 %v10350_v28  ;;  %v5851_v10 = vpop.f32.mrf.mxu0  ;;  %v5734_v28 = vpop.f32.mrf.mxu3 }
 0x42c   :  { %v5852_v33 = vadd.f32 %v5851_v10, %v4348_v35  ;;  %v5735_v25 = vadd.f32 %v5734_v28, %v5722_v5  ;;  %v10231_v10 = vld [vmem:[%s17641_s0 + $0x718] sm:$0xf0] }
 0x42d   :  { %6038 = vmatpush.bf16.msrb.mxu3 %v10330_v6  ;;  %v5864_v44 = vpop.f32.mrf.mxu1  ;;  %6500 = vmatpush.bf16.msra.mxu1 %v10414_v49  ;;  %v11627_v6 = vld [vmem:[%s17609_s9 + $0x4] sm:$0xf]  ;;  %v10234_v18 = vor.u32 %v11596_v55, %v10231_v10  ;;  %v11645_v49 = vld [vmem:[%s17609_s9 + $0x94] sm:$0xf]  ;;  %v10423_v5 = vld [vmem:[%s17609_s9 + $0x98] sm:$0xf0] }
 0x42e   :  { %v5865_v32 = vadd.f32 %v5864_v44, %v5852_v33  ;;  %v6050_v1 = vmul.f32 0.2, %v5735_v25  ;;  %v11651_v33 = vld [vmem:[%s17609_s9 + $0xc4] sm:$0xf]  ;;  %v10447_v44 = vld [vmem:[%s17609_s9 + $0xc8] sm:$0xf0]  ;;  %v10426_v38 = vor.u32 %v11645_v49, %v10423_v5 }
 0x42f   :  { %6532 = vmatpush.bf16.msrb.mxu0 %v10410_v57  ;;  %v10282_v57 = vor.u32 %v11608_v8, %v10279_v46  ;;  %v10450_v26 = vor.u32 %v11651_v33, %v10447_v44  ;;  %v11792_v55 = vld [vmem:[%s17644_s5] sm:$0xf]  ;;  %v11660_v44 = vld [vmem:[%s17609_s9 + $0x104] sm:$0xf0] }
 0x430   :  { %v6054_v4 = vmax.f32 %v5735_v25, %v6050_v1  ;;  %v10517_v1 = vld [vmem:[%s17609_s9 + $0x150] sm:$0xf]  ;;  %v4349_v10 = vperm.slane %v11792_v55, 3  ;;  %v10477_v33 = vld [vmem:[%s17609_s9 + $0x100] sm:$0xf] }
 0x431   :  { %6039 = vmatpush.bf16.msrb.mxu3 %v10314_v14  ;;  %6545 = vmatpush.bf16.msrb.mxu1 %v10474_v56  ;;  %v10354_v14 = vor.u32 %v11627_v6, %v10351_v11  ;;  %v10415_v56 = vld [vmem:[%s17609_s9 + $0x88] sm:$0xf0]  ;;  %v11666_v6 = vld [vmem:[%s17609_s9 + $0x134] sm:$0xf0] }
 0x432   :  { %v6068_v35 = vmul.f32 %v6060_v51, %v6054_v4  ;;  %v10418_v25 = vor.u32 %v11643_v48, %v10415_v56  ;;  %v10519_v48 = vld [vmem:[%s17609_s9 + $0x158] sm:$0xf0]  ;;  %v11686_v55 = vld [vmem:[%s17609_s9 + $0x1d4] sm:$0xf0] }
 0x433   :  { %6533 = vmatpush.bf16.msrb.mxu0 %v10402_v27  ;;  %v5853_v59 = vpop.f32.mrf.mxu0  ;;  %v5736_v7 = vpop.f32.mrf.mxu3 }
 0x434   :  { %v6082_v53 = vadd.f32 %v6074_v42, %v6068_v35  ;;  %v10525_v59 = vld [vmem:[%s17609_s9 + $0x160] sm:$0xf] }
 0x435   :  { %6040 = vmatpush.bf16.msrb.mxu3 %v10298_v39  ;;  %v5866_v45 = vpop.f32.mrf.mxu1  ;;  %v5877_v58 = vpop.f32.mrf.mxu2  ;;  %6546 = vmatpush.bf16.msrb.mxu1 %v10466_v29  ;;  %v10431_v39 = vld [vmem:[%s17609_s9 + $0xa8] sm:$0xf0]  ;;  %v6061_v29 = vperm.slane %v16970_v47, 1  ;;  %v10509_v42 = vld [vmem:[%s17609_s9 + $0x140] sm:$0xf] }
 0x436   :  { %v17010_v27 = vadd.f32 %v5877_v58, %v5865_v32  ;;  %v6086_v16 = vpack.c.bf16 %v6082_v53, %v6082_v53  ;;  %v11647_v32 = vld [vmem:[%s17609_s9 + $0xa4] sm:$0xf]  ;;  %v11670_v58 = vld [vmem:[%s17609_s9 + $0x154] sm:$0xf0]  ;;  %v10493_v7 = vld [vmem:[%s17609_s9 + $0x120] sm:$0xf] }
 0x437   :  { %6534 = vmatpush.bf16.msrb.mxu0 %v10394_v31  ;;  %v11653_v31 = vld [vmem:[%s17609_s9 + $0xd4] sm:$0xf]  ;;  %v10518_v43 = vor.u32 %v11670_v58, %v10517_v1  ;;  %v10597_v1 = vld [vmem:[%s17609_s9 + $0x1f0] sm:$0xf]  ;;  %v11690_v58 = vld [vmem:[%s17609_s9 + $0x1f4] sm:$0xf0] }
 0x438   :  { %v10458_v12 = vor.u32 %v11653_v31, %v10455_v24  ;;  %6488 = vmatmul.bf16.vlgmr.msra.gmra.mxu0 %v6086_v16 }
 0x439   :  { %6041 = vmatpush.bf16.msrb.mxu3 %v10282_v57  ;;  %v11672_v57 = vld [vmem:[%s17609_s9 + $0x164] sm:$0xf0] }
 0x43a   :  { %6547 = vmatpush.bf16.msrb.mxu1 %v10458_v12  ;;  %v11664_v12 = vld [vmem:[%s17609_s9 + $0x124] sm:$0xf0] }
 0x43b   :  { %6535 = vmatpush.bf16.msrb.mxu0 %v10386_v19  ;;  %v5786_v23 = vpop.f32.mrf.mxu3 }
 0x43c   :  { %v5787_v8 = vadd.f32 %v5786_v23, %v16770_v41  ;;  %v10478_v23 = vor.u32 %v11660_v44, %v10477_v33  ;;  %v10573_v33 = vld [vmem:[%s17609_s9 + $0x1c0] sm:$0xf]  ;;  %v11684_v44 = vld [vmem:[%s17609_s9 + $0x1c4] sm:$0xf0] }
 0x43d   :  { %6042 = vmatpush.bf16.msrb.mxu3 %v10266_v37  ;;  %v5879_v19 = vpop.f32.mrf.mxu2  ;;  %v11668_v37 = vld [vmem:[%s17609_s9 + $0x144] sm:$0xf0] }
 0x43e   :  { %6548 = vmatpush.bf16.msrb.mxu1 %v10450_v26  ;;  %v5800_v46 = vadd.f32 %v16797_v22, %v5787_v8  ;;  %v10510_v52 = vor.u32 %v11668_v37, %v10509_v42  ;;  %v11673_v26 = vld [vmem:[%s17609_s9 + $0x174] sm:$0xf]  ;;  %v11671_v8 = vld [vmem:[%s17609_s9 + $0x164] sm:$0xf]  ;;  %v10479_v42 = vld [vmem:[%s17609_s9 + $0x108] sm:$0xf0] }
 0x43f   :  { %6536 = vmatpush.bf16.msrb.mxu0 %v10378_v0  ;;  %v10434_v0 = vor.u32 %v11647_v32, %v10431_v39  ;;  %v10538_v32 = vor.u32 %v11673_v26, %v10535_v50  ;;  %v10574_v26 = vor.u32 %v11684_v44, %v10573_v33  ;;  %v11682_v50 = vld [vmem:[%s17609_s9 + $0x1b4] sm:$0xf0] }
 0x440   :  { %v5813_v34 = vadd.f32 %v16802_v9, %v5800_v46  ;;  %v11674_v9 = vld [vmem:[%s17609_s9 + $0x174] sm:$0xf0]  ;;  %v10527_v46 = vld [vmem:[%s17609_s9 + $0x168] sm:$0xf0] }
 0x441   :  { %6043 = vmatpush.bf16.msrb.mxu3 %v10250_v15  ;;  %v10494_v15 = vor.u32 %v11664_v12, %v10493_v7 }
 0x442   :  { %6549 = vmatpush.bf16.msrb.mxu1 %v10442_v36  ;;  %v5826_v60 = vadd.f32 %v16834_v21, %v5813_v34  ;;  %v6075_v21 = vperm.slane %v16996_v30, 1  ;;  %v10530_v34 = vor.u32 %v11671_v8, %v10527_v46  ;;  %v10557_v8 = vld [vmem:[%s17609_s9 + $0x1a0] sm:$0xf]  ;;  %v11680_v46 = vld [vmem:[%s17609_s9 + $0x1a4] sm:$0xf0] }
 0x443   :  { %6537 = vmatpush.bf16.msrb.mxu0 %v10370_v61  ;;  %v5788_v22 = vpop.f32.mrf.mxu3  ;;  %v10526_v61 = vor.u32 %v11672_v57, %v10525_v59 }
 0x445   :  { %6044 = vmatpush.bf16.msrb.mxu3 %v10234_v18 }
 0x446   :  { %6550 = vmatpush.bf16.msrb.mxu1 %v10434_v0 }
 0x447   :  { %6538 = vmatpush.bf16.msrb.mxu0 %v10362_v63  ;;  %v10501_v63 = vld [vmem:[%s17609_s9 + $0x130] sm:$0xf] }
 0x448   :  { %6045 = vmatmul.bf16.vlgmr.msrb.gmra.mxu3 %v16183_v62  ;;  %v10533_v62 = vld [vmem:[%s17609_s9 + $0x170] sm:$0xf]  ;;  %v10502_v24 = vor.u32 %v11666_v6, %v10501_v63  ;;  %v11688_v6 = vld [vmem:[%s17609_s9 + $0x1e4] sm:$0xf0] }
 0x449   :  { %v10534_v28 = vor.u32 %v11674_v9, %v10533_v62  ;;  %v11669_v9 = vld [vmem:[%s17609_s9 + $0x154] sm:$0xf] }
 0x44a   :  { %6551 = vmatpush.bf16.msrb.mxu1 %v10426_v38 }
 0x44b   :  { %6539 = vmatpush.bf16.msrb.mxu0 %v10354_v14  ;;  %v17059_v20 = vpop.f32.mrf.mxu0  ;;  %6506 = vmatpush.bf16.msra.mxu2 %v10534_v28  ;;  %v5838_v2 = vpop.f32.mrf.mxu3  ;;  %v10485_v14 = vld [vmem:[%s17609_s9 + $0x110] sm:$0xf]  ;;  %v10522_v28 = vor.u32 %v11669_v9, %v10519_v48  ;;  %v11676_v9 = vld [vmem:[%s17609_s9 + $0x184] sm:$0xf0]  ;;  %v11689_v48 = vld [vmem:[%s17609_s9 + $0x1f4] sm:$0xf] }
 0x44c   :  { %v5839_v54 = vadd.f32 %v5838_v2, %v5826_v60  ;;  %v11665_v60 = vld [vmem:[%s17609_s9 + $0x134] sm:$0xf]  ;;  %v10495_v2 = vld [vmem:[%s17609_s9 + $0x128] sm:$0xf0] }
 0x44d   :  { %v17067_v41 = vpop.f32.mrf.mxu1 }
 0x44e   :  { %6540 = vmatmul.bf16.vlgmr.msrb.gmra.mxu0 %v6086_v16  ;;  %6552 = vmatpush.bf16.msrb.mxu1 %v10418_v25  ;;  %v6051_v40 = vmul.f32 0.2, %v5839_v54  ;;  %v11662_v16 = vld [vmem:[%s17609_s9 + $0x114] sm:$0xf0] }
 0x44f   :  { %6507 = vmatpush.bf16.msra.mxu2 %v10526_v61  ;;  %v10486_v19 = vor.u32 %v11662_v16, %v10485_v14  ;;  %v11663_v61 = vld [vmem:[%s17609_s9 + $0x124] sm:$0xf]  ;;  %v6062_v16 = vperm.slane %v16970_v47, 2 }
 0x450   :  { %v6055_v4 = vmax.f32 %v5839_v54, %v6051_v40  ;;  %v10498_v54 = vor.u32 %v11663_v61, %v10495_v2  ;;  %v10487_v40 = vld [vmem:[%s17609_s9 + $0x118] sm:$0xf0]  ;;  %v10575_v61 = vld [vmem:[%s17609_s9 + $0x1c8] sm:$0xf0] }
 0x452   :  { %v6069_v3 = vmul.f32 %v6061_v29, %v6055_v4  ;;  %v10598_v29 = vor.u32 %v11690_v58, %v10597_v1  ;;  %v11681_v1 = vld [vmem:[%s17609_s9 + $0x1b4] sm:$0xf]  ;;  %v10567_v58 = vld [vmem:[%s17609_s9 + $0x1b8] sm:$0xf0] }
 0x453   :  { %v5905_v51 = vpop.f32.mrf.mxu0  ;;  %6508 = vmatpush.bf16.msra.mxu2 %v10518_v43  ;;  %v5840_v11 = vpop.f32.mrf.mxu3  ;;  %v11661_v43 = vld [vmem:[%s17609_s9 + $0x114] sm:$0xf] }
 0x454   :  { %v6083_v31 = vadd.f32 %v6075_v21, %v6069_v3  ;;  %v10511_v51 = vld [vmem:[%s17609_s9 + $0x148] sm:$0xf0]  ;;  %6519 = vmatpush.bf16.msra.mxu3 %v10598_v29  ;;  %v10490_v4 = vor.u32 %v11661_v43, %v10487_v40  ;;  %v11659_v21 = vld [vmem:[%s17609_s9 + $0x104] sm:$0xf]  ;;  %v10570_v43 = vor.u32 %v11681_v1, %v10567_v58  ;;  %v10755_v58 = vld [vmem:[%s17615_s17 + $0xb4] sm:$0xf0] }
 0x455   :  { %v5918_v13 = vpop.f32.mrf.mxu1  ;;  %v17088_v45 = vpop.f32.mrf.mxu2  ;;  %v10482_v63 = vor.u32 %v11659_v21, %v10479_v42  ;;  %v11679_v40 = vld [vmem:[%s17609_s9 + $0x1a4] sm:$0xf]  ;;  %v10559_v29 = vld [vmem:[%s17609_s9 + $0x1a8] sm:$0xf0]  ;;  %v11677_v21 = vld [vmem:[%s17609_s9 + $0x194] sm:$0xf] }
 0x456   :  { %v6087_v53 = vpack.c.bf16 %v6083_v31, %v6083_v31  ;;  %v10551_v42 = vld [vmem:[%s17609_s9 + $0x198] sm:$0xf0] }
 0x457   :  { %6509 = vmatpush.bf16.msra.mxu2 %v10510_v52  ;;  %v10589_v52 = vld [vmem:[%s17609_s9 + $0x1e0] sm:$0xf] }
 0x458   :  { %6501 = vmatmul.bf16.vlgmr.msra.gmra.mxu1 %v6087_v53 }
 0x45b   :  { %6510 = vmatpush.bf16.msra.mxu2 %v10502_v24 }
 0x45d   :  { %v5931_v35 = vpop.f32.mrf.mxu2 }
 0x45e   :  { %v10590_v35 = vor.u32 %v11688_v6, %v10589_v52 }
 0x45f   :  { %6511 = vmatpush.bf16.msra.mxu2 %v10494_v15  ;;  %v10581_v15 = vld [vmem:[%s17609_s9 + $0x1d0] sm:$0xf] }
 0x460   :  { %6520 = vmatpush.bf16.msra.mxu3 %v10590_v35  ;;  %v11675_v35 = vld [vmem:[%s17609_s9 + $0x184] sm:$0xf] }
 0x463   :  { %6512 = vmatpush.bf16.msra.mxu2 %v10486_v19  ;;  %v6076_v19 = vperm.slane %v16996_v30, 2 }
 0x467   :  { %6513 = vmatpush.bf16.msra.mxu2 %v10478_v23 }
 0x468   :  { %6553 = vmatmul.bf16.vlgmr.msrb.gmra.mxu1 %v6087_v53  ;;  %v5890_v5 = vpop.f32.mrf.mxu3 }
 0x469   :  { %v5891_v38 = vadd.f32 %v5890_v5, %v17010_v27  ;;  %v11667_v27 = vld [vmem:[%s17609_s9 + $0x144] sm:$0xf]  ;;  %v11678_v5 = vld [vmem:[%s17609_s9 + $0x194] sm:$0xf0] }
 0x46a   :  { %v10514_v59 = vor.u32 %v11667_v27, %v10511_v51  ;;  %v11687_v27 = vld [vmem:[%s17609_s9 + $0x1e4] sm:$0xf]  ;;  %v10591_v51 = vld [vmem:[%s17609_s9 + $0x1e8] sm:$0xf0] }
 0x46b   :  { %v5955_v18 = vpop.f32.mrf.mxu0  ;;  %6558 = vmatpush.bf16.msrb.mxu2 %v10538_v32  ;;  %v5904_v56 = vadd.f32 %v17059_v20, %v5891_v38  ;;  %v10503_v20 = vld [vmem:[%s17609_s9 + $0x138] sm:$0xf0]  ;;  %v10541_v38 = vld [vmem:[%s17609_s9 + $0x180] sm:$0xf] }
 0x46c   :  { %v5956_v17 = vadd.f32 %v5955_v18, %v4349_v10  ;;  %v10582_v10 = vor.u32 %v11686_v55, %v10581_v15  ;;  %v10565_v18 = vld [vmem:[%s17609_s9 + $0x1b0] sm:$0xf] }
 0x46d   :  { %v5968_v36 = vpop.f32.mrf.mxu1  ;;  %v5917_v25 = vadd.f32 %v17067_v41, %v5904_v56  ;;  %v10506_v41 = vor.u32 %v11665_v60, %v10503_v20  ;;  %v10566_v23 = vor.u32 %v11682_v50, %v10565_v18  ;;  %v10542_v56 = vor.u32 %v11676_v9, %v10541_v38  ;;  %v10583_v60 = vld [vmem:[%s17609_s9 + $0x1d8] sm:$0xf0] }
 0x46e   :  { %v5969_v39 = vadd.f32 %v5968_v36, %v5956_v17  ;;  %6521 = vmatpush.bf16.msra.mxu3 %v10582_v10  ;;  %v11694_v38 = vld [vmem:[%s17614_s13 + $0x18] sm:$0xff] }
 0x46f   :  { %6559 = vmatpush.bf16.msrb.mxu2 %v10530_v34  ;;  %v5930_v31 = vadd.f32 %v17088_v45, %v5917_v25  ;;  %v10558_v34 = vor.u32 %v11680_v46, %v10557_v8  ;;  %v11698_v46 = vld [vmem:[%s17614_s13 + $0x38] sm:$0xff] }
 0x470   :  { %v5892_v57 = vpop.f32.mrf.mxu3  ;;  %6738 = vmatpush.bf16.msra.mxu0 %v11698_v46  ;;  %v11722_v46 = vld [vmem:[%s17615_s17 + $0x7c] sm:$0xf] }
 0x472   :  { %6522 = vmatpush.bf16.msra.mxu3 %v10574_v26 }
 0x473   :  { %v5957_v0 = vpop.f32.mrf.mxu0  ;;  %6560 = vmatpush.bf16.msrb.mxu2 %v10522_v28  ;;  %v10599_v28 = vld [vmem:[%s17609_s9 + $0x1f8] sm:$0xf0] }
 0x474   :  { %v10602_v25 = vor.u32 %v11689_v48, %v10599_v28 }
 0x475   :  { %v5970_v49 = vpop.f32.mrf.mxu1  ;;  %v5981_v22 = vpop.f32.mrf.mxu2 }
 0x476   :  { %v17144_v62 = vadd.f32 %v5981_v22, %v5969_v39  ;;  %6523 = vmatpush.bf16.msra.mxu3 %v10566_v23  ;;  %v10549_v49 = vld [vmem:[%s17609_s9 + $0x190] sm:$0xf] }
 0x477   :  { %6561 = vmatpush.bf16.msrb.mxu2 %v10514_v59  ;;  %v10550_v22 = vor.u32 %v11678_v5, %v10549_v49  ;;  %v10594_v59 = vor.u32 %v11687_v27, %v10591_v51  ;;  %v11696_v49 = vld [vmem:[%s17614_s13 + $0x28] sm:$0xff] }
 0x478   :  { %v11692_v27 = vld [vmem:[%s17614_s13 + $0x8] sm:$0xff] }
 0x479   :  { %v11704_v51 = vld [vmem:[%s17614_s13 + $0x68] sm:$0xff] }
 0x47a   :  { %6524 = vmatpush.bf16.msra.mxu3 %v10558_v34  ;;  %v11697_v34 = vld [vmem:[%s17614_s13 + $0x30] sm:$0xff] }
 0x47b   :  { %6562 = vmatpush.bf16.msrb.mxu2 %v10506_v41  ;;  %v11683_v41 = vld [vmem:[%s17609_s9 + $0x1c4] sm:$0xf]  ;;  %6739 = vmatpush.bf16.msra.mxu0 %v11697_v34  ;;  %v10731_v34 = vld [vmem:[%s17615_s17 + $0x84] sm:$0xf0] }
 0x47c   :  { %v10578_v2 = vor.u32 %v11683_v41, %v10575_v61  ;;  %v11699_v41 = vld [vmem:[%s17614_s13 + $0x40] sm:$0xff]  ;;  %v10753_v61 = vld [vmem:[%s17615_s17 + $0xa8] sm:$0xf] }
 0x47d   :  { %v5983_v13 = vpop.f32.mrf.mxu2 }
 0x47e   :  { %6525 = vmatpush.bf16.msra.mxu3 %v10550_v22  ;;  %v11685_v13 = vld [vmem:[%s17609_s9 + $0x1d4] sm:$0xf]  ;;  %v11695_v22 = vld [vmem:[%s17614_s13 + $0x20] sm:$0xff] }
 0x47f   :  { %6563 = vmatpush.bf16.msrb.mxu2 %v10498_v54  ;;  %v10586_v20 = vor.u32 %v11685_v13, %v10583_v60  ;;  %6740 = vmatpush.bf16.msra.mxu0 %v11696_v49  ;;  %v11702_v13 = vld [vmem:[%s17614_s13 + $0x58] sm:$0xff]  ;;  %v11701_v60 = vld [vmem:[%s17614_s13 + $0x50] sm:$0xff]  ;;  %v10737_v49 = vld [vmem:[%s17615_s17 + $0x80] sm:$0xf] }
 0x482   :  { %6526 = vmatpush.bf16.msra.mxu3 %v10542_v56  ;;  %v11693_v56 = vld [vmem:[%s17614_s13 + $0x10] sm:$0xff] }
 0x483   :  { %6564 = vmatpush.bf16.msrb.mxu2 %v10490_v4  ;;  %v10562_v4 = vor.u32 %v11679_v40, %v10559_v29  ;;  %6741 = vmatpush.bf16.msra.mxu0 %v11695_v22  ;;  %v11730_v40 = vld [vmem:[%s17615_s17 + $0xb8] sm:$0xf0]  ;;  %v10734_v22 = vor.u32 %v11722_v46, %v10731_v34  ;;  %v11735_v46 = vld [vmem:[%s17620_s20 + $0x20] sm:$0xff] }
 0x484   :  { %v11755_v34 = vld [vmem:[%s17613_s14] ss:$0 sm:$0xff] }
 0x486   :  { %6571 = vmatpush.bf16.msrb.mxu3 %v10602_v25  ;;  %v11705_v25 = vld [vmem:[%s17614_s13 + $0x70] sm:$0xff] }
 0x487   :  { %6565 = vmatpush.bf16.msrb.mxu2 %v10482_v63  ;;  %v10554_v63 = vor.u32 %v11677_v21, %v10551_v42  ;;  %6742 = vmatpush.bf16.msra.mxu0 %v11694_v38 }
 0x48a   :  { %6572 = vmatpush.bf16.msrb.mxu3 %v10594_v59  ;;  %v11691_v59 = vld [vmem:[%s17614_s13] sm:$0xff] }
 0x48b   :  { %v17190_v37 = vpop.f32.mrf.mxu0  ;;  %v5942_v7 = vpop.f32.mrf.mxu3  ;;  %6743 = vmatpush.bf16.msra.mxu0 %v11693_v56 }
 0x48c   :  { %v5943_v12 = vadd.f32 %v5942_v7, %v5930_v31 }
 0x48d   :  { %v17192_v3 = vpop.f32.mrf.mxu1 }
 0x48e   :  { %v6052_v14 = vmul.f32 0.2, %v5943_v12  ;;  %6573 = vmatpush.bf16.msrb.mxu3 %v10586_v20  ;;  %v11700_v20 = vld [vmem:[%s17614_s13 + $0x48] sm:$0xff] }
 0x48f   :  { %6744 = vmatpush.bf16.msra.mxu0 %v11692_v27  ;;  %v10725_v27 = vld [vmem:[%s17615_s17 + $0x68] sm:$0xf] }
 0x490   :  { %v6056_v45 = vmax.f32 %v5943_v12, %v6052_v14  ;;  %v6063_v14 = vperm.slane %v16970_v47, 3 }
 0x492   :  { %v6070_v17 = vmul.f32 %v6062_v16, %v6056_v45  ;;  %6574 = vmatpush.bf16.msrb.mxu3 %v10578_v2  ;;  %v11729_v2 = vld [vmem:[%s17615_s17 + $0xb0] sm:$0xf0] }
 0x493   :  { %v6009_v11 = vpop.f32.mrf.mxu0  ;;  %v5944_v36 = vpop.f32.mrf.mxu3  ;;  %6745 = vmatpush.bf16.msra.mxu0 %v11691_v59  ;;  %v10754_v1 = vor.u32 %v11729_v2, %v10753_v61  ;;  %v10707_v61 = vld [vmem:[%s17615_s17 + $0x54] sm:$0xf0]  ;;  %v10713_v2 = vld [vmem:[%s17615_s17 + $0x50] sm:$0xf] }
 0x494   :  { %v6084_v32 = vadd.f32 %v6076_v19, %v6070_v17  ;;  %v10543_v11 = vld [vmem:[%s17609_s9 + $0x188] sm:$0xf0]  ;;  %v6077_v19 = vperm.slane %v16996_v30, 3 }
 0x495   :  { %v6022_v24 = vpop.f32.mrf.mxu1  ;;  %v17201_v53 = vpop.f32.mrf.mxu2  ;;  %v10546_v31 = vor.u32 %v11675_v35, %v10543_v11 }
 0x496   :  { %v6088_v0 = vpack.c.bf16 %v6084_v32, %v6084_v32  ;;  %6575 = vmatpush.bf16.msrb.mxu3 %v10570_v43  ;;  %v10761_v43 = vld [vmem:[%s17615_s17 + $0xb0] sm:$0xf] }
 0x497   :  { %v10762_v21 = vor.u32 %v11730_v40, %v10761_v43  ;;  %v10693_v43 = vld [vmem:[%s17615_s17 + $0x30] sm:$0xf]  ;;  %v11714_v40 = vld [vmem:[%s17615_s17 + $0x38] sm:$0xf0] }
 0x498   :  { %6514 = vmatmul.bf16.vlgmr.msra.gmra.mxu2 %v6088_v0 }
 0x499   :  { %6937 = vmatpush.bf16.msra.mxu2 %v10754_v1  ;;  %6963 = vmatpush.bf16.msrb.mxu0 %v10762_v21  ;;  %v10695_v21 = vld [vmem:[%s17615_s17 + $0x3c] sm:$0xf0] }
 0x49a   :  { %6576 = vmatpush.bf16.msrb.mxu3 %v10562_v4 }
 0x49d   :  { %v6035_v39 = vpop.f32.mrf.mxu2 }
 0x49e   :  { %6577 = vmatpush.bf16.msrb.mxu3 %v10554_v63  ;;  %v6588_v63 = vld [vmem:[%s17616_s11] sm:$0x3] }
 0x49f   :  { %v6590_v11 = vperm.slane %v6588_v63, 0 }
 0x4a2   :  { %6578 = vmatpush.bf16.msrb.mxu3 %v10546_v31 }
 0x4a8   :  { %6566 = vmatmul.bf16.vlgmr.msrb.gmra.mxu2 %v6088_v0  ;;  %v11706_v0 = vld [vmem:[%s17614_s13 + $0x78] sm:$0xff] }
 0x4a9   :  { %6751 = vmatpush.bf16.msra.mxu1 %v11706_v0 }
 0x4ab   :  { %v5994_v57 = vpop.f32.mrf.mxu3 }
 0x4ac   :  { %v5995_v52 = vadd.f32 %v5994_v57, %v17144_v62  ;;  %v11703_v57 = vld [vmem:[%s17614_s13 + $0x60] sm:$0xff] }
 0x4ad   :  { %6752 = vmatpush.bf16.msra.mxu1 %v11705_v25  ;;  %v10719_v25 = vld [vmem:[%s17615_s17 + $0x6c] sm:$0xf0] }
 0x4ae   :  { %v6008_v24 = vadd.f32 %v17190_v37, %v5995_v52 }
 0x4b0   :  { %v6021_v12 = vadd.f32 %v17192_v3, %v6008_v24  ;;  %v6154_v3 = vld [vmem:[%s17612_s10] sm:$0x3] }
 0x4b1   :  { %v6157_v47 = vperm.slane %v6154_v3, 1  ;;  %6753 = vmatpush.bf16.msra.mxu1 %v11704_v51  ;;  %v11721_v51 = vld [vmem:[%s17615_s17 + $0x70] sm:$0xf0] }
 0x4b2   :  { %v6034_v15 = vadd.f32 %v17201_v53, %v6021_v12  ;;  %v6156_v53 = vperm.slane %v6154_v3, 0  ;;  %v10741_v3 = vld [vmem:[%s17615_s17 + $0x90] sm:$0xf] }
 0x4b3   :  { %v5996_v54 = vpop.f32.mrf.mxu3 }
 0x4b4   :  { %v11728_v54 = vld [vmem:[%s17615_s17 + $0xac] sm:$0xf] }
 0x4b5   :  { %v6489_v6 = vpop.f32.mrf.mxu0  ;;  %6754 = vmatpush.bf16.msra.mxu1 %v11703_v57  ;;  %v10758_v4 = vor.u32 %v11728_v54, %v10755_v58  ;;  %v10726_v57 = vor.u32 %v11721_v51, %v10725_v27  ;;  %v11718_v54 = vld [vmem:[%s17615_s17 + $0x58] sm:$0xf0] }
 0x4b6   :  { %v6490_v50 = vadd.f32 %v6489_v6, %v6156_v53  ;;  %v6596_v6 = vld [vmem:[%s17617_s12] sm:$0x3]  ;;  %v11726_v53 = vld [vmem:[%s17615_s17 + $0x98] sm:$0xf0]  ;;  %v10714_v58 = vor.u32 %v11718_v54, %v10713_v2  ;;  %v11741_v2 = vld [vmem:[%s17620_s20 + $0x50] sm:$0xff] }
 0x4b7   :  { %v6598_v24 = vperm.slane %v6596_v6, 0  ;;  %v11732_v54 = vld [vmem:[%s17620_s20 + $0x8] sm:$0xff] }
 0x4b9   :  { %6755 = vmatpush.bf16.msra.mxu1 %v11702_v13  ;;  %v10705_v13 = vld [vmem:[%s17615_s17 + $0x48] sm:$0xf] }
 0x4bd   :  { %v6491_v7 = vpop.f32.mrf.mxu0  ;;  %6756 = vmatpush.bf16.msra.mxu1 %v11701_v60  ;;  %v11717_v60 = vld [vmem:[%s17615_s17 + $0x50] sm:$0xf0] }
 0x4c1   :  { %6757 = vmatpush.bf16.msra.mxu1 %v11700_v20  ;;  %v11716_v20 = vld [vmem:[%s17615_s17 + $0x4c] sm:$0xf] }
 0x4c2   :  { %v10710_v1 = vor.u32 %v11716_v20, %v10707_v61  ;;  %v11742_v20 = vld [vmem:[%s17620_s20 + $0x58] sm:$0xff]  ;;  %v11733_v61 = vld [vmem:[%s17620_s20 + $0x10] sm:$0xff] }
 0x4c5   :  { %6758 = vmatpush.bf16.msra.mxu1 %v11699_v41  ;;  %v10706_v41 = vor.u32 %v11717_v60, %v10705_v13  ;;  %v11748_v13 = vld [vmem:[%s17620_s20 + $0x88] sm:$0xff]  ;;  %v11734_v60 = vld [vmem:[%s17620_s20 + $0x18] sm:$0xff] }
 0x4cb   :  { %v6046_v62 = vpop.f32.mrf.mxu3  ;;  %v6541_v16 = vpop.f32.mrf.mxu0 }
 0x4cc   :  { %v6047_v55 = vadd.f32 %v6046_v62, %v6034_v15  ;;  %v6542_v32 = vadd.f32 %v6541_v16, %v6157_v47  ;;  %v6591_v16 = vperm.slane %v6588_v63, 1  ;;  %v11727_v47 = vld [vmem:[%s17615_s17 + $0xa0] sm:$0xf0] }
 0x4cd   :  { %v11715_v63 = vld [vmem:[%s17615_s17 + $0x40] sm:$0xf0] }
 0x4ce   :  { %v6053_v10 = vmul.f32 0.2, %v6047_v55 }
 0x4d0   :  { %v6057_v45 = vmax.f32 %v6047_v55, %v6053_v10 }
 0x4d2   :  { %v6071_v33 = vmul.f32 %v6063_v14, %v6057_v45 }
 0x4d3   :  { %v6048_v44 = vpop.f32.mrf.mxu3  ;;  %v6543_v37 = vpop.f32.mrf.mxu0 }
 0x4d4   :  { %v6085_v26 = vadd.f32 %v6077_v19, %v6071_v33  ;;  %v6599_v33 = vperm.slane %v6596_v6, 1 }
 0x4d5   :  { %v6502_v17 = vpop.f32.mrf.mxu1 }
 0x4d6   :  { %v6089_v18 = vpack.c.bf16 %v6085_v26, %v6085_v26  ;;  %v6503_v36 = vadd.f32 %v6502_v17, %v6490_v50  ;;  %v11725_v50 = vld [vmem:[%s17615_s17 + $0x94] sm:$0xf]  ;;  %v10742_v17 = vor.u32 %v11726_v53, %v10741_v3  ;;  %v11738_v3 = vld [vmem:[%s17620_s20 + $0x38] sm:$0xff] }
 0x4d7   :  { %v11746_v53 = vld [vmem:[%s17620_s20 + $0x78] sm:$0xff]  ;;  %7213 = vmatpush.bf16.msrb.mxu1 %v11738_v3 }
 0x4d8   :  { %6527 = vmatmul.bf16.vlgmr.msra.gmra.mxu3 %v6089_v18  ;;  %6938 = vmatpush.bf16.msra.mxu2 %v10742_v17  ;;  %v11753_v17 = vld [vmem:[%s17620_s20 + $0xb0] sm:$0xff] }
 0x4d9   :  { %6950 = vmatpush.bf16.msra.mxu3 %v10758_v4  ;;  %v10694_v4 = vor.u32 %v11714_v40, %v10693_v43  ;;  %v11739_v43 = vld [vmem:[%s17620_s20 + $0x40] sm:$0xff] }
 0x4da   :  { %v6976_v40 = vld [vmem:[%s17621_s18] sm:$0x7] }
 0x4dd   :  { %v6504_v23 = vpop.f32.mrf.mxu1 }
 0x4de   :  { %v10749_v23 = vld [vmem:[%s17615_s17 + $0x98] sm:$0xf] }
 0x4e5   :  { %v6554_v39 = vpop.f32.mrf.mxu1 }
 0x4e6   :  { %v17298_v30 = vadd.f32 %v6554_v39, %v6542_v32  ;;  %v10750_v39 = vor.u32 %v11727_v47, %v10749_v23  ;;  %v11745_v23 = vld [vmem:[%s17620_s20 + $0x70] sm:$0xff]  ;;  %v11752_v47 = vld [vmem:[%s17620_s20 + $0xa8] sm:$0xff] }
 0x4e8   :  { %6579 = vmatmul.bf16.vlgmr.msrb.gmra.mxu3 %v6089_v18  ;;  %6964 = vmatpush.bf16.msrb.mxu0 %v10750_v39  ;;  %v11744_v39 = vld [vmem:[%s17620_s20 + $0x68] sm:$0xff] }
 0x4ed   :  { %v6556_v8 = vpop.f32.mrf.mxu1 }
 0x4ee   :  { %v11723_v8 = vld [vmem:[%s17615_s17 + $0x80] sm:$0xf0] }
 0x51b   :  { %v6515_v5 = vpop.f32.mrf.mxu2 }
 0x51c   :  { %v6516_v29 = vadd.f32 %v6515_v5, %v6503_v36  ;;  %v10743_v36 = vld [vmem:[%s17615_s17 + $0x9c] sm:$0xf0]  ;;  %v11724_v5 = vld [vmem:[%s17615_s17 + $0x88] sm:$0xf0] }
 0x51d   :  { %v10746_v32 = vor.u32 %v11725_v50, %v10743_v36  ;;  %v10738_v38 = vor.u32 %v11724_v5, %v10737_v49  ;;  %v11737_v36 = vld [vmem:[%s17620_s20 + $0x30] sm:$0xff]  ;;  %v11750_v49 = vld [vmem:[%s17620_s20 + $0x98] sm:$0xff] }
 0x51e   :  { %7214 = vmatpush.bf16.msrb.mxu1 %v11737_v36 }
 0x51f   :  { %6951 = vmatpush.bf16.msra.mxu3 %v10746_v32  ;;  %6965 = vmatpush.bf16.msrb.mxu0 %v10738_v38  ;;  %v11736_v32 = vld [vmem:[%s17620_s20 + $0x28] sm:$0xff]  ;;  %v11749_v38 = vld [vmem:[%s17620_s20 + $0x90] sm:$0xff] }
 0x522   :  { %7215 = vmatpush.bf16.msrb.mxu1 %v11736_v32 }
 0x523   :  { %v6517_v9 = vpop.f32.mrf.mxu2  ;;  %6952 = vmatpush.bf16.msra.mxu3 %v10734_v22  ;;  %6966 = vmatpush.bf16.msrb.mxu0 %v10726_v57 }
 0x524   :  { %v10717_v9 = vld [vmem:[%s17615_s17 + $0x60] sm:$0xf] }
 0x526   :  { %7216 = vmatpush.bf16.msrb.mxu1 %v11735_v46 }
 0x527   :  { %6967 = vmatpush.bf16.msrb.mxu0 %v10714_v58  ;;  %v11731_v58 = vld [vmem:[%s17620_s20] sm:$0xff] }
 0x52a   :  { %7217 = vmatpush.bf16.msrb.mxu1 %v11734_v60 }
 0x52b   :  { %v6567_v48 = vpop.f32.mrf.mxu2 }
 0x52c   :  { %v6568_v55 = vadd.f32 %v6567_v48, %v17298_v30  ;;  %v10729_v30 = vld [vmem:[%s17615_s17 + $0x78] sm:$0xf]  ;;  %v11720_v48 = vld [vmem:[%s17615_s17 + $0x68] sm:$0xf0] }
 0x52d   :  { %v10730_v0 = vor.u32 %v11723_v8, %v10729_v30  ;;  %v10718_v56 = vor.u32 %v11720_v48, %v10717_v9  ;;  %v11751_v8 = vld [vmem:[%s17620_s20 + $0xa0] sm:$0xff] }
 0x52e   :  { %7218 = vmatpush.bf16.msrb.mxu1 %v11733_v61 }
 0x52f   :  { %6939 = vmatpush.bf16.msra.mxu2 %v10730_v0  ;;  %v11743_v0 = vld [vmem:[%s17620_s20 + $0x60] sm:$0xff] }
 0x532   :  { %7219 = vmatpush.bf16.msrb.mxu1 %v11732_v54 }
 0x533   :  { %v6569_v28 = vpop.f32.mrf.mxu2  ;;  %6940 = vmatpush.bf16.msra.mxu2 %v10718_v56 }
 0x534   :  { %v11719_v28 = vld [vmem:[%s17615_s17 + $0x64] sm:$0xf] }
 0x535   :  { %v10722_v59 = vor.u32 %v11719_v28, %v10719_v25  ;;  %v11756_v28 = vld [vmem:[%s17618_s15] ss:$0 sm:$0xff] }
 0x536   :  { %v11757_v25 = vld [vmem:[%s17619_s16] ss:$0 sm:$0xff]  ;;  %7220 = vmatpush.bf16.msrb.mxu1 %v11731_v58 }
 0x537   :  { %6953 = vmatpush.bf16.msra.mxu3 %v10722_v59  ;;  %6941 = vmatpush.bf16.msra.mxu2 %v10706_v41  ;;  %v11747_v41 = vld [vmem:[%s17620_s20 + $0x80] sm:$0xff] }
 0x53b   :  { %6954 = vmatpush.bf16.msra.mxu3 %v10710_v1  ;;  %6942 = vmatpush.bf16.msra.mxu2 %v10694_v4  ;;  %v11740_v1 = vld [vmem:[%s17620_s20 + $0x48] sm:$0xff]  ;;  %v6980_v4 = vperm.slane %v6976_v40, 2 }
 0x55b   :  { %v6528_v42 = vpop.f32.mrf.mxu3 }
 0x55c   :  { %v6529_v52 = vadd.f32 %v6528_v42, %v6516_v29  ;;  %v11713_v29 = vld [vmem:[%s17615_s17 + $0x34] sm:$0xf]  ;;  %v10701_v42 = vld [vmem:[%s17615_s17 + $0x38] sm:$0xf] }
 0x55d   :  { %v10702_v6 = vor.u32 %v11715_v63, %v10701_v42 }
 0x55e   :  { %v6584_v35 = vmul.f32 0.2, %v6529_v52 }
 0x55f   :  { %6968 = vmatpush.bf16.msrb.mxu0 %v10702_v6  ;;  %v6979_v6 = vperm.slane %v6976_v40, 1 }
 0x560   :  { %v6586_v31 = vmax.f32 %v6529_v52, %v6584_v35  ;;  %v10698_v52 = vor.u32 %v11713_v29, %v10695_v21  ;;  %v10681_v35 = vld [vmem:[%s17615_s17 + $0x18] sm:$0xf]  ;;  %v6987_v29 = vld [vmem:[%s17622_s19] sm:$0x7] }
 0x561   :  { %v6991_v21 = vperm.slane %v6987_v29, 2 }
 0x562   :  { %v6594_v7 = vmul.f32 %v6590_v11, %v6586_v31  ;;  %6955 = vmatpush.bf16.msra.mxu3 %v10698_v52  ;;  %v11711_v11 = vld [vmem:[%s17615_s17 + $0x20] sm:$0xf0]  ;;  %v11710_v31 = vld [vmem:[%s17615_s17 + $0x1c] sm:$0xf]  ;;  %v6978_v52 = vperm.slane %v6976_v40, 0 }
 0x563   :  { %v6530_v12 = vpop.f32.mrf.mxu3 }
 0x564   :  { %v6602_v15 = vadd.f32 %v6598_v24, %v6594_v7  ;;  %v10682_v24 = vor.u32 %v11711_v11, %v10681_v35  ;;  %v10683_v7 = vld [vmem:[%s17615_s17 + $0x24] sm:$0xf0]  ;;  %v10689_v12 = vld [vmem:[%s17615_s17 + $0x20] sm:$0xf]  ;;  %v6989_v11 = vperm.slane %v6987_v29, 0 }
 0x566   :  { %v6604_v62 = vpack.c.bf16 %v6602_v15, %v6602_v15  ;;  %v11712_v15 = vld [vmem:[%s17615_s17 + $0x28] sm:$0xf0]  ;;  %6943 = vmatpush.bf16.msra.mxu2 %v10682_v24 }
 0x568   :  { %6746 = vmatmul.bf16.vlgmr.msra.gmra.mxu0 %v6604_v62  ;;  %v10686_v62 = vor.u32 %v11710_v31, %v10683_v7  ;;  %v6990_v31 = vperm.slane %v6987_v29, 1 }
 0x56a   :  { %6956 = vmatpush.bf16.msra.mxu3 %v10686_v62 }
 0x56b   :  { %v6580_v10 = vpop.f32.mrf.mxu3 }
 0x56c   :  { %v6581_v14 = vadd.f32 %v6580_v10, %v6568_v55  ;;  %v10690_v55 = vor.u32 %v11712_v15, %v10689_v12  ;;  %v10669_v10 = vld [vmem:[%s17615_s17] sm:$0xf] }
 0x56e   :  { %v6585_v45 = vmul.f32 0.2, %v6581_v14  ;;  %6969 = vmatpush.bf16.msrb.mxu0 %v10690_v55 }
 0x570   :  { %v6587_v19 = vmax.f32 %v6581_v14, %v6585_v45  ;;  %v11708_v14 = vld [vmem:[%s17615_s17 + $0x8] sm:$0xf0]  ;;  %v11707_v45 = vld [vmem:[%s17615_s17 + $0x4] sm:$0xf] }
 0x572   :  { %v6595_v44 = vmul.f32 %v6591_v16, %v6587_v19  ;;  %v10670_v16 = vor.u32 %v11708_v14, %v10669_v10  ;;  %v10671_v19 = vld [vmem:[%s17615_s17 + $0xc] sm:$0xf0] }
 0x573   :  { %v6582_v26 = vpop.f32.mrf.mxu3 }
 0x574   :  { %v6603_v18 = vadd.f32 %v6599_v33, %v6595_v44  ;;  %v10677_v33 = vld [vmem:[%s17615_s17 + $0x8] sm:$0xf]  ;;  %v10674_v44 = vor.u32 %v11707_v45, %v10671_v19  ;;  %v11709_v26 = vld [vmem:[%s17615_s17 + $0x10] sm:$0xf0]  ;;  %6944 = vmatpush.bf16.msra.mxu2 %v10670_v16 }
 0x576   :  { %v6605_v37 = vpack.c.bf16 %v6603_v18, %v6603_v18  ;;  %v10678_v18 = vor.u32 %v11709_v26, %v10677_v33  ;;  %6957 = vmatpush.bf16.msra.mxu3 %v10674_v44 }
 0x578   :  { %6759 = vmatmul.bf16.vlgmr.msra.gmra.mxu1 %v6605_v37  ;;  %6970 = vmatpush.bf16.msrb.mxu0 %v10678_v18  ;;  %v11754_v37 = vld [vmem:[%s17620_s20 + $0xb8] sm:$0xff] }
 0x579   :  { %7226 = vmatpush.bf16.msrb.mxu2 %v11746_v53  ;;  %v6998_v53 = vlaneseq }
 0x57a   :  { %7239 = vmatpush.bf16.msrb.mxu3 %v11754_v37 }
 0x57b   :  { %v6999_v36 = vand.u32 127, %v6998_v53 }
 0x57d   :  { %7227 = vmatpush.bf16.msrb.mxu2 %v11745_v23  ;;  %vm7252_vm0 = vcmp.ge.s32.totalorder %v6999_v36, 1  ;;  %vm7253_vm1 = vcmp.lt.s32.totalorder %v6999_v36, 11 }
 0x57e   :  { %7240 = vmatpush.bf16.msrb.mxu3 %v11753_v17  ;;  %v11758_v17 = vld [vmem:[%s17623_s21] ss:$0 sm:$0xff]  ;;  %vm17589_vm2 = vmand %vm7252_vm0, %vm7253_vm1 }
 0x581   :  { %7228 = vmatpush.bf16.msrb.mxu2 %v11744_v39 }
 0x582   :  { %7241 = vmatpush.bf16.msrb.mxu3 %v11752_v47 }
 0x585   :  { %7229 = vmatpush.bf16.msrb.mxu2 %v11743_v0 }
 0x586   :  { %7242 = vmatpush.bf16.msrb.mxu3 %v11751_v8 }
 0x589   :  { %7230 = vmatpush.bf16.msrb.mxu2 %v11742_v20 }
 0x58a   :  { %7243 = vmatpush.bf16.msrb.mxu3 %v11750_v49 }
 0x58d   :  { %7231 = vmatpush.bf16.msrb.mxu2 %v11741_v2 }
 0x58e   :  { %7244 = vmatpush.bf16.msrb.mxu3 %v11749_v38 }
 0x591   :  { %7232 = vmatpush.bf16.msrb.mxu2 %v11740_v1 }
 0x592   :  { %7245 = vmatpush.bf16.msrb.mxu3 %v11748_v13 }
 0x595   :  { %7233 = vmatpush.bf16.msrb.mxu2 %v11739_v43 }
 0x596   :  { %7246 = vmatpush.bf16.msrb.mxu3 %v11747_v41 }
 0x5e5   :  { %v6747_v50 = vpop.f32.mrf.mxu0 }
 0x5e6   :  { %v6748_v5 = vadd.f32 %v11755_v34, %v6747_v50 }
 0x5ed   :  { %v6749_v30 = vpop.f32.mrf.mxu0 }
 0x5f5   :  { %v6760_v22 = vpop.f32.mrf.mxu1 }
 0x5f6   :  { %v6761_v9 = vadd.f32 %v6760_v22, %v6748_v5 }
 0x5f8   :  { %v6764_v48 = vmul.f32 0.2, %v6761_v9 }
 0x5fa   :  { %v6765_v56 = vmax.f32 %v6761_v9, %v6764_v48 }
 0x5fc   :  { %v6770_v27 = vmul.f32 %v11756_v28, %v6765_v56 }
 0x5fd   :  { %v6762_v51 = vpop.f32.mrf.mxu1 }
 0x5fe   :  { %v6775_v59 = vadd.f32 %v11757_v25, %v6770_v27 }
 0x600   :  { %v6776_v57 = vpack.c.bf16 %v6775_v59, %v6775_v59 }
 0x602   :  { %6945 = vmatmul.bf16.vlgmr.msra.gmra.mxu2 %v6776_v57  ;;  %6958 = vmatmul.bf16.vlgmr.msra.gmra.mxu3 %v6776_v57 }
 0x603   :  { %6971 = vmatmul.bf16.vlgmr.msrb.gmra.mxu0 %v6776_v57 }
 0x680   :  { %v6972_v42 = vpop.f32.mrf.mxu0 }
 0x681   :  { %v6986_v63 = vmul.f32 %v6980_v4, %v6972_v42 }
 0x683   :  { %v6997_v35 = vadd.f32 %v6991_v21, %v6986_v63 }
 0x685   :  { %v7016_v24 = vpack.c.bf16 %v6997_v35, %v6997_v35  ;;  %v6946_v7 = vpop.f32.mrf.mxu2  ;;  %v6959_v12 = vpop.f32.mrf.mxu3 }
 0x686   :  { %v6984_v15 = vmul.f32 %v6978_v52, %v6946_v7  ;;  %v6985_v62 = vmul.f32 %v6979_v6, %v6959_v12 }
 0x687   :  { %7247 = vmatmul.bf16.vlgmr.msrb.gmra.mxu3 %v7016_v24 }
 0x688   :  { %v6995_v55 = vadd.f32 %v6989_v11, %v6984_v15  ;;  %v6996_v10 = vadd.f32 %v6990_v31, %v6985_v62  ;;  %v6974_v14 = vpop.f32.mrf.mxu0 }
 0x68a   :  { %v7005_v16 = vmul.f32 0.2, %v6995_v55  ;;  %v7006_v45 = vmul.f32 0.2, %v6996_v10 }
 0x68c   :  { %v7008_v19 = vmax.f32 %v6995_v55, %v7005_v16  ;;  %v7009_v33 = vmax.f32 %v6996_v10, %v7006_v45 }
 0x68d   :  { %v6948_v44 = vpop.f32.mrf.mxu2  ;;  %v6961_v26 = vpop.f32.mrf.mxu3 }
 0x68e   :  { %v7014_v18 = vpack.c.bf16 %v7008_v19, %v7008_v19  ;;  %v7015_v37 = vpack.c.bf16 %v7009_v33, %v7009_v33 }
 0x690   :  { %7221 = vmatmul.bf16.vlgmr.msrb.gmra.mxu1 %v7014_v18  ;;  %7234 = vmatmul.bf16.vlgmr.msrb.gmra.mxu2 %v7015_v37 }
 0x70a   :  { %v7248_v3 = vpop.f32.mrf.mxu3 }
 0x70d   :  { %v7222_v50 = vpop.f32.mrf.mxu1 }
 0x70e   :  { %v7223_v23 = vadd.f32 %v11758_v17, %v7222_v50 }
 0x712   :  { %v7250_v47 = vpop.f32.mrf.mxu3 }
 0x713   :  { %v7235_v32 = vpop.f32.mrf.mxu2 }
 0x714   :  { %v7236_v39 = vadd.f32 %v7235_v32, %v7223_v23 }
 0x715   :  { %v7224_v30 = vpop.f32.mrf.mxu1 }
 0x716   :  { %v7249_v46 = vadd.f32 %v7248_v3, %v7236_v39 }
 0x718   :  { %v7255_v0 = vsel %vm17589_vm2, %v7249_v46, -inf }
 0x719   :  { %v7257_v34 = vsel %vm7256_vm3, %v7255_v0, -inf }
 0x71a   :  { %7258 = vmax.xlane.f32.xlu0 %v7257_v34 }
 0x71b   :  { %v7237_v49 = vpop.f32.mrf.mxu2 }
 0x78d   :  { %v7259_v5 = vpop.xlane.xlu0 %7258 }
 0x78e   :  { %v7260_v22 = vsub.f32 %v7249_v46, %v7259_v5 }
 0x790   :  { %v7261_v38 = vmul.f32 1.442695, %v7260_v22 }
 0x792   :  { %11759 = vpow2.f32 %v7261_v38 }
 0x798   :  { %v11760_v9 = vpop.eup %11759 }
 0x799   :  { %v7263_v48 = vsel %vm17589_vm2, %v11760_v9, 0.0 }
 0x79a   :  { %v7264_v28 = vsel %vm7256_vm3, %v7263_v48, 0.0 }
 0x79b   :  { %7265 = vadd.xlane.f32.xlu0 %v7264_v28 }
 0x80e   :  { %v7266_v56 = vpop.xlane.xlu0 %7265 }
 0x80f   :  { %11761 = vrcp.f32 %v7266_v56 }
 0x815   :  { %v11762_v25 = vpop.eup %11761 }
 0x816   :  { %v7268_v27 = vmul.f32 %v11762_v25, %v7263_v48 }
 0x818   :  { %v7269_v51 = vsel %vm17589_vm2, %v7268_v27, %v7249_v46 }
 0x819   :  { %7270 = vst [vmem:[%s17624_s22] sm:$0x3] %v7269_v51 }

</bundles_post_ra>
